<compile_context>
chip_gen: v7x
topology: tpu7x:2x2x1
jax: 0.10.0
libtpu: 0.0.40
codegen_flags: <defaults>
</compile_context>

<pallas_src>
import functools

import jax
import jax.numpy as jnp
from jax.experimental import pallas as pl
from jax.experimental.pallas import tpu as pltpu

VMEM_LIMIT = 32 * 1024 * 1024   # >= scoped default everywhere, << physical VMEM


# ---------------------------------------------------------------------------
# Tiling helpers
# ---------------------------------------------------------------------------
def _ceil_to(x, m):
    return (x + m - 1) // m * m


def _row_tile(m, max_tile):
    """Row tile: whole array if small, else the largest divisor of m that is a
    multiple of 8 and <= max_tile.  Returns None if the caller must pad."""
    if m <= 512:
        return m
    for t in range(max_tile - max_tile % 8, 7, -8):
        if m % t == 0:
            return t
    return None


def _pad_rows(a, mp):
    m = a.shape[0]
    if mp == m:
        return a
    return jnp.pad(a, ((0, mp - m), (0, 0)))


# ---------------------------------------------------------------------------
# Pallas kernels
# ---------------------------------------------------------------------------
def _conv_bias_relu_kernel(p_ref, w_ref, b_ref, o_ref):
    """o = relu(p @ w + b).  p: f32 patch tile (cast to bf16 for the MXU),
    w: bf16 weight matrix, accumulation + epilogue in f32."""
    acc = jnp.dot(p_ref[...].astype(jnp.bfloat16), w_ref[...],
                  preferred_element_type=jnp.float32)
    o_ref[...] = jnp.maximum(acc + b_ref[...], 0.0).astype(o_ref.dtype)


def _conv_res_kernel(*refs, kk, cin, cout, affine, h3_external):
    """Fused ConvResNxN unit:
         h1 = relu(patches @ w1) ; h2 = h1 @ w2        (both on the MXU, bf16)
         h3 = avg_pool2d residual (tap-mean of the in-VMEM patch tile, or a
              pre-padded external input for narrow-channel layers)
         out = (h2 + [channel-pad] h3) [* bn_scale + bn_shift]
       h1/h2/h3 never leave VMEM; epilogue is f32."""
    p_ref, w1_ref, w2_ref = refs[:3]
    i = 3
    if h3_external:
        h3_ref = refs[i]; i += 1
    if affine:
        sc_ref, sh_ref = refs[i], refs[i + 1]; i += 2
    o_ref = refs[i]

    p = p_ref[...]                                                # (tm, kk*cin) f32
    h1 = jnp.maximum(
        jnp.dot(p.astype(jnp.bfloat16), w1_ref[...],
                preferred_element_type=jnp.float32), 0.0)
    h2 = jnp.dot(h1.astype(jnp.bfloat16), w2_ref[...],
                 preferred_element_type=jnp.float32)              # (tm, cout) f32

    def finish(out):
        if affine:                      # folded eval-mode BatchNorm2d(n_rkhs)
            out = out * sc_ref[...] + sh_ref[...]
        o_ref[...] = out.astype(o_ref.dtype)

    if h3_external:
        # Pre-padded avg-pool residual supplied by the wrapper (narrow cin).
        finish(h2 + h3_ref[...])
    else:
        if kk == 1:                     # F.avg_pool2d(x, 1, 1, 0) == x
            h3 = p
        else:                           # tap-mean over lane-aligned slices
            h3 = p[:, 0:cin]
            for t in range(1, kk):
                h3 = h3 + p[:, t * cin:(t + 1) * cin]
            h3 = h3 * (1.0 / kk)
        if cin == cout:
            finish(h2 + h3)
        else:
            # Channel-growing residual (cin % 128 == 0 on this path): two
            # disjoint lane-aligned stores — no concat, no read-modify-write.
            o_ref[:, 0:cin] = (h2[:, 0:cin] + h3).astype(o_ref.dtype)
            o_ref[:, cin:cout] = h2[:, cin:cout].astype(o_ref.dtype)


# ---------------------------------------------------------------------------
# pallas_call wrappers
# ---------------------------------------------------------------------------
def conv_bias_relu(patches, w_mat, bias, *, max_tile=512):
    """relu(patches @ w_mat + bias).  patches (M, K) f32, w_mat (K, N) bf16."""
    m, k = patches.shape
    n = w_mat.shape[1]
    tm = _row_tile(m, max_tile)
    if tm is None:                      # fallback (unused at these shapes)
        mp = _ceil_to(m, 256)
        tm = 256
        patches = _pad_rows(patches, mp)
    else:
        mp = m
    out = pl.pallas_call(
        _conv_bias_relu_kernel,
        out_shape=jax.ShapeDtypeStruct((mp, n), jnp.float32),
        grid=(mp // tm,),
        in_specs=[
            pl.BlockSpec((tm, k), lambda i: (i, 0)),
            pl.BlockSpec((k, n), lambda i: (0, 0)),      # resident across grid
            pl.BlockSpec((1, n), lambda i: (0, 0)),
        ],
        out_specs=pl.BlockSpec((tm, n), lambda i: (i, 0)),
        compiler_params=pltpu.CompilerParams(
            dimension_semantics=("parallel",),
            vmem_limit_bytes=VMEM_LIMIT),
    )(patches, w_mat, bias.reshape(1, n).astype(jnp.float32))
    return out[:m] if mp != m else out


def conv_res_unit_matmul(patches, w1_mat, w2_mat, kk, cin, cout,
                         h3_ext=None, out_scale=None, out_shift=None,
                         *, max_tile=256):
    """One fused ConvResNxN unit on im2col patches.
    patches (M, kk*cin) f32; w1 (kk*cin, cout), w2 (cout, cout) bf16."""
    m = patches.shape[0]
    kdim = kk * cin
    affine = out_scale is not None
    h3_external = h3_ext is not None
    assert not (affine and cin != cout)   # BN only folds into l8 (cin == cout)

    tm = _row_tile(m, max_tile)
    if tm is None:                        # fallback (unused at these shapes)
        mp = _ceil_to(m, 256)
        tm = 256
        patches = _pad_rows(patches, mp)
        if h3_external:
            h3_ext = _pad_rows(h3_ext, mp)
    else:
        mp = m

    in_specs = [
        pl.BlockSpec((tm, kdim), lambda i: (i, 0)),      # patch tile (pipelined)
        pl.BlockSpec((kdim, cout), lambda i: (0, 0)),    # w1: resident across grid
        pl.BlockSpec((cout, cout), lambda i: (0, 0)),    # w2: resident across grid
    ]
    args = [patches, w1_mat, w2_mat]
    if h3_external:
        in_specs.append(pl.BlockSpec((tm, cout), lambda i: (i, 0)))
        args.append(h3_ext)
    if affine:
        in_specs += [pl.BlockSpec((1, cout), lambda i: (0, 0)),
                     pl.BlockSpec((1, cout), lambda i: (0, 0))]
        args += [out_scale.reshape(1, cout).astype(jnp.float32),
                 out_shift.reshape(1, cout).astype(jnp.float32)]

    out = pl.pallas_call(
        functools.partial(_conv_res_kernel, kk=kk, cin=cin, cout=cout,
                          affine=affine, h3_external=h3_external),
        out_shape=jax.ShapeDtypeStruct((mp, cout), jnp.float32),
        grid=(mp // tm,),
        in_specs=in_specs,
        out_specs=pl.BlockSpec((tm, cout), lambda i: (i, 0)),
        compiler_params=pltpu.CompilerParams(
            dimension_semantics=("parallel",),
            vmem_limit_bytes=VMEM_LIMIT),
    )(*args)
    return out[:m] if mp != m else out


# ---------------------------------------------------------------------------
# JAX glue: im2col, layers
# ---------------------------------------------------------------------------
def im2col(x, k, stride):
    """x: (N, H, W, C) -> (N*Ho*Wo, k*k*C) patches, taps ordered (kh, kw, C)."""
    n, h, w, c = x.shape
    ho = (h - k) // stride + 1
    wo = (w - k) // stride + 1
    cols = []
    for i in range(k):
        for j in range(k):
            cols.append(x[:, i:i + stride * (ho - 1) + 1:stride,
                             j:j + stride * (wo - 1) + 1:stride, :])
    p = jnp.stack(cols, axis=3)                   # (N, Ho, Wo, k*k, C)
    return p.reshape(n * ho * wo, k * k * c), (n, ho, wo)


def _w_to_mat(w, dtype=jnp.bfloat16):
    """PyTorch conv weight (Cout, Cin, kh, kw) -> bf16 (kh*kw*Cin, Cout)."""
    cout, cin, kh, kw = w.shape
    return jnp.transpose(w, (2, 3, 1, 0)).reshape(kh * kw * cin, cout).astype(dtype)


def conv3x3_layer(x, w_mat, bias, k, stride, pad, pad_mode):
    """Conv3x3 module with use_bn=False: [pad] -> conv(+bias) -> ReLU."""
    if pad > 0:
        x = jnp.pad(x, ((0, 0), (pad, pad), (pad, pad), (0, 0)), mode=pad_mode)
    patches, (n, ho, wo) = im2col(x, k, stride)
    y = conv_bias_relu(patches, w_mat, bias)
    return y.reshape(n, ho, wo, -1)


def conv_res_nxn(x, unit, k, stride, out_scale=None, out_shift=None):
    """ConvResNxN (use_bn=0): h1 = conv1(x); h2 = conv2(relu(h1));
    h3 = avg_pool (channel-padded if growing); return h2 + h3 — one pallas_call."""
    n, h, w, cin = x.shape
    cout = unit["w2"].shape[1]
    if k == 1 and stride == 1:
        patches = x.reshape(-1, cin)              # pointwise unit: no im2col
        ho, wo, kk = h, w, 1
    else:
        patches, (n, ho, wo) = im2col(x, k, stride)
        kk = k * k
    h3_ext = None
    if kk > 1 and cin % 128 != 0:
        # Narrow-channel layers: in-kernel tap-sum would need unaligned lane
        # slices, so let XLA compute the (small) avg-pool residual and pre-pad
        # it so the kernel epilogue is a single dense add.
        h3 = patches.reshape(-1, kk, cin).mean(axis=1)
        h3_ext = jnp.pad(h3, ((0, 0), (0, cout - cin))) if cout > cin else h3
    y = conv_res_unit_matmul(patches, unit["w1"], unit["w2"], kk, cin, cout,
                             h3_ext, out_scale, out_shift)
    return y.reshape(n, ho, wo, cout)


def conv_res_block(x, units, k, stride):
    x = conv_res_nxn(x, units[0], k, stride)
    for u in units[1:]:
        x = conv_res_nxn(x, u, 1, 1)
    return x


# ---------------------------------------------------------------------------
# Parameters (deterministic synthetic init; no checkpoint loading)
# ---------------------------------------------------------------------------
def init_params(key, ndf, n_rkhs, n_channels, n_depth):
    keys = iter(jax.random.split(key, 128))

    def conv_w(cout, cin, ksz):
        fan_in = cin * ksz * ksz
        return (jax.random.normal(next(keys), (cout, cin, ksz, ksz), jnp.float32)
                * jnp.sqrt(2.0 / fan_in))

    def res_block(cin, cout, ksz):
        blk = [{"w1": conv_w(cout, cin, ksz), "w2": conv_w(cout, cout, 1)}]
        for _ in range(n_depth - 1):
            blk.append({"w1": conv_w(cout, cout, 1), "w2": conv_w(cout, cout, 1)})
        return blk

    return {
        "l0_w": conv_w(ndf, n_channels, 5),
        "l0_b": jnp.zeros((ndf,), jnp.float32),
        "l1_w": conv_w(ndf, ndf, 3),
        "l1_b": jnp.zeros((ndf,), jnp.float32),
        "b2": res_block(ndf, 2 * ndf, 4),
        "b3": res_block(2 * ndf, 4 * ndf, 4),
        "b4": res_block(4 * ndf, 8 * ndf, 2),
        "b6": res_block(8 * ndf, 8 * ndf, 3),
        "b7": res_block(8 * ndf, 8 * ndf, 3),
        "l8": {"w1": conv_w(n_rkhs, 8 * ndf, 3), "w2": conv_w(n_rkhs, n_rkhs, 1)},
        # final MaybeBatchNorm2d(n_rkhs, affine=True, use_bn=True), eval mode
        "bn_gamma": jnp.ones((n_rkhs,), jnp.float32),
        "bn_beta": jnp.zeros((n_rkhs,), jnp.float32),
        "bn_mean": jnp.zeros((n_rkhs,), jnp.float32),
        "bn_var": jnp.ones((n_rkhs,), jnp.float32),
        # TODO(synk): BENTransformValid band statistics are not public here;
        # deterministic synthetic per-band mean/std are used instead.
        "band_mean": 0.1 * jnp.arange(n_channels, dtype=jnp.float32),
        "band_std": 1.0 + 0.05 * jnp.arange(n_channels, dtype=jnp.float32),
    }


def prepare_params(p):
    """Fold the channel-affine ops into adjacent convs and pre-reshape every
    conv weight to an MXU-ready bf16 (kh*kw*Cin, Cout) matrix.  Runs once."""
    # BEN band normalization (x - mean)/std folds into the l0 conv (reflect
    # padding commutes with the per-channel affine).
    scale = 1.0 / p["band_std"]
    shift = -p["band_mean"] / p["band_std"]
    w0 = p["l0_w"] * scale[None, :, None, None]
    b0 = p["l0_b"] + jnp.einsum("ocij,c->o", p["l0_w"], shift)

    def res_units(units):
        return [{"w1": _w_to_mat(u["w1"]), "w2": _w_to_mat(u["w2"])} for u in units]

    # Final eval-mode BatchNorm2d(n_rkhs) folds into the l8 kernel epilogue.
    eps = 1e-5
    bn_sc = p["bn_gamma"] / jnp.sqrt(p["bn_var"] + eps)
    bn_sh = p["bn_beta"] - p["bn_mean"] * bn_sc

    return {
        "l0_w": _w_to_mat(w0), "l0_b": b0,
        "l1_w": _w_to_mat(p["l1_w"]), "l1_b": p["l1_b"],
        "b2": res_units(p["b2"]), "b3": res_units(p["b3"]), "b4": res_units(p["b4"]),
        "b6": res_units(p["b6"]), "b7": res_units(p["b7"]),
        "l8": {"w1": _w_to_mat(p["l8"]["w1"]), "w2": _w_to_mat(p["l8"]["w2"])},
        "bn_sc": bn_sc, "bn_sh": bn_sh,
    }


# ---------------------------------------------------------------------------
# Full forward (== AMDIMEncoder.forward semantics)
# ---------------------------------------------------------------------------
def amdim_forward(prm, x_nchw):
    b, c, h, w = x_nchw.shape
    assert c == 12 and h == 128 and w == 128, "Input must be (B, 12, 128, 128)"
    n_rkhs = prm["bn_sc"].shape[0]

    x = jnp.transpose(x_nchw, (0, 2, 3, 1)).astype(jnp.float32)  # NCHW -> NHWC
    # BENTransformValid is folded into l0's weights/bias (prepare_params).

    x = conv3x3_layer(x, prm["l0_w"], prm["l0_b"], 5, 2, 2, "reflect")   # 64x64
    x = conv3x3_layer(x, prm["l1_w"], prm["l1_b"], 3, 1, 0, "constant")  # 62x62
    x = conv_res_block(x, prm["b2"], 4, 2)                                # 30x30
    x = conv_res_block(x, prm["b3"], 4, 2)                                # 14x14
    x = conv_res_block(x, prm["b4"], 2, 2)                                # 7x7
    # MaybeBatchNorm2d(8*ndf, True, use_bn=0) -> identity
    x = conv_res_block(x, prm["b6"], 3, 1)                                # 5x5
    x = conv_res_block(x, prm["b7"], 3, 1)                                # 3x3
    # ConvResNxN(8ndf, n_rkhs, 3, 1) with the final eval BatchNorm folded in.
    x = conv_res_nxn(x, prm["l8"], 3, 1, prm["bn_sc"], prm["bn_sh"])      # 1x1

    # rkhs_block_1 = NopNet() (identity); out = acts[dim2layer[1]][:, :, 0, 0]
    return x.reshape(b, n_rkhs)


if __name__ == "__main__":
    NDF = 16                 # real checkpoint: 128 (scaled down for the demo)
    N_RKHS = 8 * NDF         # real checkpoint: 1024 == 8*ndf (ratio preserved)
    N_DEPTH = 3
    NUM_CHANNELS = 12

    key = jax.random.PRNGKey(0)
    kp, kx = jax.random.split(key)
    raw_params = init_params(kp, NDF, N_RKHS, NUM_CHANNELS, N_DEPTH)
    prm = prepare_params(raw_params)
    x = jax.random.uniform(kx, (2, NUM_CHANNELS, 128, 128), jnp.float32)

    fwd = jax.jit(amdim_forward)
    out = jax.block_until_ready(fwd(prm, x))

    assert out.shape == (2, N_RKHS), out.shape
    assert bool(jnp.all(jnp.isfinite(out)))
    print("KERNEL_OK")
</pallas_src>

<mosaic_0001>
module attributes {stable_mosaic.version = 11 : i64} {
  func.func @_conv_bias_relu_kernel(%arg0: i32, %arg1: memref<512x300xf32, #tpu.memory_space<vmem>>, %arg2: memref<300x16xbf16, #tpu.memory_space<vmem>>, %arg3: memref<1x16xf32, #tpu.memory_space<vmem>>, %arg4: memref<512x16xf32, #tpu.memory_space<vmem>>) attributes {dimension_semantics = [#tpu.dimension_semantics<parallel>], iteration_bounds = array<i64: 16>, scalar_prefetch = 0 : i64, scratch_operands = 0 : i64, tpu.core_type = #tpu.core_type<tc>, window_params = [{transform_indices = @transform_0, window_bounds = array<i64: 512, 300>}, {pipeline_mode = #tpu.pipeline_mode<synchronous>, transform_indices = @transform_1, window_bounds = array<i64: 300, 16>}, {pipeline_mode = #tpu.pipeline_mode<synchronous>, transform_indices = @transform_2, window_bounds = array<i64: 1, 16>}, {transform_indices = @transform_3, window_bounds = array<i64: 512, 16>}]} {
    %c0 = arith.constant 0 : index
    %c0_0 = arith.constant 0 : index
    %0 = vector.load %arg1[%c0, %c0_0] : memref<512x300xf32, #tpu.memory_space<vmem>>, vector<512x300xf32>
    %1 = arith.truncf %0 : vector<512x300xf32> to vector<512x300xbf16>
    %c0_1 = arith.constant 0 : index
    %c0_2 = arith.constant 0 : index
    %2 = vector.load %arg2[%c0_1, %c0_2] : memref<300x16xbf16, #tpu.memory_space<vmem>>, vector<300x16xbf16>
    %cst = arith.constant dense<0.000000e+00> : vector<512x16xf32>
    %3 = tpu.matmul %1, %2, %cst {dimension_numbers = #tpu.dot_dimension_numbers<[1], [0], [0], [1], [0, 0, 1, 1], [], []>} : vector<512x300xbf16>, vector<300x16xbf16>, vector<512x16xf32> -> vector<512x16xf32>
    %c0_3 = arith.constant 0 : index
    %c0_4 = arith.constant 0 : index
    %4 = vector.load %arg3[%c0_3, %c0_4] : memref<1x16xf32, #tpu.memory_space<vmem>>, vector<1x16xf32>
    %5 = vector.broadcast %4 : vector<1x16xf32> to vector<512x16xf32>
    %6 = arith.addf %3, %5 : vector<512x16xf32>
    %cst_5 = arith.constant 0.000000e+00 : f32
    %7 = vector.broadcast %cst_5 : f32 to vector<512x16xf32>
    %8 = arith.maximumf %6, %7 : vector<512x16xf32>
    %c0_6 = arith.constant 0 : index
    %c0_7 = arith.constant 0 : index
    %9 = vector.load %arg4[%c0_6, %c0_7] : memref<512x16xf32, #tpu.memory_space<vmem>>, vector<512x16xf32>
    tpu.vector_store %arg4[%c0_6, %c0_7], %8 {strides = array<i32>} : memref<512x16xf32, #tpu.memory_space<vmem>>, vector<512x16xf32>,
    return
  }
  func.func @transform_0(%arg0: i32) -> (i32, i32) {
    %c0_i32 = arith.constant 0 : i32
    %c0_i32_0 = arith.constant 0 : i32
    return %arg0, %c0_i32 : i32, i32
  }
  func.func @transform_1(%arg0: i32) -> (i32, i32) {
    %c0_i32 = arith.constant 0 : i32
    %c0_i32_0 = arith.constant 0 : i32
    %c0_i32_1 = arith.constant 0 : i32
    return %c0_i32, %c0_i32_0 : i32, i32
  }
  func.func @transform_2(%arg0: i32) -> (i32, i32) {
    %c0_i32 = arith.constant 0 : i32
    %c0_i32_0 = arith.constant 0 : i32
    %c0_i32_1 = arith.constant 0 : i32
    return %c0_i32, %c0_i32_0 : i32, i32
  }
  func.func @transform_3(%arg0: i32) -> (i32, i32) {
    %c0_i32 = arith.constant 0 : i32
    %c0_i32_0 = arith.constant 0 : i32
    return %arg0, %c0_i32 : i32, i32
  }
}

module attributes {stable_mosaic.version = 11 : i64} {
  func.func @_conv_bias_relu_kernel(%arg0: i32, %arg1: memref<248x144xf32, #tpu.memory_space<vmem>>, %arg2: memref<144x16xbf16, #tpu.memory_space<vmem>>, %arg3: memref<1x16xf32, #tpu.memory_space<vmem>>, %arg4: memref<248x16xf32, #tpu.memory_space<vmem>>) attributes {dimension_semantics = [#tpu.dimension_semantics<parallel>], iteration_bounds = array<i64: 31>, scalar_prefetch = 0 : i64, scratch_operands = 0 : i64, tpu.core_type = #tpu.core_type<tc>, window_params = [{transform_indices = @transform_0, window_bounds = array<i64: 248, 144>}, {pipeline_mode = #tpu.pipeline_mode<synchronous>, transform_indices = @transform_1, window_bounds = array<i64: 144, 16>}, {pipeline_mode = #tpu.pipeline_mode<synchronous>, transform_indices = @transform_2, window_bounds = array<i64: 1, 16>}, {transform_indices = @transform_3, window_bounds = array<i64: 248, 16>}]} {
    %c0 = arith.constant 0 : index
    %c0_0 = arith.constant 0 : index
    %0 = vector.load %arg1[%c0, %c0_0] : memref<248x144xf32, #tpu.memory_space<vmem>>, vector<248x144xf32>
    %1 = arith.truncf %0 : vector<248x144xf32> to vector<248x144xbf16>
    %c0_1 = arith.constant 0 : index
    %c0_2 = arith.constant 0 : index
    %2 = vector.load %arg2[%c0_1, %c0_2] : memref<144x16xbf16, #tpu.memory_space<vmem>>, vector<144x16xbf16>
    %cst = arith.constant dense<0.000000e+00> : vector<248x16xf32>
    %3 = tpu.matmul %1, %2, %cst {dimension_numbers = #tpu.dot_dimension_numbers<[1], [0], [0], [1], [0, 0, 1, 1], [], []>} : vector<248x144xbf16>, vector<144x16xbf16>, vector<248x16xf32> -> vector<248x16xf32>
    %c0_3 = arith.constant 0 : index
    %c0_4 = arith.constant 0 : index
    %4 = vector.load %arg3[%c0_3, %c0_4] : memref<1x16xf32, #tpu.memory_space<vmem>>, vector<1x16xf32>
    %5 = vector.broadcast %4 : vector<1x16xf32> to vector<248x16xf32>
    %6 = arith.addf %3, %5 : vector<248x16xf32>
    %cst_5 = arith.constant 0.000000e+00 : f32
    %7 = vector.broadcast %cst_5 : f32 to vector<248x16xf32>
    %8 = arith.maximumf %6, %7 : vector<248x16xf32>
    %c0_6 = arith.constant 0 : index
    %c0_7 = arith.constant 0 : index
    %9 = vector.load %arg4[%c0_6, %c0_7] : memref<248x16xf32, #tpu.memory_space<vmem>>, vector<248x16xf32>
    tpu.vector_store %arg4[%c0_6, %c0_7], %8 {strides = array<i32>} : memref<248x16xf32, #tpu.memory_space<vmem>>, vector<248x16xf32>,
    return
  }
  func.func @transform_0(%arg0: i32) -> (i32, i32) {
    %c0_i32 = arith.constant 0 : i32
    %c0_i32_0 = arith.constant 0 : i32
    return %arg0, %c0_i32 : i32, i32
  }
  func.func @transform_1(%arg0: i32) -> (i32, i32) {
    %c0_i32 = arith.constant 0 : i32
    %c0_i32_0 = arith.constant 0 : i32
    %c0_i32_1 = arith.constant 0 : i32
    return %c0_i32, %c0_i32_0 : i32, i32
  }
  func.func @transform_2(%arg0: i32) -> (i32, i32) {
    %c0_i32 = arith.constant 0 : i32
    %c0_i32_0 = arith.constant 0 : i32
    %c0_i32_1 = arith.constant 0 : i32
    return %c0_i32, %c0_i32_0 : i32, i32
  }
  func.func @transform_3(%arg0: i32) -> (i32, i32) {
    %c0_i32 = arith.constant 0 : i32
    %c0_i32_0 = arith.constant 0 : i32
    return %arg0, %c0_i32 : i32, i32
  }
}

module attributes {stable_mosaic.version = 11 : i64} {
  func.func @_conv_res_kernel(%arg0: i32, %arg1: memref<200x256xf32, #tpu.memory_space<vmem>>, %arg2: memref<256x32xbf16, #tpu.memory_space<vmem>>, %arg3: memref<32x32xbf16, #tpu.memory_space<vmem>>, %arg4: memref<200x32xf32, #tpu.memory_space<vmem>>, %arg5: memref<200x32xf32, #tpu.memory_space<vmem>>) attributes {dimension_semantics = [#tpu.dimension_semantics<parallel>], iteration_bounds = array<i64: 9>, scalar_prefetch = 0 : i64, scratch_operands = 0 : i64, tpu.core_type = #tpu.core_type<tc>, window_params = [{transform_indices = @transform_0, window_bounds = array<i64: 200, 256>}, {pipeline_mode = #tpu.pipeline_mode<synchronous>, transform_indices = @transform_1, window_bounds = array<i64: 256, 32>}, {pipeline_mode = #tpu.pipeline_mode<synchronous>, transform_indices = @transform_2, window_bounds = array<i64: 32, 32>}, {transform_indices = @transform_3, window_bounds = array<i64: 200, 32>}, {transform_indices = @transform_4, window_bounds = array<i64: 200, 32>}]} {
    %c0 = arith.constant 0 : index
    %c0_0 = arith.constant 0 : index
    %0 = vector.load %arg1[%c0, %c0_0] : memref<200x256xf32, #tpu.memory_space<vmem>>, vector<200x256xf32>
    %1 = arith.truncf %0 : vector<200x256xf32> to vector<200x256xbf16>
    %c0_1 = arith.constant 0 : index
    %c0_2 = arith.constant 0 : index
    %2 = vector.load %arg2[%c0_1, %c0_2] : memref<256x32xbf16, #tpu.memory_space<vmem>>, vector<256x32xbf16>
    %cst = arith.constant dense<0.000000e+00> : vector<200x32xf32>
    %3 = tpu.matmul %1, %2, %cst {dimension_numbers = #tpu.dot_dimension_numbers<[1], [0], [0], [1], [0, 0, 1, 1], [], []>} : vector<200x256xbf16>, vector<256x32xbf16>, vector<200x32xf32> -> vector<200x32xf32>
    %cst_3 = arith.constant 0.000000e+00 : f32
    %4 = vector.broadcast %cst_3 : f32 to vector<200x32xf32>
    %5 = arith.maximumf %3, %4 : vector<200x32xf32>
    %6 = arith.truncf %5 : vector<200x32xf32> to vector<200x32xbf16>
    %c0_4 = arith.constant 0 : index
    %c0_5 = arith.constant 0 : index
    %7 = vector.load %arg3[%c0_4, %c0_5] : memref<32x32xbf16, #tpu.memory_space<vmem>>, vector<32x32xbf16>
    %cst_6 = arith.constant dense<0.000000e+00> : vector<200x32xf32>
    %8 = tpu.matmul %6, %7, %cst_6 {dimension_numbers = #tpu.dot_dimension_numbers<[1], [0], [0], [1], [0, 0, 1, 1], [], []>} : vector<200x32xbf16>, vector<32x32xbf16>, vector<200x32xf32> -> vector<200x32xf32>
    %c0_7 = arith.constant 0 : index
    %c0_8 = arith.constant 0 : index
    %9 = vector.load %arg4[%c0_7, %c0_8] : memref<200x32xf32, #tpu.memory_space<vmem>>, vector<200x32xf32>
    %10 = arith.addf %8, %9 : vector<200x32xf32>
    %c0_9 = arith.constant 0 : index
    %c0_10 = arith.constant 0 : index
    %11 = vector.load %arg5[%c0_9, %c0_10] : memref<200x32xf32, #tpu.memory_space<vmem>>, vector<200x32xf32>
    tpu.vector_store %arg5[%c0_9, %c0_10], %10 {strides = array<i32>} : memref<200x32xf32, #tpu.memory_space<vmem>>, vector<200x32xf32>,
    return
  }
  func.func @transform_0(%arg0: i32) -> (i32, i32) {
    %c0_i32 = arith.constant 0 : i32
    %c0_i32_0 = arith.constant 0 : i32
    return %arg0, %c0_i32 : i32, i32
  }
  func.func @transform_1(%arg0: i32) -> (i32, i32) {
    %c0_i32 = arith.constant 0 : i32
    %c0_i32_0 = arith.constant 0 : i32
    %c0_i32_1 = arith.constant 0 : i32
    return %c0_i32, %c0_i32_0 : i32, i32
  }
  func.func @transform_2(%arg0: i32) -> (i32, i32) {
    %c0_i32 = arith.constant 0 : i32
    %c0_i32_0 = arith.constant 0 : i32
    %c0_i32_1 = arith.constant 0 : i32
    return %c0_i32, %c0_i32_0 : i32, i32
  }
  func.func @transform_3(%arg0: i32) -> (i32, i32) {
    %c0_i32 = arith.constant 0 : i32
    %c0_i32_0 = arith.constant 0 : i32
    return %arg0, %c0_i32 : i32, i32
  }
  func.func @transform_4(%arg0: i32) -> (i32, i32) {
    %c0_i32 = arith.constant 0 : i32
    %c0_i32_0 = arith.constant 0 : i32
    return %arg0, %c0_i32 : i32, i32
  }
}

module attributes {stable_mosaic.version = 11 : i64} {
  func.func @_conv_res_kernel(%arg0: i32, %arg1: memref<200x32xf32, #tpu.memory_space<vmem>>, %arg2: memref<32x32xbf16, #tpu.memory_space<vmem>>, %arg3: memref<32x32xbf16, #tpu.memory_space<vmem>>, %arg4: memref<200x32xf32, #tpu.memory_space<vmem>>) attributes {dimension_semantics = [#tpu.dimension_semantics<parallel>], iteration_bounds = array<i64: 9>, scalar_prefetch = 0 : i64, scratch_operands = 0 : i64, tpu.core_type = #tpu.core_type<tc>, window_params = [{transform_indices = @transform_0, window_bounds = array<i64: 200, 32>}, {pipeline_mode = #tpu.pipeline_mode<synchronous>, transform_indices = @transform_1, window_bounds = array<i64: 32, 32>}, {pipeline_mode = #tpu.pipeline_mode<synchronous>, transform_indices = @transform_2, window_bounds = array<i64: 32, 32>}, {transform_indices = @transform_3, window_bounds = array<i64: 200, 32>}]} {
    %c0 = arith.constant 0 : index
    %c0_0 = arith.constant 0 : index
    %0 = vector.load %arg1[%c0, %c0_0] : memref<200x32xf32, #tpu.memory_space<vmem>>, vector<200x32xf32>
    %1 = arith.truncf %0 : vector<200x32xf32> to vector<200x32xbf16>
    %c0_1 = arith.constant 0 : index
    %c0_2 = arith.constant 0 : index
    %2 = vector.load %arg2[%c0_1, %c0_2] : memref<32x32xbf16, #tpu.memory_space<vmem>>, vector<32x32xbf16>
    %cst = arith.constant dense<0.000000e+00> : vector<200x32xf32>
    %3 = tpu.matmul %1, %2, %cst {dimension_numbers = #tpu.dot_dimension_numbers<[1], [0], [0], [1], [0, 0, 1, 1], [], []>} : vector<200x32xbf16>, vector<32x32xbf16>, vector<200x32xf32> -> vector<200x32xf32>
    %cst_3 = arith.constant 0.000000e+00 : f32
    %4 = vector.broadcast %cst_3 : f32 to vector<200x32xf32>
    %5 = arith.maximumf %3, %4 : vector<200x32xf32>
    %6 = arith.truncf %5 : vector<200x32xf32> to vector<200x32xbf16>
    %c0_4 = arith.constant 0 : index
    %c0_5 = arith.constant 0 : index
    %7 = vector.load %arg3[%c0_4, %c0_5] : memref<32x32xbf16, #tpu.memory_space<vmem>>, vector<32x32xbf16>
    %cst_6 = arith.constant dense<0.000000e+00> : vector<200x32xf32>
    %8 = tpu.matmul %6, %7, %cst_6 {dimension_numbers = #tpu.dot_dimension_numbers<[1], [0], [0], [1], [0, 0, 1, 1], [], []>} : vector<200x32xbf16>, vector<32x32xbf16>, vector<200x32xf32> -> vector<200x32xf32>
    %9 = arith.addf %8, %0 : vector<200x32xf32>
    %c0_7 = arith.constant 0 : index
    %c0_8 = arith.constant 0 : index
    %10 = vector.load %arg4[%c0_7, %c0_8] : memref<200x32xf32, #tpu.memory_space<vmem>>, vector<200x32xf32>
    tpu.vector_store %arg4[%c0_7, %c0_8], %9 {strides = array<i32>} : memref<200x32xf32, #tpu.memory_space<vmem>>, vector<200x32xf32>,
    return
  }
  func.func @transform_0(%arg0: i32) -> (i32, i32) {
    %c0_i32 = arith.constant 0 : i32
    %c0_i32_0 = arith.constant 0 : i32
    return %arg0, %c0_i32 : i32, i32
  }
  func.func @transform_1(%arg0: i32) -> (i32, i32) {
    %c0_i32 = arith.constant 0 : i32
    %c0_i32_0 = arith.constant 0 : i32
    %c0_i32_1 = arith.constant 0 : i32
    return %c0_i32, %c0_i32_0 : i32, i32
  }
  func.func @transform_2(%arg0: i32) -> (i32, i32) {
    %c0_i32 = arith.constant 0 : i32
    %c0_i32_0 = arith.constant 0 : i32
    %c0_i32_1 = arith.constant 0 : i32
    return %c0_i32, %c0_i32_0 : i32, i32
  }
  func.func @transform_3(%arg0: i32) -> (i32, i32) {
    %c0_i32 = arith.constant 0 : i32
    %c0_i32_0 = arith.constant 0 : i32
    return %arg0, %c0_i32 : i32, i32
  }
}

module attributes {stable_mosaic.version = 11 : i64} {
  func.func @_conv_res_kernel(%arg0: i32, %arg1: memref<392x512xf32, #tpu.memory_space<vmem>>, %arg2: memref<512x64xbf16, #tpu.memory_space<vmem>>, %arg3: memref<64x64xbf16, #tpu.memory_space<vmem>>, %arg4: memref<392x64xf32, #tpu.memory_space<vmem>>, %arg5: memref<392x64xf32, #tpu.memory_space<vmem>>) attributes {dimension_semantics = [#tpu.dimension_semantics<parallel>], iteration_bounds = array<i64: 1>, scalar_prefetch = 0 : i64, scratch_operands = 0 : i64, tpu.core_type = #tpu.core_type<tc>, window_params = [{transform_indices = @transform_0, window_bounds = array<i64: 392, 512>}, {pipeline_mode = #tpu.pipeline_mode<synchronous>, transform_indices = @transform_1, window_bounds = array<i64: 512, 64>}, {pipeline_mode = #tpu.pipeline_mode<synchronous>, transform_indices = @transform_2, window_bounds = array<i64: 64, 64>}, {transform_indices = @transform_3, window_bounds = array<i64: 392, 64>}, {transform_indices = @transform_4, window_bounds = array<i64: 392, 64>}]} {
    %c0 = arith.constant 0 : index
    %c0_0 = arith.constant 0 : index
    %0 = vector.load %arg1[%c0, %c0_0] : memref<392x512xf32, #tpu.memory_space<vmem>>, vector<392x512xf32>
    %1 = arith.truncf %0 : vector<392x512xf32> to vector<392x512xbf16>
    %c0_1 = arith.constant 0 : index
    %c0_2 = arith.constant 0 : index
    %2 = vector.load %arg2[%c0_1, %c0_2] : memref<512x64xbf16, #tpu.memory_space<vmem>>, vector<512x64xbf16>
    %cst = arith.constant dense<0.000000e+00> : vector<392x64xf32>
    %3 = tpu.matmul %1, %2, %cst {dimension_numbers = #tpu.dot_dimension_numbers<[1], [0], [0], [1], [0, 0, 1, 1], [], []>} : vector<392x512xbf16>, vector<512x64xbf16>, vector<392x64xf32> -> vector<392x64xf32>
    %cst_3 = arith.constant 0.000000e+00 : f32
    %4 = vector.broadcast %cst_3 : f32 to vector<392x64xf32>
    %5 = arith.maximumf %3, %4 : vector<392x64xf32>
    %6 = arith.truncf %5 : vector<392x64xf32> to vector<392x64xbf16>
    %c0_4 = arith.constant 0 : index
    %c0_5 = arith.constant 0 : index
    %7 = vector.load %arg3[%c0_4, %c0_5] : memref<64x64xbf16, #tpu.memory_space<vmem>>, vector<64x64xbf16>
    %cst_6 = arith.constant dense<0.000000e+00> : vector<392x64xf32>
    %8 = tpu.matmul %6, %7, %cst_6 {dimension_numbers = #tpu.dot_dimension_numbers<[1], [0], [0], [1], [0, 0, 1, 1], [], []>} : vector<392x64xbf16>, vector<64x64xbf16>, vector<392x64xf32> -> vector<392x64xf32>
    %c0_7 = arith.constant 0 : index
    %c0_8 = arith.constant 0 : index
    %9 = vector.load %arg4[%c0_7, %c0_8] : memref<392x64xf32, #tpu.memory_space<vmem>>, vector<392x64xf32>
    %10 = arith.addf %8, %9 : vector<392x64xf32>
    %c0_9 = arith.constant 0 : index
    %c0_10 = arith.constant 0 : index
    %11 = vector.load %arg5[%c0_9, %c0_10] : memref<392x64xf32, #tpu.memory_space<vmem>>, vector<392x64xf32>
    tpu.vector_store %arg5[%c0_9, %c0_10], %10 {strides = array<i32>} : memref<392x64xf32, #tpu.memory_space<vmem>>, vector<392x64xf32>,
    return
  }
  func.func @transform_0(%arg0: i32) -> (i32, i32) {
    %c0_i32 = arith.constant 0 : i32
    %c0_i32_0 = arith.constant 0 : i32
    return %arg0, %c0_i32 : i32, i32
  }
  func.func @transform_1(%arg0: i32) -> (i32, i32) {
    %c0_i32 = arith.constant 0 : i32
    %c0_i32_0 = arith.constant 0 : i32
    %c0_i32_1 = arith.constant 0 : i32
    return %c0_i32, %c0_i32_0 : i32, i32
  }
  func.func @transform_2(%arg0: i32) -> (i32, i32) {
    %c0_i32 = arith.constant 0 : i32
    %c0_i32_0 = arith.constant 0 : i32
    %c0_i32_1 = arith.constant 0 : i32
    return %c0_i32, %c0_i32_0 : i32, i32
  }
  func.func @transform_3(%arg0: i32) -> (i32, i32) {
    %c0_i32 = arith.constant 0 : i32
    %c0_i32_0 = arith.constant 0 : i32
    return %arg0, %c0_i32 : i32, i32
  }
  func.func @transform_4(%arg0: i32) -> (i32, i32) {
    %c0_i32 = arith.constant 0 : i32
    %c0_i32_0 = arith.constant 0 : i32
    return %arg0, %c0_i32 : i32, i32
  }
}

module attributes {stable_mosaic.version = 11 : i64} {
  func.func @_conv_res_kernel(%arg0: i32, %arg1: memref<392x64xf32, #tpu.memory_space<vmem>>, %arg2: memref<64x64xbf16, #tpu.memory_space<vmem>>, %arg3: memref<64x64xbf16, #tpu.memory_space<vmem>>, %arg4: memref<392x64xf32, #tpu.memory_space<vmem>>) attributes {dimension_semantics = [#tpu.dimension_semantics<parallel>], iteration_bounds = array<i64: 1>, scalar_prefetch = 0 : i64, scratch_operands = 0 : i64, tpu.core_type = #tpu.core_type<tc>, window_params = [{transform_indices = @transform_0, window_bounds = array<i64: 392, 64>}, {pipeline_mode = #tpu.pipeline_mode<synchronous>, transform_indices = @transform_1, window_bounds = array<i64: 64, 64>}, {pipeline_mode = #tpu.pipeline_mode<synchronous>, transform_indices = @transform_2, window_bounds = array<i64: 64, 64>}, {transform_indices = @transform_3, window_bounds = array<i64: 392, 64>}]} {
    %c0 = arith.constant 0 : index
    %c0_0 = arith.constant 0 : index
    %0 = vector.load %arg1[%c0, %c0_0] : memref<392x64xf32, #tpu.memory_space<vmem>>, vector<392x64xf32>
    %1 = arith.truncf %0 : vector<392x64xf32> to vector<392x64xbf16>
    %c0_1 = arith.constant 0 : index
    %c0_2 = arith.constant 0 : index
    %2 = vector.load %arg2[%c0_1, %c0_2] : memref<64x64xbf16, #tpu.memory_space<vmem>>, vector<64x64xbf16>
    %cst = arith.constant dense<0.000000e+00> : vector<392x64xf32>
    %3 = tpu.matmul %1, %2, %cst {dimension_numbers = #tpu.dot_dimension_numbers<[1], [0], [0], [1], [0, 0, 1, 1], [], []>} : vector<392x64xbf16>, vector<64x64xbf16>, vector<392x64xf32> -> vector<392x64xf32>
    %cst_3 = arith.constant 0.000000e+00 : f32
    %4 = vector.broadcast %cst_3 : f32 to vector<392x64xf32>
    %5 = arith.maximumf %3, %4 : vector<392x64xf32>
    %6 = arith.truncf %5 : vector<392x64xf32> to vector<392x64xbf16>
    %c0_4 = arith.constant 0 : index
    %c0_5 = arith.constant 0 : index
    %7 = vector.load %arg3[%c0_4, %c0_5] : memref<64x64xbf16, #tpu.memory_space<vmem>>, vector<64x64xbf16>
    %cst_6 = arith.constant dense<0.000000e+00> : vector<392x64xf32>
    %8 = tpu.matmul %6, %7, %cst_6 {dimension_numbers = #tpu.dot_dimension_numbers<[1], [0], [0], [1], [0, 0, 1, 1], [], []>} : vector<392x64xbf16>, vector<64x64xbf16>, vector<392x64xf32> -> vector<392x64xf32>
    %9 = arith.addf %8, %0 : vector<392x64xf32>
    %c0_7 = arith.constant 0 : index
    %c0_8 = arith.constant 0 : index
    %10 = vector.load %arg4[%c0_7, %c0_8] : memref<392x64xf32, #tpu.memory_space<vmem>>, vector<392x64xf32>
    tpu.vector_store %arg4[%c0_7, %c0_8], %9 {strides = array<i32>} : memref<392x64xf32, #tpu.memory_space<vmem>>, vector<392x64xf32>,
    return
  }
  func.func @transform_0(%arg0: i32) -> (i32, i32) {
    %c0_i32 = arith.constant 0 : i32
    %c0_i32_0 = arith.constant 0 : i32
    return %arg0, %c0_i32 : i32, i32
  }
  func.func @transform_1(%arg0: i32) -> (i32, i32) {
    %c0_i32 = arith.constant 0 : i32
    %c0_i32_0 = arith.constant 0 : i32
    %c0_i32_1 = arith.constant 0 : i32
    return %c0_i32, %c0_i32_0 : i32, i32
  }
  func.func @transform_2(%arg0: i32) -> (i32, i32) {
    %c0_i32 = arith.constant 0 : i32
    %c0_i32_0 = arith.constant 0 : i32
    %c0_i32_1 = arith.constant 0 : i32
    return %c0_i32, %c0_i32_0 : i32, i32
  }
  func.func @transform_3(%arg0: i32) -> (i32, i32) {
    %c0_i32 = arith.constant 0 : i32
    %c0_i32_0 = arith.constant 0 : i32
    return %arg0, %c0_i32 : i32, i32
  }
}

module attributes {stable_mosaic.version = 11 : i64} {
  func.func @_conv_res_kernel(%arg0: i32, %arg1: memref<98x256xf32, #tpu.memory_space<vmem>>, %arg2: memref<256x128xbf16, #tpu.memory_space<vmem>>, %arg3: memref<128x128xbf16, #tpu.memory_space<vmem>>, %arg4: memref<98x128xf32, #tpu.memory_space<vmem>>, %arg5: memref<98x128xf32, #tpu.memory_space<vmem>>) attributes {dimension_semantics = [#tpu.dimension_semantics<parallel>], iteration_bounds = array<i64: 1>, scalar_prefetch = 0 : i64, scratch_operands = 0 : i64, tpu.core_type = #tpu.core_type<tc>, window_params = [{transform_indices = @transform_0, window_bounds = array<i64: 98, 256>}, {pipeline_mode = #tpu.pipeline_mode<synchronous>, transform_indices = @transform_1, window_bounds = array<i64: 256, 128>}, {pipeline_mode = #tpu.pipeline_mode<synchronous>, transform_indices = @transform_2, window_bounds = array<i64: 128, 128>}, {transform_indices = @transform_3, window_bounds = array<i64: 98, 128>}, {transform_indices = @transform_4, window_bounds = array<i64: 98, 128>}]} {
    %c0 = arith.constant 0 : index
    %c0_0 = arith.constant 0 : index
    %0 = vector.load %arg1[%c0, %c0_0] : memref<98x256xf32, #tpu.memory_space<vmem>>, vector<98x256xf32>
    %1 = arith.truncf %0 : vector<98x256xf32> to vector<98x256xbf16>
    %c0_1 = arith.constant 0 : index
    %c0_2 = arith.constant 0 : index
    %2 = vector.load %arg2[%c0_1, %c0_2] : memref<256x128xbf16, #tpu.memory_space<vmem>>, vector<256x128xbf16>
    %cst = arith.constant dense<0.000000e+00> : vector<98x128xf32>
    %3 = tpu.matmul %1, %2, %cst {dimension_numbers = #tpu.dot_dimension_numbers<[1], [0], [0], [1], [0, 0, 1, 1], [], []>} : vector<98x256xbf16>, vector<256x128xbf16>, vector<98x128xf32> -> vector<98x128xf32>
    %cst_3 = arith.constant 0.000000e+00 : f32
    %4 = vector.broadcast %cst_3 : f32 to vector<98x128xf32>
    %5 = arith.maximumf %3, %4 : vector<98x128xf32>
    %6 = arith.truncf %5 : vector<98x128xf32> to vector<98x128xbf16>
    %c0_4 = arith.constant 0 : index
    %c0_5 = arith.constant 0 : index
    %7 = vector.load %arg3[%c0_4, %c0_5] : memref<128x128xbf16, #tpu.memory_space<vmem>>, vector<128x128xbf16>
    %cst_6 = arith.constant dense<0.000000e+00> : vector<98x128xf32>
    %8 = tpu.matmul %6, %7, %cst_6 {dimension_numbers = #tpu.dot_dimension_numbers<[1], [0], [0], [1], [0, 0, 1, 1], [], []>} : vector<98x128xbf16>, vector<128x128xbf16>, vector<98x128xf32> -> vector<98x128xf32>
    %c0_7 = arith.constant 0 : index
    %c0_8 = arith.constant 0 : index
    %9 = vector.load %arg4[%c0_7, %c0_8] : memref<98x128xf32, #tpu.memory_space<vmem>>, vector<98x128xf32>
    %10 = arith.addf %8, %9 : vector<98x128xf32>
    %c0_9 = arith.constant 0 : index
    %c0_10 = arith.constant 0 : index
    %11 = vector.load %arg5[%c0_9, %c0_10] : memref<98x128xf32, #tpu.memory_space<vmem>>, vector<98x128xf32>
    tpu.vector_store %arg5[%c0_9, %c0_10], %10 {strides = array<i32>} : memref<98x128xf32, #tpu.memory_space<vmem>>, vector<98x128xf32>,
    return
  }
  func.func @transform_0(%arg0: i32) -> (i32, i32) {
    %c0_i32 = arith.constant 0 : i32
    %c0_i32_0 = arith.constant 0 : i32
    return %arg0, %c0_i32 : i32, i32
  }
  func.func @transform_1(%arg0: i32) -> (i32, i32) {
    %c0_i32 = arith.constant 0 : i32
    %c0_i32_0 = arith.constant 0 : i32
    %c0_i32_1 = arith.constant 0 : i32
    return %c0_i32, %c0_i32_0 : i32, i32
  }
  func.func @transform_2(%arg0: i32) -> (i32, i32) {
    %c0_i32 = arith.constant 0 : i32
    %c0_i32_0 = arith.constant 0 : i32
    %c0_i32_1 = arith.constant 0 : i32
    return %c0_i32, %c0_i32_0 : i32, i32
  }
  func.func @transform_3(%arg0: i32) -> (i32, i32) {
    %c0_i32 = arith.constant 0 : i32
    %c0_i32_0 = arith.constant 0 : i32
    return %arg0, %c0_i32 : i32, i32
  }
  func.func @transform_4(%arg0: i32) -> (i32, i32) {
    %c0_i32 = arith.constant 0 : i32
    %c0_i32_0 = arith.constant 0 : i32
    return %arg0, %c0_i32 : i32, i32
  }
}

module attributes {stable_mosaic.version = 11 : i64} {
  func.func @_conv_res_kernel(%arg0: i32, %arg1: memref<98x128xf32, #tpu.memory_space<vmem>>, %arg2: memref<128x128xbf16, #tpu.memory_space<vmem>>, %arg3: memref<128x128xbf16, #tpu.memory_space<vmem>>, %arg4: memref<98x128xf32, #tpu.memory_space<vmem>>) attributes {dimension_semantics = [#tpu.dimension_semantics<parallel>], iteration_bounds = array<i64: 1>, scalar_prefetch = 0 : i64, scratch_operands = 0 : i64, tpu.core_type = #tpu.core_type<tc>, window_params = [{transform_indices = @transform_0, window_bounds = array<i64: 98, 128>}, {pipeline_mode = #tpu.pipeline_mode<synchronous>, transform_indices = @transform_1, window_bounds = array<i64: 128, 128>}, {pipeline_mode = #tpu.pipeline_mode<synchronous>, transform_indices = @transform_2, window_bounds = array<i64: 128, 128>}, {transform_indices = @transform_3, window_bounds = array<i64: 98, 128>}]} {
    %c0 = arith.constant 0 : index
    %c0_0 = arith.constant 0 : index
    %0 = vector.load %arg1[%c0, %c0_0] : memref<98x128xf32, #tpu.memory_space<vmem>>, vector<98x128xf32>
    %1 = arith.truncf %0 : vector<98x128xf32> to vector<98x128xbf16>
    %c0_1 = arith.constant 0 : index
    %c0_2 = arith.constant 0 : index
    %2 = vector.load %arg2[%c0_1, %c0_2] : memref<128x128xbf16, #tpu.memory_space<vmem>>, vector<128x128xbf16>
    %cst = arith.constant dense<0.000000e+00> : vector<98x128xf32>
    %3 = tpu.matmul %1, %2, %cst {dimension_numbers = #tpu.dot_dimension_numbers<[1], [0], [0], [1], [0, 0, 1, 1], [], []>} : vector<98x128xbf16>, vector<128x128xbf16>, vector<98x128xf32> -> vector<98x128xf32>
    %cst_3 = arith.constant 0.000000e+00 : f32
    %4 = vector.broadcast %cst_3 : f32 to vector<98x128xf32>
    %5 = arith.maximumf %3, %4 : vector<98x128xf32>
    %6 = arith.truncf %5 : vector<98x128xf32> to vector<98x128xbf16>
    %c0_4 = arith.constant 0 : index
    %c0_5 = arith.constant 0 : index
    %7 = vector.load %arg3[%c0_4, %c0_5] : memref<128x128xbf16, #tpu.memory_space<vmem>>, vector<128x128xbf16>
    %cst_6 = arith.constant dense<0.000000e+00> : vector<98x128xf32>
    %8 = tpu.matmul %6, %7, %cst_6 {dimension_numbers = #tpu.dot_dimension_numbers<[1], [0], [0], [1], [0, 0, 1, 1], [], []>} : vector<98x128xbf16>, vector<128x128xbf16>, vector<98x128xf32> -> vector<98x128xf32>
    %9 = arith.addf %8, %0 : vector<98x128xf32>
    %c0_7 = arith.constant 0 : index
    %c0_8 = arith.constant 0 : index
    %10 = vector.load %arg4[%c0_7, %c0_8] : memref<98x128xf32, #tpu.memory_space<vmem>>, vector<98x128xf32>
    tpu.vector_store %arg4[%c0_7, %c0_8], %9 {strides = array<i32>} : memref<98x128xf32, #tpu.memory_space<vmem>>, vector<98x128xf32>,
    return
  }
  func.func @transform_0(%arg0: i32) -> (i32, i32) {
    %c0_i32 = arith.constant 0 : i32
    %c0_i32_0 = arith.constant 0 : i32
    return %arg0, %c0_i32 : i32, i32
  }
  func.func @transform_1(%arg0: i32) -> (i32, i32) {
    %c0_i32 = arith.constant 0 : i32
    %c0_i32_0 = arith.constant 0 : i32
    %c0_i32_1 = arith.constant 0 : i32
    return %c0_i32, %c0_i32_0 : i32, i32
  }
  func.func @transform_2(%arg0: i32) -> (i32, i32) {
    %c0_i32 = arith.constant 0 : i32
    %c0_i32_0 = arith.constant 0 : i32
    %c0_i32_1 = arith.constant 0 : i32
    return %c0_i32, %c0_i32_0 : i32, i32
  }
  func.func @transform_3(%arg0: i32) -> (i32, i32) {
    %c0_i32 = arith.constant 0 : i32
    %c0_i32_0 = arith.constant 0 : i32
    return %arg0, %c0_i32 : i32, i32
  }
}

module attributes {stable_mosaic.version = 11 : i64} {
  func.func @_conv_res_kernel(%arg0: i32, %arg1: memref<50x1152xf32, #tpu.memory_space<vmem>>, %arg2: memref<1152x128xbf16, #tpu.memory_space<vmem>>, %arg3: memref<128x128xbf16, #tpu.memory_space<vmem>>, %arg4: memref<50x128xf32, #tpu.memory_space<vmem>>) attributes {dimension_semantics = [#tpu.dimension_semantics<parallel>], iteration_bounds = array<i64: 1>, scalar_prefetch = 0 : i64, scratch_operands = 0 : i64, tpu.core_type = #tpu.core_type<tc>, window_params = [{transform_indices = @transform_0, window_bounds = array<i64: 50, 1152>}, {pipeline_mode = #tpu.pipeline_mode<synchronous>, transform_indices = @transform_1, window_bounds = array<i64: 1152, 128>}, {pipeline_mode = #tpu.pipeline_mode<synchronous>, transform_indices = @transform_2, window_bounds = array<i64: 128, 128>}, {transform_indices = @transform_3, window_bounds = array<i64: 50, 128>}]} {
    %c0 = arith.constant 0 : index
    %c0_0 = arith.constant 0 : index
    %0 = vector.load %arg1[%c0, %c0_0] : memref<50x1152xf32, #tpu.memory_space<vmem>>, vector<50x1152xf32>
    %1 = arith.truncf %0 : vector<50x1152xf32> to vector<50x1152xbf16>
    %c0_1 = arith.constant 0 : index
    %c0_2 = arith.constant 0 : index
    %2 = vector.load %arg2[%c0_1, %c0_2] : memref<1152x128xbf16, #tpu.memory_space<vmem>>, vector<1152x128xbf16>
    %cst = arith.constant dense<0.000000e+00> : vector<50x128xf32>
    %3 = tpu.matmul %1, %2, %cst {dimension_numbers = #tpu.dot_dimension_numbers<[1], [0], [0], [1], [0, 0, 1, 1], [], []>} : vector<50x1152xbf16>, vector<1152x128xbf16>, vector<50x128xf32> -> vector<50x128xf32>
    %cst_3 = arith.constant 0.000000e+00 : f32
    %4 = vector.broadcast %cst_3 : f32 to vector<50x128xf32>
    %5 = arith.maximumf %3, %4 : vector<50x128xf32>
    %6 = arith.truncf %5 : vector<50x128xf32> to vector<50x128xbf16>
    %c0_4 = arith.constant 0 : index
    %c0_5 = arith.constant 0 : index
    %7 = vector.load %arg3[%c0_4, %c0_5] : memref<128x128xbf16, #tpu.memory_space<vmem>>, vector<128x128xbf16>
    %cst_6 = arith.constant dense<0.000000e+00> : vector<50x128xf32>
    %8 = tpu.matmul %6, %7, %cst_6 {dimension_numbers = #tpu.dot_dimension_numbers<[1], [0], [0], [1], [0, 0, 1, 1], [], []>} : vector<50x128xbf16>, vector<128x128xbf16>, vector<50x128xf32> -> vector<50x128xf32>
    %9 = vector.extract_strided_slice %0 {offsets = [0, 0], sizes = [50, 128], strides = [1, 1]} : vector<50x1152xf32> to vector<50x128xf32>
    %10 = vector.extract_strided_slice %0 {offsets = [0, 128], sizes = [50, 128], strides = [1, 1]} : vector<50x1152xf32> to vector<50x128xf32>
    %11 = arith.addf %9, %10 : vector<50x128xf32>
    %12 = vector.extract_strided_slice %0 {offsets = [0, 256], sizes = [50, 128], strides = [1, 1]} : vector<50x1152xf32> to vector<50x128xf32>
    %13 = arith.addf %11, %12 : vector<50x128xf32>
    %14 = vector.extract_strided_slice %0 {offsets = [0, 384], sizes = [50, 128], strides = [1, 1]} : vector<50x1152xf32> to vector<50x128xf32>
    %15 = arith.addf %13, %14 : vector<50x128xf32>
    %16 = vector.extract_strided_slice %0 {offsets = [0, 512], sizes = [50, 128], strides = [1, 1]} : vector<50x1152xf32> to vector<50x128xf32>
    %17 = arith.addf %15, %16 : vector<50x128xf32>
    %18 = vector.extract_strided_slice %0 {offsets = [0, 640], sizes = [50, 128], strides = [1, 1]} : vector<50x1152xf32> to vector<50x128xf32>
    %19 = arith.addf %17, %18 : vector<50x128xf32>
    %20 = vector.extract_strided_slice %0 {offsets = [0, 768], sizes = [50, 128], strides = [1, 1]} : vector<50x1152xf32> to vector<50x128xf32>
    %21 = arith.addf %19, %20 : vector<50x128xf32>
    %22 = vector.extract_strided_slice %0 {offsets = [0, 896], sizes = [50, 128], strides = [1, 1]} : vector<50x1152xf32> to vector<50x128xf32>
    %23 = arith.addf %21, %22 : vector<50x128xf32>
    %24 = vector.extract_strided_slice %0 {offsets = [0, 1024], sizes = [50, 128], strides = [1, 1]} : vector<50x1152xf32> to vector<50x128xf32>
    %25 = arith.addf %23, %24 : vector<50x128xf32>
    %cst_7 = arith.constant 0.111111112 : f32
    %26 = vector.broadcast %cst_7 : f32 to vector<50x128xf32>
    %27 = arith.mulf %25, %26 : vector<50x128xf32>
    %28 = arith.addf %8, %27 : vector<50x128xf32>
    %c0_8 = arith.constant 0 : index
    %c0_9 = arith.constant 0 : index
    %29 = vector.load %arg4[%c0_8, %c0_9] : memref<50x128xf32, #tpu.memory_space<vmem>>, vector<50x128xf32>
    tpu.vector_store %arg4[%c0_8, %c0_9], %28 {strides = array<i32>} : memref<50x128xf32, #tpu.memory_space<vmem>>, vector<50x128xf32>,
    return
  }
  func.func @transform_0(%arg0: i32) -> (i32, i32) {
    %c0_i32 = arith.constant 0 : i32
    %c0_i32_0 = arith.constant 0 : i32
    return %arg0, %c0_i32 : i32, i32
  }
  func.func @transform_1(%arg0: i32) -> (i32, i32) {
    %c0_i32 = arith.constant 0 : i32
    %c0_i32_0 = arith.constant 0 : i32
    %c0_i32_1 = arith.constant 0 : i32
    return %c0_i32, %c0_i32_0 : i32, i32
  }
  func.func @transform_2(%arg0: i32) -> (i32, i32) {
    %c0_i32 = arith.constant 0 : i32
    %c0_i32_0 = arith.constant 0 : i32
    %c0_i32_1 = arith.constant 0 : i32
    return %c0_i32, %c0_i32_0 : i32, i32
  }
  func.func @transform_3(%arg0: i32) -> (i32, i32) {
    %c0_i32 = arith.constant 0 : i32
    %c0_i32_0 = arith.constant 0 : i32
    return %arg0, %c0_i32 : i32, i32
  }
}

module attributes {stable_mosaic.version = 11 : i64} {
  func.func @_conv_res_kernel(%arg0: i32, %arg1: memref<50x128xf32, #tpu.memory_space<vmem>>, %arg2: memref<128x128xbf16, #tpu.memory_space<vmem>>, %arg3: memref<128x128xbf16, #tpu.memory_space<vmem>>, %arg4: memref<50x128xf32, #tpu.memory_space<vmem>>) attributes {dimension_semantics = [#tpu.dimension_semantics<parallel>], iteration_bounds = array<i64: 1>, scalar_prefetch = 0 : i64, scratch_operands = 0 : i64, tpu.core_type = #tpu.core_type<tc>, window_params = [{transform_indices = @transform_0, window_bounds = array<i64: 50, 128>}, {pipeline_mode = #tpu.pipeline_mode<synchronous>, transform_indices = @transform_1, window_bounds = array<i64: 128, 128>}, {pipeline_mode = #tpu.pipeline_mode<synchronous>, transform_indices = @transform_2, window_bounds = array<i64: 128, 128>}, {transform_indices = @transform_3, window_bounds = array<i64: 50, 128>}]} {
    %c0 = arith.constant 0 : index
    %c0_0 = arith.constant 0 : index
    %0 = vector.load %arg1[%c0, %c0_0] : memref<50x128xf32, #tpu.memory_space<vmem>>, vector<50x128xf32>
    %1 = arith.truncf %0 : vector<50x128xf32> to vector<50x128xbf16>
    %c0_1 = arith.constant 0 : index
    %c0_2 = arith.constant 0 : index
    %2 = vector.load %arg2[%c0_1, %c0_2] : memref<128x128xbf16, #tpu.memory_space<vmem>>, vector<128x128xbf16>
    %cst = arith.constant dense<0.000000e+00> : vector<50x128xf32>
    %3 = tpu.matmul %1, %2, %cst {dimension_numbers = #tpu.dot_dimension_numbers<[1], [0], [0], [1], [0, 0, 1, 1], [], []>} : vector<50x128xbf16>, vector<128x128xbf16>, vector<50x128xf32> -> vector<50x128xf32>
    %cst_3 = arith.constant 0.000000e+00 : f32
    %4 = vector.broadcast %cst_3 : f32 to vector<50x128xf32>
    %5 = arith.maximumf %3, %4 : vector<50x128xf32>
    %6 = arith.truncf %5 : vector<50x128xf32> to vector<50x128xbf16>
    %c0_4 = arith.constant 0 : index
    %c0_5 = arith.constant 0 : index
    %7 = vector.load %arg3[%c0_4, %c0_5] : memref<128x128xbf16, #tpu.memory_space<vmem>>, vector<128x128xbf16>
    %cst_6 = arith.constant dense<0.000000e+00> : vector<50x128xf32>
    %8 = tpu.matmul %6, %7, %cst_6 {dimension_numbers = #tpu.dot_dimension_numbers<[1], [0], [0], [1], [0, 0, 1, 1], [], []>} : vector<50x128xbf16>, vector<128x128xbf16>, vector<50x128xf32> -> vector<50x128xf32>
    %9 = arith.addf %8, %0 : vector<50x128xf32>
    %c0_7 = arith.constant 0 : index
    %c0_8 = arith.constant 0 : index
    %10 = vector.load %arg4[%c0_7, %c0_8] : memref<50x128xf32, #tpu.memory_space<vmem>>, vector<50x128xf32>
    tpu.vector_store %arg4[%c0_7, %c0_8], %9 {strides = array<i32>} : memref<50x128xf32, #tpu.memory_space<vmem>>, vector<50x128xf32>,
    return
  }
  func.func @transform_0(%arg0: i32) -> (i32, i32) {
    %c0_i32 = arith.constant 0 : i32
    %c0_i32_0 = arith.constant 0 : i32
    return %arg0, %c0_i32 : i32, i32
  }
  func.func @transform_1(%arg0: i32) -> (i32, i32) {
    %c0_i32 = arith.constant 0 : i32
    %c0_i32_0 = arith.constant 0 : i32
    %c0_i32_1 = arith.constant 0 : i32
    return %c0_i32, %c0_i32_0 : i32, i32
  }
  func.func @transform_2(%arg0: i32) -> (i32, i32) {
    %c0_i32 = arith.constant 0 : i32
    %c0_i32_0 = arith.constant 0 : i32
    %c0_i32_1 = arith.constant 0 : i32
    return %c0_i32, %c0_i32_0 : i32, i32
  }
  func.func @transform_3(%arg0: i32) -> (i32, i32) {
    %c0_i32 = arith.constant 0 : i32
    %c0_i32_0 = arith.constant 0 : i32
    return %arg0, %c0_i32 : i32, i32
  }
}

module attributes {stable_mosaic.version = 11 : i64} {
  func.func @_conv_res_kernel(%arg0: i32, %arg1: memref<18x1152xf32, #tpu.memory_space<vmem>>, %arg2: memref<1152x128xbf16, #tpu.memory_space<vmem>>, %arg3: memref<128x128xbf16, #tpu.memory_space<vmem>>, %arg4: memref<18x128xf32, #tpu.memory_space<vmem>>) attributes {dimension_semantics = [#tpu.dimension_semantics<parallel>], iteration_bounds = array<i64: 1>, scalar_prefetch = 0 : i64, scratch_operands = 0 : i64, tpu.core_type = #tpu.core_type<tc>, window_params = [{transform_indices = @transform_0, window_bounds = array<i64: 18, 1152>}, {pipeline_mode = #tpu.pipeline_mode<synchronous>, transform_indices = @transform_1, window_bounds = array<i64: 1152, 128>}, {pipeline_mode = #tpu.pipeline_mode<synchronous>, transform_indices = @transform_2, window_bounds = array<i64: 128, 128>}, {transform_indices = @transform_3, window_bounds = array<i64: 18, 128>}]} {
    %c0 = arith.constant 0 : index
    %c0_0 = arith.constant 0 : index
    %0 = vector.load %arg1[%c0, %c0_0] : memref<18x1152xf32, #tpu.memory_space<vmem>>, vector<18x1152xf32>
    %1 = arith.truncf %0 : vector<18x1152xf32> to vector<18x1152xbf16>
    %c0_1 = arith.constant 0 : index
    %c0_2 = arith.constant 0 : index
    %2 = vector.load %arg2[%c0_1, %c0_2] : memref<1152x128xbf16, #tpu.memory_space<vmem>>, vector<1152x128xbf16>
    %cst = arith.constant dense<0.000000e+00> : vector<18x128xf32>
    %3 = tpu.matmul %1, %2, %cst {dimension_numbers = #tpu.dot_dimension_numbers<[1], [0], [0], [1], [0, 0, 1, 1], [], []>} : vector<18x1152xbf16>, vector<1152x128xbf16>, vector<18x128xf32> -> vector<18x128xf32>
    %cst_3 = arith.constant 0.000000e+00 : f32
    %4 = vector.broadcast %cst_3 : f32 to vector<18x128xf32>
    %5 = arith.maximumf %3, %4 : vector<18x128xf32>
    %6 = arith.truncf %5 : vector<18x128xf32> to vector<18x128xbf16>
    %c0_4 = arith.constant 0 : index
    %c0_5 = arith.constant 0 : index
    %7 = vector.load %arg3[%c0_4, %c0_5] : memref<128x128xbf16, #tpu.memory_space<vmem>>, vector<128x128xbf16>
    %cst_6 = arith.constant dense<0.000000e+00> : vector<18x128xf32>
    %8 = tpu.matmul %6, %7, %cst_6 {dimension_numbers = #tpu.dot_dimension_numbers<[1], [0], [0], [1], [0, 0, 1, 1], [], []>} : vector<18x128xbf16>, vector<128x128xbf16>, vector<18x128xf32> -> vector<18x128xf32>
    %9 = vector.extract_strided_slice %0 {offsets = [0, 0], sizes = [18, 128], strides = [1, 1]} : vector<18x1152xf32> to vector<18x128xf32>
    %10 = vector.extract_strided_slice %0 {offsets = [0, 128], sizes = [18, 128], strides = [1, 1]} : vector<18x1152xf32> to vector<18x128xf32>
    %11 = arith.addf %9, %10 : vector<18x128xf32>
    %12 = vector.extract_strided_slice %0 {offsets = [0, 256], sizes = [18, 128], strides = [1, 1]} : vector<18x1152xf32> to vector<18x128xf32>
    %13 = arith.addf %11, %12 : vector<18x128xf32>
    %14 = vector.extract_strided_slice %0 {offsets = [0, 384], sizes = [18, 128], strides = [1, 1]} : vector<18x1152xf32> to vector<18x128xf32>
    %15 = arith.addf %13, %14 : vector<18x128xf32>
    %16 = vector.extract_strided_slice %0 {offsets = [0, 512], sizes = [18, 128], strides = [1, 1]} : vector<18x1152xf32> to vector<18x128xf32>
    %17 = arith.addf %15, %16 : vector<18x128xf32>
    %18 = vector.extract_strided_slice %0 {offsets = [0, 640], sizes = [18, 128], strides = [1, 1]} : vector<18x1152xf32> to vector<18x128xf32>
    %19 = arith.addf %17, %18 : vector<18x128xf32>
    %20 = vector.extract_strided_slice %0 {offsets = [0, 768], sizes = [18, 128], strides = [1, 1]} : vector<18x1152xf32> to vector<18x128xf32>
    %21 = arith.addf %19, %20 : vector<18x128xf32>
    %22 = vector.extract_strided_slice %0 {offsets = [0, 896], sizes = [18, 128], strides = [1, 1]} : vector<18x1152xf32> to vector<18x128xf32>
    %23 = arith.addf %21, %22 : vector<18x128xf32>
    %24 = vector.extract_strided_slice %0 {offsets = [0, 1024], sizes = [18, 128], strides = [1, 1]} : vector<18x1152xf32> to vector<18x128xf32>
    %25 = arith.addf %23, %24 : vector<18x128xf32>
    %cst_7 = arith.constant 0.111111112 : f32
    %26 = vector.broadcast %cst_7 : f32 to vector<18x128xf32>
    %27 = arith.mulf %25, %26 : vector<18x128xf32>
    %28 = arith.addf %8, %27 : vector<18x128xf32>
    %c0_8 = arith.constant 0 : index
    %c0_9 = arith.constant 0 : index
    %29 = vector.load %arg4[%c0_8, %c0_9] : memref<18x128xf32, #tpu.memory_space<vmem>>, vector<18x128xf32>
    tpu.vector_store %arg4[%c0_8, %c0_9], %28 {strides = array<i32>} : memref<18x128xf32, #tpu.memory_space<vmem>>, vector<18x128xf32>,
    return
  }
  func.func @transform_0(%arg0: i32) -> (i32, i32) {
    %c0_i32 = arith.constant 0 : i32
    %c0_i32_0 = arith.constant 0 : i32
    return %arg0, %c0_i32 : i32, i32
  }
  func.func @transform_1(%arg0: i32) -> (i32, i32) {
    %c0_i32 = arith.constant 0 : i32
    %c0_i32_0 = arith.constant 0 : i32
    %c0_i32_1 = arith.constant 0 : i32
    return %c0_i32, %c0_i32_0 : i32, i32
  }
  func.func @transform_2(%arg0: i32) -> (i32, i32) {
    %c0_i32 = arith.constant 0 : i32
    %c0_i32_0 = arith.constant 0 : i32
    %c0_i32_1 = arith.constant 0 : i32
    return %c0_i32, %c0_i32_0 : i32, i32
  }
  func.func @transform_3(%arg0: i32) -> (i32, i32) {
    %c0_i32 = arith.constant 0 : i32
    %c0_i32_0 = arith.constant 0 : i32
    return %arg0, %c0_i32 : i32, i32
  }
}

module attributes {stable_mosaic.version = 11 : i64} {
  func.func @_conv_res_kernel(%arg0: i32, %arg1: memref<18x128xf32, #tpu.memory_space<vmem>>, %arg2: memref<128x128xbf16, #tpu.memory_space<vmem>>, %arg3: memref<128x128xbf16, #tpu.memory_space<vmem>>, %arg4: memref<18x128xf32, #tpu.memory_space<vmem>>) attributes {dimension_semantics = [#tpu.dimension_semantics<parallel>], iteration_bounds = array<i64: 1>, scalar_prefetch = 0 : i64, scratch_operands = 0 : i64, tpu.core_type = #tpu.core_type<tc>, window_params = [{transform_indices = @transform_0, window_bounds = array<i64: 18, 128>}, {pipeline_mode = #tpu.pipeline_mode<synchronous>, transform_indices = @transform_1, window_bounds = array<i64: 128, 128>}, {pipeline_mode = #tpu.pipeline_mode<synchronous>, transform_indices = @transform_2, window_bounds = array<i64: 128, 128>}, {transform_indices = @transform_3, window_bounds = array<i64: 18, 128>}]} {
    %c0 = arith.constant 0 : index
    %c0_0 = arith.constant 0 : index
    %0 = vector.load %arg1[%c0, %c0_0] : memref<18x128xf32, #tpu.memory_space<vmem>>, vector<18x128xf32>
    %1 = arith.truncf %0 : vector<18x128xf32> to vector<18x128xbf16>
    %c0_1 = arith.constant 0 : index
    %c0_2 = arith.constant 0 : index
    %2 = vector.load %arg2[%c0_1, %c0_2] : memref<128x128xbf16, #tpu.memory_space<vmem>>, vector<128x128xbf16>
    %cst = arith.constant dense<0.000000e+00> : vector<18x128xf32>
    %3 = tpu.matmul %1, %2, %cst {dimension_numbers = #tpu.dot_dimension_numbers<[1], [0], [0], [1], [0, 0, 1, 1], [], []>} : vector<18x128xbf16>, vector<128x128xbf16>, vector<18x128xf32> -> vector<18x128xf32>
    %cst_3 = arith.constant 0.000000e+00 : f32
    %4 = vector.broadcast %cst_3 : f32 to vector<18x128xf32>
    %5 = arith.maximumf %3, %4 : vector<18x128xf32>
    %6 = arith.truncf %5 : vector<18x128xf32> to vector<18x128xbf16>
    %c0_4 = arith.constant 0 : index
    %c0_5 = arith.constant 0 : index
    %7 = vector.load %arg3[%c0_4, %c0_5] : memref<128x128xbf16, #tpu.memory_space<vmem>>, vector<128x128xbf16>
    %cst_6 = arith.constant dense<0.000000e+00> : vector<18x128xf32>
    %8 = tpu.matmul %6, %7, %cst_6 {dimension_numbers = #tpu.dot_dimension_numbers<[1], [0], [0], [1], [0, 0, 1, 1], [], []>} : vector<18x128xbf16>, vector<128x128xbf16>, vector<18x128xf32> -> vector<18x128xf32>
    %9 = arith.addf %8, %0 : vector<18x128xf32>
    %c0_7 = arith.constant 0 : index
    %c0_8 = arith.constant 0 : index
    %10 = vector.load %arg4[%c0_7, %c0_8] : memref<18x128xf32, #tpu.memory_space<vmem>>, vector<18x128xf32>
    tpu.vector_store %arg4[%c0_7, %c0_8], %9 {strides = array<i32>} : memref<18x128xf32, #tpu.memory_space<vmem>>, vector<18x128xf32>,
    return
  }
  func.func @transform_0(%arg0: i32) -> (i32, i32) {
    %c0_i32 = arith.constant 0 : i32
    %c0_i32_0 = arith.constant 0 : i32
    return %arg0, %c0_i32 : i32, i32
  }
  func.func @transform_1(%arg0: i32) -> (i32, i32) {
    %c0_i32 = arith.constant 0 : i32
    %c0_i32_0 = arith.constant 0 : i32
    %c0_i32_1 = arith.constant 0 : i32
    return %c0_i32, %c0_i32_0 : i32, i32
  }
  func.func @transform_2(%arg0: i32) -> (i32, i32) {
    %c0_i32 = arith.constant 0 : i32
    %c0_i32_0 = arith.constant 0 : i32
    %c0_i32_1 = arith.constant 0 : i32
    return %c0_i32, %c0_i32_0 : i32, i32
  }
  func.func @transform_3(%arg0: i32) -> (i32, i32) {
    %c0_i32 = arith.constant 0 : i32
    %c0_i32_0 = arith.constant 0 : i32
    return %arg0, %c0_i32 : i32, i32
  }
}

module attributes {stable_mosaic.version = 11 : i64} {
  func.func @_conv_res_kernel(%arg0: i32, %arg1: memref<2x1152xf32, #tpu.memory_space<vmem>>, %arg2: memref<1152x128xbf16, #tpu.memory_space<vmem>>, %arg3: memref<128x128xbf16, #tpu.memory_space<vmem>>, %arg4: memref<1x128xf32, #tpu.memory_space<vmem>>, %arg5: memref<1x128xf32, #tpu.memory_space<vmem>>, %arg6: memref<2x128xf32, #tpu.memory_space<vmem>>) attributes {dimension_semantics = [#tpu.dimension_semantics<parallel>], iteration_bounds = array<i64: 1>, scalar_prefetch = 0 : i64, scratch_operands = 0 : i64, tpu.core_type = #tpu.core_type<tc>, window_params = [{transform_indices = @transform_0, window_bounds = array<i64: 2, 1152>}, {pipeline_mode = #tpu.pipeline_mode<synchronous>, transform_indices = @transform_1, window_bounds = array<i64: 1152, 128>}, {pipeline_mode = #tpu.pipeline_mode<synchronous>, transform_indices = @transform_2, window_bounds = array<i64: 128, 128>}, {pipeline_mode = #tpu.pipeline_mode<synchronous>, transform_indices = @transform_3, window_bounds = array<i64: 1, 128>}, {pipeline_mode = #tpu.pipeline_mode<synchronous>, transform_indices = @transform_4, window_bounds = array<i64: 1, 128>}, {transform_indices = @transform_5, window_bounds = array<i64: 2, 128>}]} {
    %c0 = arith.constant 0 : index
    %c0_0 = arith.constant 0 : index
    %0 = vector.load %arg1[%c0, %c0_0] : memref<2x1152xf32, #tpu.memory_space<vmem>>, vector<2x1152xf32>
    %1 = arith.truncf %0 : vector<2x1152xf32> to vector<2x1152xbf16>
    %c0_1 = arith.constant 0 : index
    %c0_2 = arith.constant 0 : index
    %2 = vector.load %arg2[%c0_1, %c0_2] : memref<1152x128xbf16, #tpu.memory_space<vmem>>, vector<1152x128xbf16>
    %cst = arith.constant dense<0.000000e+00> : vector<2x128xf32>
    %3 = tpu.matmul %1, %2, %cst {dimension_numbers = #tpu.dot_dimension_numbers<[1], [0], [0], [1], [0, 0, 1, 1], [], []>} : vector<2x1152xbf16>, vector<1152x128xbf16>, vector<2x128xf32> -> vector<2x128xf32>
    %cst_3 = arith.constant 0.000000e+00 : f32
    %4 = vector.broadcast %cst_3 : f32 to vector<2x128xf32>
    %5 = arith.maximumf %3, %4 : vector<2x128xf32>
    %6 = arith.truncf %5 : vector<2x128xf32> to vector<2x128xbf16>
    %c0_4 = arith.constant 0 : index
    %c0_5 = arith.constant 0 : index
    %7 = vector.load %arg3[%c0_4, %c0_5] : memref<128x128xbf16, #tpu.memory_space<vmem>>, vector<128x128xbf16>
    %cst_6 = arith.constant dense<0.000000e+00> : vector<2x128xf32>
    %8 = tpu.matmul %6, %7, %cst_6 {dimension_numbers = #tpu.dot_dimension_numbers<[1], [0], [0], [1], [0, 0, 1, 1], [], []>} : vector<2x128xbf16>, vector<128x128xbf16>, vector<2x128xf32> -> vector<2x128xf32>
    %9 = vector.extract_strided_slice %0 {offsets = [0, 0], sizes = [2, 128], strides = [1, 1]} : vector<2x1152xf32> to vector<2x128xf32>
    %10 = vector.extract_strided_slice %0 {offsets = [0, 128], sizes = [2, 128], strides = [1, 1]} : vector<2x1152xf32> to vector<2x128xf32>
    %11 = arith.addf %9, %10 : vector<2x128xf32>
    %12 = vector.extract_strided_slice %0 {offsets = [0, 256], sizes = [2, 128], strides = [1, 1]} : vector<2x1152xf32> to vector<2x128xf32>
    %13 = arith.addf %11, %12 : vector<2x128xf32>
    %14 = vector.extract_strided_slice %0 {offsets = [0, 384], sizes = [2, 128], strides = [1, 1]} : vector<2x1152xf32> to vector<2x128xf32>
    %15 = arith.addf %13, %14 : vector<2x128xf32>
    %16 = vector.extract_strided_slice %0 {offsets = [0, 512], sizes = [2, 128], strides = [1, 1]} : vector<2x1152xf32> to vector<2x128xf32>
    %17 = arith.addf %15, %16 : vector<2x128xf32>
    %18 = vector.extract_strided_slice %0 {offsets = [0, 640], sizes = [2, 128], strides = [1, 1]} : vector<2x1152xf32> to vector<2x128xf32>
    %19 = arith.addf %17, %18 : vector<2x128xf32>
    %20 = vector.extract_strided_slice %0 {offsets = [0, 768], sizes = [2, 128], strides = [1, 1]} : vector<2x1152xf32> to vector<2x128xf32>
    %21 = arith.addf %19, %20 : vector<2x128xf32>
    %22 = vector.extract_strided_slice %0 {offsets = [0, 896], sizes = [2, 128], strides = [1, 1]} : vector<2x1152xf32> to vector<2x128xf32>
    %23 = arith.addf %21, %22 : vector<2x128xf32>
    %24 = vector.extract_strided_slice %0 {offsets = [0, 1024], sizes = [2, 128], strides = [1, 1]} : vector<2x1152xf32> to vector<2x128xf32>
    %25 = arith.addf %23, %24 : vector<2x128xf32>
    %cst_7 = arith.constant 0.111111112 : f32
    %26 = vector.broadcast %cst_7 : f32 to vector<2x128xf32>
    %27 = arith.mulf %25, %26 : vector<2x128xf32>
    %28 = arith.addf %8, %27 : vector<2x128xf32>
    %c0_8 = arith.constant 0 : index
    %c0_9 = arith.constant 0 : index
    %29 = vector.load %arg4[%c0_8, %c0_9] : memref<1x128xf32, #tpu.memory_space<vmem>>, vector<1x128xf32>
    %30 = vector.broadcast %29 : vector<1x128xf32> to vector<2x128xf32>
    %31 = arith.mulf %28, %30 : vector<2x128xf32>
    %c0_10 = arith.constant 0 : index
    %c0_11 = arith.constant 0 : index
    %32 = vector.load %arg5[%c0_10, %c0_11] : memref<1x128xf32, #tpu.memory_space<vmem>>, vector<1x128xf32>
    %33 = vector.broadcast %32 : vector<1x128xf32> to vector<2x128xf32>
    %34 = arith.addf %31, %33 : vector<2x128xf32>
    %c0_12 = arith.constant 0 : index
    %c0_13 = arith.constant 0 : index
    %35 = vector.load %arg6[%c0_12, %c0_13] : memref<2x128xf32, #tpu.memory_space<vmem>>, vector<2x128xf32>
    tpu.vector_store %arg6[%c0_12, %c0_13], %34 {strides = array<i32>} : memref<2x128xf32, #tpu.memory_space<vmem>>, vector<2x128xf32>,
    return
  }
  func.func @transform_0(%arg0: i32) -> (i32, i32) {
    %c0_i32 = arith.constant 0 : i32
    %c0_i32_0 = arith.constant 0 : i32
    return %arg0, %c0_i32 : i32, i32
  }
  func.func @transform_1(%arg0: i32) -> (i32, i32) {
    %c0_i32 = arith.constant 0 : i32
    %c0_i32_0 = arith.constant 0 : i32
    %c0_i32_1 = arith.constant 0 : i32
    return %c0_i32, %c0_i32_0 : i32, i32
  }
  func.func @transform_2(%arg0: i32) -> (i32, i32) {
    %c0_i32 = arith.constant 0 : i32
    %c0_i32_0 = arith.constant 0 : i32
    %c0_i32_1 = arith.constant 0 : i32
    return %c0_i32, %c0_i32_0 : i32, i32
  }
  func.func @transform_3(%arg0: i32) -> (i32, i32) {
    %c0_i32 = arith.constant 0 : i32
    %c0_i32_0 = arith.constant 0 : i32
    %c0_i32_1 = arith.constant 0 : i32
    return %c0_i32, %c0_i32_0 : i32, i32
  }
  func.func @transform_4(%arg0: i32) -> (i32, i32) {
    %c0_i32 = arith.constant 0 : i32
    %c0_i32_0 = arith.constant 0 : i32
    %c0_i32_1 = arith.constant 0 : i32
    return %c0_i32, %c0_i32_0 : i32, i32
  }
  func.func @transform_5(%arg0: i32) -> (i32, i32) {
    %c0_i32 = arith.constant 0 : i32
    %c0_i32_0 = arith.constant 0 : i32
    return %arg0, %c0_i32 : i32, i32
  }
}

</mosaic_0001>

<bundles_post_ra>
// kernel: amdim_forward.18
= control target key start
LH: loop header
LB: loop body
LE: loop exit
PB: predicated region body
PF: predicated region fallthrough
CT: control target
= control target key end

     0   :  { %s1747_s12 = smov 0   ;;  %s2408_s0 = inlined_call_operand.vmem [shape: f32[8192,300], index: 0, kind: input, shape index: {}]   ;;  %s2409_s1 = inlined_call_operand.vmem [shape: bf16[300,16], index: 1, kind: input, shape index: {}]   ;;  %s2410_s2 = inlined_call_operand.vmem [shape: f32[1,16], index: 2, kind: input, shape index: {}]   ;;  %s2411_s3 = inlined_call_operand.vmem [shape: f32[8192,16], index: 3, kind: output, shape index: {}]  }
   0x1 LB: > { %s1488_s13 = sadd.s32 4294967295, %s1724_s12   ;;  %p1492_p0 = scmp.ge.s32.totalorder %s1724_s12, 1  ;;  %s1724_s12 = sphi %s1747_s12, %s13_s12  }
   0x2   : > { %p139_p1 = scmp.lt.s32.totalorder %s1724_s12, 17 }
   0x4   : > { %p140_p2 = pnand %p1492_p0, %p139_p1 }
   0x5   : > { %v1699_v0 = vld [vmem:[%s2409_s1] sm:$0xff] (!%p140_p2)   ;;  %v1726_v1 = vmov (!%p140_p2), 0   ;;  %s1493_s16 = sshll.u32 (!%p140_p2), %s1488_s13, 6  ;;  %v1700_v2 = vld [vmem:[%s2409_s1 + $0x8] sm:$0xff] (!%p140_p2)   ;;  %v1701_v3 = vld [vmem:[%s2409_s1 + $0x10] sm:$0xff] (!%p140_p2)   ;;  %vm721_vm0 = vcmask (!%p140_p2), 1045504  }
   0x6   : > { %143 = sbr.rel (%p140_p2) target bundleno = 475 (0x1db), region = 32  ;;  %725 = vmatprep.subr.bf16.mxu0 (!%p140_p2), %v1726_v1  ;;  %1656 = vmatprep.subr.bf16.mxu1 (!%p140_p2), %v1726_v1  ;;  %p165_p3 = scmp.lt.s32.totalorder (!%p140_p2), %s1493_s16, 1023  ;;  %v1702_v4 = vld [vmem:[%s2409_s1 + $0x18] sm:$0xff] (!%p140_p2)   ;;  %v1703_v5 = vld [vmem:[%s2409_s1 + $0x20] sm:$0xff] (!%p140_p2)   ;;  %v1704_v11 = vld [vmem:[%s2409_s1 + $0x28] sm:$0xff] (!%p140_p2)   ;;  %vm624_vm1 = vcmask (!%p140_p2), 359424  }
   0x7   : > { %726 = vmatpush1.bf16.msra.mxu0 (!%p140_p2), %v1699_v0  ;;  %1672 = vmatpush1.bf16.msra.mxu1 (!%p140_p2), %v1699_v0  ;;  %v1705_v13 = vld [vmem:[%s2409_s1 + $0x30] sm:$0xff] (!%p140_p2)   ;;  %v1706_v14 = vld [vmem:[%s2409_s1 + $0x38] sm:$0xff] (!%p140_p2)   ;;  %v1707_v15 = vld [vmem:[%s2409_s1 + $0x40] sm:$0xff] (!%p140_p2)   ;;  %vm1367_vm2 = vcmask (!%p140_p2), 130048  }
   0x8   : > { %727 = vmatprep.subr.bf16.mxu0 (!%p140_p2), %v1726_v1  ;;  %1657 = vmatprep.subr.bf16.mxu1 (!%p140_p2), %v1726_v1  ;;  %v1708_v16 = vld [vmem:[%s2409_s1 + $0x48] sm:$0xff] (!%p140_p2)   ;;  %v1709_v17 = vld [vmem:[%s2409_s1 + $0x50] sm:$0xff] (!%p140_p2)   ;;  %v1710_v18 = vld [vmem:[%s2409_s1 + $0x58] sm:$0xff] (!%p140_p2)  }
   0x9   : > { %v1711_v19 = vld [vmem:[%s2409_s1 + $0x60] sm:$0xff] (!%p140_p2)   ;;  %v1712_v20 = vld [vmem:[%s2409_s1 + $0x68] sm:$0xff] (!%p140_p2)   ;;  %v1713_v21 = vld [vmem:[%s2409_s1 + $0x70] sm:$0xff] (!%p140_p2)  }
   0xa   : > { %v1714_v22 = vld [vmem:[%s2409_s1 + $0x78] sm:$0xff] (!%p140_p2)   ;;  %v1715_v27 = vld [vmem:[%s2409_s1 + $0x80] sm:$0xff] (!%p140_p2)   ;;  %v1716_v36 = vld [vmem:[%s2409_s1 + $0x88] sm:$0xff] (!%p140_p2)  }
   0xb   : > { %728 = vmatpush1.bf16.msra.mxu0 (!%p140_p2), %v1700_v2  ;;  %1673 = vmatpush1.bf16.msra.mxu1 (!%p140_p2), %v1700_v2  ;;  %v1717_v45 = vld [vmem:[%s2409_s1 + $0x90] sm:$0x3f] (!%p140_p2)  }
   0xc   : > { %729 = vmatprep.subr.bf16.mxu0 (!%p140_p2), %v1726_v1  ;;  %1658 = vmatprep.subr.bf16.mxu1 (!%p140_p2), %v1726_v1  ;;  %v723_v50 = vsel (!%p140_p2), %vm721_vm0, %v1717_v45, 0 }
   0xd   : > { %s2413_s16 = smov (!%p165_p3, %s1493_s16), 1023 }
   0xe   : > { %s1689_s21 = smul.u32 24, %s2413_s16  ;;  %s1496_s7 = sshll.u32 %s2413_s16, 3 }
   0xf   : > { %730 = vmatpush1.bf16.msra.mxu0 %v1701_v3  ;;  %1674 = vmatpush1.bf16.msra.mxu1 %v1701_v3  ;;  %s2153_s10 = scalar_lea.vmem %s2411_s3, %s1496_s7 }
  0x10   : > { %731 = vmatprep.subr.bf16.mxu0 %v1726_v1  ;;  %1659 = vmatprep.subr.bf16.mxu1 %v1726_v1  ;;  %s1781_s26 = scalar_lea.vmem %s2408_s0, %s1689_s21 }
  0x11   : > { %v179_v6 = vld [vmem:[%s1781_s26 + $0x8] sm:$0xff]  ;;  %v182_v7 = vld [vmem:[%s1781_s26 + $0x20] sm:$0xff]  ;;  %v181_v24 = vld [vmem:[%s1781_s26 + $0x18] sm:$0xff] }
  0x12   : > { %v323_v8 = vld [vmem:[%s1781_s26 + $0x488] sm:$0xff]  ;;  %v371_v9 = vpack.c.bf16 %v182_v7, %v179_v6  ;;  %v326_v10 = vld [vmem:[%s1781_s26 + $0x4a0] sm:$0xff]  ;;  %v325_v26 = vld [vmem:[%s1781_s26 + $0x498] sm:$0xff] }
  0x13   : > { %732 = vmatpush1.bf16.msra.mxu0 %v1702_v4  ;;  %1675 = vmatpush1.bf16.msra.mxu1 %v1702_v4  ;;  %v443_v12 = vpack.c.bf16 %v326_v10, %v323_v8  ;;  %v178_v23 = vld [vmem:[%s1781_s26] sm:$0xff]  ;;  %v185_v28 = vld [vmem:[%s1781_s26 + $0x38] sm:$0xff]  ;;  %v188_v29 = vld [vmem:[%s1781_s26 + $0x50] sm:$0xff] }
  0x14   : > { %733 = vmatprep.subr.bf16.mxu0 %v1726_v1  ;;  %1660 = vmatprep.subr.bf16.mxu1 %v1726_v1  ;;  %v322_v25 = vld [vmem:[%s1781_s26 + $0x480] sm:$0xff]  ;;  %v329_v30 = vld [vmem:[%s1781_s26 + $0x4b8] sm:$0xff]  ;;  %v332_v31 = vld [vmem:[%s1781_s26 + $0x4d0] sm:$0xff]  ;;  %v370_v32 = vpack.c.bf16 %v181_v24, %v178_v23  ;;  %v374_v34 = vpack.c.bf16 %v188_v29, %v185_v28 }
  0x15   : > { %757 = vmatprep.mubr.bf16.mxu0 %v371_v9  ;;  %949 = vmatprep.mubr.bf16.mxu1 %v443_v12  ;;  %v442_v33 = vpack.c.bf16 %v325_v26, %v322_v25  ;;  %v446_v35 = vpack.c.bf16 %v332_v31, %v329_v30  ;;  %v184_v37 = vld [vmem:[%s1781_s26 + $0x30] sm:$0xff]  ;;  %v187_v38 = vld [vmem:[%s1781_s26 + $0x48] sm:$0xff]  ;;  %v194_v42 = vld [vmem:[%s1781_s26 + $0x80] sm:$0xff] }
  0x16   : > { %v328_v39 = vld [vmem:[%s1781_s26 + $0x4b0] sm:$0xff]  ;;  %v331_v40 = vld [vmem:[%s1781_s26 + $0x4c8] sm:$0xff]  ;;  %v338_v44 = vld [vmem:[%s1781_s26 + $0x500] sm:$0xff]  ;;  %v373_v46 = vpack.c.bf16 %v187_v38, %v184_v37 }
  0x17   : > { %734 = vmatpush1.bf16.msra.mxu0 %v1703_v5  ;;  %1676 = vmatpush1.bf16.msra.mxu1 %v1703_v5  ;;  %v191_v41 = vld [vmem:[%s1781_s26 + $0x68] sm:$0xff]  ;;  %v445_v47 = vpack.c.bf16 %v331_v40, %v328_v39  ;;  %v190_v51 = vld [vmem:[%s1781_s26 + $0x60] sm:$0xff]  ;;  %v193_v52 = vld [vmem:[%s1781_s26 + $0x78] sm:$0xff] }
  0x18   : > { %735 = vmatprep.subr.bf16.mxu0 %v1726_v1  ;;  %1661 = vmatprep.subr.bf16.mxu1 %v1726_v1  ;;  %v335_v43 = vld [vmem:[%s1781_s26 + $0x4e8] sm:$0xff]  ;;  %v377_v48 = vpack.c.bf16 %v194_v42, %v191_v41  ;;  %v334_v53 = vld [vmem:[%s1781_s26 + $0x4e0] sm:$0xff]  ;;  %v337_v54 = vld [vmem:[%s1781_s26 + $0x4f8] sm:$0xff]  ;;  %v376_v59 = vpack.c.bf16 %v193_v52, %v190_v51 }
  0x19   : > { %v449_v49 = vpack.c.bf16 %v338_v44, %v335_v43  ;;  %v197_v55 = vld [vmem:[%s1781_s26 + $0x98] sm:$0xff]  ;;  %v200_v56 = vld [vmem:[%s1781_s26 + $0xb0] sm:$0xff]  ;;  %v448_v60 = vpack.c.bf16 %v337_v54, %v334_v53  ;;  %v199_v0 = vld [vmem:[%s1781_s26 + $0xa8] sm:$0xff] }
  0x1a   : > { %v341_v57 = vld [vmem:[%s1781_s26 + $0x518] sm:$0xff]  ;;  %v344_v58 = vld [vmem:[%s1781_s26 + $0x530] sm:$0xff]  ;;  %v380_v61 = vpack.c.bf16 %v200_v56, %v197_v55  ;;  %v343_v2 = vld [vmem:[%s1781_s26 + $0x528] sm:$0xff] }
  0x1b   : > { %736 = vmatpush1.bf16.msra.mxu0 %v1704_v11  ;;  %1677 = vmatpush1.bf16.msra.mxu1 %v1704_v11  ;;  %v452_v62 = vpack.c.bf16 %v344_v58, %v341_v57  ;;  %v196_v63 = vld [vmem:[%s1781_s26 + $0x90] sm:$0xff]  ;;  %v203_v3 = vld [vmem:[%s1781_s26 + $0xc8] sm:$0xff]  ;;  %v206_v4 = vld [vmem:[%s1781_s26 + $0xe0] sm:$0xff] }
  0x1c   : > { %737 = vmatprep.subr.bf16.mxu0 %v1726_v1  ;;  %1662 = vmatprep.subr.bf16.mxu1 %v1726_v1  ;;  %v347_v5 = vld [vmem:[%s1781_s26 + $0x548] sm:$0xff]  ;;  %v350_v6 = vld [vmem:[%s1781_s26 + $0x560] sm:$0xff]  ;;  %v379_v7 = vpack.c.bf16 %v199_v0, %v196_v63  ;;  %v383_v9 = vpack.c.bf16 %v206_v4, %v203_v3  ;;  %v205_v12 = vld [vmem:[%s1781_s26 + $0xd8] sm:$0xff] }
  0x1d   : > { %v455_v10 = vpack.c.bf16 %v350_v6, %v347_v5  ;;  %v202_v11 = vld [vmem:[%s1781_s26 + $0xc0] sm:$0xff]  ;;  %v208_v23 = vld [vmem:[%s1781_s26 + $0xf0] sm:$0xff]  ;;  %v211_v24 = vld [vmem:[%s1781_s26 + $0x108] sm:$0xff] }
  0x1e   : > { %v352_v25 = vld [vmem:[%s1781_s26 + $0x570] sm:$0xff]  ;;  %v355_v26 = vld [vmem:[%s1781_s26 + $0x588] sm:$0xff]  ;;  %v218_v28 = vld [vmem:[%s1781_s26 + $0x140] sm:$0xff]  ;;  %v385_v31 = vpack.c.bf16 %v211_v24, %v208_v23 }
  0x1f   : > { %738 = vmatpush1.bf16.msra.mxu0 %v1705_v13  ;;  %1678 = vmatpush1.bf16.msra.mxu1 %v1705_v13  ;;  %v346_v13 = vld [vmem:[%s1781_s26 + $0x540] sm:$0xff]  ;;  %v359_v29 = vld [vmem:[%s1781_s26 + $0x5a8] sm:$0xff]  ;;  %v361_v38 = vld [vmem:[%s1781_s26 + $0x5b8] sm:$0xff] }
  0x20   : > { %739 = vmatprep.subr.bf16.mxu0 %v1726_v1  ;;  %1663 = vmatprep.subr.bf16.mxu1 %v1726_v1  ;;  %v362_v30 = vld [vmem:[%s1781_s26 + $0x5c0] sm:$0xff]  ;;  %v221_v39 = vld [vmem:[%s1781_s26 + $0x158] sm:$0xff]  ;;  %v224_v40 = vld [vmem:[%s1781_s26 + $0x170] sm:$0xff] }
  0x21   : > { %v358_v37 = vld [vmem:[%s1781_s26 + $0x5a0] sm:$0xff]  ;;  %v365_v41 = vld [vmem:[%s1781_s26 + $0x5d8] sm:$0xff]  ;;  %v368_v42 = vld [vmem:[%s1781_s26 + $0x5f0] sm:$0xff] }
  0x22   : > { %v460_v44 = vpack.c.bf16 %v361_v38, %v358_v37  ;;  %v227_v51 = vld [vmem:[%s1781_s26 + $0x188] sm:$0xff]  ;;  %v230_v52 = vld [vmem:[%s1781_s26 + $0x1a0] sm:$0xff]  ;;  %v180_v53 = vld [vmem:[%s1781_s26 + $0x10] sm:$0xff] }
  0x23   : > { %740 = vmatpush1.bf16.msra.mxu0 %v1706_v14  ;;  %1679 = vmatpush1.bf16.msra.mxu1 %v1706_v14  ;;  %v349_v14 = vld [vmem:[%s1781_s26 + $0x558] sm:$0xff]  ;;  %v183_v54 = vld [vmem:[%s1781_s26 + $0x28] sm:$0xff]  ;;  %v395_v57 = vpack.c.bf16 %v230_v52, %v227_v51  ;;  %v236_v0 = vld [vmem:[%s1781_s26 + $0x1d0] sm:$0xff] }
  0x24   : > { %741 = vmatprep.subr.bf16.mxu0 %v1726_v1  ;;  %1664 = vmatprep.subr.bf16.mxu1 %v1726_v1  ;;  %v372_v58 = vpack.c.bf16 %v183_v54, %v180_v53  ;;  %v233_v63 = vld [vmem:[%s1781_s26 + $0x1b8] sm:$0xff]  ;;  %v248_v24 = vld [vmem:[%s1781_s26 + $0x230] sm:$0xff]  ;;  %v231_v38 = vld [vmem:[%s1781_s26 + $0x1a8] sm:$0xff] }
  0x25   : > { %v398_v5 = vpack.c.bf16 %v236_v0, %v233_v63  ;;  %v245_v23 = vld [vmem:[%s1781_s26 + $0x218] sm:$0xff]  ;;  %v228_v37 = vld [vmem:[%s1781_s26 + $0x190] sm:$0xff] }
  0x27   : > { %742 = vmatpush1.bf16.msra.mxu0 %v1707_v15  ;;  %1680 = vmatpush1.bf16.msra.mxu1 %v1707_v15  ;;  %v209_v15 = vld [vmem:[%s1781_s26 + $0xf8] sm:$0xff] }
  0x28   : > { %743 = vmatprep.subr.bf16.mxu0 %v1726_v1  ;;  %1665 = vmatprep.subr.bf16.mxu1 %v1726_v1 }
  0x2b   : > { %744 = vmatpush1.bf16.msra.mxu0 %v1708_v16  ;;  %1681 = vmatpush1.bf16.msra.mxu1 %v1708_v16  ;;  %v212_v16 = vld [vmem:[%s1781_s26 + $0x110] sm:$0xff] }
  0x2c   : > { %745 = vmatprep.subr.bf16.mxu0 %v1726_v1  ;;  %1666 = vmatprep.subr.bf16.mxu1 %v1726_v1 }
  0x2f   : > { %746 = vmatpush1.bf16.msra.mxu0 %v1709_v17  ;;  %1682 = vmatpush1.bf16.msra.mxu1 %v1709_v17  ;;  %v353_v17 = vld [vmem:[%s1781_s26 + $0x578] sm:$0xff] }
  0x30   : > { %747 = vmatprep.subr.bf16.mxu0 %v1726_v1  ;;  %1667 = vmatprep.subr.bf16.mxu1 %v1726_v1 }
  0x33   : > { %748 = vmatpush1.bf16.msra.mxu0 %v1710_v18  ;;  %1683 = vmatpush1.bf16.msra.mxu1 %v1710_v18  ;;  %v356_v18 = vld [vmem:[%s1781_s26 + $0x590] sm:$0xff] }
  0x34   : > { %749 = vmatprep.subr.bf16.mxu0 %v1726_v1  ;;  %1668 = vmatprep.subr.bf16.mxu1 %v1726_v1 }
  0x37   : > { %750 = vmatpush1.bf16.msra.mxu0 %v1711_v19  ;;  %1684 = vmatpush1.bf16.msra.mxu1 %v1711_v19  ;;  %v382_v19 = vpack.c.bf16 %v205_v12, %v202_v11  ;;  %v239_v11 = vld [vmem:[%s1781_s26 + $0x1e8] sm:$0xff]  ;;  %v242_v12 = vld [vmem:[%s1781_s26 + $0x200] sm:$0xff] }
  0x38   : > { %751 = vmatprep.subr.bf16.mxu0 %v1726_v1  ;;  %1669 = vmatprep.subr.bf16.mxu1 %v1726_v1 }
  0x3b   : > { %752 = vmatpush1.bf16.msra.mxu0 %v1712_v20  ;;  %1685 = vmatpush1.bf16.msra.mxu1 %v1712_v20  ;;  %v454_v20 = vpack.c.bf16 %v349_v14, %v346_v13  ;;  %v204_v13 = vld [vmem:[%s1781_s26 + $0xd0] sm:$0xff]  ;;  %v207_v14 = vld [vmem:[%s1781_s26 + $0xe8] sm:$0xff] }
  0x3c   : > { %753 = vmatprep.subr.bf16.mxu0 %v1726_v1  ;;  %1670 = vmatprep.subr.bf16.mxu1 %v1726_v1 }
  0x3f   : > { %754 = vmatpush1.bf16.msra.mxu0 %v1713_v21  ;;  %1686 = vmatpush1.bf16.msra.mxu1 %v1713_v21  ;;  %v386_v21 = vpack.c.bf16 %v212_v16, %v209_v15 }
  0x40   : > { %755 = vmatprep.subr.bf16.mxu0 %v1726_v1  ;;  %1671 = vmatprep.subr.bf16.mxu1 %v1726_v1  ;;  %v340_v1 = vld [vmem:[%s1781_s26 + $0x510] sm:$0xff] }
  0x41   : > { %v451_v8 = vpack.c.bf16 %v343_v2, %v340_v1  ;;  %v192_v1 = vld [vmem:[%s1781_s26 + $0x70] sm:$0xff]  ;;  %v195_v2 = vld [vmem:[%s1781_s26 + $0x88] sm:$0xff] }
  0x42   : > { %v378_v6 = vpack.c.bf16 %v195_v2, %v192_v1 }
  0x43   : > { %756 = vmatpush1.bf16.msra.mxu0 %v1714_v22  ;;  %1687 = vmatpush1.bf16.msra.mxu1 %v1714_v22  ;;  %v458_v22 = vpack.c.bf16 %v356_v18, %v353_v17  ;;  %v401_v17 = vpack.c.bf16 %v242_v12, %v239_v11  ;;  %v384_v18 = vpack.c.bf16 %v207_v14, %v204_v13 }
  0x44   : > { %1586 = vmatprep.subr.bf16.mxu1 %v1715_v27 }
  0x46   : > { %758 = vmatmul.mubr.bf16.vlgmr.msra.gmra.mrb[0].mxu0 %v370_v32  ;;  %950 = vmatmul.mubr.bf16.vlgmr.msra.gmra.mrb[0].mxu1 %v442_v33  ;;  %v457_v32 = vpack.c.bf16 %v355_v26, %v352_v25  ;;  %v216_v25 = vld [vmem:[%s1781_s26 + $0x130] sm:$0xff]  ;;  %v219_v26 = vld [vmem:[%s1781_s26 + $0x148] sm:$0xff] }
  0x47   : > { %1587 = vmatpush3.bf16.msra.mxu1 %v1715_v27  ;;  %765 = vmatprep.mubr.bf16.mxu0 %v374_v34  ;;  %v215_v27 = vld [vmem:[%s1781_s26 + $0x128] sm:$0xff]  ;;  %v461_v34 = vpack.c.bf16 %v362_v30, %v359_v29  ;;  %v404_v29 = vpack.c.bf16 %v248_v24, %v245_v23  ;;  %v390_v30 = vpack.c.bf16 %v219_v26, %v216_v25 }
  0x48   : > { %957 = vmatprep.mubr.bf16.mxu1 %v446_v35  ;;  %1588 = vmatprep.subr.bf16.mxu1 %v1716_v36  ;;  %v389_v33 = vpack.c.bf16 %v218_v28, %v215_v27  ;;  %v214_v35 = vld [vmem:[%s1781_s26 + $0x120] sm:$0xff] }
  0x4b   : > { %1589 = vmatpush3.bf16.msra.mxu1 %v1716_v36  ;;  %v217_v36 = vld [vmem:[%s1781_s26 + $0x138] sm:$0xff] }
  0x4c   : > { %1688 = vmatprep.subr.msk.bf16.mxu1 %vm721_vm0, %v1717_v45  ;;  %v388_v43 = vpack.c.bf16 %v217_v36, %v214_v35  ;;  %v392_v45 = vpack.c.bf16 %v224_v40, %v221_v39  ;;  %v251_v35 = vld [vmem:[%s1781_s26 + $0x248] sm:$0xff]  ;;  %v254_v36 = vld [vmem:[%s1781_s26 + $0x260] sm:$0xff] }
  0x4e   : > { %766 = vmatmul.mubr.bf16.gmra.mrb[4].mxu0 %v373_v46  ;;  %958 = vmatmul.mubr.bf16.gmra.mrb[4].mxu1 %v445_v47  ;;  %v464_v46 = vpack.c.bf16 %v368_v42, %v365_v41  ;;  %v220_v47 = vld [vmem:[%s1781_s26 + $0x150] sm:$0xff]  ;;  %v407_v41 = vpack.c.bf16 %v254_v36, %v251_v35  ;;  %v396_v42 = vpack.c.bf16 %v231_v38, %v228_v37 }
  0x4f   : > { %773 = vmatprep.mubr.bf16.mxu0 %v377_v48  ;;  %965 = vmatprep.mubr.bf16.mxu1 %v449_v49  ;;  %v223_v48 = vld [vmem:[%s1781_s26 + $0x168] sm:$0xff]  ;;  %v364_v49 = vld [vmem:[%s1781_s26 + $0x5d0] sm:$0xff] }
  0x50   : > { %1591 = vmatpush3.bf16.msra.mxu1 %v723_v50  ;;  %v367_v50 = vld [vmem:[%s1781_s26 + $0x5e8] sm:$0xff]  ;;  %v391_v55 = vpack.c.bf16 %v223_v48, %v220_v47  ;;  %v257_v47 = vld [vmem:[%s1781_s26 + $0x278] sm:$0xff]  ;;  %v260_v48 = vld [vmem:[%s1781_s26 + $0x290] sm:$0xff] }
  0x51   : > { %v463_v56 = vpack.c.bf16 %v367_v50, %v364_v49  ;;  %v240_v49 = vld [vmem:[%s1781_s26 + $0x1f0] sm:$0xff]  ;;  %v243_v50 = vld [vmem:[%s1781_s26 + $0x208] sm:$0xff]  ;;  %v410_v53 = vpack.c.bf16 %v260_v48, %v257_v47 }
  0x52   : > { %v402_v54 = vpack.c.bf16 %v243_v50, %v240_v49 }
  0x56   : > { %774 = vmatmul.mubr.bf16.gmra.mrb[8].mxu0 %v376_v59  ;;  %966 = vmatmul.mubr.bf16.gmra.mrb[8].mxu1 %v448_v60  ;;  %v226_v59 = vld [vmem:[%s1781_s26 + $0x180] sm:$0xff]  ;;  %v229_v60 = vld [vmem:[%s1781_s26 + $0x198] sm:$0xff] }
  0x57   : > { %781 = vmatprep.mubr.bf16.mxu0 %v380_v61  ;;  %973 = vmatprep.mubr.bf16.mxu1 %v452_v62  ;;  %v186_v61 = vld [vmem:[%s1781_s26 + $0x40] sm:$0xff]  ;;  %v189_v62 = vld [vmem:[%s1781_s26 + $0x58] sm:$0xff]  ;;  %v394_v3 = vpack.c.bf16 %v229_v60, %v226_v59  ;;  %v263_v59 = vld [vmem:[%s1781_s26 + $0x2a8] sm:$0xff] }
  0x58   : > { %v375_v4 = vpack.c.bf16 %v189_v62, %v186_v61  ;;  %v266_v60 = vld [vmem:[%s1781_s26 + $0x2c0] sm:$0xff]  ;;  %v252_v61 = vld [vmem:[%s1781_s26 + $0x250] sm:$0xff]  ;;  %v255_v62 = vld [vmem:[%s1781_s26 + $0x268] sm:$0xff] }
  0x59   : > { %v413_v1 = vpack.c.bf16 %v266_v60, %v263_v59  ;;  %v408_v2 = vpack.c.bf16 %v255_v62, %v252_v61 }
  0x5e   : > { %782 = vmatmul.mubr.bf16.gmra.mrb[12].mxu0 %v379_v7  ;;  %974 = vmatmul.mubr.bf16.gmra.mrb[12].mxu1 %v451_v8  ;;  %v232_v7 = vld [vmem:[%s1781_s26 + $0x1b0] sm:$0xff]  ;;  %v235_v8 = vld [vmem:[%s1781_s26 + $0x1c8] sm:$0xff] }
  0x5f   : > { %789 = vmatprep.mubr.bf16.mxu0 %v383_v9  ;;  %981 = vmatprep.mubr.bf16.mxu1 %v455_v10  ;;  %v198_v9 = vld [vmem:[%s1781_s26 + $0xa0] sm:$0xff]  ;;  %v201_v10 = vld [vmem:[%s1781_s26 + $0xb8] sm:$0xff]  ;;  %v397_v15 = vpack.c.bf16 %v235_v8, %v232_v7  ;;  %v272_v8 = vld [vmem:[%s1781_s26 + $0x2f0] sm:$0xff] }
  0x60   : > { %v381_v16 = vpack.c.bf16 %v201_v10, %v198_v9  ;;  %v269_v7 = vld [vmem:[%s1781_s26 + $0x2d8] sm:$0xff]  ;;  %v264_v9 = vld [vmem:[%s1781_s26 + $0x2b0] sm:$0xff]  ;;  %v267_v10 = vld [vmem:[%s1781_s26 + $0x2c8] sm:$0xff] }
  0x61   : > { %v416_v13 = vpack.c.bf16 %v272_v8, %v269_v7  ;;  %v414_v14 = vpack.c.bf16 %v267_v10, %v264_v9 }
  0x66   : > { %790 = vmatmul.mubr.bf16.gmra.mrb[16].mxu0 %v382_v19  ;;  %982 = vmatmul.mubr.bf16.gmra.mrb[16].mxu1 %v454_v20  ;;  %v238_v19 = vld [vmem:[%s1781_s26 + $0x1e0] sm:$0xff]  ;;  %v241_v20 = vld [vmem:[%s1781_s26 + $0x1f8] sm:$0xff] }
  0x67   : > { %797 = vmatprep.mubr.bf16.mxu0 %v386_v21  ;;  %989 = vmatprep.mubr.bf16.mxu1 %v458_v22  ;;  %v210_v21 = vld [vmem:[%s1781_s26 + $0x100] sm:$0xff]  ;;  %v213_v22 = vld [vmem:[%s1781_s26 + $0x118] sm:$0xff]  ;;  %v400_v27 = vpack.c.bf16 %v241_v20, %v238_v19  ;;  %v275_v19 = vld [vmem:[%s1781_s26 + $0x308] sm:$0xff] }
  0x68   : > { %v387_v28 = vpack.c.bf16 %v213_v22, %v210_v21  ;;  %v278_v20 = vld [vmem:[%s1781_s26 + $0x320] sm:$0xff]  ;;  %v276_v21 = vld [vmem:[%s1781_s26 + $0x310] sm:$0xff]  ;;  %v279_v22 = vld [vmem:[%s1781_s26 + $0x328] sm:$0xff] }
  0x69   : > { %v419_v25 = vpack.c.bf16 %v278_v20, %v275_v19  ;;  %v420_v26 = vpack.c.bf16 %v279_v22, %v276_v21 }
  0x6e   : > { %798 = vmatmul.mubr.bf16.gmra.mrb[20].mxu0 %v385_v31  ;;  %990 = vmatmul.mubr.bf16.gmra.mrb[20].mxu1 %v457_v32  ;;  %v244_v31 = vld [vmem:[%s1781_s26 + $0x210] sm:$0xff]  ;;  %v247_v32 = vld [vmem:[%s1781_s26 + $0x228] sm:$0xff] }
  0x6f   : > { %805 = vmatprep.mubr.bf16.mxu0 %v389_v33  ;;  %997 = vmatprep.mubr.bf16.mxu1 %v461_v34  ;;  %v222_v33 = vld [vmem:[%s1781_s26 + $0x160] sm:$0xff]  ;;  %v225_v34 = vld [vmem:[%s1781_s26 + $0x178] sm:$0xff]  ;;  %v403_v39 = vpack.c.bf16 %v247_v32, %v244_v31  ;;  %v284_v32 = vld [vmem:[%s1781_s26 + $0x350] sm:$0xff] }
  0x70   : > { %v393_v40 = vpack.c.bf16 %v225_v34, %v222_v33  ;;  %v281_v31 = vld [vmem:[%s1781_s26 + $0x338] sm:$0xff]  ;;  %v288_v33 = vld [vmem:[%s1781_s26 + $0x370] sm:$0xff]  ;;  %v291_v34 = vld [vmem:[%s1781_s26 + $0x388] sm:$0xff] }
  0x71   : > { %v422_v37 = vpack.c.bf16 %v284_v32, %v281_v31  ;;  %v426_v38 = vpack.c.bf16 %v291_v34, %v288_v33 }
  0x76   : > { %806 = vmatmul.mubr.bf16.gmra.mrb[24].mxu0 %v388_v43  ;;  %998 = vmatmul.mubr.bf16.gmra.mrb[24].mxu1 %v460_v44  ;;  %v250_v43 = vld [vmem:[%s1781_s26 + $0x240] sm:$0xff]  ;;  %v253_v44 = vld [vmem:[%s1781_s26 + $0x258] sm:$0xff] }
  0x77   : > { %813 = vmatprep.mubr.bf16.mxu0 %v392_v45  ;;  %1005 = vmatprep.mubr.bf16.mxu1 %v464_v46  ;;  %v234_v45 = vld [vmem:[%s1781_s26 + $0x1c0] sm:$0xff]  ;;  %v237_v46 = vld [vmem:[%s1781_s26 + $0x1d8] sm:$0xff]  ;;  %v406_v51 = vpack.c.bf16 %v253_v44, %v250_v43  ;;  %v287_v43 = vld [vmem:[%s1781_s26 + $0x368] sm:$0xff] }
  0x78   : > { %v399_v52 = vpack.c.bf16 %v237_v46, %v234_v45  ;;  %v290_v44 = vld [vmem:[%s1781_s26 + $0x380] sm:$0xff]  ;;  %v300_v45 = vld [vmem:[%s1781_s26 + $0x3d0] sm:$0xff]  ;;  %v303_v46 = vld [vmem:[%s1781_s26 + $0x3e8] sm:$0xff] }
  0x79   : > { %v425_v49 = vpack.c.bf16 %v290_v44, %v287_v43  ;;  %v432_v50 = vpack.c.bf16 %v303_v46, %v300_v45 }
  0x7e   : > { %814 = vmatmul.mubr.bf16.gmra.mrb[28].mxu0 %v391_v55  ;;  %1006 = vmatmul.mubr.bf16.gmra.mrb[28].mxu1 %v463_v56  ;;  %v256_v55 = vld [vmem:[%s1781_s26 + $0x270] sm:$0xff]  ;;  %v259_v56 = vld [vmem:[%s1781_s26 + $0x288] sm:$0xff] }
  0x7f   : > { %821 = vmatprep.mubr.bf16.mxu0 %v395_v57  ;;  %1592 = vmatprep.mubr.msk.bf16.mxu1 %vm624_vm1, %v372_v58  ;;  %v246_v57 = vld [vmem:[%s1781_s26 + $0x220] sm:$0xff]  ;;  %v249_v58 = vld [vmem:[%s1781_s26 + $0x238] sm:$0xff]  ;;  %v409_v63 = vpack.c.bf16 %v259_v56, %v256_v55  ;;  %v296_v56 = vld [vmem:[%s1781_s26 + $0x3b0] sm:$0xff] }
  0x80   : > { %v405_v0 = vpack.c.bf16 %v249_v58, %v246_v57  ;;  %v293_v55 = vld [vmem:[%s1781_s26 + $0x398] sm:$0xff]  ;;  %v312_v57 = vld [vmem:[%s1781_s26 + $0x430] sm:$0xff]  ;;  %v315_v58 = vld [vmem:[%s1781_s26 + $0x448] sm:$0xff] }
  0x81   : > { %v428_v61 = vpack.c.bf16 %v296_v56, %v293_v55  ;;  %v438_v62 = vpack.c.bf16 %v315_v58, %v312_v57 }
  0x86   : > { %822 = vmatmul.mubr.bf16.gmra.mrb[32].mxu0 %v394_v3  ;;  %1593 = vmatmul.mubr.msk.bf16.vlgmr.msra.gmra.mrb[32].mxu1 %vm624_vm1, %v375_v4  ;;  %v262_v3 = vld [vmem:[%s1781_s26 + $0x2a0] sm:$0xff]  ;;  %v265_v4 = vld [vmem:[%s1781_s26 + $0x2b8] sm:$0xff] }
  0x87   : > { %829 = vmatprep.mubr.bf16.mxu0 %v398_v5  ;;  %1596 = vmatprep.mubr.msk.bf16.mxu1 %vm624_vm1, %v378_v6  ;;  %v258_v5 = vld [vmem:[%s1781_s26 + $0x280] sm:$0xff]  ;;  %v261_v6 = vld [vmem:[%s1781_s26 + $0x298] sm:$0xff]  ;;  %v412_v11 = vpack.c.bf16 %v265_v4, %v262_v3  ;;  %v299_v3 = vld [vmem:[%s1781_s26 + $0x3c8] sm:$0xff] }
  0x88   : > { %v411_v12 = vpack.c.bf16 %v261_v6, %v258_v5  ;;  %v302_v4 = vld [vmem:[%s1781_s26 + $0x3e0] sm:$0xff]  ;;  %v324_v5 = vld [vmem:[%s1781_s26 + $0x490] sm:$0xff]  ;;  %v327_v6 = vld [vmem:[%s1781_s26 + $0x4a8] sm:$0xff] }
  0x89   : > { %v431_v9 = vpack.c.bf16 %v302_v4, %v299_v3  ;;  %v444_v10 = vpack.c.bf16 %v327_v6, %v324_v5 }
  0x8e   : > { %830 = vmatmul.mubr.bf16.gmra.mrb[36].mxu0 %v397_v15  ;;  %1597 = vmatmul.mubr.msk.bf16.gmra.mrb[36].mxu1 %vm624_vm1, %v381_v16  ;;  %v268_v15 = vld [vmem:[%s1781_s26 + $0x2d0] sm:$0xff]  ;;  %v271_v16 = vld [vmem:[%s1781_s26 + $0x2e8] sm:$0xff] }
  0x8f   : > { %837 = vmatprep.mubr.bf16.mxu0 %v401_v17  ;;  %1600 = vmatprep.mubr.msk.bf16.mxu1 %vm624_vm1, %v384_v18  ;;  %v270_v17 = vld [vmem:[%s1781_s26 + $0x2e0] sm:$0xff]  ;;  %v273_v18 = vld [vmem:[%s1781_s26 + $0x2f8] sm:$0xff]  ;;  %v415_v23 = vpack.c.bf16 %v271_v16, %v268_v15  ;;  %v308_v16 = vld [vmem:[%s1781_s26 + $0x410] sm:$0xff] }
  0x90   : > { %v417_v24 = vpack.c.bf16 %v273_v18, %v270_v17  ;;  %v305_v15 = vld [vmem:[%s1781_s26 + $0x3f8] sm:$0xff]  ;;  %v336_v17 = vld [vmem:[%s1781_s26 + $0x4f0] sm:$0xff]  ;;  %v339_v18 = vld [vmem:[%s1781_s26 + $0x508] sm:$0xff] }
  0x91   : > { %v434_v21 = vpack.c.bf16 %v308_v16, %v305_v15  ;;  %v450_v22 = vpack.c.bf16 %v339_v18, %v336_v17 }
  0x96   : > { %838 = vmatmul.mubr.bf16.gmra.mrb[40].mxu0 %v400_v27  ;;  %1601 = vmatmul.mubr.msk.bf16.gmra.mrb[40].mxu1 %vm624_vm1, %v387_v28  ;;  %v274_v27 = vld [vmem:[%s1781_s26 + $0x300] sm:$0xff]  ;;  %v277_v28 = vld [vmem:[%s1781_s26 + $0x318] sm:$0xff] }
  0x97   : > { %845 = vmatprep.mubr.bf16.mxu0 %v404_v29  ;;  %1604 = vmatprep.mubr.msk.bf16.mxu1 %vm624_vm1, %v390_v30  ;;  %v282_v29 = vld [vmem:[%s1781_s26 + $0x340] sm:$0xff]  ;;  %v285_v30 = vld [vmem:[%s1781_s26 + $0x358] sm:$0xff]  ;;  %v418_v35 = vpack.c.bf16 %v277_v28, %v274_v27  ;;  %v311_v27 = vld [vmem:[%s1781_s26 + $0x428] sm:$0xff] }
  0x98   : > { %v423_v36 = vpack.c.bf16 %v285_v30, %v282_v29  ;;  %v314_v28 = vld [vmem:[%s1781_s26 + $0x440] sm:$0xff]  ;;  %v348_v29 = vld [vmem:[%s1781_s26 + $0x550] sm:$0xff]  ;;  %v351_v30 = vld [vmem:[%s1781_s26 + $0x568] sm:$0xff] }
  0x99   : > { %v437_v33 = vpack.c.bf16 %v314_v28, %v311_v27  ;;  %v456_v34 = vpack.c.bf16 %v351_v30, %v348_v29 }
  0x9e   : > { %846 = vmatmul.mubr.bf16.gmra.mrb[44].mxu0 %v403_v39  ;;  %1605 = vmatmul.mubr.msk.bf16.gmra.mrb[44].mxu1 %vm624_vm1, %v393_v40  ;;  %v280_v39 = vld [vmem:[%s1781_s26 + $0x330] sm:$0xff]  ;;  %v283_v40 = vld [vmem:[%s1781_s26 + $0x348] sm:$0xff] }
  0x9f   : > { %853 = vmatprep.mubr.bf16.mxu0 %v407_v41  ;;  %1608 = vmatprep.mubr.msk.bf16.mxu1 %vm624_vm1, %v396_v42  ;;  %v294_v41 = vld [vmem:[%s1781_s26 + $0x3a0] sm:$0xff]  ;;  %v297_v42 = vld [vmem:[%s1781_s26 + $0x3b8] sm:$0xff]  ;;  %v421_v47 = vpack.c.bf16 %v283_v40, %v280_v39  ;;  %v320_v40 = vld [vmem:[%s1781_s26 + $0x470] sm:$0xff] }
  0xa0   : > { %v429_v48 = vpack.c.bf16 %v297_v42, %v294_v41  ;;  %v317_v39 = vld [vmem:[%s1781_s26 + $0x458] sm:$0xff]  ;;  %v360_v41 = vld [vmem:[%s1781_s26 + $0x5b0] sm:$0xff]  ;;  %v363_v42 = vld [vmem:[%s1781_s26 + $0x5c8] sm:$0xff] }
  0xa1   : > { %v440_v45 = vpack.c.bf16 %v320_v40, %v317_v39  ;;  %v462_v46 = vpack.c.bf16 %v363_v42, %v360_v41 }
  0xa6   : > { %854 = vmatmul.mubr.bf16.gmra.mrb[48].mxu0 %v406_v51  ;;  %1609 = vmatmul.mubr.msk.bf16.gmra.mrb[48].mxu1 %vm624_vm1, %v399_v52  ;;  %v286_v51 = vld [vmem:[%s1781_s26 + $0x360] sm:$0xff]  ;;  %v289_v52 = vld [vmem:[%s1781_s26 + $0x378] sm:$0xff] }
  0xa7   : > { %861 = vmatprep.mubr.bf16.mxu0 %v410_v53  ;;  %1612 = vmatprep.mubr.msk.bf16.mxu1 %vm624_vm1, %v402_v54  ;;  %v306_v53 = vld [vmem:[%s1781_s26 + $0x400] sm:$0xff]  ;;  %v309_v54 = vld [vmem:[%s1781_s26 + $0x418] sm:$0xff]  ;;  %v424_v59 = vpack.c.bf16 %v289_v52, %v286_v51 }
  0xa8   : > { %v435_v60 = vpack.c.bf16 %v309_v54, %v306_v53 }
  0xae   : > { %862 = vmatmul.mubr.bf16.gmra.mrb[52].mxu0 %v409_v63  ;;  %1613 = vmatmul.mubr.msk.bf16.gmra.mrb[52].mxu1 %vm624_vm1, %v405_v0  ;;  %v292_v63 = vld [vmem:[%s1781_s26 + $0x390] sm:$0xff]  ;;  %v295_v0 = vld [vmem:[%s1781_s26 + $0x3a8] sm:$0xff] }
  0xaf   : > { %869 = vmatprep.mubr.bf16.mxu0 %v413_v1  ;;  %1616 = vmatprep.mubr.msk.bf16.mxu1 %vm624_vm1, %v408_v2  ;;  %v318_v1 = vld [vmem:[%s1781_s26 + $0x460] sm:$0xff]  ;;  %v321_v2 = vld [vmem:[%s1781_s26 + $0x478] sm:$0xff]  ;;  %v427_v7 = vpack.c.bf16 %v295_v0, %v292_v63 }
  0xb0   : > { %v441_v8 = vpack.c.bf16 %v321_v2, %v318_v1 }
  0xb6   : > { %870 = vmatmul.mubr.bf16.gmra.mrb[56].mxu0 %v412_v11  ;;  %1617 = vmatmul.mubr.msk.bf16.gmra.mrb[56].mxu1 %vm624_vm1, %v411_v12  ;;  %v298_v11 = vld [vmem:[%s1781_s26 + $0x3c0] sm:$0xff]  ;;  %v301_v12 = vld [vmem:[%s1781_s26 + $0x3d8] sm:$0xff] }
  0xb7   : > { %877 = vmatprep.mubr.bf16.mxu0 %v416_v13  ;;  %1620 = vmatprep.mubr.msk.bf16.mxu1 %vm624_vm1, %v414_v14  ;;  %v330_v13 = vld [vmem:[%s1781_s26 + $0x4c0] sm:$0xff]  ;;  %v333_v14 = vld [vmem:[%s1781_s26 + $0x4d8] sm:$0xff]  ;;  %v430_v19 = vpack.c.bf16 %v301_v12, %v298_v11 }
  0xb8   : > { %v447_v20 = vpack.c.bf16 %v333_v14, %v330_v13 }
  0xbe   : > { %878 = vmatmul.mubr.bf16.gmra.mrb[60].mxu0 %v415_v23  ;;  %1621 = vmatmul.mubr.msk.bf16.gmra.mrb[60].mxu1 %vm624_vm1, %v417_v24  ;;  %v304_v23 = vld [vmem:[%s1781_s26 + $0x3f0] sm:$0xff]  ;;  %v307_v24 = vld [vmem:[%s1781_s26 + $0x408] sm:$0xff] }
  0xbf   : > { %885 = vmatprep.mubr.bf16.mxu0 %v419_v25  ;;  %1624 = vmatprep.mubr.msk.bf16.mxu1 %vm624_vm1, %v420_v26  ;;  %v342_v25 = vld [vmem:[%s1781_s26 + $0x520] sm:$0xff]  ;;  %v345_v26 = vld [vmem:[%s1781_s26 + $0x538] sm:$0xff]  ;;  %v433_v31 = vpack.c.bf16 %v307_v24, %v304_v23 }
  0xc0   : > { %v453_v32 = vpack.c.bf16 %v345_v26, %v342_v25 }
  0xc6   : > { %886 = vmatmul.mubr.bf16.gmra.mrb[64].mxu0 %v418_v35  ;;  %1625 = vmatmul.mubr.msk.bf16.gmra.mrb[64].mxu1 %vm624_vm1, %v423_v36  ;;  %v310_v35 = vld [vmem:[%s1781_s26 + $0x420] sm:$0xff]  ;;  %v313_v36 = vld [vmem:[%s1781_s26 + $0x438] sm:$0xff] }
  0xc7   : > { %893 = vmatprep.mubr.bf16.mxu0 %v422_v37  ;;  %1628 = vmatprep.mubr.msk.bf16.mxu1 %vm624_vm1, %v426_v38  ;;  %v354_v37 = vld [vmem:[%s1781_s26 + $0x580] sm:$0xff]  ;;  %v357_v38 = vld [vmem:[%s1781_s26 + $0x598] sm:$0xff]  ;;  %v436_v43 = vpack.c.bf16 %v313_v36, %v310_v35 }
  0xc8   : > { %v459_v44 = vpack.c.bf16 %v357_v38, %v354_v37 }
  0xce   : > { %894 = vmatmul.mubr.bf16.gmra.mrb[68].mxu0 %v421_v47  ;;  %1629 = vmatmul.mubr.msk.bf16.gmra.mrb[68].mxu1 %vm624_vm1, %v429_v48  ;;  %v316_v47 = vld [vmem:[%s1781_s26 + $0x450] sm:$0xff]  ;;  %v319_v48 = vld [vmem:[%s1781_s26 + $0x468] sm:$0xff] }
  0xcf   : > { %901 = vmatprep.mubr.bf16.mxu0 %v425_v49  ;;  %1632 = vmatprep.mubr.msk.bf16.mxu1 %vm624_vm1, %v432_v50  ;;  %v366_v49 = vld [vmem:[%s1781_s26 + $0x5e0] sm:$0xff]  ;;  %v369_v50 = vld [vmem:[%s1781_s26 + $0x5f8] sm:$0xff]  ;;  %v439_v51 = vpack.c.bf16 %v319_v48, %v316_v47 }
  0xd0   : > { %v465_v52 = vpack.c.bf16 %v369_v50, %v366_v49 }
  0xd6   : > { %902 = vmatmul.mubr.bf16.gmra.mrb[72].mxu0 %v424_v59  ;;  %1633 = vmatmul.mubr.msk.bf16.gmra.mrb[72].mxu1 %vm624_vm1, %v435_v60 }
  0xd7   : > { %909 = vmatprep.mubr.bf16.mxu0 %v428_v61  ;;  %1636 = vmatprep.mubr.msk.bf16.mxu1 %vm624_vm1, %v438_v62 }
  0xde   : > { %910 = vmatmul.mubr.bf16.gmra.mrb[76].mxu0 %v427_v7  ;;  %1637 = vmatmul.mubr.msk.bf16.gmra.mrb[76].mxu1 %vm624_vm1, %v441_v8 }
  0xdf   : > { %917 = vmatprep.mubr.bf16.mxu0 %v431_v9  ;;  %1640 = vmatprep.mubr.msk.bf16.mxu1 %vm624_vm1, %v444_v10 }
  0xe6   : > { %918 = vmatmul.mubr.bf16.gmra.mrb[80].mxu0 %v430_v19  ;;  %1641 = vmatmul.mubr.msk.bf16.gmra.mrb[80].mxu1 %vm624_vm1, %v447_v20 }
  0xe7   : > { %925 = vmatprep.mubr.bf16.mxu0 %v434_v21  ;;  %1644 = vmatprep.mubr.msk.bf16.mxu1 %vm624_vm1, %v450_v22 }
  0xee   : > { %926 = vmatmul.mubr.bf16.gmra.mrb[84].mxu0 %v433_v31  ;;  %1645 = vmatmul.mubr.msk.bf16.gmra.mrb[84].mxu1 %vm624_vm1, %v453_v32 }
  0xef   : > { %933 = vmatprep.mubr.bf16.mxu0 %v437_v33  ;;  %1648 = vmatprep.mubr.msk.bf16.mxu1 %vm624_vm1, %v456_v34 }
  0xf6   : > { %934 = vmatmul.mubr.bf16.gmra.mrb[88].mxu0 %v436_v43  ;;  %1649 = vmatmul.mubr.msk.bf16.gmra.mrb[88].mxu1 %vm624_vm1, %v459_v44 }
  0xf7   : > { %941 = vmatprep.mubr.bf16.mxu0 %v440_v45  ;;  %1652 = vmatprep.mubr.msk.bf16.mxu1 %vm624_vm1, %v462_v46 }
  0xfe   : > { %942 = vmatmul.mubr.bf16.gmra.mrb[92].mxu0 %v439_v51  ;;  %1653 = vmatmul.mubr.msk.bf16.gmra.mrb[92].mxu1 %vm624_vm1, %v465_v52 }
 0x119   : > { %v2076_v53 = vpop.f32.mrb[0].mxu0  ;;  %v2078_v54 = vpop.f32.mrb[0].mxu1 }
 0x11a   : > { %v761_v55 = vpop.f32.mrb[1].mxu0  ;;  %v953_v56 = vpop.f32.mrb[1].mxu1 }
 0x11b   : > { %v2080_v57 = vpop.f32.mrb[2].mxu0  ;;  %v2082_v58 = vpop.f32.mrb[2].mxu1  ;;  %v2139_v55 = vld [vmem:[%s2410_s2] ss:$0 sm:$0xff] }
 0x11c   : > { %v764_v59 = vpop.f32.mrb[3].mxu0  ;;  %v956_v60 = vpop.f32.mrb[3].mxu1 }
 0x11d   : > { %v760_v59 = vadd.f32 %v2139_v55, %v2076_v53 }
 0x121   : > { %v767_v61 = vpop.f32.mrb[4].mxu0  ;;  %v2084_v62 = vpop.f32.mrb[4].mxu1 }
 0x122   : > { %v769_v63 = vpop.f32.mrb[5].mxu0  ;;  %v961_v0 = vpop.f32.mrb[5].mxu1  ;;  %v768_v56 = vadd.f32 %v2139_v55, %v767_v61 }
 0x123   : > { %v770_v1 = vpop.f32.mrb[6].mxu0  ;;  %v2086_v2 = vpop.f32.mrb[6].mxu1 }
 0x124   : > { %v772_v3 = vpop.f32.mrb[7].mxu0  ;;  %v964_v4 = vpop.f32.mrb[7].mxu1  ;;  %v771_v0 = vadd.f32 %v2139_v55, %v770_v1 }
 0x129   : > { %v2088_v5 = vpop.f32.mrb[8].mxu0  ;;  %v2090_v6 = vpop.f32.mrb[8].mxu1 }
 0x12a   : > { %v777_v7 = vpop.f32.mrb[9].mxu0  ;;  %v969_v8 = vpop.f32.mrb[9].mxu1 }
 0x12b   : > { %v2092_v9 = vpop.f32.mrb[10].mxu0  ;;  %v2094_v10 = vpop.f32.mrb[10].mxu1  ;;  %v763_v8 = vadd.f32 %v2139_v55, %v2080_v57 }
 0x12c   : > { %v780_v11 = vpop.f32.mrb[11].mxu0  ;;  %v972_v12 = vpop.f32.mrb[11].mxu1 }
 0x131   : > { %v2096_v13 = vpop.f32.mrb[12].mxu0  ;;  %v2098_v14 = vpop.f32.mrb[12].mxu1 }
 0x132   : > { %v785_v15 = vpop.f32.mrb[13].mxu0  ;;  %v977_v16 = vpop.f32.mrb[13].mxu1 }
 0x133   : > { %v2100_v17 = vpop.f32.mrb[14].mxu0  ;;  %v2102_v18 = vpop.f32.mrb[14].mxu1 }
 0x134   : > { %v788_v19 = vpop.f32.mrb[15].mxu0  ;;  %v980_v20 = vpop.f32.mrb[15].mxu1 }
 0x139   : > { %v2104_v21 = vpop.f32.mrb[16].mxu0  ;;  %v2106_v22 = vpop.f32.mrb[16].mxu1 }
 0x13a   : > { %v793_v23 = vpop.f32.mrb[17].mxu0  ;;  %v985_v24 = vpop.f32.mrb[17].mxu1 }
 0x13b   : > { %v2108_v25 = vpop.f32.mrb[18].mxu0  ;;  %v2110_v26 = vpop.f32.mrb[18].mxu1  ;;  %v784_v24 = vadd.f32 %v2139_v55, %v2096_v13  ;;  %v779_v13 = vadd.f32 %v2139_v55, %v2092_v9 }
 0x13c   : > { %v796_v27 = vpop.f32.mrb[19].mxu0  ;;  %v988_v28 = vpop.f32.mrb[19].mxu1 }
 0x13d   : > { %v776_v27 = vadd.f32 %v2139_v55, %v2088_v5 }
 0x141   : > { %v2112_v29 = vpop.f32.mrb[20].mxu0  ;;  %v2114_v30 = vpop.f32.mrb[20].mxu1 }
 0x142   : > { %v801_v31 = vpop.f32.mrb[21].mxu0  ;;  %v993_v32 = vpop.f32.mrb[21].mxu1  ;;  %v800_v9 = vadd.f32 %v2139_v55, %v2112_v29  ;;  %v795_v29 = vadd.f32 %v2139_v55, %v2108_v25 }
 0x143   : > { %v2116_v33 = vpop.f32.mrb[22].mxu0  ;;  %v2118_v34 = vpop.f32.mrb[22].mxu1  ;;  %v787_v32 = vadd.f32 %v2139_v55, %v2100_v17 }
 0x144   : > { %v804_v35 = vpop.f32.mrb[23].mxu0  ;;  %v996_v36 = vpop.f32.mrb[23].mxu1 }
 0x149   : > { %v2120_v37 = vpop.f32.mrb[24].mxu0  ;;  %v2122_v38 = vpop.f32.mrb[24].mxu1 }
 0x14a   : > { %v809_v39 = vpop.f32.mrb[25].mxu0  ;;  %v1001_v40 = vpop.f32.mrb[25].mxu1 }
 0x14b   : > { %v2124_v41 = vpop.f32.mrb[26].mxu0  ;;  %v2126_v42 = vpop.f32.mrb[26].mxu1 }
 0x14c   : > { %v812_v43 = vpop.f32.mrb[27].mxu0  ;;  %v1004_v44 = vpop.f32.mrb[27].mxu1 }
 0x151   : > { %v2128_v45 = vpop.f32.mrb[28].mxu0  ;;  %v2130_v46 = vpop.f32.mrb[28].mxu1 }
 0x152   : > { %v817_v47 = vpop.f32.mrb[29].mxu0  ;;  %v1009_v48 = vpop.f32.mrb[29].mxu1  ;;  %v816_v25 = vadd.f32 %v2139_v55, %v2128_v45  ;;  %v811_v45 = vadd.f32 %v2139_v55, %v2124_v41 }
 0x153   : > { %v2132_v49 = vpop.f32.mrb[30].mxu0  ;;  %v2134_v50 = vpop.f32.mrb[30].mxu1 }
 0x154   : > { %v820_v51 = vpop.f32.mrb[31].mxu0  ;;  %v1012_v52 = vpop.f32.mrb[31].mxu1 }
 0x159   : > { %v2145_v60 = vpop.f32.mrb[32].mxu0  ;;  %v1594_v63 = vpop.f32.mrb[32].mxu1 }
 0x15a   : > { %v1057_v3 = vadd.f32 %v1594_v63, %v768_v56  ;;  %v825_v4 = vpop.f32.mrb[33].mxu0  ;;  %v1048_v7 = vpop.f32.mrb[33].mxu1  ;;  %v792_v63 = vadd.f32 %v2139_v55, %v2104_v21  ;;  %v824_v41 = vadd.f32 %v2139_v55, %v2145_v60 }
 0x15b   : > { %v1049_v53 = vadd.f32 %v1048_v7, %v760_v59  ;;  %v2155_v61 = vpop.f32.mrb[34].mxu0  ;;  %v1595_v1 = vpop.f32.mrb[34].mxu1  ;;  %v803_v4 = vadd.f32 %v2139_v55, %v2116_v33 }
 0x15c   : > { %v1305_v11 = vmax.f32 %v1057_v3, 0.0  ;;  %v1060_v12 = vadd.f32 %v1595_v1, %v771_v0  ;;  %v828_v15 = vpop.f32.mrb[35].mxu0  ;;  %v1051_v16 = vpop.f32.mrb[35].mxu1 }
 0x15d   : > { %v1303_v19 = vmax.f32 %v1049_v53, 0.0  ;;  %v1052_v57 = vadd.f32 %v1051_v16, %v763_v8 }
 0x15e   : > { %1370 = vst.msk [vmem:[%s2153_s10 + $0x10] sm:$0xff] %vm1367_vm2, %v1305_v11  ;;  %v1306_v20 = vmax.f32 %v1060_v12, 0.0 }
 0x15f   : > { %1368 = vst.msk [vmem:[%s2153_s10] sm:$0xff] %vm1367_vm2, %v1303_v19  ;;  %v1304_v23 = vmax.f32 %v1052_v57, 0.0 }
 0x160   : > { %1371 = vst.msk [vmem:[%s2153_s10 + $0x18] sm:$0xff] %vm1367_vm2, %v1306_v20 }
 0x161   : > { %1369 = vst.msk [vmem:[%s2153_s10 + $0x8] sm:$0xff] %vm1367_vm2, %v1304_v23  ;;  %v2169_v28 = vpop.f32.mrb[36].mxu0  ;;  %v1598_v31 = vpop.f32.mrb[36].mxu1 }
 0x162   : > { %v1073_v35 = vadd.f32 %v1598_v31, %v784_v24  ;;  %v833_v36 = vpop.f32.mrb[37].mxu0  ;;  %v1064_v39 = vpop.f32.mrb[37].mxu1  ;;  %v808_v24 = vadd.f32 %v2139_v55, %v2120_v37 }
 0x163   : > { %v1065_v40 = vadd.f32 %v1064_v39, %v776_v27  ;;  %v2175_v5 = vpop.f32.mrb[38].mxu0  ;;  %v1599_v43 = vpop.f32.mrb[38].mxu1 }
 0x164   : > { %v1309_v44 = vmax.f32 %v1073_v35, 0.0  ;;  %v1076_v47 = vadd.f32 %v1599_v43, %v787_v32  ;;  %v836_v48 = vpop.f32.mrb[39].mxu0  ;;  %v1067_v51 = vpop.f32.mrb[39].mxu1  ;;  %v819_v32 = vadd.f32 %v2139_v55, %v2132_v49 }
 0x165   : > { %v1307_v52 = vmax.f32 %v1065_v40, 0.0  ;;  %v1068_v56 = vadd.f32 %v1067_v51, %v779_v13 }
 0x166   : > { %1374 = vst.msk [vmem:[%s2153_s10 + $0x30] sm:$0xff] %vm1367_vm2, %v1309_v44  ;;  %v1310_v17 = vmax.f32 %v1076_v47, 0.0 }
 0x167   : > { %1372 = vst.msk [vmem:[%s2153_s10 + $0x20] sm:$0xff] %vm1367_vm2, %v1307_v52  ;;  %v1308_v59 = vmax.f32 %v1068_v56, 0.0 }
 0x168   : > { %1375 = vst.msk [vmem:[%s2153_s10 + $0x38] sm:$0xff] %vm1367_vm2, %v1310_v17  ;;  %v832_v17 = vadd.f32 %v2139_v55, %v2169_v28  ;;  %v827_v28 = vadd.f32 %v2139_v55, %v2155_v61 }
 0x169   : > { %1373 = vst.msk [vmem:[%s2153_s10 + $0x28] sm:$0xff] %vm1367_vm2, %v1308_v59  ;;  %v2189_v0 = vpop.f32.mrb[40].mxu0  ;;  %v1602_v3 = vpop.f32.mrb[40].mxu1 }
 0x16a   : > { %v1089_v7 = vadd.f32 %v1602_v3, %v800_v9  ;;  %v841_v8 = vpop.f32.mrb[41].mxu0  ;;  %v1080_v53 = vpop.f32.mrb[41].mxu1  ;;  %v840_v61 = vadd.f32 %v2139_v55, %v2189_v0 }
 0x16b   : > { %v1081_v1 = vadd.f32 %v1080_v53, %v792_v63  ;;  %v2195_v21 = vpop.f32.mrb[42].mxu0  ;;  %v1603_v11 = vpop.f32.mrb[42].mxu1  ;;  %v835_v63 = vadd.f32 %v2139_v55, %v2175_v5 }
 0x16c   : > { %v1313_v12 = vmax.f32 %v1089_v7, 0.0  ;;  %v1092_v15 = vadd.f32 %v1603_v11, %v803_v4  ;;  %v844_v16 = vpop.f32.mrb[43].mxu0  ;;  %v1083_v19 = vpop.f32.mrb[43].mxu1 }
 0x16d   : > { %v1311_v57 = vmax.f32 %v1081_v1, 0.0  ;;  %v1084_v20 = vadd.f32 %v1083_v19, %v795_v29 }
 0x16e   : > { %1378 = vst.msk [vmem:[%s2153_s10 + $0x50] sm:$0xff] %vm1367_vm2, %v1313_v12  ;;  %v1314_v33 = vmax.f32 %v1092_v15, 0.0 }
 0x16f   : > { %1376 = vst.msk [vmem:[%s2153_s10 + $0x40] sm:$0xff] %vm1367_vm2, %v1311_v57  ;;  %v1312_v23 = vmax.f32 %v1084_v20, 0.0 }
 0x170   : > { %1379 = vst.msk [vmem:[%s2153_s10 + $0x58] sm:$0xff] %vm1367_vm2, %v1314_v33 }
 0x171   : > { %1377 = vst.msk [vmem:[%s2153_s10 + $0x48] sm:$0xff] %vm1367_vm2, %v1312_v23  ;;  %v847_v27 = vpop.f32.mrb[44].mxu0  ;;  %v1606_v31 = vpop.f32.mrb[44].mxu1 }
 0x172   : > { %v1105_v35 = vadd.f32 %v1606_v31, %v816_v25  ;;  %v849_v36 = vpop.f32.mrb[45].mxu0  ;;  %v1096_v39 = vpop.f32.mrb[45].mxu1  ;;  %v848_v57 = vadd.f32 %v2139_v55, %v847_v27  ;;  %v843_v27 = vadd.f32 %v2139_v55, %v2195_v21 }
 0x173   : > { %v1097_v13 = vadd.f32 %v1096_v39, %v808_v24  ;;  %v850_v40 = vpop.f32.mrb[46].mxu0  ;;  %v1607_v37 = vpop.f32.mrb[46].mxu1 }
 0x174   : > { %v1317_v43 = vmax.f32 %v1105_v35, 0.0  ;;  %v1108_v44 = vadd.f32 %v1607_v37, %v819_v32  ;;  %v852_v47 = vpop.f32.mrb[47].mxu0  ;;  %v1099_v48 = vpop.f32.mrb[47].mxu1  ;;  %v851_v23 = vadd.f32 %v2139_v55, %v850_v40 }
 0x175   : > { %v1315_v51 = vmax.f32 %v1097_v13, 0.0  ;;  %v1100_v52 = vadd.f32 %v1099_v48, %v811_v45 }
 0x176   : > { %1382 = vst.msk [vmem:[%s2153_s10 + $0x70] sm:$0xff] %vm1367_vm2, %v1317_v43  ;;  %v1318_v49 = vmax.f32 %v1108_v44, 0.0 }
 0x177   : > { %1380 = vst.msk [vmem:[%s2153_s10 + $0x60] sm:$0xff] %vm1367_vm2, %v1315_v51  ;;  %v1316_v56 = vmax.f32 %v1100_v52, 0.0 }
 0x178   : > { %1383 = vst.msk [vmem:[%s2153_s10 + $0x78] sm:$0xff] %vm1367_vm2, %v1318_v49 }
 0x179   : > { %1381 = vst.msk [vmem:[%s2153_s10 + $0x68] sm:$0xff] %vm1367_vm2, %v1316_v56  ;;  %v855_v59 = vpop.f32.mrb[48].mxu0  ;;  %v1610_v9 = vpop.f32.mrb[48].mxu1 }
 0x17a   : > { %v1121_v3 = vadd.f32 %v1610_v9, %v832_v17  ;;  %v857_v4 = vpop.f32.mrb[49].mxu0  ;;  %v1112_v7 = vpop.f32.mrb[49].mxu1  ;;  %v856_v21 = vadd.f32 %v2139_v55, %v855_v59 }
 0x17b   : > { %v1113_v8 = vadd.f32 %v1112_v7, %v824_v41  ;;  %v858_v53 = vpop.f32.mrb[50].mxu0  ;;  %v1611_v60 = vpop.f32.mrb[50].mxu1 }
 0x17c   : > { %v1321_v29 = vmax.f32 %v1121_v3, 0.0  ;;  %v1124_v1 = vadd.f32 %v1611_v60, %v835_v63  ;;  %v860_v11 = vpop.f32.mrb[51].mxu0  ;;  %v1115_v12 = vpop.f32.mrb[51].mxu1  ;;  %v859_v41 = vadd.f32 %v2139_v55, %v858_v53 }
 0x17d   : > { %v1319_v15 = vmax.f32 %v1113_v8, 0.0  ;;  %v1116_v16 = vadd.f32 %v1115_v12, %v827_v28 }
 0x17e   : > { %1386 = vst.msk [vmem:[%s2153_s10 + $0x90] sm:$0xff] %vm1367_vm2, %v1321_v29  ;;  %v1322_v5 = vmax.f32 %v1124_v1, 0.0 }
 0x17f   : > { %1384 = vst.msk [vmem:[%s2153_s10 + $0x80] sm:$0xff] %vm1367_vm2, %v1319_v15  ;;  %v1320_v19 = vmax.f32 %v1116_v16, 0.0 }
 0x180   : > { %1387 = vst.msk [vmem:[%s2153_s10 + $0x98] sm:$0xff] %vm1367_vm2, %v1322_v5 }
 0x181   : > { %1385 = vst.msk [vmem:[%s2153_s10 + $0x88] sm:$0xff] %vm1367_vm2, %v1320_v19  ;;  %v863_v20 = vpop.f32.mrb[52].mxu0  ;;  %v1614_v33 = vpop.f32.mrb[52].mxu1 }
 0x182   : > { %v1137_v25 = vadd.f32 %v1614_v33, %v848_v57  ;;  %v865_v24 = vpop.f32.mrb[53].mxu0  ;;  %v1128_v31 = vpop.f32.mrb[53].mxu1  ;;  %v864_v47 = vadd.f32 %v2139_v55, %v863_v20 }
 0x183   : > { %v1129_v32 = vadd.f32 %v1128_v31, %v840_v61  ;;  %v866_v35 = vpop.f32.mrb[54].mxu0  ;;  %v1615_v36 = vpop.f32.mrb[54].mxu1 }
 0x184   : > { %v1325_v0 = vmax.f32 %v1137_v25, 0.0  ;;  %v1140_v39 = vadd.f32 %v1615_v36, %v851_v23  ;;  %v868_v45 = vpop.f32.mrb[55].mxu0  ;;  %v1131_v13 = vpop.f32.mrb[55].mxu1  ;;  %v867_v52 = vadd.f32 %v2139_v55, %v866_v35 }
 0x185   : > { %v1323_v37 = vmax.f32 %v1129_v32, 0.0  ;;  %v1132_v43 = vadd.f32 %v1131_v13, %v843_v27 }
 0x186   : > { %1390 = vst.msk [vmem:[%s2153_s10 + $0xb0] sm:$0xff] %vm1367_vm2, %v1325_v0  ;;  %v1326_v40 = vmax.f32 %v1140_v39, 0.0 }
 0x187   : > { %1388 = vst.msk [vmem:[%s2153_s10 + $0xa0] sm:$0xff] %vm1367_vm2, %v1323_v37  ;;  %v1324_v44 = vmax.f32 %v1132_v43, 0.0 }
 0x188   : > { %1391 = vst.msk [vmem:[%s2153_s10 + $0xb8] sm:$0xff] %vm1367_vm2, %v1326_v40 }
 0x189   : > { %1389 = vst.msk [vmem:[%s2153_s10 + $0xa8] sm:$0xff] %vm1367_vm2, %v1324_v44  ;;  %v871_v48 = vpop.f32.mrb[56].mxu0  ;;  %v1618_v51 = vpop.f32.mrb[56].mxu1 }
 0x18a   : > { %v1153_v49 = vadd.f32 %v1618_v51, %v864_v47  ;;  %v873_v56 = vpop.f32.mrb[57].mxu0  ;;  %v1144_v17 = vpop.f32.mrb[57].mxu1  ;;  %v872_v53 = vadd.f32 %v2139_v55, %v871_v48 }
 0x18b   : > { %v1145_v9 = vadd.f32 %v1144_v17, %v856_v21  ;;  %v874_v63 = vpop.f32.mrb[58].mxu0  ;;  %v1619_v3 = vpop.f32.mrb[58].mxu1 }
 0x18c   : > { %v1329_v4 = vmax.f32 %v1153_v49, 0.0  ;;  %v1156_v59 = vadd.f32 %v1619_v3, %v867_v52  ;;  %v876_v7 = vpop.f32.mrb[59].mxu0  ;;  %v1147_v28 = vpop.f32.mrb[59].mxu1  ;;  %v875_v19 = vadd.f32 %v2139_v55, %v874_v63 }
 0x18d   : > { %v1327_v8 = vmax.f32 %v1145_v9, 0.0  ;;  %v1148_v60 = vadd.f32 %v1147_v28, %v859_v41 }
 0x18e   : > { %1394 = vst.msk [vmem:[%s2153_s10 + $0xd0] sm:$0xff] %vm1367_vm2, %v1329_v4  ;;  %v1330_v29 = vmax.f32 %v1156_v59, 0.0 }
 0x18f   : > { %1392 = vst.msk [vmem:[%s2153_s10 + $0xc0] sm:$0xff] %vm1367_vm2, %v1327_v8  ;;  %v1328_v1 = vmax.f32 %v1148_v60, 0.0 }
 0x190   : > { %1395 = vst.msk [vmem:[%s2153_s10 + $0xd8] sm:$0xff] %vm1367_vm2, %v1330_v29 }
 0x191   : > { %1393 = vst.msk [vmem:[%s2153_s10 + $0xc8] sm:$0xff] %vm1367_vm2, %v1328_v1  ;;  %v879_v11 = vpop.f32.mrb[60].mxu0  ;;  %v1622_v12 = vpop.f32.mrb[60].mxu1 }
 0x192   : > { %v880_v15 = vadd.f32 %v2139_v55, %v879_v11  ;;  %v881_v16 = vpop.f32.mrb[61].mxu0  ;;  %v1160_v5 = vpop.f32.mrb[61].mxu1 }
 0x193   : > { %v1161_v57 = vadd.f32 %v1160_v5, %v872_v53  ;;  %v882_v61 = vpop.f32.mrb[62].mxu0  ;;  %v1623_v20 = vpop.f32.mrb[62].mxu1 }
 0x194   : > { %v1169_v33 = vadd.f32 %v1622_v12, %v880_v15  ;;  %v883_v23 = vadd.f32 %v2139_v55, %v882_v61  ;;  %v884_v25 = vpop.f32.mrb[63].mxu0  ;;  %v1163_v24 = vpop.f32.mrb[63].mxu1 }
 0x195   : > { %v1331_v31 = vmax.f32 %v1161_v57, 0.0  ;;  %v1164_v27 = vadd.f32 %v1163_v24, %v875_v19 }
 0x196   : > { %v1333_v32 = vmax.f32 %v1169_v33, 0.0  ;;  %v1172_v35 = vadd.f32 %v1623_v20, %v883_v23 }
 0x197   : > { %1396 = vst.msk [vmem:[%s2153_s10 + $0xe0] sm:$0xff] %vm1367_vm2, %v1331_v31  ;;  %v1332_v36 = vmax.f32 %v1164_v27, 0.0 }
 0x198   : > { %1398 = vst.msk [vmem:[%s2153_s10 + $0xf0] sm:$0xff] %vm1367_vm2, %v1333_v32  ;;  %v1334_v0 = vmax.f32 %v1172_v35, 0.0 }
 0x199   : > { %1397 = vst.msk [vmem:[%s2153_s10 + $0xe8] sm:$0xff] %vm1367_vm2, %v1332_v36  ;;  %v887_v39 = vpop.f32.mrb[64].mxu0  ;;  %v1626_v45 = vpop.f32.mrb[64].mxu1 }
 0x19a   : > { %1399 = vst.msk [vmem:[%s2153_s10 + $0xf8] sm:$0xff] %vm1367_vm2, %v1334_v0  ;;  %v888_v13 = vadd.f32 %v2139_v55, %v887_v39  ;;  %v889_v37 = vpop.f32.mrb[65].mxu0  ;;  %v1176_v43 = vpop.f32.mrb[65].mxu1 }
 0x19b   : > { %v890_v40 = vpop.f32.mrb[66].mxu0  ;;  %v1627_v44 = vpop.f32.mrb[66].mxu1 }
 0x19c   : > { %v1177_v47 = vadd.f32 %v1176_v43, %v888_v13  ;;  %v891_v21 = vadd.f32 %v2139_v55, %v890_v40  ;;  %v892_v48 = vpop.f32.mrb[67].mxu0  ;;  %v1179_v51 = vpop.f32.mrb[67].mxu1 }
 0x19e   : > { %v1335_v52 = vmax.f32 %v1177_v47, 0.0  ;;  %v1180_v49 = vadd.f32 %v1179_v51, %v891_v21  ;;  %v960_v21 = vadd.f32 %v2139_v55, %v2084_v62  ;;  %v952_v51 = vadd.f32 %v2139_v55, %v2078_v54 }
 0x19f   : > { %v955_v62 = vadd.f32 %v2139_v55, %v2082_v58 }
 0x1a0   : > { %1400 = vst.msk [vmem:[%s2153_s10 + $0x100] sm:$0xff] %vm1367_vm2, %v1335_v52  ;;  %v1336_v56 = vmax.f32 %v1180_v49, 0.0 }
 0x1a1   : > { %v895_v17 = vpop.f32.mrb[68].mxu0  ;;  %v1630_v41 = vpop.f32.mrb[68].mxu1 }
 0x1a2   : > { %1401 = vst.msk [vmem:[%s2153_s10 + $0x108] sm:$0xff] %vm1367_vm2, %v1336_v56  ;;  %v896_v9 = vadd.f32 %v2139_v55, %v895_v17  ;;  %v897_v63 = vpop.f32.mrb[69].mxu0  ;;  %v1192_v3 = vpop.f32.mrb[69].mxu1  ;;  %v963_v56 = vadd.f32 %v2139_v55, %v2086_v2 }
 0x1a3   : > { %v898_v4 = vpop.f32.mrb[70].mxu0  ;;  %v1631_v59 = vpop.f32.mrb[70].mxu1 }
 0x1a4   : > { %v1185_v7 = vadd.f32 %v1626_v45, %v896_v9  ;;  %v899_v28 = vadd.f32 %v2139_v55, %v898_v4  ;;  %v900_v8 = vpop.f32.mrb[71].mxu0  ;;  %v1195_v60 = vpop.f32.mrb[71].mxu1 }
 0x1a6   : > { %v1337_v29 = vmax.f32 %v1185_v7, 0.0  ;;  %v1188_v1 = vadd.f32 %v1627_v44, %v899_v28 }
 0x1a8   : > { %1402 = vst.msk [vmem:[%s2153_s10 + $0x110] sm:$0xff] %vm1367_vm2, %v1337_v29  ;;  %v1338_v53 = vmax.f32 %v1188_v1, 0.0 }
 0x1a9   : > { %v903_v11 = vpop.f32.mrb[72].mxu0  ;;  %v2285_v12 = vpop.f32.mrb[72].mxu1 }
 0x1aa   : > { %1403 = vst.msk [vmem:[%s2153_s10 + $0x118] sm:$0xff] %vm1367_vm2, %v1338_v53  ;;  %v904_v15 = vadd.f32 %v2139_v55, %v903_v11  ;;  %v905_v16 = vpop.f32.mrb[73].mxu0  ;;  %v1208_v5 = vpop.f32.mrb[73].mxu1 }
 0x1ab   : > { %v906_v19 = vpop.f32.mrb[74].mxu0  ;;  %v2290_v57 = vpop.f32.mrb[74].mxu1  ;;  %v976_v16 = vadd.f32 %v2139_v55, %v2098_v14 }
 0x1ac   : > { %v1193_v61 = vadd.f32 %v1192_v3, %v904_v15  ;;  %v907_v20 = vadd.f32 %v2139_v55, %v906_v19  ;;  %v908_v33 = vpop.f32.mrb[75].mxu0  ;;  %v1211_v23 = vpop.f32.mrb[75].mxu1  ;;  %v968_v19 = vadd.f32 %v2139_v55, %v2090_v6 }
 0x1ad   : > { %v979_v33 = vadd.f32 %v2139_v55, %v2102_v18 }
 0x1ae   : > { %v1339_v25 = vmax.f32 %v1193_v61, 0.0  ;;  %v1196_v24 = vadd.f32 %v1195_v60, %v907_v20 }
 0x1b0   : > { %1404 = vst.msk [vmem:[%s2153_s10 + $0x120] sm:$0xff] %vm1367_vm2, %v1339_v25  ;;  %v1340_v31 = vmax.f32 %v1196_v24, 0.0 }
 0x1b1   : > { %v911_v27 = vpop.f32.mrb[76].mxu0  ;;  %v2295_v32 = vpop.f32.mrb[76].mxu1 }
 0x1b2   : > { %1405 = vst.msk [vmem:[%s2153_s10 + $0x128] sm:$0xff] %vm1367_vm2, %v1340_v31  ;;  %v912_v35 = vadd.f32 %v2139_v55, %v911_v27  ;;  %v913_v36 = vpop.f32.mrb[77].mxu0  ;;  %v2300_v0 = vpop.f32.mrb[77].mxu1  ;;  %v971_v31 = vadd.f32 %v2139_v55, %v2094_v10 }
 0x1b3   : > { %v914_v39 = vpop.f32.mrb[78].mxu0  ;;  %v2302_v45 = vpop.f32.mrb[78].mxu1 }
 0x1b4   : > { %v1201_v13 = vadd.f32 %v1630_v41, %v912_v35  ;;  %v915_v37 = vadd.f32 %v2139_v55, %v914_v39  ;;  %v916_v43 = vpop.f32.mrb[79].mxu0  ;;  %v2305_v40 = vpop.f32.mrb[79].mxu1 }
 0x1b6   : > { %v1341_v44 = vmax.f32 %v1201_v13, 0.0  ;;  %v1204_v47 = vadd.f32 %v1631_v59, %v915_v37 }
 0x1b8   : > { %1406 = vst.msk [vmem:[%s2153_s10 + $0x130] sm:$0xff] %vm1367_vm2, %v1341_v44  ;;  %v1342_v48 = vmax.f32 %v1204_v47, 0.0 }
 0x1b9   : > { %v919_v52 = vpop.f32.mrb[80].mxu0  ;;  %v1642_v49 = vpop.f32.mrb[80].mxu1 }
 0x1ba   : > { %1407 = vst.msk [vmem:[%s2153_s10 + $0x138] sm:$0xff] %vm1367_vm2, %v1342_v48  ;;  %v920_v17 = vadd.f32 %v2139_v55, %v919_v52  ;;  %v1249_v41 = vadd.f32 %v1642_v49, %v960_v21  ;;  %v921_v9 = vpop.f32.mrb[81].mxu0  ;;  %v1240_v63 = vpop.f32.mrb[81].mxu1  ;;  %v984_v49 = vadd.f32 %v2139_v55, %v2106_v22 }
 0x1bb   : > { %v1241_v3 = vadd.f32 %v1240_v63, %v952_v51  ;;  %v922_v4 = vpop.f32.mrb[82].mxu0  ;;  %v1643_v54 = vpop.f32.mrb[82].mxu1  ;;  %v992_v51 = vadd.f32 %v2139_v55, %v2114_v30 }
 0x1bc   : > { %v1209_v59 = vadd.f32 %v1208_v5, %v920_v17  ;;  %v1353_v7 = vmax.f32 %v1249_v41, 0.0  ;;  %v923_v2 = vadd.f32 %v2139_v55, %v922_v4  ;;  %v1252_v28 = vadd.f32 %v1643_v54, %v963_v56  ;;  %v924_v8 = vpop.f32.mrb[83].mxu0  ;;  %v1243_v60 = vpop.f32.mrb[83].mxu1 }
 0x1bd   : > { %v1351_v29 = vmax.f32 %v1241_v3, 0.0  ;;  %v1244_v1 = vadd.f32 %v1243_v60, %v955_v62  ;;  %v987_v62 = vadd.f32 %v2139_v55, %v2110_v26 }
 0x1be   : > { %v1343_v53 = vmax.f32 %v1209_v59, 0.0  ;;  %1418 = vst.msk [vmem:[%s2153_s10 + $0x190] sm:$0xff] %vm1367_vm2, %v1353_v7  ;;  %v1212_v58 = vadd.f32 %v1211_v23, %v923_v2  ;;  %v1354_v11 = vmax.f32 %v1252_v28, 0.0 }
 0x1bf   : > { %1416 = vst.msk [vmem:[%s2153_s10 + $0x180] sm:$0xff] %vm1367_vm2, %v1351_v29  ;;  %v1352_v15 = vmax.f32 %v1244_v1, 0.0 }
 0x1c0   : > { %1408 = vst.msk [vmem:[%s2153_s10 + $0x140] sm:$0xff] %vm1367_vm2, %v1343_v53  ;;  %v1344_v5 = vmax.f32 %v1212_v58, 0.0  ;;  %1419 = vst.msk [vmem:[%s2153_s10 + $0x198] sm:$0xff] %vm1367_vm2, %v1354_v11  ;;  %v1008_v53 = vadd.f32 %v2139_v55, %v2130_v46  ;;  %v1000_v11 = vadd.f32 %v2139_v55, %v2122_v38 }
 0x1c1   : > { %1417 = vst.msk [vmem:[%s2153_s10 + $0x188] sm:$0xff] %vm1367_vm2, %v1352_v15  ;;  %v927_v61 = vpop.f32.mrb[84].mxu0  ;;  %v1646_v20 = vpop.f32.mrb[84].mxu1 }
 0x1c2   : > { %1409 = vst.msk [vmem:[%s2153_s10 + $0x148] sm:$0xff] %vm1367_vm2, %v1344_v5  ;;  %v928_v23 = vadd.f32 %v2139_v55, %v927_v61  ;;  %v1265_v14 = vadd.f32 %v1646_v20, %v976_v16  ;;  %v929_v25 = vpop.f32.mrb[85].mxu0  ;;  %v1256_v24 = vpop.f32.mrb[85].mxu1  ;;  %v1003_v20 = vadd.f32 %v2139_v55, %v2126_v42 }
 0x1c3   : > { %v1257_v6 = vadd.f32 %v1256_v24, %v968_v19  ;;  %v930_v27 = vpop.f32.mrb[86].mxu0  ;;  %v1647_v35 = vpop.f32.mrb[86].mxu1 }
 0x1c4   : > { %v1217_v36 = vadd.f32 %v2285_v12, %v928_v23  ;;  %v1357_v39 = vmax.f32 %v1265_v14, 0.0  ;;  %v931_v18 = vadd.f32 %v2139_v55, %v930_v27  ;;  %v1268_v13 = vadd.f32 %v1647_v35, %v979_v33  ;;  %v932_v37 = vpop.f32.mrb[87].mxu0  ;;  %v1259_v43 = vpop.f32.mrb[87].mxu1 }
 0x1c5   : > { %v1355_v44 = vmax.f32 %v1257_v6, 0.0  ;;  %v1260_v47 = vadd.f32 %v1259_v43, %v971_v31 }
 0x1c6   : > { %v1345_v21 = vmax.f32 %v1217_v36, 0.0  ;;  %1422 = vst.msk [vmem:[%s2153_s10 + $0x1b0] sm:$0xff] %vm1367_vm2, %v1357_v39  ;;  %v1220_v10 = vadd.f32 %v2290_v57, %v931_v18  ;;  %v1358_v48 = vmax.f32 %v1268_v13, 0.0  ;;  %v995_v57 = vadd.f32 %v2139_v55, %v2118_v34 }
 0x1c7   : > { %1420 = vst.msk [vmem:[%s2153_s10 + $0x1a0] sm:$0xff] %vm1367_vm2, %v1355_v44  ;;  %v1356_v12 = vmax.f32 %v1260_v47, 0.0 }
 0x1c8   : > { %1410 = vst.msk [vmem:[%s2153_s10 + $0x150] sm:$0xff] %vm1367_vm2, %v1345_v21  ;;  %v1346_v52 = vmax.f32 %v1220_v10, 0.0  ;;  %1423 = vst.msk [vmem:[%s2153_s10 + $0x1b8] sm:$0xff] %vm1367_vm2, %v1358_v48 }
 0x1c9   : > { %1421 = vst.msk [vmem:[%s2153_s10 + $0x1a8] sm:$0xff] %vm1367_vm2, %v1356_v12  ;;  %v935_v56 = vpop.f32.mrb[88].mxu0  ;;  %v1650_v17 = vpop.f32.mrb[88].mxu1 }
 0x1ca   : > { %1411 = vst.msk [vmem:[%s2153_s10 + $0x158] sm:$0xff] %vm1367_vm2, %v1346_v52  ;;  %v936_v41 = vadd.f32 %v2139_v55, %v935_v56  ;;  %v1281_v30 = vadd.f32 %v1650_v17, %v992_v51  ;;  %v937_v9 = vpop.f32.mrb[89].mxu0  ;;  %v1272_v63 = vpop.f32.mrb[89].mxu1 }
 0x1cb   : > { %v1273_v22 = vadd.f32 %v1272_v63, %v984_v49  ;;  %v938_v3 = vpop.f32.mrb[90].mxu0  ;;  %v1651_v4 = vpop.f32.mrb[90].mxu1 }
 0x1cc   : > { %v1225_v54 = vadd.f32 %v2300_v0, %v936_v41  ;;  %v1361_v59 = vmax.f32 %v1281_v30, 0.0  ;;  %v939_v34 = vadd.f32 %v2139_v55, %v938_v3  ;;  %v1284_v7 = vadd.f32 %v1651_v4, %v995_v57  ;;  %v940_v2 = vpop.f32.mrb[91].mxu0  ;;  %v1275_v28 = vpop.f32.mrb[91].mxu1 }
 0x1cd   : > { %v1359_v8 = vmax.f32 %v1273_v22, 0.0  ;;  %v1276_v60 = vadd.f32 %v1275_v28, %v987_v62 }
 0x1ce   : > { %v1347_v29 = vmax.f32 %v1225_v54, 0.0  ;;  %1426 = vst.msk [vmem:[%s2153_s10 + $0x1d0] sm:$0xff] %vm1367_vm2, %v1361_v59  ;;  %v1228_v26 = vadd.f32 %v2305_v40, %v939_v34  ;;  %v1362_v1 = vmax.f32 %v1284_v7, 0.0  ;;  %v1011_v40 = vadd.f32 %v2139_v55, %v2134_v50 }
 0x1cf   : > { %1424 = vst.msk [vmem:[%s2153_s10 + $0x1c0] sm:$0xff] %vm1367_vm2, %v1359_v8  ;;  %v1360_v0 = vmax.f32 %v1276_v60, 0.0 }
 0x1d0   : > { %1412 = vst.msk [vmem:[%s2153_s10 + $0x160] sm:$0xff] %vm1367_vm2, %v1347_v29  ;;  %v1348_v58 = vmax.f32 %v1228_v26, 0.0  ;;  %1427 = vst.msk [vmem:[%s2153_s10 + $0x1d8] sm:$0xff] %vm1367_vm2, %v1362_v1 }
 0x1d1   : > { %1425 = vst.msk [vmem:[%s2153_s10 + $0x1c8] sm:$0xff] %vm1367_vm2, %v1360_v0  ;;  %v943_v15 = vpop.f32.mrb[92].mxu0  ;;  %v1654_v16 = vpop.f32.mrb[92].mxu1 }
 0x1d2   : > { %1413 = vst.msk [vmem:[%s2153_s10 + $0x168] sm:$0xff] %vm1367_vm2, %v1348_v58  ;;  %v944_v5 = vadd.f32 %v2139_v55, %v943_v15  ;;  %v1297_v46 = vadd.f32 %v1654_v16, %v1008_v53  ;;  %v945_v19 = vpop.f32.mrb[93].mxu0  ;;  %v1288_v61 = vpop.f32.mrb[93].mxu1 }
 0x1d3   : > { %v1289_v38 = vadd.f32 %v1288_v61, %v1000_v11  ;;  %v946_v33 = vpop.f32.mrb[94].mxu0  ;;  %v1655_v23 = vpop.f32.mrb[94].mxu1 }
 0x1d4   : > { %v1233_v14 = vadd.f32 %v2295_v32, %v944_v5  ;;  %v1365_v50 = vmax.f32 %v1297_v46, 0.0  ;;  %v947_v25 = vadd.f32 %v2139_v55, %v946_v33  ;;  %v1300_v24 = vadd.f32 %v1655_v23, %v1011_v40  ;;  %v948_v31 = vpop.f32.mrb[95].mxu0  ;;  %v1291_v6 = vpop.f32.mrb[95].mxu1 }
 0x1d5   : > { %v1363_v27 = vmax.f32 %v1289_v38, 0.0  ;;  %v1292_v35 = vadd.f32 %v1291_v6, %v1003_v20 }
 0x1d6   : > { %v1349_v36 = vmax.f32 %v1233_v14, 0.0  ;;  %1430 = vst.msk [vmem:[%s2153_s10 + $0x1f0] sm:$0xff] %vm1367_vm2, %v1365_v50  ;;  %v1236_v42 = vadd.f32 %v2302_v45, %v947_v25  ;;  %v1366_v39 = vmax.f32 %v1300_v24, 0.0 }
 0x1d7   : > { %1428 = vst.msk [vmem:[%s2153_s10 + $0x1e0] sm:$0xff] %vm1367_vm2, %v1363_v27  ;;  %v1364_v32 = vmax.f32 %v1292_v35, 0.0 }
 0x1d8   : > { %1414 = vst.msk [vmem:[%s2153_s10 + $0x170] sm:$0xff] %vm1367_vm2, %v1349_v36  ;;  %v1350_v18 = vmax.f32 %v1236_v42, 0.0  ;;  %1431 = vst.msk [vmem:[%s2153_s10 + $0x1f8] sm:$0xff] %vm1367_vm2, %v1366_v39 }
 0x1d9   : > { %1429 = vst.msk [vmem:[%s2153_s10 + $0x1e8] sm:$0xff] %vm1367_vm2, %v1364_v32 }
 0x1da   : > { %1415 = vst.msk [vmem:[%s2153_s10 + $0x178] sm:$0xff] %vm1367_vm2, %v1350_v18 }
 0x1db PF: > { %s13_s12 = sadd.s32 1, %s1724_s12  }
 0x1dc   : > { %p10_p4 = scmp.ge.s32.totalorder %s13_s12, 18  }
 0x1de   :  { %12 = sbr.rel (!%p10_p4) target bundleno = 1 (0x1), region = 62 }

// kernel: amdim_forward.19
= control target key start
LH: loop header
LB: loop body
LE: loop exit
PB: predicated region body
PF: predicated region fallthrough
CT: control target
= control target key end

     0   :  { %s780_s12 = smov 0   ;;  %s1008_s0 = inlined_call_operand.vmem [shape: f32[7688,144], index: 0, kind: input, shape index: {}]   ;;  %s1009_s1 = inlined_call_operand.vmem [shape: bf16[144,16], index: 1, kind: input, shape index: {}]   ;;  %s1010_s2 = inlined_call_operand.vmem [shape: f32[1,16], index: 2, kind: input, shape index: {}]   ;;  %s1011_s3 = inlined_call_operand.vmem [shape: f32[7688,16], index: 3, kind: output, shape index: {}]  }
   0x1 LB: > { %s678_s13 = sadd.s32 4294967295, %s757_s12   ;;  %p682_p0 = scmp.ge.s32.totalorder %s757_s12, 1  ;;  %s757_s12 = sphi %s780_s12, %s13_s12  }
   0x2   : > { %p139_p1 = scmp.lt.s32.totalorder %s757_s12, 32 }
   0x4   : > { %p140_p2 = pnand %p682_p0, %p139_p1 }
   0x5   : > { %v742_v0 = vld [vmem:[%s1009_s1] sm:$0xff] (!%p140_p2)   ;;  %v759_v1 = vmov (!%p140_p2), 0   ;;  %s164_s16 = smul.u32 (!%p140_p2), 31, %s678_s13  ;;  %v743_v2 = vld [vmem:[%s1009_s1 + $0x8] sm:$0xff] (!%p140_p2)   ;;  %v744_v3 = vld [vmem:[%s1009_s1 + $0x10] sm:$0xff] (!%p140_p2)   ;;  %vm351_vm0 = vcmask (!%p140_p2), 130048  }
   0x6   : > { %143 = sbr.rel (%p140_p2) target bundleno = 317 (0x13d), region = 32  ;;  %400 = vmatprep.subr.bf16.mxu0 (!%p140_p2), %v759_v1  ;;  %715 = vmatprep.subr.bf16.mxu1 (!%p140_p2), %v759_v1  ;;  %v745_v7 = vld [vmem:[%s1009_s1 + $0x18] sm:$0xff] (!%p140_p2)   ;;  %v746_v11 = vld [vmem:[%s1009_s1 + $0x20] sm:$0xff] (!%p140_p2)   ;;  %v747_v12 = vld [vmem:[%s1009_s1 + $0x28] sm:$0xff] (!%p140_p2)  }
   0x7   : > { %401 = vmatpush1.bf16.msra.mxu0 (!%p140_p2), %v742_v0  ;;  %724 = vmatpush1.bf16.msra.mxu1 (!%p140_p2), %v742_v0  ;;  %p165_p3 = scmp.lt.s32.totalorder (!%p140_p2), %s164_s16, 960  ;;  %v748_v13 = vld [vmem:[%s1009_s1 + $0x30] sm:$0xff] (!%p140_p2)   ;;  %v749_v14 = vld [vmem:[%s1009_s1 + $0x38] sm:$0xff] (!%p140_p2)   ;;  %v750_v15 = vld [vmem:[%s1009_s1 + $0x40] sm:$0xff] (!%p140_p2)  }
   0x8   : > { %402 = vmatprep.subr.bf16.mxu0 (!%p140_p2), %v759_v1  ;;  %716 = vmatprep.subr.bf16.mxu1 (!%p140_p2), %v759_v1 }
   0xb   : > { %403 = vmatpush1.bf16.msra.mxu0 (!%p140_p2), %v743_v2  ;;  %725 = vmatpush1.bf16.msra.mxu1 (!%p140_p2), %v743_v2 }
   0xc   : > { %404 = vmatprep.subr.bf16.mxu0 (!%p140_p2), %v759_v1  ;;  %717 = vmatprep.subr.bf16.mxu1 (!%p140_p2), %v759_v1 }
   0xd   : > { %s1013_s16 = smov (!%p165_p3, %s164_s16), 960 }
   0xe   : > { %s714_s21 = sshll.u32 %s1013_s16, 4  ;;  %s685_s13 = sshll.u32 %s1013_s16, 3 }
   0xf   : > { %s803_s24 = scalar_lea.vmem %s1008_s0, %s714_s21  ;;  %405 = vmatpush1.bf16.msra.mxu0 %v744_v3  ;;  %726 = vmatpush1.bf16.msra.mxu1 %v744_v3  ;;  %s912_s17 = scalar_lea.vmem %s1011_s3, %s685_s13 }
  0x10   : > { %v179_v4 = vld [vmem:[%s803_s24 + $0x8] sm:$0xff]  ;;  %v181_v5 = vld [vmem:[%s803_s24 + $0x18] sm:$0xff]  ;;  %406 = vmatprep.subr.bf16.mxu0 %v759_v1  ;;  %718 = vmatprep.subr.bf16.mxu1 %v759_v1  ;;  %v178_v16 = vld [vmem:[%s803_s24] sm:$0xff] }
  0x11   : > { %v211_v6 = vld [vmem:[%s803_s24 + $0x108] sm:$0xff]  ;;  %v241_v8 = vpack.c.bf16 %v181_v5, %v179_v4  ;;  %v213_v9 = vld [vmem:[%s803_s24 + $0x118] sm:$0xff]  ;;  %v180_v17 = vld [vmem:[%s803_s24 + $0x10] sm:$0xff] }
  0x12   : > { %v257_v10 = vpack.c.bf16 %v213_v9, %v211_v6  ;;  %v210_v18 = vld [vmem:[%s803_s24 + $0x100] sm:$0xff]  ;;  %v212_v19 = vld [vmem:[%s803_s24 + $0x110] sm:$0xff]  ;;  %v183_v20 = vld [vmem:[%s803_s24 + $0x28] sm:$0xff]  ;;  %v240_v24 = vpack.c.bf16 %v180_v17, %v178_v16 }
  0x13   : > { %696 = vmatprep.mubr.msk.bf16.mxu0 %vm351_vm0, %v241_v8  ;;  %407 = vmatpush1.bf16.msra.mxu0 %v745_v7  ;;  %v185_v21 = vld [vmem:[%s803_s24 + $0x38] sm:$0xff]  ;;  %v215_v22 = vld [vmem:[%s803_s24 + $0x128] sm:$0xff]  ;;  %v256_v25 = vpack.c.bf16 %v212_v19, %v210_v18  ;;  %v182_v28 = vld [vmem:[%s803_s24 + $0x20] sm:$0xff] }
  0x14   : > { %704 = vmatprep.mubr.msk.bf16.mxu1 %vm351_vm0, %v257_v10  ;;  %727 = vmatpush1.bf16.msra.mxu1 %v745_v7  ;;  %v217_v23 = vld [vmem:[%s803_s24 + $0x138] sm:$0xff]  ;;  %v243_v26 = vpack.c.bf16 %v185_v21, %v183_v20  ;;  %v184_v29 = vld [vmem:[%s803_s24 + $0x30] sm:$0xff]  ;;  %v214_v30 = vld [vmem:[%s803_s24 + $0x120] sm:$0xff] }
  0x15   : > { %408 = vmatprep.subr.bf16.mxu0 %v759_v1  ;;  %719 = vmatprep.subr.bf16.mxu1 %v759_v1  ;;  %v259_v27 = vpack.c.bf16 %v217_v23, %v215_v22  ;;  %v216_v31 = vld [vmem:[%s803_s24 + $0x130] sm:$0xff]  ;;  %v187_v32 = vld [vmem:[%s803_s24 + $0x48] sm:$0xff]  ;;  %v189_v33 = vld [vmem:[%s803_s24 + $0x58] sm:$0xff]  ;;  %v242_v36 = vpack.c.bf16 %v184_v29, %v182_v28 }
  0x16   : > { %v219_v34 = vld [vmem:[%s803_s24 + $0x148] sm:$0xff]  ;;  %v221_v35 = vld [vmem:[%s803_s24 + $0x158] sm:$0xff]  ;;  %v258_v37 = vpack.c.bf16 %v216_v31, %v214_v30  ;;  %v245_v38 = vpack.c.bf16 %v189_v33, %v187_v32  ;;  %v186_v40 = vld [vmem:[%s803_s24 + $0x40] sm:$0xff] }
  0x17   : > { %409 = vmatpush1.bf16.msra.mxu0 %v746_v11  ;;  %v261_v39 = vpack.c.bf16 %v221_v35, %v219_v34  ;;  %v188_v41 = vld [vmem:[%s803_s24 + $0x50] sm:$0xff]  ;;  %v218_v42 = vld [vmem:[%s803_s24 + $0x140] sm:$0xff]  ;;  %v191_v44 = vld [vmem:[%s803_s24 + $0x68] sm:$0xff] }
  0x18   : > { %728 = vmatpush1.bf16.msra.mxu1 %v746_v11  ;;  %410 = vmatprep.subr.bf16.mxu0 %v759_v1  ;;  %v220_v43 = vld [vmem:[%s803_s24 + $0x150] sm:$0xff]  ;;  %v193_v45 = vld [vmem:[%s803_s24 + $0x78] sm:$0xff]  ;;  %v223_v46 = vld [vmem:[%s803_s24 + $0x168] sm:$0xff]  ;;  %v244_v48 = vpack.c.bf16 %v188_v41, %v186_v40 }
  0x19   : > { %720 = vmatprep.subr.bf16.mxu1 %v759_v1  ;;  %v225_v47 = vld [vmem:[%s803_s24 + $0x178] sm:$0xff]  ;;  %v260_v49 = vpack.c.bf16 %v220_v43, %v218_v42  ;;  %v247_v50 = vpack.c.bf16 %v193_v45, %v191_v44  ;;  %v190_v52 = vld [vmem:[%s803_s24 + $0x60] sm:$0xff]  ;;  %v192_v53 = vld [vmem:[%s803_s24 + $0x70] sm:$0xff] }
  0x1a   : > { %v263_v51 = vpack.c.bf16 %v225_v47, %v223_v46  ;;  %v222_v54 = vld [vmem:[%s803_s24 + $0x160] sm:$0xff]  ;;  %v224_v55 = vld [vmem:[%s803_s24 + $0x170] sm:$0xff]  ;;  %v195_v56 = vld [vmem:[%s803_s24 + $0x88] sm:$0xff]  ;;  %v246_v60 = vpack.c.bf16 %v192_v53, %v190_v52 }
  0x1b   : > { %411 = vmatpush1.bf16.msra.mxu0 %v747_v12  ;;  %v197_v57 = vld [vmem:[%s803_s24 + $0x98] sm:$0xff]  ;;  %v227_v58 = vld [vmem:[%s803_s24 + $0x188] sm:$0xff]  ;;  %v262_v61 = vpack.c.bf16 %v224_v55, %v222_v54  ;;  %v194_v0 = vld [vmem:[%s803_s24 + $0x80] sm:$0xff] }
  0x1c   : > { %729 = vmatpush1.bf16.msra.mxu1 %v747_v12  ;;  %412 = vmatprep.subr.bf16.mxu0 %v759_v1  ;;  %v229_v59 = vld [vmem:[%s803_s24 + $0x198] sm:$0xff]  ;;  %v249_v62 = vpack.c.bf16 %v197_v57, %v195_v56  ;;  %v226_v2 = vld [vmem:[%s803_s24 + $0x180] sm:$0xff]  ;;  %v228_v3 = vld [vmem:[%s803_s24 + $0x190] sm:$0xff] }
  0x1d   : > { %721 = vmatprep.subr.bf16.mxu1 %v759_v1  ;;  %v265_v63 = vpack.c.bf16 %v229_v59, %v227_v58  ;;  %v199_v4 = vld [vmem:[%s803_s24 + $0xa8] sm:$0xff]  ;;  %v201_v5 = vld [vmem:[%s803_s24 + $0xb8] sm:$0xff]  ;;  %v264_v9 = vpack.c.bf16 %v228_v3, %v226_v2  ;;  %v198_v12 = vld [vmem:[%s803_s24 + $0xa0] sm:$0xff] }
  0x1e   : > { %v231_v6 = vld [vmem:[%s803_s24 + $0x1a8] sm:$0xff]  ;;  %v233_v7 = vld [vmem:[%s803_s24 + $0x1b8] sm:$0xff]  ;;  %v251_v10 = vpack.c.bf16 %v201_v5, %v199_v4  ;;  %v206_v35 = vld [vmem:[%s803_s24 + $0xe0] sm:$0xff] }
  0x1f   : > { %413 = vmatpush1.bf16.msra.mxu0 %v748_v13  ;;  %v267_v11 = vpack.c.bf16 %v233_v7, %v231_v6  ;;  %v203_v16 = vld [vmem:[%s803_s24 + $0xc8] sm:$0xff]  ;;  %v205_v17 = vld [vmem:[%s803_s24 + $0xd8] sm:$0xff]  ;;  %v904_v40 = vld [vmem:[%s1010_s2] ss:$0 sm:$0xff] }
  0x20   : > { %730 = vmatpush1.bf16.msra.mxu1 %v748_v13  ;;  %414 = vmatprep.subr.bf16.mxu0 %v759_v1  ;;  %v200_v13 = vld [vmem:[%s803_s24 + $0xb0] sm:$0xff]  ;;  %v235_v18 = vld [vmem:[%s803_s24 + $0x1c8] sm:$0xff]  ;;  %v237_v19 = vld [vmem:[%s803_s24 + $0x1d8] sm:$0xff]  ;;  %v253_v22 = vpack.c.bf16 %v205_v17, %v203_v16 }
  0x21   : > { %722 = vmatprep.subr.bf16.mxu1 %v759_v1  ;;  %v250_v20 = vpack.c.bf16 %v200_v13, %v198_v12  ;;  %v269_v23 = vpack.c.bf16 %v237_v19, %v235_v18  ;;  %v207_v28 = vld [vmem:[%s803_s24 + $0xe8] sm:$0xff]  ;;  %v209_v29 = vld [vmem:[%s803_s24 + $0xf8] sm:$0xff] }
  0x22   : > { %v239_v30 = vld [vmem:[%s803_s24 + $0x1e8] sm:$0xff]  ;;  %v255_v33 = vpack.c.bf16 %v209_v29, %v207_v28 }
  0x23   : > { %415 = vmatpush1.bf16.msra.mxu0 %v749_v14  ;;  %v271_v34 = vpack.c.bf16 %v239_v30, %v239_v30 }
  0x24   : > { %731 = vmatpush1.bf16.msra.mxu1 %v749_v14  ;;  %416 = vmatprep.subr.bf16.mxu0 %v759_v1  ;;  %v230_v14 = vld [vmem:[%s803_s24 + $0x1a0] sm:$0xff] }
  0x25   : > { %723 = vmatprep.subr.bf16.mxu1 %v759_v1  ;;  %v196_v1 = vld [vmem:[%s803_s24 + $0x90] sm:$0xff] }
  0x26   : > { %v248_v8 = vpack.c.bf16 %v196_v1, %v194_v0 }
  0x27   : > { %417 = vmatpush1.bf16.msra.mxu0 %v750_v15 }
  0x28   : > { %732 = vmatpush1.bf16.msra.mxu1 %v750_v15  ;;  %v232_v15 = vld [vmem:[%s803_s24 + $0x1b0] sm:$0xff] }
  0x29   : > { %v266_v21 = vpack.c.bf16 %v232_v15, %v230_v14 }
  0x2a   : > { %433 = vmatmul.mubr.bf16.vlgmr.msra.gmra.mrb[0].mxu0 %v240_v24  ;;  %v202_v24 = vld [vmem:[%s803_s24 + $0xc0] sm:$0xff] }
  0x2b   : > { %497 = vmatmul.mubr.bf16.vlgmr.msra.gmra.mrb[0].mxu1 %v256_v25  ;;  %697 = vmatprep.mubr.msk.bf16.mxu0 %vm351_vm0, %v243_v26  ;;  %v204_v25 = vld [vmem:[%s803_s24 + $0xd0] sm:$0xff]  ;;  %v234_v26 = vld [vmem:[%s803_s24 + $0x1c0] sm:$0xff] }
  0x2c   : > { %705 = vmatprep.mubr.msk.bf16.mxu1 %vm351_vm0, %v259_v27  ;;  %v236_v27 = vld [vmem:[%s803_s24 + $0x1d0] sm:$0xff]  ;;  %v252_v31 = vpack.c.bf16 %v204_v25, %v202_v24 }
  0x2d   : > { %v268_v32 = vpack.c.bf16 %v236_v27, %v234_v26 }
  0x32   : > { %441 = vmatmul.mubr.bf16.gmra.mrb[4].mxu0 %v242_v36  ;;  %v208_v36 = vld [vmem:[%s803_s24 + $0xf0] sm:$0xff] }
  0x33   : > { %505 = vmatmul.mubr.bf16.gmra.mrb[4].mxu1 %v258_v37  ;;  %698 = vmatprep.mubr.msk.bf16.mxu0 %vm351_vm0, %v245_v38  ;;  %v238_v37 = vld [vmem:[%s803_s24 + $0x1e0] sm:$0xff]  ;;  %v254_v38 = vpack.c.bf16 %v208_v36, %v206_v35 }
  0x34   : > { %706 = vmatprep.mubr.msk.bf16.mxu1 %vm351_vm0, %v261_v39  ;;  %v270_v39 = vpack.c.bf16 %v238_v37, %v238_v37 }
  0x3a   : > { %449 = vmatmul.mubr.bf16.gmra.mrb[8].mxu0 %v244_v48 }
  0x3b   : > { %513 = vmatmul.mubr.bf16.gmra.mrb[8].mxu1 %v260_v49  ;;  %699 = vmatprep.mubr.msk.bf16.mxu0 %vm351_vm0, %v247_v50 }
  0x3c   : > { %707 = vmatprep.mubr.msk.bf16.mxu1 %vm351_vm0, %v263_v51 }
  0x42   : > { %457 = vmatmul.mubr.bf16.gmra.mrb[12].mxu0 %v246_v60 }
  0x43   : > { %521 = vmatmul.mubr.bf16.gmra.mrb[12].mxu1 %v262_v61  ;;  %700 = vmatprep.mubr.msk.bf16.mxu0 %vm351_vm0, %v249_v62 }
  0x44   : > { %708 = vmatprep.mubr.msk.bf16.mxu1 %vm351_vm0, %v265_v63 }
  0x4a   : > { %465 = vmatmul.mubr.bf16.gmra.mrb[16].mxu0 %v248_v8 }
  0x4b   : > { %529 = vmatmul.mubr.bf16.gmra.mrb[16].mxu1 %v264_v9  ;;  %701 = vmatprep.mubr.msk.bf16.mxu0 %vm351_vm0, %v251_v10 }
  0x4c   : > { %709 = vmatprep.mubr.msk.bf16.mxu1 %vm351_vm0, %v267_v11 }
  0x52   : > { %473 = vmatmul.mubr.bf16.gmra.mrb[20].mxu0 %v250_v20 }
  0x53   : > { %537 = vmatmul.mubr.bf16.gmra.mrb[20].mxu1 %v266_v21  ;;  %702 = vmatprep.mubr.msk.bf16.mxu0 %vm351_vm0, %v253_v22 }
  0x54   : > { %710 = vmatprep.mubr.msk.bf16.mxu1 %vm351_vm0, %v269_v23 }
  0x5a   : > { %481 = vmatmul.mubr.bf16.gmra.mrb[24].mxu0 %v252_v31 }
  0x5b   : > { %545 = vmatmul.mubr.bf16.gmra.mrb[24].mxu1 %v268_v32  ;;  %703 = vmatprep.mubr.msk.bf16.mxu0 %vm351_vm0, %v255_v33 }
  0x5c   : > { %711 = vmatprep.mubr.msk.bf16.mxu1 %vm351_vm0, %v271_v34 }
  0x62   : > { %489 = vmatmul.mubr.bf16.gmra.mrb[28].mxu0 %v254_v38 }
  0x63   : > { %553 = vmatmul.mubr.bf16.gmra.mrb[28].mxu1 %v270_v39 }
  0xfd   : > { %v434_v41 = vpop.f32.mrb[0].mxu0 }
  0xfe   : > { %v498_v42 = vpop.f32.mrb[0].mxu1  ;;  %v435_v43 = vadd.f32 %v904_v40, %v434_v41  ;;  %v436_v45 = vpop.f32.mrb[1].mxu0 }
  0xff   : > { %v499_v44 = vadd.f32 %v904_v40, %v498_v42  ;;  %v500_v46 = vpop.f32.mrb[1].mxu1  ;;  %v437_v47 = vpop.f32.mrb[2].mxu0 }
 0x100   : > { %v501_v48 = vpop.f32.mrb[2].mxu1  ;;  %v560_v49 = vmax.f32 %v435_v43, 0.0  ;;  %v438_v51 = vadd.f32 %v904_v40, %v437_v47  ;;  %v439_v53 = vpop.f32.mrb[3].mxu0 }
 0x101   : > { %v576_v50 = vmax.f32 %v499_v44, 0.0  ;;  %v502_v52 = vadd.f32 %v904_v40, %v501_v48  ;;  %v503_v54 = vpop.f32.mrb[3].mxu1 }
 0x102   : > { %591 = vst.msk [vmem:[%s912_s17] sm:$0xff] %vm351_vm0, %v560_v49  ;;  %v561_v55 = vmax.f32 %v438_v51, 0.0 }
 0x103   : > { %607 = vst.msk [vmem:[%s912_s17 + $0x80] sm:$0xff] %vm351_vm0, %v576_v50  ;;  %v577_v56 = vmax.f32 %v502_v52, 0.0 }
 0x104   : > { %592 = vst.msk [vmem:[%s912_s17 + $0x8] sm:$0xff] %vm351_vm0, %v561_v55 }
 0x105   : > { %608 = vst.msk [vmem:[%s912_s17 + $0x88] sm:$0xff] %vm351_vm0, %v577_v56  ;;  %v442_v57 = vpop.f32.mrb[4].mxu0 }
 0x106   : > { %v506_v58 = vpop.f32.mrb[4].mxu1  ;;  %v443_v59 = vadd.f32 %v904_v40, %v442_v57  ;;  %v444_v61 = vpop.f32.mrb[5].mxu0 }
 0x107   : > { %v507_v60 = vadd.f32 %v904_v40, %v506_v58  ;;  %v508_v62 = vpop.f32.mrb[5].mxu1  ;;  %v445_v63 = vpop.f32.mrb[6].mxu0 }
 0x108   : > { %v509_v0 = vpop.f32.mrb[6].mxu1  ;;  %v562_v1 = vmax.f32 %v443_v59, 0.0  ;;  %v446_v3 = vadd.f32 %v904_v40, %v445_v63  ;;  %v447_v5 = vpop.f32.mrb[7].mxu0 }
 0x109   : > { %v578_v2 = vmax.f32 %v507_v60, 0.0  ;;  %v510_v4 = vadd.f32 %v904_v40, %v509_v0  ;;  %v511_v6 = vpop.f32.mrb[7].mxu1 }
 0x10a   : > { %593 = vst.msk [vmem:[%s912_s17 + $0x10] sm:$0xff] %vm351_vm0, %v562_v1  ;;  %v563_v7 = vmax.f32 %v446_v3, 0.0 }
 0x10b   : > { %609 = vst.msk [vmem:[%s912_s17 + $0x90] sm:$0xff] %vm351_vm0, %v578_v2  ;;  %v579_v8 = vmax.f32 %v510_v4, 0.0 }
 0x10c   : > { %594 = vst.msk [vmem:[%s912_s17 + $0x18] sm:$0xff] %vm351_vm0, %v563_v7 }
 0x10d   : > { %610 = vst.msk [vmem:[%s912_s17 + $0x98] sm:$0xff] %vm351_vm0, %v579_v8  ;;  %v450_v9 = vpop.f32.mrb[8].mxu0 }
 0x10e   : > { %v514_v10 = vpop.f32.mrb[8].mxu1  ;;  %v451_v11 = vadd.f32 %v904_v40, %v450_v9  ;;  %v452_v13 = vpop.f32.mrb[9].mxu0 }
 0x10f   : > { %v515_v12 = vadd.f32 %v904_v40, %v514_v10  ;;  %v516_v14 = vpop.f32.mrb[9].mxu1  ;;  %v453_v15 = vpop.f32.mrb[10].mxu0 }
 0x110   : > { %v517_v16 = vpop.f32.mrb[10].mxu1  ;;  %v564_v17 = vmax.f32 %v451_v11, 0.0  ;;  %v454_v19 = vadd.f32 %v904_v40, %v453_v15  ;;  %v455_v21 = vpop.f32.mrb[11].mxu0 }
 0x111   : > { %v580_v18 = vmax.f32 %v515_v12, 0.0  ;;  %v518_v20 = vadd.f32 %v904_v40, %v517_v16  ;;  %v519_v22 = vpop.f32.mrb[11].mxu1 }
 0x112   : > { %595 = vst.msk [vmem:[%s912_s17 + $0x20] sm:$0xff] %vm351_vm0, %v564_v17  ;;  %v565_v23 = vmax.f32 %v454_v19, 0.0 }
 0x113   : > { %611 = vst.msk [vmem:[%s912_s17 + $0xa0] sm:$0xff] %vm351_vm0, %v580_v18  ;;  %v581_v24 = vmax.f32 %v518_v20, 0.0 }
 0x114   : > { %596 = vst.msk [vmem:[%s912_s17 + $0x28] sm:$0xff] %vm351_vm0, %v565_v23 }
 0x115   : > { %612 = vst.msk [vmem:[%s912_s17 + $0xa8] sm:$0xff] %vm351_vm0, %v581_v24  ;;  %v458_v25 = vpop.f32.mrb[12].mxu0 }
 0x116   : > { %v522_v26 = vpop.f32.mrb[12].mxu1  ;;  %v459_v27 = vadd.f32 %v904_v40, %v458_v25  ;;  %v460_v29 = vpop.f32.mrb[13].mxu0 }
 0x117   : > { %v523_v28 = vadd.f32 %v904_v40, %v522_v26  ;;  %v524_v30 = vpop.f32.mrb[13].mxu1  ;;  %v461_v31 = vpop.f32.mrb[14].mxu0 }
 0x118   : > { %v525_v32 = vpop.f32.mrb[14].mxu1  ;;  %v566_v33 = vmax.f32 %v459_v27, 0.0  ;;  %v462_v35 = vadd.f32 %v904_v40, %v461_v31  ;;  %v463_v37 = vpop.f32.mrb[15].mxu0 }
 0x119   : > { %v582_v34 = vmax.f32 %v523_v28, 0.0  ;;  %v526_v36 = vadd.f32 %v904_v40, %v525_v32  ;;  %v527_v38 = vpop.f32.mrb[15].mxu1 }
 0x11a   : > { %597 = vst.msk [vmem:[%s912_s17 + $0x30] sm:$0xff] %vm351_vm0, %v566_v33  ;;  %v567_v39 = vmax.f32 %v462_v35, 0.0 }
 0x11b   : > { %613 = vst.msk [vmem:[%s912_s17 + $0xb0] sm:$0xff] %vm351_vm0, %v582_v34  ;;  %v583_v41 = vmax.f32 %v526_v36, 0.0 }
 0x11c   : > { %598 = vst.msk [vmem:[%s912_s17 + $0x38] sm:$0xff] %vm351_vm0, %v567_v39 }
 0x11d   : > { %614 = vst.msk [vmem:[%s912_s17 + $0xb8] sm:$0xff] %vm351_vm0, %v583_v41  ;;  %v466_v42 = vpop.f32.mrb[16].mxu0 }
 0x11e   : > { %v530_v43 = vpop.f32.mrb[16].mxu1  ;;  %v467_v44 = vadd.f32 %v904_v40, %v466_v42  ;;  %v468_v46 = vpop.f32.mrb[17].mxu0 }
 0x11f   : > { %v531_v45 = vadd.f32 %v904_v40, %v530_v43  ;;  %v532_v47 = vpop.f32.mrb[17].mxu1  ;;  %v469_v48 = vpop.f32.mrb[18].mxu0 }
 0x120   : > { %v533_v49 = vpop.f32.mrb[18].mxu1  ;;  %v568_v50 = vmax.f32 %v467_v44, 0.0  ;;  %v470_v52 = vadd.f32 %v904_v40, %v469_v48  ;;  %v471_v54 = vpop.f32.mrb[19].mxu0 }
 0x121   : > { %v584_v51 = vmax.f32 %v531_v45, 0.0  ;;  %v534_v53 = vadd.f32 %v904_v40, %v533_v49  ;;  %v535_v55 = vpop.f32.mrb[19].mxu1 }
 0x122   : > { %599 = vst.msk [vmem:[%s912_s17 + $0x40] sm:$0xff] %vm351_vm0, %v568_v50  ;;  %v569_v56 = vmax.f32 %v470_v52, 0.0 }
 0x123   : > { %615 = vst.msk [vmem:[%s912_s17 + $0xc0] sm:$0xff] %vm351_vm0, %v584_v51  ;;  %v585_v57 = vmax.f32 %v534_v53, 0.0 }
 0x124   : > { %600 = vst.msk [vmem:[%s912_s17 + $0x48] sm:$0xff] %vm351_vm0, %v569_v56 }
 0x125   : > { %616 = vst.msk [vmem:[%s912_s17 + $0xc8] sm:$0xff] %vm351_vm0, %v585_v57  ;;  %v474_v58 = vpop.f32.mrb[20].mxu0 }
 0x126   : > { %v538_v59 = vpop.f32.mrb[20].mxu1  ;;  %v475_v60 = vadd.f32 %v904_v40, %v474_v58  ;;  %v476_v62 = vpop.f32.mrb[21].mxu0 }
 0x127   : > { %v539_v61 = vadd.f32 %v904_v40, %v538_v59  ;;  %v540_v63 = vpop.f32.mrb[21].mxu1  ;;  %v477_v0 = vpop.f32.mrb[22].mxu0 }
 0x128   : > { %v541_v1 = vpop.f32.mrb[22].mxu1  ;;  %v570_v2 = vmax.f32 %v475_v60, 0.0  ;;  %v478_v4 = vadd.f32 %v904_v40, %v477_v0  ;;  %v479_v6 = vpop.f32.mrb[23].mxu0 }
 0x129   : > { %v586_v3 = vmax.f32 %v539_v61, 0.0  ;;  %v542_v5 = vadd.f32 %v904_v40, %v541_v1  ;;  %v543_v7 = vpop.f32.mrb[23].mxu1 }
 0x12a   : > { %601 = vst.msk [vmem:[%s912_s17 + $0x50] sm:$0xff] %vm351_vm0, %v570_v2  ;;  %v571_v8 = vmax.f32 %v478_v4, 0.0 }
 0x12b   : > { %617 = vst.msk [vmem:[%s912_s17 + $0xd0] sm:$0xff] %vm351_vm0, %v586_v3  ;;  %v587_v9 = vmax.f32 %v542_v5, 0.0 }
 0x12c   : > { %602 = vst.msk [vmem:[%s912_s17 + $0x58] sm:$0xff] %vm351_vm0, %v571_v8 }
 0x12d   : > { %618 = vst.msk [vmem:[%s912_s17 + $0xd8] sm:$0xff] %vm351_vm0, %v587_v9  ;;  %v482_v10 = vpop.f32.mrb[24].mxu0 }
 0x12e   : > { %v546_v11 = vpop.f32.mrb[24].mxu1  ;;  %v483_v12 = vadd.f32 %v904_v40, %v482_v10  ;;  %v484_v14 = vpop.f32.mrb[25].mxu0 }
 0x12f   : > { %v547_v13 = vadd.f32 %v904_v40, %v546_v11  ;;  %v548_v15 = vpop.f32.mrb[25].mxu1  ;;  %v485_v16 = vpop.f32.mrb[26].mxu0 }
 0x130   : > { %v549_v17 = vpop.f32.mrb[26].mxu1  ;;  %v572_v18 = vmax.f32 %v483_v12, 0.0  ;;  %v486_v20 = vadd.f32 %v904_v40, %v485_v16  ;;  %v487_v22 = vpop.f32.mrb[27].mxu0 }
 0x131   : > { %v588_v19 = vmax.f32 %v547_v13, 0.0  ;;  %v550_v21 = vadd.f32 %v904_v40, %v549_v17  ;;  %v551_v23 = vpop.f32.mrb[27].mxu1 }
 0x132   : > { %603 = vst.msk [vmem:[%s912_s17 + $0x60] sm:$0xff] %vm351_vm0, %v572_v18  ;;  %v573_v24 = vmax.f32 %v486_v20, 0.0 }
 0x133   : > { %619 = vst.msk [vmem:[%s912_s17 + $0xe0] sm:$0xff] %vm351_vm0, %v588_v19  ;;  %v589_v25 = vmax.f32 %v550_v21, 0.0 }
 0x134   : > { %604 = vst.msk [vmem:[%s912_s17 + $0x68] sm:$0xff] %vm351_vm0, %v573_v24 }
 0x135   : > { %620 = vst.msk [vmem:[%s912_s17 + $0xe8] sm:$0xff] %vm351_vm0, %v589_v25  ;;  %v490_v26 = vpop.f32.mrb[28].mxu0 }
 0x136   : > { %v554_v27 = vpop.f32.mrb[28].mxu1  ;;  %v491_v28 = vadd.f32 %v904_v40, %v490_v26  ;;  %v492_v30 = vpop.f32.mrb[29].mxu0 }
 0x137   : > { %v555_v29 = vadd.f32 %v904_v40, %v554_v27  ;;  %v556_v31 = vpop.f32.mrb[29].mxu1  ;;  %v493_v32 = vpop.f32.mrb[30].mxu0 }
 0x138   : > { %v557_v33 = vpop.f32.mrb[30].mxu1  ;;  %v574_v34 = vmax.f32 %v491_v28, 0.0  ;;  %v494_v36 = vadd.f32 %v904_v40, %v493_v32  ;;  %v495_v37 = vpop.f32.mrb[31].mxu0 }
 0x139   : > { %v590_v35 = vmax.f32 %v555_v29, 0.0  ;;  %v558_v38 = vpop.f32.mrb[31].mxu1 }
 0x13a   : > { %605 = vst.msk [vmem:[%s912_s17 + $0x70] sm:$0xff] %vm351_vm0, %v574_v34  ;;  %v575_v39 = vmax.f32 %v494_v36, 0.0 }
 0x13b   : > { %621 = vst.msk [vmem:[%s912_s17 + $0xf0] sm:$0xff] %vm351_vm0, %v590_v35 }
 0x13c   : > { %606 = vst.msk [vmem:[%s912_s17 + $0x78] sm:$0xff] %vm351_vm0, %v575_v39 }
 0x13d PF: > { %s13_s12 = sadd.s32 1, %s757_s12  }
 0x13e   : > { %p10_p4 = scmp.ge.s32.totalorder %s13_s12, 33  }
 0x140   :  { %12 = sbr.rel (!%p10_p4) target bundleno = 1 (0x1), region = 62 }

// kernel: amdim_forward.20
= control target key start
LH: loop header
LB: loop body
LE: loop exit
PB: predicated region body
PF: predicated region fallthrough
CT: control target
= control target key end

     0   :  { %s1186_s15 = smov 0   ;;  %s1436_s0 = inlined_call_operand.vmem [shape: f32[1800,256], index: 0, kind: input, shape index: {}]   ;;  %s1437_s1 = inlined_call_operand.vmem [shape: bf16[256,32], index: 1, kind: input, shape index: {}]   ;;  %s1438_s2 = inlined_call_operand.vmem [shape: bf16[32,32], index: 2, kind: input, shape index: {}]   ;;  %s1439_s3 = inlined_call_operand.vmem [shape: f32[1800,32], index: 3, kind: input, shape index: {}]   ;;  %s1440_s4 = inlined_call_operand.vmem [shape: f32[1800,32], index: 4, kind: output, shape index: {}]  }
   0x1 LB: > { %s915_s16 = sadd.s32 4294967295, %s1157_s15   ;;  %p919_p0 = scmp.ge.s32.totalorder %s1157_s15, 1  ;;  %s1157_s15 = sphi %s1186_s15, %s14_s15  }
   0x2   : > { %p175_p1 = scmp.lt.s32.totalorder %s1157_s15, 10 }
   0x4   : > { %p176_p2 = pnand %p919_p0, %p175_p1 }
   0x5   : > { %v1133_v0 = vld [vmem:[%s1437_s1 + $0x40] sm:$0xff] (!%p176_p2)   ;;  %s207_s19 = smul.u32 (!%p176_p2), 25, %s915_s16  ;;  %v1135_v2 = vld [vmem:[%s1437_s1 + $0x48] sm:$0xff] (!%p176_p2)   ;;  %v1137_v4 = vld [vmem:[%s1437_s1 + $0x50] sm:$0xff] (!%p176_p2)   ;;  %vm1160_vm0 = vmmov (!%p176_p2), 0   ;;  %vm646_vm1 = vcmask (!%p176_p2), 261120  }
   0x6   : > { %179 = sbr.rel (%p176_p2) target bundleno = 570 (0x23a), region = 36  ;;  %v1134_v1 = vld [vmem:[%s1437_s1] sm:$0xff] (!%p176_p2)   ;;  %958 = vmatprep.subr.bf16.mxu0 (!%p176_p2), %v1133_v0  ;;  %v1136_v3 = vld [vmem:[%s1437_s1 + $0x8] sm:$0xff] (!%p176_p2)   ;;  %v1138_v5 = vld [vmem:[%s1437_s1 + $0x10] sm:$0xff] (!%p176_p2)  }
   0x7   : > { %p208_p3 = scmp.lt.s32.totalorder (!%p176_p2), %s207_s19, 224  ;;  %959 = vmatpush3.bf16.msra.mxu0 (!%p176_p2), %v1134_v1  ;;  %v1139_v6 = vld [vmem:[%s1437_s1 + $0x58] sm:$0xff] (!%p176_p2)   ;;  %v1141_v8 = vld [vmem:[%s1437_s1 + $0x60] sm:$0xff] (!%p176_p2)   ;;  %v1143_v10 = vld [vmem:[%s1437_s1 + $0x68] sm:$0xff] (!%p176_p2)  }
   0x8   : > { %960 = vmatprep.subr.bf16.mxu0 (!%p176_p2), %v1135_v2  ;;  %v1140_v7 = vld [vmem:[%s1437_s1 + $0x18] sm:$0xff] (!%p176_p2)   ;;  %v1142_v9 = vld [vmem:[%s1437_s1 + $0x20] sm:$0xff] (!%p176_p2)   ;;  %v1144_v14 = vld [vmem:[%s1437_s1 + $0x28] sm:$0xff] (!%p176_p2)  }
   0x9   : > { %v1145_v15 = vld [vmem:[%s1437_s1 + $0x70] sm:$0xff] (!%p176_p2)   ;;  %v1147_v17 = vld [vmem:[%s1437_s1 + $0x78] sm:$0xff] (!%p176_p2)  }
   0xa   : > { %v1146_v16 = vld [vmem:[%s1437_s1 + $0x30] sm:$0xff] (!%p176_p2)   ;;  %v1148_v18 = vld [vmem:[%s1437_s1 + $0x38] sm:$0xff] (!%p176_p2)  }
   0xb   : > { %961 = vmatpush3.bf16.msra.mxu0 (!%p176_p2), %v1136_v3 }
   0xc   : > { %962 = vmatprep.subr.bf16.mxu0 (!%p176_p2), %v1137_v4 }
   0xd   : > { %s1442_s19 = smov (!%p208_p3, %s207_s19), 224 }
   0xe   : > { %s957_s6 = sshll.u32 %s1442_s19, 4  ;;  %s922_s8 = sshll.u32 %s1442_s19, 3 }
   0xf   : > { %963 = vmatpush3.bf16.msra.mxu0 %v1138_v5  ;;  %s1227_s13 = scalar_lea.vmem %s1436_s0, %s957_s6  ;;  %s1351_s11 = scalar_lea.vmem %s1439_s3, %s922_s8 }
  0x10   : > { %964 = vmatprep.subr.bf16.mxu0 %v1139_v6  ;;  %v228_v11 = vld [vmem:[%s1227_s13 + $0x8] sm:$0xff]  ;;  %v230_v12 = vld [vmem:[%s1227_s13 + $0x18] sm:$0xff]  ;;  %v227_v19 = vld [vmem:[%s1227_s13] sm:$0xff]  ;;  %s1357_s14 = scalar_lea.vmem %s1440_s4, %s922_s8 }
  0x11   : > { %v278_v13 = vpack.c.bf16 %v230_v12, %v228_v11  ;;  %v229_v20 = vld [vmem:[%s1227_s13 + $0x10] sm:$0xff]  ;;  %v232_v21 = vld [vmem:[%s1227_s13 + $0x28] sm:$0xff]  ;;  %v234_v22 = vld [vmem:[%s1227_s13 + $0x38] sm:$0xff] }
  0x12   : > { %v277_v23 = vpack.c.bf16 %v229_v20, %v227_v19  ;;  %v280_v24 = vpack.c.bf16 %v234_v22, %v232_v21  ;;  %v231_v25 = vld [vmem:[%s1227_s13 + $0x20] sm:$0xff]  ;;  %v233_v26 = vld [vmem:[%s1227_s13 + $0x30] sm:$0xff]  ;;  %v236_v27 = vld [vmem:[%s1227_s13 + $0x48] sm:$0xff] }
  0x13   : > { %965 = vmatpush3.bf16.msra.mxu0 %v1140_v7  ;;  %463 = vmatprep.mubr.bf16.mxu0 %v278_v13  ;;  %v238_v28 = vld [vmem:[%s1227_s13 + $0x58] sm:$0xff]  ;;  %v279_v29 = vpack.c.bf16 %v233_v26, %v231_v25  ;;  %v235_v31 = vld [vmem:[%s1227_s13 + $0x40] sm:$0xff]  ;;  %v237_v32 = vld [vmem:[%s1227_s13 + $0x50] sm:$0xff] }
  0x14   : > { %966 = vmatprep.subr.bf16.mxu0 %v1141_v8  ;;  %v282_v30 = vpack.c.bf16 %v238_v28, %v236_v27  ;;  %v240_v33 = vld [vmem:[%s1227_s13 + $0x68] sm:$0xff]  ;;  %v242_v34 = vld [vmem:[%s1227_s13 + $0x78] sm:$0xff]  ;;  %v281_v35 = vpack.c.bf16 %v237_v32, %v235_v31  ;;  %v239_v37 = vld [vmem:[%s1227_s13 + $0x60] sm:$0xff]  ;;  %v1159_v27 = vmov 0.0  }
  0x15   : > { %v284_v36 = vpack.c.bf16 %v242_v34, %v240_v33  ;;  %v241_v38 = vld [vmem:[%s1227_s13 + $0x70] sm:$0xff]  ;;  %v244_v39 = vld [vmem:[%s1227_s13 + $0x88] sm:$0xff]  ;;  %v246_v40 = vld [vmem:[%s1227_s13 + $0x98] sm:$0xff]  ;;  %1067 = vmatprep.subr.bf16.mxu1 %v1159_v27  ;;  %1071 = vmatprep.mubr.msk.bf16.mxu1 %vm1160_vm0, %v1159_v27 }
  0x16   : > { %v283_v41 = vpack.c.bf16 %v241_v38, %v239_v37  ;;  %v286_v42 = vpack.c.bf16 %v246_v40, %v244_v39  ;;  %v243_v43 = vld [vmem:[%s1227_s13 + $0x80] sm:$0xff]  ;;  %v245_v44 = vld [vmem:[%s1227_s13 + $0x90] sm:$0xff]  ;;  %v248_v45 = vld [vmem:[%s1227_s13 + $0xa8] sm:$0xff] }
  0x17   : > { %967 = vmatpush3.bf16.msra.mxu0 %v1142_v9  ;;  %v250_v46 = vld [vmem:[%s1227_s13 + $0xb8] sm:$0xff]  ;;  %v285_v47 = vpack.c.bf16 %v245_v44, %v243_v43  ;;  %v247_v49 = vld [vmem:[%s1227_s13 + $0xa0] sm:$0xff]  ;;  %v249_v50 = vld [vmem:[%s1227_s13 + $0xb0] sm:$0xff] }
  0x18   : > { %968 = vmatprep.subr.bf16.mxu0 %v1143_v10  ;;  %v288_v48 = vpack.c.bf16 %v250_v46, %v248_v45  ;;  %v252_v51 = vld [vmem:[%s1227_s13 + $0xc8] sm:$0xff]  ;;  %v254_v52 = vld [vmem:[%s1227_s13 + $0xd8] sm:$0xff]  ;;  %v287_v53 = vpack.c.bf16 %v249_v50, %v247_v49  ;;  %v251_v55 = vld [vmem:[%s1227_s13 + $0xc0] sm:$0xff] }
  0x19   : > { %v290_v54 = vpack.c.bf16 %v254_v52, %v252_v51  ;;  %v253_v56 = vld [vmem:[%s1227_s13 + $0xd0] sm:$0xff]  ;;  %v256_v57 = vld [vmem:[%s1227_s13 + $0xe8] sm:$0xff]  ;;  %v258_v58 = vld [vmem:[%s1227_s13 + $0xf8] sm:$0xff] }
  0x1a   : > { %v289_v59 = vpack.c.bf16 %v253_v56, %v251_v55  ;;  %v292_v60 = vpack.c.bf16 %v258_v58, %v256_v57  ;;  %v255_v61 = vld [vmem:[%s1227_s13 + $0xe0] sm:$0xff]  ;;  %v257_v62 = vld [vmem:[%s1227_s13 + $0xf0] sm:$0xff]  ;;  %v260_v63 = vld [vmem:[%s1227_s13 + $0x108] sm:$0xff] }
  0x1b   : > { %969 = vmatpush3.bf16.msra.mxu0 %v1144_v14  ;;  %v262_v0 = vld [vmem:[%s1227_s13 + $0x118] sm:$0xff]  ;;  %v291_v1 = vpack.c.bf16 %v257_v62, %v255_v61  ;;  %v259_v3 = vld [vmem:[%s1227_s13 + $0x100] sm:$0xff]  ;;  %v261_v4 = vld [vmem:[%s1227_s13 + $0x110] sm:$0xff] }
  0x1c   : > { %970 = vmatprep.subr.bf16.mxu0 %v1145_v15  ;;  %v294_v2 = vpack.c.bf16 %v262_v0, %v260_v63  ;;  %v264_v5 = vld [vmem:[%s1227_s13 + $0x128] sm:$0xff]  ;;  %v266_v6 = vld [vmem:[%s1227_s13 + $0x138] sm:$0xff]  ;;  %v293_v7 = vpack.c.bf16 %v261_v4, %v259_v3  ;;  %v263_v9 = vld [vmem:[%s1227_s13 + $0x120] sm:$0xff] }
  0x1d   : > { %v296_v8 = vpack.c.bf16 %v266_v6, %v264_v5  ;;  %v265_v10 = vld [vmem:[%s1227_s13 + $0x130] sm:$0xff]  ;;  %v268_v11 = vld [vmem:[%s1227_s13 + $0x148] sm:$0xff]  ;;  %v270_v12 = vld [vmem:[%s1227_s13 + $0x158] sm:$0xff] }
  0x1e   : > { %v295_v13 = vpack.c.bf16 %v265_v10, %v263_v9  ;;  %v298_v14 = vpack.c.bf16 %v270_v12, %v268_v11  ;;  %v267_v15 = vld [vmem:[%s1227_s13 + $0x140] sm:$0xff]  ;;  %v273_v22 = vld [vmem:[%s1227_s13 + $0x170] sm:$0xff]  ;;  %v1150_v28 = vld [vmem:[%s1438_s2 + $0x8] sm:$0xff]  }
  0x1f   : > { %971 = vmatpush3.bf16.msra.mxu0 %v1146_v16  ;;  %v269_v16 = vld [vmem:[%s1227_s13 + $0x150] sm:$0xff]  ;;  %v271_v21 = vld [vmem:[%s1227_s13 + $0x160] sm:$0xff] }
  0x20   : > { %972 = vmatprep.subr.bf16.mxu0 %v1147_v17  ;;  %v272_v17 = vld [vmem:[%s1227_s13 + $0x168] sm:$0xff]  ;;  %v297_v19 = vpack.c.bf16 %v269_v16, %v267_v15  ;;  %v1149_v25 = vld [vmem:[%s1438_s2] sm:$0xff]  }
  0x21   : > { %1068 = vmatpush3.bf16.msra.mxu1 %v1149_v25 }
  0x22   : > { %1069 = vmatprep.subr.bf16.mxu1 %v1159_v27 }
  0x23   : > { %973 = vmatpush3.bf16.msra.mxu0 %v1148_v18  ;;  %v274_v18 = vld [vmem:[%s1227_s13 + $0x178] sm:$0xff] }
  0x24   : > { %v300_v20 = vpack.c.bf16 %v274_v18, %v272_v17 }
  0x25   : > { %1070 = vmatpush3.bf16.msra.mxu1 %v1150_v28 }
  0x26   : > { %464 = vmatmul.mubr.bf16.vlgmr.msra.gmra.mrb[0].mxu0 %v277_v23  ;;  %v276_v23 = vld [vmem:[%s1227_s13 + $0x188] sm:$0xff] }
  0x27   : > { %471 = vmatprep.mubr.bf16.mxu0 %v280_v24  ;;  %v299_v24 = vpack.c.bf16 %v273_v22, %v271_v21  ;;  %v302_v26 = vpack.c.bf16 %v276_v23, %v276_v23 }
  0x2e   : > { %472 = vmatmul.mubr.bf16.gmra.mrb[4].mxu0 %v279_v29  ;;  %v275_v29 = vld [vmem:[%s1227_s13 + $0x180] sm:$0xff] }
  0x2f   : > { %479 = vmatprep.mubr.bf16.mxu0 %v282_v30  ;;  %v301_v30 = vpack.c.bf16 %v275_v29, %v275_v29 }
  0x36   : > { %480 = vmatmul.mubr.bf16.gmra.mrb[8].mxu0 %v281_v35 }
  0x37   : > { %487 = vmatprep.mubr.bf16.mxu0 %v284_v36 }
  0x3e   : > { %488 = vmatmul.mubr.bf16.gmra.mrb[12].mxu0 %v283_v41 }
  0x3f   : > { %495 = vmatprep.mubr.bf16.mxu0 %v286_v42 }
  0x46   : > { %496 = vmatmul.mubr.bf16.gmra.mrb[16].mxu0 %v285_v47 }
  0x47   : > { %503 = vmatprep.mubr.bf16.mxu0 %v288_v48 }
  0x4e   : > { %504 = vmatmul.mubr.bf16.gmra.mrb[20].mxu0 %v287_v53 }
  0x4f   : > { %511 = vmatprep.mubr.bf16.mxu0 %v290_v54 }
  0x56   : > { %512 = vmatmul.mubr.bf16.gmra.mrb[24].mxu0 %v289_v59 }
  0x57   : > { %519 = vmatprep.mubr.bf16.mxu0 %v292_v60 }
  0x5e   : > { %520 = vmatmul.mubr.bf16.gmra.mrb[28].mxu0 %v291_v1 }
  0x5f   : > { %527 = vmatprep.mubr.bf16.mxu0 %v294_v2 }
  0x66   : > { %528 = vmatmul.mubr.bf16.gmra.mrb[32].mxu0 %v293_v7 }
  0x67   : > { %535 = vmatprep.mubr.bf16.mxu0 %v296_v8 }
  0x6e   : > { %536 = vmatmul.mubr.bf16.gmra.mrb[36].mxu0 %v295_v13 }
  0x6f   : > { %543 = vmatprep.mubr.bf16.mxu0 %v298_v14 }
  0x76   : > { %544 = vmatmul.mubr.bf16.gmra.mrb[40].mxu0 %v297_v19 }
  0x77   : > { %551 = vmatprep.mubr.bf16.mxu0 %v300_v20 }
  0x7e   : > { %552 = vmatmul.mubr.bf16.gmra.mrb[44].mxu0 %v299_v24 }
  0x7f   : > { %559 = vmatprep.mubr.bf16.mxu0 %v302_v26 }
  0x86   : > { %560 = vmatmul.mubr.bf16.gmra.mrb[48].mxu0 %v301_v30 }
  0xf9   : > { %v974_v31 = vpop.f32.mrb[0].mxu0 }
  0xfa   : > { %v975_v32 = vpop.f32.mrb[1].mxu0 }
  0xfb   : > { %v976_v33 = vadd.f32 %v975_v32, %v974_v31  ;;  %v977_v34 = vpop.f32.mrb[2].mxu0 }
  0xfc   : > { %v978_v35 = vpop.f32.mrb[3].mxu0 }
  0xfd   : > { %v979_v36 = vadd.f32 %v978_v35, %v977_v34  ;;  %v567_v37 = vmax.f32 %v976_v33, 0.0 }
  0xff   : > { %v568_v38 = vmax.f32 %v979_v36, 0.0 }
 0x101   : > { %v592_v39 = vpack.c.bf16 %v568_v38, %v567_v37  ;;  %v980_v40 = vpop.f32.mrb[4].mxu0 }
 0x102   : > { %v981_v41 = vpop.f32.mrb[5].mxu0 }
 0x103   : > { %v982_v42 = vadd.f32 %v981_v41, %v980_v40  ;;  %v983_v43 = vpop.f32.mrb[6].mxu0  ;;  %1072 = vmatmul.mubr.msk.bf16.vlgmr.msra.gmra.mrb[0].mxu1 %vm646_vm1, %v592_v39 }
 0x104   : > { %v984_v44 = vpop.f32.mrb[7].mxu0  ;;  %1075 = vmatprep.mubr.msk.bf16.mxu1 %vm1160_vm0, %v1159_v27 }
 0x105   : > { %v985_v45 = vadd.f32 %v984_v44, %v983_v43  ;;  %v569_v46 = vmax.f32 %v982_v42, 0.0 }
 0x107   : > { %v570_v47 = vmax.f32 %v985_v45, 0.0 }
 0x109   : > { %v593_v48 = vpack.c.bf16 %v570_v47, %v569_v46  ;;  %v986_v49 = vpop.f32.mrb[8].mxu0 }
 0x10a   : > { %v987_v50 = vpop.f32.mrb[9].mxu0 }
 0x10b   : > { %v988_v51 = vadd.f32 %v987_v50, %v986_v49  ;;  %v989_v52 = vpop.f32.mrb[10].mxu0  ;;  %1076 = vmatmul.mubr.msk.bf16.gmra.mrb[4].mxu1 %vm646_vm1, %v593_v48 }
 0x10c   : > { %v990_v53 = vpop.f32.mrb[11].mxu0  ;;  %1079 = vmatprep.mubr.msk.bf16.mxu1 %vm1160_vm0, %v1159_v27 }
 0x10d   : > { %v991_v54 = vadd.f32 %v990_v53, %v989_v52  ;;  %v571_v55 = vmax.f32 %v988_v51, 0.0 }
 0x10f   : > { %v572_v56 = vmax.f32 %v991_v54, 0.0 }
 0x111   : > { %v594_v57 = vpack.c.bf16 %v572_v56, %v571_v55  ;;  %v992_v58 = vpop.f32.mrb[12].mxu0 }
 0x112   : > { %v993_v59 = vpop.f32.mrb[13].mxu0 }
 0x113   : > { %v994_v60 = vadd.f32 %v993_v59, %v992_v58  ;;  %v995_v61 = vpop.f32.mrb[14].mxu0  ;;  %1080 = vmatmul.mubr.msk.bf16.gmra.mrb[8].mxu1 %vm646_vm1, %v594_v57 }
 0x114   : > { %v996_v62 = vpop.f32.mrb[15].mxu0  ;;  %1083 = vmatprep.mubr.msk.bf16.mxu1 %vm1160_vm0, %v1159_v27 }
 0x115   : > { %v997_v63 = vadd.f32 %v996_v62, %v995_v61  ;;  %v573_v0 = vmax.f32 %v994_v60, 0.0 }
 0x117   : > { %v574_v1 = vmax.f32 %v997_v63, 0.0 }
 0x119   : > { %v595_v2 = vpack.c.bf16 %v574_v1, %v573_v0  ;;  %v998_v3 = vpop.f32.mrb[16].mxu0 }
 0x11a   : > { %v999_v4 = vpop.f32.mrb[17].mxu0 }
 0x11b   : > { %v1000_v5 = vadd.f32 %v999_v4, %v998_v3  ;;  %v1001_v6 = vpop.f32.mrb[18].mxu0  ;;  %1084 = vmatmul.mubr.msk.bf16.gmra.mrb[12].mxu1 %vm646_vm1, %v595_v2 }
 0x11c   : > { %v1002_v7 = vpop.f32.mrb[19].mxu0  ;;  %1087 = vmatprep.mubr.msk.bf16.mxu1 %vm1160_vm0, %v1159_v27 }
 0x11d   : > { %v1003_v8 = vadd.f32 %v1002_v7, %v1001_v6  ;;  %v575_v9 = vmax.f32 %v1000_v5, 0.0 }
 0x11f   : > { %v576_v10 = vmax.f32 %v1003_v8, 0.0 }
 0x121   : > { %v596_v11 = vpack.c.bf16 %v576_v10, %v575_v9  ;;  %v1004_v12 = vpop.f32.mrb[20].mxu0 }
 0x122   : > { %v1005_v13 = vpop.f32.mrb[21].mxu0 }
 0x123   : > { %v1006_v14 = vadd.f32 %v1005_v13, %v1004_v12  ;;  %v1007_v15 = vpop.f32.mrb[22].mxu0  ;;  %1088 = vmatmul.mubr.msk.bf16.gmra.mrb[16].mxu1 %vm646_vm1, %v596_v11 }
 0x124   : > { %v1008_v16 = vpop.f32.mrb[23].mxu0  ;;  %1091 = vmatprep.mubr.msk.bf16.mxu1 %vm1160_vm0, %v1159_v27 }
 0x125   : > { %v1009_v17 = vadd.f32 %v1008_v16, %v1007_v15  ;;  %v577_v18 = vmax.f32 %v1006_v14, 0.0 }
 0x127   : > { %v578_v19 = vmax.f32 %v1009_v17, 0.0 }
 0x129   : > { %v597_v20 = vpack.c.bf16 %v578_v19, %v577_v18  ;;  %v1010_v21 = vpop.f32.mrb[24].mxu0  ;;  %v609_v19 = vld [vmem:[%s1351_s11] sm:$0xff] }
 0x12a   : > { %v1011_v22 = vpop.f32.mrb[25].mxu0 }
 0x12b   : > { %v1012_v23 = vadd.f32 %v1011_v22, %v1010_v21  ;;  %v1013_v24 = vpop.f32.mrb[26].mxu0  ;;  %1092 = vmatmul.mubr.msk.bf16.gmra.mrb[20].mxu1 %vm646_vm1, %v597_v20  ;;  %v610_v20 = vld [vmem:[%s1351_s11 + $0x8] sm:$0xff] }
 0x12c   : > { %v1014_v25 = vpop.f32.mrb[27].mxu0  ;;  %1095 = vmatprep.mubr.msk.bf16.mxu1 %vm1160_vm0, %v1159_v27 }
 0x12d   : > { %v1015_v26 = vadd.f32 %v1014_v25, %v1013_v24  ;;  %v579_v28 = vmax.f32 %v1012_v23, 0.0 }
 0x12f   : > { %v580_v29 = vmax.f32 %v1015_v26, 0.0  ;;  %v611_v26 = vld [vmem:[%s1351_s11 + $0x10] sm:$0xff] }
 0x131   : > { %v598_v30 = vpack.c.bf16 %v580_v29, %v579_v28  ;;  %v1016_v31 = vpop.f32.mrb[28].mxu0  ;;  %v612_v29 = vld [vmem:[%s1351_s11 + $0x18] sm:$0xff] }
 0x132   : > { %v1017_v32 = vpop.f32.mrb[29].mxu0 }
 0x133   : > { %v1018_v33 = vadd.f32 %v1017_v32, %v1016_v31  ;;  %v1019_v34 = vpop.f32.mrb[30].mxu0  ;;  %1096 = vmatmul.mubr.msk.bf16.gmra.mrb[24].mxu1 %vm646_vm1, %v598_v30 }
 0x134   : > { %v1020_v35 = vpop.f32.mrb[31].mxu0  ;;  %1099 = vmatprep.mubr.msk.bf16.mxu1 %vm1160_vm0, %v1159_v27 }
 0x135   : > { %v1021_v36 = vadd.f32 %v1020_v35, %v1019_v34  ;;  %v581_v37 = vmax.f32 %v1018_v33, 0.0  ;;  %v613_v35 = vld [vmem:[%s1351_s11 + $0x20] sm:$0xff] }
 0x137   : > { %v582_v38 = vmax.f32 %v1021_v36, 0.0 }
 0x139   : > { %v599_v39 = vpack.c.bf16 %v582_v38, %v581_v37  ;;  %v1022_v40 = vpop.f32.mrb[32].mxu0  ;;  %v614_v37 = vld [vmem:[%s1351_s11 + $0x28] sm:$0xff] }
 0x13a   : > { %v1023_v41 = vpop.f32.mrb[33].mxu0 }
 0x13b   : > { %v1024_v42 = vadd.f32 %v1023_v41, %v1022_v40  ;;  %v1025_v43 = vpop.f32.mrb[34].mxu0  ;;  %1100 = vmatmul.mubr.msk.bf16.gmra.mrb[28].mxu1 %vm646_vm1, %v599_v39 }
 0x13c   : > { %v1026_v44 = vpop.f32.mrb[35].mxu0  ;;  %1103 = vmatprep.mubr.msk.bf16.mxu1 %vm1160_vm0, %v1159_v27 }
 0x13d   : > { %v1027_v45 = vadd.f32 %v1026_v44, %v1025_v43  ;;  %v583_v46 = vmax.f32 %v1024_v42, 0.0  ;;  %v615_v43 = vld [vmem:[%s1351_s11 + $0x30] sm:$0xff] }
 0x13f   : > { %v584_v47 = vmax.f32 %v1027_v45, 0.0  ;;  %v616_v45 = vld [vmem:[%s1351_s11 + $0x38] sm:$0xff] }
 0x141   : > { %v600_v48 = vpack.c.bf16 %v584_v47, %v583_v46  ;;  %v1028_v49 = vpop.f32.mrb[36].mxu0 }
 0x142   : > { %v1029_v50 = vpop.f32.mrb[37].mxu0 }
 0x143   : > { %v1030_v51 = vadd.f32 %v1029_v50, %v1028_v49  ;;  %v1031_v52 = vpop.f32.mrb[38].mxu0  ;;  %1104 = vmatmul.mubr.msk.bf16.gmra.mrb[32].mxu1 %vm646_vm1, %v600_v48 }
 0x144   : > { %v1032_v53 = vpop.f32.mrb[39].mxu0  ;;  %1107 = vmatprep.mubr.msk.bf16.mxu1 %vm1160_vm0, %v1159_v27 }
 0x145   : > { %v1033_v54 = vadd.f32 %v1032_v53, %v1031_v52  ;;  %v585_v55 = vmax.f32 %v1030_v51, 0.0  ;;  %v617_v51 = vld [vmem:[%s1351_s11 + $0x40] sm:$0xff]  ;;  %v618_v53 = vld [vmem:[%s1351_s11 + $0x48] sm:$0xff] }
 0x147   : > { %v586_v56 = vmax.f32 %v1033_v54, 0.0 }
 0x149   : > { %v601_v57 = vpack.c.bf16 %v586_v56, %v585_v55  ;;  %v1034_v58 = vpop.f32.mrb[40].mxu0 }
 0x14a   : > { %v1035_v59 = vpop.f32.mrb[41].mxu0 }
 0x14b   : > { %v1036_v60 = vadd.f32 %v1035_v59, %v1034_v58  ;;  %v1037_v61 = vpop.f32.mrb[42].mxu0  ;;  %1108 = vmatmul.mubr.msk.bf16.gmra.mrb[36].mxu1 %vm646_vm1, %v601_v57  ;;  %v619_v59 = vld [vmem:[%s1351_s11 + $0x50] sm:$0xff] }
 0x14c   : > { %v1038_v62 = vpop.f32.mrb[43].mxu0  ;;  %1111 = vmatprep.mubr.msk.bf16.mxu1 %vm1160_vm0, %v1159_v27 }
 0x14d   : > { %v1039_v63 = vadd.f32 %v1038_v62, %v1037_v61  ;;  %v587_v0 = vmax.f32 %v1036_v60, 0.0  ;;  %v620_v61 = vld [vmem:[%s1351_s11 + $0x58] sm:$0xff] }
 0x14f   : > { %v588_v1 = vmax.f32 %v1039_v63, 0.0 }
 0x151   : > { %v602_v2 = vpack.c.bf16 %v588_v1, %v587_v0  ;;  %v1040_v3 = vpop.f32.mrb[44].mxu0 }
 0x152   : > { %v1041_v4 = vpop.f32.mrb[45].mxu0 }
 0x153   : > { %v1042_v5 = vadd.f32 %v1041_v4, %v1040_v3  ;;  %v1043_v6 = vpop.f32.mrb[46].mxu0  ;;  %1112 = vmatmul.mubr.msk.bf16.gmra.mrb[40].mxu1 %vm646_vm1, %v602_v2  ;;  %v621_v3 = vld [vmem:[%s1351_s11 + $0x60] sm:$0xff] }
 0x154   : > { %v1044_v7 = vpop.f32.mrb[47].mxu0  ;;  %1115 = vmatprep.mubr.msk.bf16.mxu1 %vm1160_vm0, %v1159_v27 }
 0x155   : > { %v1045_v8 = vadd.f32 %v1044_v7, %v1043_v6  ;;  %v589_v9 = vmax.f32 %v1042_v5, 0.0  ;;  %v622_v5 = vld [vmem:[%s1351_s11 + $0x68] sm:$0xff] }
 0x157   : > { %v590_v10 = vmax.f32 %v1045_v8, 0.0 }
 0x159   : > { %v603_v11 = vpack.c.bf16 %v590_v10, %v589_v9  ;;  %v1046_v12 = vpop.f32.mrb[48].mxu0 }
 0x15a   : > { %v1047_v13 = vpop.f32.mrb[49].mxu0 }
 0x15b   : > { %v1048_v14 = vadd.f32 %v1047_v13, %v1046_v12  ;;  %v1049_v15 = vpop.f32.mrb[50].mxu0  ;;  %1116 = vmatmul.mubr.msk.bf16.gmra.mrb[44].mxu1 %vm646_vm1, %v603_v11  ;;  %v623_v11 = vld [vmem:[%s1351_s11 + $0x70] sm:$0xff]  ;;  %v624_v13 = vld [vmem:[%s1351_s11 + $0x78] sm:$0xff] }
 0x15c   : > { %v1050_v16 = vpop.f32.mrb[51].mxu0  ;;  %1119 = vmatprep.mubr.msk.bf16.mxu1 %vm1160_vm0, %v1159_v27 }
 0x15d   : > { %v591_v17 = vmax.f32 %v1048_v14, 0.0 }
 0x15f   : > { %v604_v18 = vpack.c.bf16 %v591_v17, %v591_v17 }
 0x163   : > { %1120 = vmatmul.mubr.msk.bf16.gmra.mrb[48].mxu1 %vm646_vm1, %v604_v18 }
 0x1d6   : > { %v720_v27 = vpop.f32.mrb[0].mxu1 }
 0x1d7   : > { %v721_v21 = vadd.f32 %v720_v27, %v609_v19  ;;  %v1073_v22 = vpop.f32.mrb[1].mxu1  ;;  %v625_v19 = vld [vmem:[%s1351_s11 + $0x80] sm:$0xff] }
 0x1d8   : > { %v723_v23 = vpop.f32.mrb[2].mxu1 }
 0x1d9   : > { %822 = vst.msk [vmem:[%s1357_s14] sm:$0xff] %vm646_vm1, %v721_v21  ;;  %v724_v24 = vadd.f32 %v723_v23, %v610_v20  ;;  %v1074_v25 = vpop.f32.mrb[3].mxu1  ;;  %v626_v20 = vld [vmem:[%s1351_s11 + $0x88] sm:$0xff] }
 0x1db   : > { %823 = vst.msk [vmem:[%s1357_s14 + $0x8] sm:$0xff] %vm646_vm1, %v724_v24 }
 0x1de   : > { %v728_v28 = vpop.f32.mrb[4].mxu1 }
 0x1df   : > { %v729_v30 = vadd.f32 %v728_v28, %v611_v26  ;;  %v1077_v31 = vpop.f32.mrb[5].mxu1  ;;  %v627_v26 = vld [vmem:[%s1351_s11 + $0x90] sm:$0xff] }
 0x1e0   : > { %v731_v32 = vpop.f32.mrb[6].mxu1 }
 0x1e1   : > { %824 = vst.msk [vmem:[%s1357_s14 + $0x10] sm:$0xff] %vm646_vm1, %v729_v30  ;;  %v732_v33 = vadd.f32 %v731_v32, %v612_v29  ;;  %v1078_v34 = vpop.f32.mrb[7].mxu1  ;;  %v628_v29 = vld [vmem:[%s1351_s11 + $0x98] sm:$0xff] }
 0x1e3   : > { %825 = vst.msk [vmem:[%s1357_s14 + $0x18] sm:$0xff] %vm646_vm1, %v732_v33 }
 0x1e6   : > { %v736_v36 = vpop.f32.mrb[8].mxu1 }
 0x1e7   : > { %v737_v38 = vadd.f32 %v736_v36, %v613_v35  ;;  %v1081_v39 = vpop.f32.mrb[9].mxu1  ;;  %v629_v35 = vld [vmem:[%s1351_s11 + $0xa0] sm:$0xff] }
 0x1e8   : > { %v739_v40 = vpop.f32.mrb[10].mxu1 }
 0x1e9   : > { %826 = vst.msk [vmem:[%s1357_s14 + $0x20] sm:$0xff] %vm646_vm1, %v737_v38  ;;  %v740_v41 = vadd.f32 %v739_v40, %v614_v37  ;;  %v1082_v42 = vpop.f32.mrb[11].mxu1  ;;  %v630_v37 = vld [vmem:[%s1351_s11 + $0xa8] sm:$0xff] }
 0x1eb   : > { %827 = vst.msk [vmem:[%s1357_s14 + $0x28] sm:$0xff] %vm646_vm1, %v740_v41 }
 0x1ee   : > { %v744_v44 = vpop.f32.mrb[12].mxu1 }
 0x1ef   : > { %v745_v46 = vadd.f32 %v744_v44, %v615_v43  ;;  %v1085_v47 = vpop.f32.mrb[13].mxu1  ;;  %v631_v43 = vld [vmem:[%s1351_s11 + $0xb0] sm:$0xff] }
 0x1f0   : > { %v747_v48 = vpop.f32.mrb[14].mxu1 }
 0x1f1   : > { %828 = vst.msk [vmem:[%s1357_s14 + $0x30] sm:$0xff] %vm646_vm1, %v745_v46  ;;  %v748_v49 = vadd.f32 %v747_v48, %v616_v45  ;;  %v1086_v50 = vpop.f32.mrb[15].mxu1  ;;  %v632_v45 = vld [vmem:[%s1351_s11 + $0xb8] sm:$0xff] }
 0x1f3   : > { %829 = vst.msk [vmem:[%s1357_s14 + $0x38] sm:$0xff] %vm646_vm1, %v748_v49 }
 0x1f6   : > { %v752_v52 = vpop.f32.mrb[16].mxu1 }
 0x1f7   : > { %v753_v54 = vadd.f32 %v752_v52, %v617_v51  ;;  %v1089_v55 = vpop.f32.mrb[17].mxu1  ;;  %v633_v51 = vld [vmem:[%s1351_s11 + $0xc0] sm:$0xff] }
 0x1f8   : > { %v755_v56 = vpop.f32.mrb[18].mxu1 }
 0x1f9   : > { %830 = vst.msk [vmem:[%s1357_s14 + $0x40] sm:$0xff] %vm646_vm1, %v753_v54  ;;  %v756_v57 = vadd.f32 %v755_v56, %v618_v53  ;;  %v1090_v58 = vpop.f32.mrb[19].mxu1 }
 0x1fb   : > { %831 = vst.msk [vmem:[%s1357_s14 + $0x48] sm:$0xff] %vm646_vm1, %v756_v57 }
 0x1fe   : > { %v760_v60 = vpop.f32.mrb[20].mxu1 }
 0x1ff   : > { %v761_v62 = vadd.f32 %v760_v60, %v619_v59  ;;  %v1093_v63 = vpop.f32.mrb[21].mxu1 }
 0x200   : > { %v763_v0 = vpop.f32.mrb[22].mxu1 }
 0x201   : > { %832 = vst.msk [vmem:[%s1357_s14 + $0x50] sm:$0xff] %vm646_vm1, %v761_v62  ;;  %v764_v1 = vadd.f32 %v763_v0, %v620_v61  ;;  %v1094_v2 = vpop.f32.mrb[23].mxu1 }
 0x203   : > { %833 = vst.msk [vmem:[%s1357_s14 + $0x58] sm:$0xff] %vm646_vm1, %v764_v1 }
 0x206   : > { %v768_v4 = vpop.f32.mrb[24].mxu1 }
 0x207   : > { %v769_v6 = vadd.f32 %v768_v4, %v621_v3  ;;  %v1097_v7 = vpop.f32.mrb[25].mxu1 }
 0x208   : > { %v771_v8 = vpop.f32.mrb[26].mxu1 }
 0x209   : > { %834 = vst.msk [vmem:[%s1357_s14 + $0x60] sm:$0xff] %vm646_vm1, %v769_v6  ;;  %v772_v9 = vadd.f32 %v771_v8, %v622_v5  ;;  %v1098_v10 = vpop.f32.mrb[27].mxu1 }
 0x20b   : > { %835 = vst.msk [vmem:[%s1357_s14 + $0x68] sm:$0xff] %vm646_vm1, %v772_v9 }
 0x20e   : > { %v776_v12 = vpop.f32.mrb[28].mxu1 }
 0x20f   : > { %v777_v14 = vadd.f32 %v776_v12, %v623_v11  ;;  %v1101_v15 = vpop.f32.mrb[29].mxu1 }
 0x210   : > { %v779_v16 = vpop.f32.mrb[30].mxu1 }
 0x211   : > { %836 = vst.msk [vmem:[%s1357_s14 + $0x70] sm:$0xff] %vm646_vm1, %v777_v14  ;;  %v780_v17 = vadd.f32 %v779_v16, %v624_v13  ;;  %v1102_v18 = vpop.f32.mrb[31].mxu1 }
 0x213   : > { %837 = vst.msk [vmem:[%s1357_s14 + $0x78] sm:$0xff] %vm646_vm1, %v780_v17 }
 0x216   : > { %v784_v27 = vpop.f32.mrb[32].mxu1 }
 0x217   : > { %v785_v21 = vadd.f32 %v784_v27, %v625_v19  ;;  %v1105_v22 = vpop.f32.mrb[33].mxu1 }
 0x218   : > { %v787_v23 = vpop.f32.mrb[34].mxu1 }
 0x219   : > { %838 = vst.msk [vmem:[%s1357_s14 + $0x80] sm:$0xff] %vm646_vm1, %v785_v21  ;;  %v788_v24 = vadd.f32 %v787_v23, %v626_v20  ;;  %v1106_v25 = vpop.f32.mrb[35].mxu1 }
 0x21b   : > { %839 = vst.msk [vmem:[%s1357_s14 + $0x88] sm:$0xff] %vm646_vm1, %v788_v24 }
 0x21e   : > { %v792_v28 = vpop.f32.mrb[36].mxu1 }
 0x21f   : > { %v793_v30 = vadd.f32 %v792_v28, %v627_v26  ;;  %v1109_v31 = vpop.f32.mrb[37].mxu1 }
 0x220   : > { %v795_v32 = vpop.f32.mrb[38].mxu1 }
 0x221   : > { %840 = vst.msk [vmem:[%s1357_s14 + $0x90] sm:$0xff] %vm646_vm1, %v793_v30  ;;  %v796_v33 = vadd.f32 %v795_v32, %v628_v29  ;;  %v1110_v34 = vpop.f32.mrb[39].mxu1 }
 0x223   : > { %841 = vst.msk [vmem:[%s1357_s14 + $0x98] sm:$0xff] %vm646_vm1, %v796_v33 }
 0x226   : > { %v800_v36 = vpop.f32.mrb[40].mxu1 }
 0x227   : > { %v801_v38 = vadd.f32 %v800_v36, %v629_v35  ;;  %v1113_v39 = vpop.f32.mrb[41].mxu1 }
 0x228   : > { %v803_v40 = vpop.f32.mrb[42].mxu1 }
 0x229   : > { %842 = vst.msk [vmem:[%s1357_s14 + $0xa0] sm:$0xff] %vm646_vm1, %v801_v38  ;;  %v804_v41 = vadd.f32 %v803_v40, %v630_v37  ;;  %v1114_v42 = vpop.f32.mrb[43].mxu1 }
 0x22b   : > { %843 = vst.msk [vmem:[%s1357_s14 + $0xa8] sm:$0xff] %vm646_vm1, %v804_v41 }
 0x22e   : > { %v808_v44 = vpop.f32.mrb[44].mxu1 }
 0x22f   : > { %v809_v46 = vadd.f32 %v808_v44, %v631_v43  ;;  %v1117_v47 = vpop.f32.mrb[45].mxu1 }
 0x230   : > { %v811_v48 = vpop.f32.mrb[46].mxu1 }
 0x231   : > { %844 = vst.msk [vmem:[%s1357_s14 + $0xb0] sm:$0xff] %vm646_vm1, %v809_v46  ;;  %v812_v49 = vadd.f32 %v811_v48, %v632_v45  ;;  %v1118_v50 = vpop.f32.mrb[47].mxu1 }
 0x233   : > { %845 = vst.msk [vmem:[%s1357_s14 + $0xb8] sm:$0xff] %vm646_vm1, %v812_v49 }
 0x236   : > { %v816_v52 = vpop.f32.mrb[48].mxu1 }
 0x237   : > { %v817_v53 = vadd.f32 %v816_v52, %v633_v51  ;;  %v1121_v54 = vpop.f32.mrb[49].mxu1 }
 0x238   : > { %v819_v55 = vpop.f32.mrb[50].mxu1 }
 0x239   : > { %846 = vst.msk [vmem:[%s1357_s14 + $0xc0] sm:$0xff] %vm646_vm1, %v817_v53  ;;  %v1122_v56 = vpop.f32.mrb[51].mxu1 }
 0x23a PF: > { %s14_s15 = sadd.s32 1, %s1157_s15  }
 0x23b   : > { %p11_p4 = scmp.ge.s32.totalorder %s14_s15, 11  }
 0x23d   :  { %13 = sbr.rel (!%p11_p4) target bundleno = 1 (0x1), region = 69 }

// kernel: amdim_forward.21
= control target key start
LH: loop header
LB: loop body
LE: loop exit
PB: predicated region body
PF: predicated region fallthrough
CT: control target
= control target key end

     0   :  { %s940_s12 = smov 0   ;;  %s1238_s0 = inlined_call_operand.vmem [shape: f32[1800,32], index: 0, kind: input, shape index: {}]   ;;  %s1239_s1 = inlined_call_operand.vmem [shape: bf16[32,32], index: 1, kind: input, shape index: {}]   ;;  %s1240_s2 = inlined_call_operand.vmem [shape: bf16[32,32], index: 2, kind: input, shape index: {}]   ;;  %s1241_s3 = inlined_call_operand.vmem [shape: f32[1800,32], index: 3, kind: output, shape index: {}]  }
   0x1 LB: > { %s715_s13 = sadd.s32 4294967295, %s916_s12   ;;  %p719_p0 = scmp.ge.s32.totalorder %s916_s12, 1  ;;  %s916_s12 = sphi %s940_s12, %s13_s12  }
   0x2   : > { %p138_p1 = scmp.lt.s32.totalorder %s916_s12, 10 }
   0x4   : > { %p139_p2 = pnand %p719_p0, %p138_p1 }
   0x5   : > { %v906_v0 = vld [vmem:[%s1239_s1] sm:$0xff] (!%p139_p2)   ;;  %v918_v1 = vmov (!%p139_p2), 0.0   ;;  %v907_v2 = vld [vmem:[%s1239_s1 + $0x8] sm:$0xff] (!%p139_p2)   ;;  %vm919_vm0 = vmmov (!%p139_p2), 0   ;;  %s162_s18 = smul.u32 (!%p139_p2), 25, %s715_s13  ;;  %vm229_vm1 = vcmask (!%p139_p2), 261120  }
   0x6   : > { %142 = sbr.rel (%p139_p2) target bundleno = 548 (0x224), region = 32  ;;  %784 = vmatprep.subr.bf16.mxu0 (!%p139_p2), %v918_v1  ;;  %840 = vmatprep.subr.bf16.mxu1 (!%p139_p2), %v918_v1  ;;  %v908_v38 = vld [vmem:[%s1240_s2] sm:$0xff] (!%p139_p2)   ;;  %v909_v40 = vld [vmem:[%s1240_s2 + $0x8] sm:$0xff] (!%p139_p2)  }
   0x7   : > { %785 = vmatpush3.bf16.msra.mxu0 (!%p139_p2), %v906_v0  ;;  %788 = vmatprep.mubr.msk.bf16.mxu0 (!%p139_p2), %vm919_vm0, %v918_v1  ;;  %p163_p3 = scmp.lt.s32.totalorder (!%p139_p2), %s162_s18, 224 }
   0x8   : > { %786 = vmatprep.subr.bf16.mxu0 (!%p139_p2), %v918_v1  ;;  %844 = vmatprep.mubr.msk.bf16.mxu1 (!%p139_p2), %vm919_vm0, %v918_v1 }
   0x9   : > { %841 = vmatpush3.bf16.msra.mxu1 (!%p139_p2), %v908_v38 }
   0xa   : > { %842 = vmatprep.subr.bf16.mxu1 (!%p139_p2), %v918_v1 }
   0xb   : > { %787 = vmatpush3.bf16.msra.mxu0 (!%p139_p2), %v907_v2 }
   0xd   : > { %s1243_s18 = smov (!%p163_p3, %s162_s18), 224  ;;  %843 = vmatpush3.bf16.msra.mxu1 %v909_v40 }
   0xe   : > { %s720_s19 = sshll.u32 %s1243_s18, 3 }
   0xf   : > { %s969_s22 = scalar_lea.vmem %s1238_s0, %s720_s19  ;;  %s1158_s29 = scalar_lea.vmem %s1241_s3, %s720_s19 }
  0x10   : > { %v972_v3 = vld [vmem:[%s969_s22] sm:$0xff]  ;;  %v975_v4 = vld [vmem:[%s969_s22 + $0x8] sm:$0xff]  ;;  %v983_v6 = vld [vmem:[%s969_s22 + $0x10] sm:$0xff] }
  0x11   : > { %v200_v5 = vpack.c.bf16 %v975_v4, %v972_v3  ;;  %v986_v7 = vld [vmem:[%s969_s22 + $0x18] sm:$0xff]  ;;  %v994_v9 = vld [vmem:[%s969_s22 + $0x20] sm:$0xff]  ;;  %v997_v10 = vld [vmem:[%s969_s22 + $0x28] sm:$0xff] }
  0x12   : > { %v201_v8 = vpack.c.bf16 %v986_v7, %v983_v6  ;;  %v202_v11 = vpack.c.bf16 %v997_v10, %v994_v9  ;;  %v1005_v12 = vld [vmem:[%s969_s22 + $0x30] sm:$0xff]  ;;  %v1008_v13 = vld [vmem:[%s969_s22 + $0x38] sm:$0xff]  ;;  %v1016_v15 = vld [vmem:[%s969_s22 + $0x40] sm:$0xff] }
  0x13   : > { %789 = vmatmul.mubr.msk.bf16.vlgmr.msra.gmra.mrb[0].mxu0 %vm229_vm1, %v200_v5  ;;  %v203_v14 = vpack.c.bf16 %v1008_v13, %v1005_v12  ;;  %v1019_v16 = vld [vmem:[%s969_s22 + $0x48] sm:$0xff]  ;;  %v1027_v18 = vld [vmem:[%s969_s22 + $0x50] sm:$0xff]  ;;  %v1030_v19 = vld [vmem:[%s969_s22 + $0x58] sm:$0xff] }
  0x14   : > { %792 = vmatprep.mubr.msk.bf16.mxu0 %vm919_vm0, %v918_v1  ;;  %v204_v17 = vpack.c.bf16 %v1019_v16, %v1016_v15  ;;  %v205_v20 = vpack.c.bf16 %v1030_v19, %v1027_v18  ;;  %v1038_v21 = vld [vmem:[%s969_s22 + $0x60] sm:$0xff]  ;;  %v1041_v22 = vld [vmem:[%s969_s22 + $0x68] sm:$0xff]  ;;  %v1049_v24 = vld [vmem:[%s969_s22 + $0x70] sm:$0xff] }
  0x15   : > { %v206_v23 = vpack.c.bf16 %v1041_v22, %v1038_v21  ;;  %v1052_v25 = vld [vmem:[%s969_s22 + $0x78] sm:$0xff]  ;;  %v1060_v27 = vld [vmem:[%s969_s22 + $0x80] sm:$0xff]  ;;  %v1063_v28 = vld [vmem:[%s969_s22 + $0x88] sm:$0xff] }
  0x16   : > { %v207_v26 = vpack.c.bf16 %v1052_v25, %v1049_v24  ;;  %v208_v29 = vpack.c.bf16 %v1063_v28, %v1060_v27  ;;  %v1071_v30 = vld [vmem:[%s969_s22 + $0x90] sm:$0xff]  ;;  %v1074_v31 = vld [vmem:[%s969_s22 + $0x98] sm:$0xff]  ;;  %v1082_v33 = vld [vmem:[%s969_s22 + $0xa0] sm:$0xff] }
  0x17   : > { %v209_v32 = vpack.c.bf16 %v1074_v31, %v1071_v30  ;;  %v1085_v34 = vld [vmem:[%s969_s22 + $0xa8] sm:$0xff]  ;;  %v1093_v36 = vld [vmem:[%s969_s22 + $0xb0] sm:$0xff]  ;;  %v1096_v37 = vld [vmem:[%s969_s22 + $0xb8] sm:$0xff] }
  0x18   : > { %v210_v35 = vpack.c.bf16 %v1085_v34, %v1082_v33  ;;  %v211_v39 = vpack.c.bf16 %v1096_v37, %v1093_v36  ;;  %v1111_v41 = vld [vmem:[%s969_s22 + $0xc0] sm:$0xff] }
  0x19   : > { %v212_v42 = vpack.c.bf16 %v1111_v41, %v1111_v41 }
  0x1b   : > { %793 = vmatmul.mubr.msk.bf16.gmra.mrb[4].mxu0 %vm229_vm1, %v201_v8 }
  0x1c   : > { %796 = vmatprep.mubr.msk.bf16.mxu0 %vm919_vm0, %v918_v1 }
  0x23   : > { %797 = vmatmul.mubr.msk.bf16.gmra.mrb[8].mxu0 %vm229_vm1, %v202_v11 }
  0x24   : > { %800 = vmatprep.mubr.msk.bf16.mxu0 %vm919_vm0, %v918_v1 }
  0x2b   : > { %801 = vmatmul.mubr.msk.bf16.gmra.mrb[12].mxu0 %vm229_vm1, %v203_v14 }
  0x2c   : > { %804 = vmatprep.mubr.msk.bf16.mxu0 %vm919_vm0, %v918_v1 }
  0x33   : > { %805 = vmatmul.mubr.msk.bf16.gmra.mrb[16].mxu0 %vm229_vm1, %v204_v17 }
  0x34   : > { %808 = vmatprep.mubr.msk.bf16.mxu0 %vm919_vm0, %v918_v1 }
  0x3b   : > { %809 = vmatmul.mubr.msk.bf16.gmra.mrb[20].mxu0 %vm229_vm1, %v205_v20 }
  0x3c   : > { %812 = vmatprep.mubr.msk.bf16.mxu0 %vm919_vm0, %v918_v1 }
  0x43   : > { %813 = vmatmul.mubr.msk.bf16.gmra.mrb[24].mxu0 %vm229_vm1, %v206_v23 }
  0x44   : > { %816 = vmatprep.mubr.msk.bf16.mxu0 %vm919_vm0, %v918_v1 }
  0x4b   : > { %817 = vmatmul.mubr.msk.bf16.gmra.mrb[28].mxu0 %vm229_vm1, %v207_v26 }
  0x4c   : > { %820 = vmatprep.mubr.msk.bf16.mxu0 %vm919_vm0, %v918_v1 }
  0x53   : > { %821 = vmatmul.mubr.msk.bf16.gmra.mrb[32].mxu0 %vm229_vm1, %v208_v29 }
  0x54   : > { %824 = vmatprep.mubr.msk.bf16.mxu0 %vm919_vm0, %v918_v1 }
  0x5b   : > { %825 = vmatmul.mubr.msk.bf16.gmra.mrb[36].mxu0 %vm229_vm1, %v209_v32 }
  0x5c   : > { %828 = vmatprep.mubr.msk.bf16.mxu0 %vm919_vm0, %v918_v1 }
  0x63   : > { %829 = vmatmul.mubr.msk.bf16.gmra.mrb[40].mxu0 %vm229_vm1, %v210_v35 }
  0x64   : > { %832 = vmatprep.mubr.msk.bf16.mxu0 %vm919_vm0, %v918_v1 }
  0x6b   : > { %833 = vmatmul.mubr.msk.bf16.gmra.mrb[44].mxu0 %vm229_vm1, %v211_v39 }
  0x6c   : > { %836 = vmatprep.mubr.msk.bf16.mxu0 %vm919_vm0, %v918_v1 }
  0x73   : > { %837 = vmatmul.mubr.msk.bf16.gmra.mrb[48].mxu0 %vm229_vm1, %v212_v42 }
  0xe6   : > { %v303_v43 = vpop.f32.mrb[0].mxu0 }
  0xe7   : > { %v790_v44 = vpop.f32.mrb[1].mxu0  ;;  %v405_v46 = vmax.f32 %v303_v43, 0.0 }
  0xe8   : > { %v306_v45 = vpop.f32.mrb[2].mxu0 }
  0xe9   : > { %v406_v47 = vmax.f32 %v306_v45, 0.0  ;;  %v791_v48 = vpop.f32.mrb[3].mxu0 }
  0xeb   : > { %v430_v49 = vpack.c.bf16 %v406_v47, %v405_v46 }
  0xed   : > { %845 = vmatmul.mubr.msk.bf16.vlgmr.msra.gmra.mrb[0].mxu1 %vm229_vm1, %v430_v49 }
  0xee   : > { %v311_v50 = vpop.f32.mrb[4].mxu0  ;;  %848 = vmatprep.mubr.msk.bf16.mxu1 %vm919_vm0, %v918_v1 }
  0xef   : > { %v794_v51 = vpop.f32.mrb[5].mxu0  ;;  %v407_v53 = vmax.f32 %v311_v50, 0.0 }
  0xf0   : > { %v314_v52 = vpop.f32.mrb[6].mxu0 }
  0xf1   : > { %v408_v54 = vmax.f32 %v314_v52, 0.0  ;;  %v795_v55 = vpop.f32.mrb[7].mxu0 }
  0xf3   : > { %v431_v56 = vpack.c.bf16 %v408_v54, %v407_v53 }
  0xf5   : > { %849 = vmatmul.mubr.msk.bf16.gmra.mrb[4].mxu1 %vm229_vm1, %v431_v56 }
  0xf6   : > { %v319_v57 = vpop.f32.mrb[8].mxu0  ;;  %852 = vmatprep.mubr.msk.bf16.mxu1 %vm919_vm0, %v918_v1 }
  0xf7   : > { %v798_v58 = vpop.f32.mrb[9].mxu0  ;;  %v409_v60 = vmax.f32 %v319_v57, 0.0 }
  0xf8   : > { %v322_v59 = vpop.f32.mrb[10].mxu0 }
  0xf9   : > { %v410_v61 = vmax.f32 %v322_v59, 0.0  ;;  %v799_v62 = vpop.f32.mrb[11].mxu0 }
  0xfb   : > { %v432_v63 = vpack.c.bf16 %v410_v61, %v409_v60 }
  0xfd   : > { %853 = vmatmul.mubr.msk.bf16.gmra.mrb[8].mxu1 %vm229_vm1, %v432_v63 }
  0xfe   : > { %v327_v0 = vpop.f32.mrb[12].mxu0  ;;  %856 = vmatprep.mubr.msk.bf16.mxu1 %vm919_vm0, %v918_v1 }
  0xff   : > { %v802_v2 = vpop.f32.mrb[13].mxu0  ;;  %v411_v8 = vmax.f32 %v327_v0, 0.0 }
 0x100   : > { %v330_v5 = vpop.f32.mrb[14].mxu0 }
 0x101   : > { %v412_v11 = vmax.f32 %v330_v5, 0.0  ;;  %v803_v14 = vpop.f32.mrb[15].mxu0 }
 0x103   : > { %v433_v17 = vpack.c.bf16 %v412_v11, %v411_v8 }
 0x105   : > { %857 = vmatmul.mubr.msk.bf16.gmra.mrb[12].mxu1 %vm229_vm1, %v433_v17 }
 0x106   : > { %v335_v20 = vpop.f32.mrb[16].mxu0  ;;  %860 = vmatprep.mubr.msk.bf16.mxu1 %vm919_vm0, %v918_v1 }
 0x107   : > { %v806_v23 = vpop.f32.mrb[17].mxu0  ;;  %v413_v29 = vmax.f32 %v335_v20, 0.0 }
 0x108   : > { %v338_v26 = vpop.f32.mrb[18].mxu0 }
 0x109   : > { %v414_v32 = vmax.f32 %v338_v26, 0.0  ;;  %v807_v35 = vpop.f32.mrb[19].mxu0 }
 0x10b   : > { %v434_v38 = vpack.c.bf16 %v414_v32, %v413_v29 }
 0x10d   : > { %861 = vmatmul.mubr.msk.bf16.gmra.mrb[16].mxu1 %vm229_vm1, %v434_v38 }
 0x10e   : > { %v343_v39 = vpop.f32.mrb[20].mxu0  ;;  %864 = vmatprep.mubr.msk.bf16.mxu1 %vm919_vm0, %v918_v1 }
 0x10f   : > { %v810_v40 = vpop.f32.mrb[21].mxu0  ;;  %v415_v43 = vmax.f32 %v343_v39, 0.0 }
 0x110   : > { %v346_v42 = vpop.f32.mrb[22].mxu0 }
 0x111   : > { %v416_v44 = vmax.f32 %v346_v42, 0.0  ;;  %v811_v45 = vpop.f32.mrb[23].mxu0 }
 0x113   : > { %v435_v46 = vpack.c.bf16 %v416_v44, %v415_v43 }
 0x115   : > { %865 = vmatmul.mubr.msk.bf16.gmra.mrb[20].mxu1 %vm229_vm1, %v435_v46 }
 0x116   : > { %v351_v47 = vpop.f32.mrb[24].mxu0  ;;  %868 = vmatprep.mubr.msk.bf16.mxu1 %vm919_vm0, %v918_v1 }
 0x117   : > { %v814_v48 = vpop.f32.mrb[25].mxu0  ;;  %v417_v50 = vmax.f32 %v351_v47, 0.0 }
 0x118   : > { %v354_v49 = vpop.f32.mrb[26].mxu0 }
 0x119   : > { %v418_v51 = vmax.f32 %v354_v49, 0.0  ;;  %v815_v52 = vpop.f32.mrb[27].mxu0 }
 0x11b   : > { %v436_v53 = vpack.c.bf16 %v418_v51, %v417_v50 }
 0x11d   : > { %869 = vmatmul.mubr.msk.bf16.gmra.mrb[24].mxu1 %vm229_vm1, %v436_v53 }
 0x11e   : > { %v359_v54 = vpop.f32.mrb[28].mxu0  ;;  %872 = vmatprep.mubr.msk.bf16.mxu1 %vm919_vm0, %v918_v1 }
 0x11f   : > { %v818_v55 = vpop.f32.mrb[29].mxu0  ;;  %v419_v57 = vmax.f32 %v359_v54, 0.0 }
 0x120   : > { %v362_v56 = vpop.f32.mrb[30].mxu0 }
 0x121   : > { %v420_v58 = vmax.f32 %v362_v56, 0.0  ;;  %v819_v59 = vpop.f32.mrb[31].mxu0 }
 0x123   : > { %v437_v60 = vpack.c.bf16 %v420_v58, %v419_v57 }
 0x125   : > { %873 = vmatmul.mubr.msk.bf16.gmra.mrb[28].mxu1 %vm229_vm1, %v437_v60 }
 0x126   : > { %v367_v61 = vpop.f32.mrb[32].mxu0  ;;  %876 = vmatprep.mubr.msk.bf16.mxu1 %vm919_vm0, %v918_v1 }
 0x127   : > { %v822_v62 = vpop.f32.mrb[33].mxu0  ;;  %v421_v0 = vmax.f32 %v367_v61, 0.0 }
 0x128   : > { %v370_v63 = vpop.f32.mrb[34].mxu0 }
 0x129   : > { %v422_v2 = vmax.f32 %v370_v63, 0.0  ;;  %v823_v5 = vpop.f32.mrb[35].mxu0 }
 0x12b   : > { %v438_v8 = vpack.c.bf16 %v422_v2, %v421_v0 }
 0x12d   : > { %877 = vmatmul.mubr.msk.bf16.gmra.mrb[32].mxu1 %vm229_vm1, %v438_v8 }
 0x12e   : > { %v375_v11 = vpop.f32.mrb[36].mxu0  ;;  %880 = vmatprep.mubr.msk.bf16.mxu1 %vm919_vm0, %v918_v1 }
 0x12f   : > { %v826_v14 = vpop.f32.mrb[37].mxu0  ;;  %v423_v20 = vmax.f32 %v375_v11, 0.0 }
 0x130   : > { %v378_v17 = vpop.f32.mrb[38].mxu0 }
 0x131   : > { %v424_v23 = vmax.f32 %v378_v17, 0.0  ;;  %v827_v26 = vpop.f32.mrb[39].mxu0 }
 0x133   : > { %v439_v29 = vpack.c.bf16 %v424_v23, %v423_v20 }
 0x135   : > { %881 = vmatmul.mubr.msk.bf16.gmra.mrb[36].mxu1 %vm229_vm1, %v439_v29 }
 0x136   : > { %v383_v32 = vpop.f32.mrb[40].mxu0  ;;  %884 = vmatprep.mubr.msk.bf16.mxu1 %vm919_vm0, %v918_v1 }
 0x137   : > { %v830_v35 = vpop.f32.mrb[41].mxu0  ;;  %v425_v39 = vmax.f32 %v383_v32, 0.0 }
 0x138   : > { %v386_v38 = vpop.f32.mrb[42].mxu0 }
 0x139   : > { %v426_v40 = vmax.f32 %v386_v38, 0.0  ;;  %v831_v42 = vpop.f32.mrb[43].mxu0 }
 0x13b   : > { %v440_v43 = vpack.c.bf16 %v426_v40, %v425_v39 }
 0x13d   : > { %885 = vmatmul.mubr.msk.bf16.gmra.mrb[40].mxu1 %vm229_vm1, %v440_v43 }
 0x13e   : > { %v391_v44 = vpop.f32.mrb[44].mxu0  ;;  %888 = vmatprep.mubr.msk.bf16.mxu1 %vm919_vm0, %v918_v1 }
 0x13f   : > { %v834_v45 = vpop.f32.mrb[45].mxu0  ;;  %v427_v47 = vmax.f32 %v391_v44, 0.0 }
 0x140   : > { %v394_v46 = vpop.f32.mrb[46].mxu0 }
 0x141   : > { %v428_v48 = vmax.f32 %v394_v46, 0.0  ;;  %v835_v49 = vpop.f32.mrb[47].mxu0 }
 0x143   : > { %v441_v50 = vpack.c.bf16 %v428_v48, %v427_v47 }
 0x145   : > { %889 = vmatmul.mubr.msk.bf16.gmra.mrb[44].mxu1 %vm229_vm1, %v441_v50 }
 0x146   : > { %v399_v51 = vpop.f32.mrb[48].mxu0  ;;  %892 = vmatprep.mubr.msk.bf16.mxu1 %vm919_vm0, %v918_v1 }
 0x147   : > { %v429_v52 = vmax.f32 %v399_v51, 0.0  ;;  %v838_v53 = vpop.f32.mrb[49].mxu0 }
 0x148   : > { %v402_v54 = vpop.f32.mrb[50].mxu0 }
 0x149   : > { %v442_v55 = vpack.c.bf16 %v429_v52, %v429_v52  ;;  %v839_v56 = vpop.f32.mrb[51].mxu0 }
 0x14d   : > { %893 = vmatmul.mubr.msk.bf16.gmra.mrb[48].mxu1 %vm229_vm1, %v442_v55 }
 0x1c0   : > { %v532_v57 = vpop.f32.mrb[0].mxu1 }
 0x1c1   : > { %v533_v1 = vadd.f32 %v532_v57, %v972_v3  ;;  %v846_v58 = vpop.f32.mrb[1].mxu1 }
 0x1c2   : > { %v535_v59 = vpop.f32.mrb[2].mxu1 }
 0x1c3   : > { %634 = vst.msk [vmem:[%s1158_s29] sm:$0xff] %vm229_vm1, %v533_v1  ;;  %v536_v60 = vadd.f32 %v535_v59, %v975_v4  ;;  %v847_v61 = vpop.f32.mrb[3].mxu1 }
 0x1c5   : > { %635 = vst.msk [vmem:[%s1158_s29 + $0x8] sm:$0xff] %vm229_vm1, %v536_v60 }
 0x1c8   : > { %v540_v62 = vpop.f32.mrb[4].mxu1 }
 0x1c9   : > { %v541_v63 = vadd.f32 %v540_v62, %v983_v6  ;;  %v850_v0 = vpop.f32.mrb[5].mxu1 }
 0x1ca   : > { %v543_v2 = vpop.f32.mrb[6].mxu1 }
 0x1cb   : > { %636 = vst.msk [vmem:[%s1158_s29 + $0x10] sm:$0xff] %vm229_vm1, %v541_v63  ;;  %v544_v3 = vadd.f32 %v543_v2, %v986_v7  ;;  %v851_v5 = vpop.f32.mrb[7].mxu1 }
 0x1cd   : > { %637 = vst.msk [vmem:[%s1158_s29 + $0x18] sm:$0xff] %vm229_vm1, %v544_v3 }
 0x1d0   : > { %v548_v8 = vpop.f32.mrb[8].mxu1 }
 0x1d1   : > { %v549_v4 = vadd.f32 %v548_v8, %v994_v9  ;;  %v854_v11 = vpop.f32.mrb[9].mxu1 }
 0x1d2   : > { %v551_v14 = vpop.f32.mrb[10].mxu1 }
 0x1d3   : > { %638 = vst.msk [vmem:[%s1158_s29 + $0x20] sm:$0xff] %vm229_vm1, %v549_v4  ;;  %v552_v6 = vadd.f32 %v551_v14, %v997_v10  ;;  %v855_v17 = vpop.f32.mrb[11].mxu1 }
 0x1d5   : > { %639 = vst.msk [vmem:[%s1158_s29 + $0x28] sm:$0xff] %vm229_vm1, %v552_v6 }
 0x1d8   : > { %v556_v20 = vpop.f32.mrb[12].mxu1 }
 0x1d9   : > { %v557_v7 = vadd.f32 %v556_v20, %v1005_v12  ;;  %v858_v23 = vpop.f32.mrb[13].mxu1 }
 0x1da   : > { %v559_v26 = vpop.f32.mrb[14].mxu1 }
 0x1db   : > { %640 = vst.msk [vmem:[%s1158_s29 + $0x30] sm:$0xff] %vm229_vm1, %v557_v7  ;;  %v560_v9 = vadd.f32 %v559_v26, %v1008_v13  ;;  %v859_v29 = vpop.f32.mrb[15].mxu1 }
 0x1dd   : > { %641 = vst.msk [vmem:[%s1158_s29 + $0x38] sm:$0xff] %vm229_vm1, %v560_v9 }
 0x1e0   : > { %v564_v32 = vpop.f32.mrb[16].mxu1 }
 0x1e1   : > { %v565_v10 = vadd.f32 %v564_v32, %v1016_v15  ;;  %v862_v35 = vpop.f32.mrb[17].mxu1 }
 0x1e2   : > { %v567_v38 = vpop.f32.mrb[18].mxu1 }
 0x1e3   : > { %642 = vst.msk [vmem:[%s1158_s29 + $0x40] sm:$0xff] %vm229_vm1, %v565_v10  ;;  %v568_v12 = vadd.f32 %v567_v38, %v1019_v16  ;;  %v863_v39 = vpop.f32.mrb[19].mxu1 }
 0x1e5   : > { %643 = vst.msk [vmem:[%s1158_s29 + $0x48] sm:$0xff] %vm229_vm1, %v568_v12 }
 0x1e8   : > { %v572_v40 = vpop.f32.mrb[20].mxu1 }
 0x1e9   : > { %v573_v13 = vadd.f32 %v572_v40, %v1027_v18  ;;  %v866_v42 = vpop.f32.mrb[21].mxu1 }
 0x1ea   : > { %v575_v43 = vpop.f32.mrb[22].mxu1 }
 0x1eb   : > { %644 = vst.msk [vmem:[%s1158_s29 + $0x50] sm:$0xff] %vm229_vm1, %v573_v13  ;;  %v576_v15 = vadd.f32 %v575_v43, %v1030_v19  ;;  %v867_v44 = vpop.f32.mrb[23].mxu1 }
 0x1ed   : > { %645 = vst.msk [vmem:[%s1158_s29 + $0x58] sm:$0xff] %vm229_vm1, %v576_v15 }
 0x1f0   : > { %v580_v45 = vpop.f32.mrb[24].mxu1 }
 0x1f1   : > { %v581_v16 = vadd.f32 %v580_v45, %v1038_v21  ;;  %v870_v46 = vpop.f32.mrb[25].mxu1 }
 0x1f2   : > { %v583_v47 = vpop.f32.mrb[26].mxu1 }
 0x1f3   : > { %646 = vst.msk [vmem:[%s1158_s29 + $0x60] sm:$0xff] %vm229_vm1, %v581_v16  ;;  %v584_v18 = vadd.f32 %v583_v47, %v1041_v22  ;;  %v871_v48 = vpop.f32.mrb[27].mxu1 }
 0x1f5   : > { %647 = vst.msk [vmem:[%s1158_s29 + $0x68] sm:$0xff] %vm229_vm1, %v584_v18 }
 0x1f8   : > { %v588_v49 = vpop.f32.mrb[28].mxu1 }
 0x1f9   : > { %v589_v19 = vadd.f32 %v588_v49, %v1049_v24  ;;  %v874_v50 = vpop.f32.mrb[29].mxu1 }
 0x1fa   : > { %v591_v51 = vpop.f32.mrb[30].mxu1 }
 0x1fb   : > { %648 = vst.msk [vmem:[%s1158_s29 + $0x70] sm:$0xff] %vm229_vm1, %v589_v19  ;;  %v592_v21 = vadd.f32 %v591_v51, %v1052_v25  ;;  %v875_v52 = vpop.f32.mrb[31].mxu1 }
 0x1fd   : > { %649 = vst.msk [vmem:[%s1158_s29 + $0x78] sm:$0xff] %vm229_vm1, %v592_v21 }
 0x200   : > { %v596_v53 = vpop.f32.mrb[32].mxu1 }
 0x201   : > { %v597_v22 = vadd.f32 %v596_v53, %v1060_v27  ;;  %v878_v54 = vpop.f32.mrb[33].mxu1 }
 0x202   : > { %v599_v55 = vpop.f32.mrb[34].mxu1 }
 0x203   : > { %650 = vst.msk [vmem:[%s1158_s29 + $0x80] sm:$0xff] %vm229_vm1, %v597_v22  ;;  %v600_v24 = vadd.f32 %v599_v55, %v1063_v28  ;;  %v879_v56 = vpop.f32.mrb[35].mxu1 }
 0x205   : > { %651 = vst.msk [vmem:[%s1158_s29 + $0x88] sm:$0xff] %vm229_vm1, %v600_v24 }
 0x208   : > { %v604_v57 = vpop.f32.mrb[36].mxu1 }
 0x209   : > { %v605_v25 = vadd.f32 %v604_v57, %v1071_v30  ;;  %v882_v1 = vpop.f32.mrb[37].mxu1 }
 0x20a   : > { %v607_v58 = vpop.f32.mrb[38].mxu1 }
 0x20b   : > { %652 = vst.msk [vmem:[%s1158_s29 + $0x90] sm:$0xff] %vm229_vm1, %v605_v25  ;;  %v608_v27 = vadd.f32 %v607_v58, %v1074_v31  ;;  %v883_v59 = vpop.f32.mrb[39].mxu1 }
 0x20d   : > { %653 = vst.msk [vmem:[%s1158_s29 + $0x98] sm:$0xff] %vm229_vm1, %v608_v27 }
 0x210   : > { %v612_v60 = vpop.f32.mrb[40].mxu1 }
 0x211   : > { %v613_v28 = vadd.f32 %v612_v60, %v1082_v33  ;;  %v886_v61 = vpop.f32.mrb[41].mxu1 }
 0x212   : > { %v615_v62 = vpop.f32.mrb[42].mxu1 }
 0x213   : > { %654 = vst.msk [vmem:[%s1158_s29 + $0xa0] sm:$0xff] %vm229_vm1, %v613_v28  ;;  %v616_v30 = vadd.f32 %v615_v62, %v1085_v34  ;;  %v887_v63 = vpop.f32.mrb[43].mxu1 }
 0x215   : > { %655 = vst.msk [vmem:[%s1158_s29 + $0xa8] sm:$0xff] %vm229_vm1, %v616_v30 }
 0x218   : > { %v620_v0 = vpop.f32.mrb[44].mxu1 }
 0x219   : > { %v621_v31 = vadd.f32 %v620_v0, %v1093_v36  ;;  %v890_v2 = vpop.f32.mrb[45].mxu1 }
 0x21a   : > { %v623_v3 = vpop.f32.mrb[46].mxu1 }
 0x21b   : > { %656 = vst.msk [vmem:[%s1158_s29 + $0xb0] sm:$0xff] %vm229_vm1, %v621_v31  ;;  %v624_v5 = vadd.f32 %v623_v3, %v1096_v37  ;;  %v891_v33 = vpop.f32.mrb[47].mxu1 }
 0x21d   : > { %657 = vst.msk [vmem:[%s1158_s29 + $0xb8] sm:$0xff] %vm229_vm1, %v624_v5 }
 0x220   : > { %v628_v8 = vpop.f32.mrb[48].mxu1 }
 0x221   : > { %v629_v4 = vadd.f32 %v628_v8, %v1111_v41  ;;  %v894_v11 = vpop.f32.mrb[49].mxu1 }
 0x222   : > { %v631_v34 = vpop.f32.mrb[50].mxu1 }
 0x223   : > { %658 = vst.msk [vmem:[%s1158_s29 + $0xc0] sm:$0xff] %vm229_vm1, %v629_v4  ;;  %v895_v14 = vpop.f32.mrb[51].mxu1 }
 0x224 PF: > { %s13_s12 = sadd.s32 1, %s916_s12  }
 0x225   : > { %p10_p4 = scmp.ge.s32.totalorder %s13_s12, 11  }
 0x227   :  { %12 = sbr.rel (!%p10_p4) target bundleno = 1 (0x1), region = 62 }

// kernel: amdim_forward.23
= control target key start
LH: loop header
LB: loop body
LE: loop exit
PB: predicated region body
PF: predicated region fallthrough
CT: control target
= control target key end

     0   :  { %v1894_v0 = vmov 0   ;;  %vm1896_vm0 = vmmov 0   ;;  %vm1189_vm1 = vcmask 523264   ;;  %s3157_s1 = inlined_call_operand.vmem [shape: bf16[512,64], index: 1, kind: input, shape index: {}]   ;;  %s3158_s0 = inlined_call_operand.vmem [shape: f32[392,512], index: 0, kind: input, shape index: {}]   ;;  %s3159_s2 = inlined_call_operand.vmem [shape: bf16[64,64], index: 2, kind: input, shape index: {}]   ;;  %s3160_s3 = inlined_call_operand.vmem [shape: f32[392,64], index: 3, kind: input, shape index: {}]   ;;  %s3161_s4 = inlined_call_operand.vmem [shape: f32[392,64], index: 4, kind: output, shape index: {}]  }
   0x1   :  { %570 = vmatprep.subr.bf16.mxu0 %v1894_v0  ;;  %v1858_v1 = vld [vmem:[%s3157_s1] sm:$0xff]   ;;  %1748 = vmatprep.subr.bf16.mxu1 %v1894_v0  ;;  %v1859_v2 = vld [vmem:[%s3157_s1 + $0x8] sm:$0xff]   ;;  %v1860_v3 = vld [vmem:[%s3157_s1 + $0x10] sm:$0xff]  }
   0x2   :  { %571 = vmatpush1.bf16.msra.mxu0 %v1858_v1  ;;  %1764 = vmatpush1.bf16.msra.mxu1 %v1858_v1  ;;  %v1861_v4 = vld [vmem:[%s3157_s1 + $0x18] sm:$0xff]   ;;  %v1862_v5 = vld [vmem:[%s3157_s1 + $0x20] sm:$0xff]   ;;  %v19_v6 = vld [vmem:[%s3158_s0 + $0x8] sm:$0xff] }
   0x3   :  { %572 = vmatprep.subr.bf16.mxu0 %v1894_v0  ;;  %1749 = vmatprep.subr.bf16.mxu1 %v1894_v0  ;;  %v23_v7 = vld [vmem:[%s3158_s0 + $0x28] sm:$0xff]  ;;  %v1864_v10 = vld [vmem:[%s3157_s1 + $0x30] sm:$0xff]   ;;  %v1865_v11 = vld [vmem:[%s3157_s1 + $0x38] sm:$0xff]  }
   0x4   :  { %v215_v8 = vpack.c.bf16 %v23_v7, %v19_v6  ;;  %v1863_v9 = vld [vmem:[%s3157_s1 + $0x28] sm:$0xff]   ;;  %v1866_v12 = vld [vmem:[%s3157_s1 + $0x40] sm:$0xff]   ;;  %v1868_v14 = vld [vmem:[%s3157_s1 + $0x50] sm:$0xff]  }
   0x5   :  { %v1867_v13 = vld [vmem:[%s3157_s1 + $0x48] sm:$0xff]   ;;  %v1869_v15 = vld [vmem:[%s3157_s1 + $0x58] sm:$0xff]   ;;  %v1870_v16 = vld [vmem:[%s3157_s1 + $0x60] sm:$0xff]  }
   0x6   :  { %573 = vmatpush1.bf16.msra.mxu0 %v1859_v2  ;;  %1765 = vmatpush1.bf16.msra.mxu1 %v1859_v2  ;;  %v1871_v17 = vld [vmem:[%s3157_s1 + $0x68] sm:$0xff]   ;;  %v1872_v18 = vld [vmem:[%s3157_s1 + $0x70] sm:$0xff]   ;;  %v1873_v19 = vld [vmem:[%s3157_s1 + $0x78] sm:$0xff]  }
   0x7   :  { %574 = vmatprep.subr.bf16.mxu0 %v1894_v0  ;;  %1750 = vmatprep.subr.bf16.mxu1 %v1894_v0  ;;  %v18_v20 = vld [vmem:[%s3158_s0] sm:$0xff]  ;;  %v27_v22 = vld [vmem:[%s3158_s0 + $0x48] sm:$0xff]  ;;  %v1876_v33 = vld [vmem:[%s3157_s1 + $0x90] sm:$0xff]  }
   0x8   :  { %602 = vmatprep.mubr.bf16.mxu0 %v215_v8  ;;  %v22_v21 = vld [vmem:[%s3158_s0 + $0x20] sm:$0xff]  ;;  %v31_v23 = vld [vmem:[%s3158_s0 + $0x68] sm:$0xff]  ;;  %v1877_v37 = vld [vmem:[%s3157_s1 + $0x98] sm:$0xff]  }
   0x9   :  { %v214_v24 = vpack.c.bf16 %v22_v21, %v18_v20  ;;  %v1874_v25 = vld [vmem:[%s3157_s1 + $0x80] sm:$0xff]   ;;  %v219_v26 = vpack.c.bf16 %v31_v23, %v27_v22  ;;  %v1875_v29 = vld [vmem:[%s3157_s1 + $0x88] sm:$0xff]   ;;  %v1880_v50 = vld [vmem:[%s3157_s1 + $0xb0] sm:$0xff]  }
   0xa   :  { %575 = vmatpush1.bf16.msra.mxu0 %v1860_v3  ;;  %1766 = vmatpush1.bf16.msra.mxu1 %v1860_v3  ;;  %v26_v27 = vld [vmem:[%s3158_s0 + $0x40] sm:$0xff]  ;;  %v35_v30 = vld [vmem:[%s3158_s0 + $0x88] sm:$0xff]  ;;  %v1881_v53 = vld [vmem:[%s3157_s1 + $0xb8] sm:$0xff]  }
   0xb   :  { %576 = vmatprep.subr.bf16.mxu0 %v1894_v0  ;;  %1751 = vmatprep.subr.bf16.mxu1 %v1894_v0  ;;  %v30_v28 = vld [vmem:[%s3158_s0 + $0x60] sm:$0xff]  ;;  %v39_v31 = vld [vmem:[%s3158_s0 + $0xa8] sm:$0xff]  ;;  %v1884_v3 = vld [vmem:[%s3157_s1 + $0xd0] sm:$0xff]  }
   0xc   :  { %v218_v32 = vpack.c.bf16 %v30_v28, %v26_v27  ;;  %v223_v34 = vpack.c.bf16 %v39_v31, %v35_v30  ;;  %v34_v35 = vld [vmem:[%s3158_s0 + $0x80] sm:$0xff]  ;;  %v43_v38 = vld [vmem:[%s3158_s0 + $0xc8] sm:$0xff]  ;;  %v1885_v6 = vld [vmem:[%s3157_s1 + $0xd8] sm:$0xff]  }
   0xd   :  { %v38_v36 = vld [vmem:[%s3158_s0 + $0xa0] sm:$0xff]  ;;  %v47_v39 = vld [vmem:[%s3158_s0 + $0xe8] sm:$0xff]  ;;  %v1889_v22 = vld [vmem:[%s3157_s1 + $0xf8] sm:$0xff]  }
   0xe   :  { %577 = vmatpush1.bf16.msra.mxu0 %v1861_v4  ;;  %1767 = vmatpush1.bf16.msra.mxu1 %v1861_v4  ;;  %v222_v40 = vpack.c.bf16 %v38_v36, %v34_v35  ;;  %v227_v41 = vpack.c.bf16 %v47_v39, %v43_v38  ;;  %v1878_v42 = vld [vmem:[%s3157_s1 + $0xa0] sm:$0xff]   ;;  %v1879_v45 = vld [vmem:[%s3157_s1 + $0xa8] sm:$0xff]  }
   0xf   :  { %578 = vmatprep.subr.bf16.mxu0 %v1894_v0  ;;  %1752 = vmatprep.subr.bf16.mxu1 %v1894_v0  ;;  %v42_v43 = vld [vmem:[%s3158_s0 + $0xc0] sm:$0xff]  ;;  %v51_v46 = vld [vmem:[%s3158_s0 + $0x108] sm:$0xff] }
  0x10   :  { %v46_v44 = vld [vmem:[%s3158_s0 + $0xe0] sm:$0xff]  ;;  %v55_v47 = vld [vmem:[%s3158_s0 + $0x128] sm:$0xff] }
  0x11   :  { %v226_v48 = vpack.c.bf16 %v46_v44, %v42_v43  ;;  %v231_v49 = vpack.c.bf16 %v55_v47, %v51_v46  ;;  %v50_v51 = vld [vmem:[%s3158_s0 + $0x100] sm:$0xff]  ;;  %v59_v54 = vld [vmem:[%s3158_s0 + $0x148] sm:$0xff] }
  0x12   :  { %579 = vmatpush1.bf16.msra.mxu0 %v1862_v5  ;;  %1768 = vmatpush1.bf16.msra.mxu1 %v1862_v5  ;;  %v54_v52 = vld [vmem:[%s3158_s0 + $0x120] sm:$0xff]  ;;  %v63_v55 = vld [vmem:[%s3158_s0 + $0x168] sm:$0xff] }
  0x13   :  { %580 = vmatprep.subr.bf16.mxu0 %v1894_v0  ;;  %1753 = vmatprep.subr.bf16.mxu1 %v1894_v0  ;;  %v230_v56 = vpack.c.bf16 %v54_v52, %v50_v51  ;;  %v235_v57 = vpack.c.bf16 %v63_v55, %v59_v54  ;;  %v1882_v58 = vld [vmem:[%s3157_s1 + $0xc0] sm:$0xff]   ;;  %v1883_v61 = vld [vmem:[%s3157_s1 + $0xc8] sm:$0xff]  }
  0x14   :  { %v58_v59 = vld [vmem:[%s3158_s0 + $0x140] sm:$0xff]  ;;  %v67_v62 = vld [vmem:[%s3158_s0 + $0x188] sm:$0xff] }
  0x15   :  { %v62_v60 = vld [vmem:[%s3158_s0 + $0x160] sm:$0xff]  ;;  %v71_v63 = vld [vmem:[%s3158_s0 + $0x1a8] sm:$0xff] }
  0x16   :  { %581 = vmatpush1.bf16.msra.mxu0 %v1863_v9  ;;  %1769 = vmatpush1.bf16.msra.mxu1 %v1863_v9  ;;  %v234_v1 = vpack.c.bf16 %v62_v60, %v58_v59  ;;  %v239_v2 = vpack.c.bf16 %v71_v63, %v67_v62  ;;  %v66_v4 = vld [vmem:[%s3158_s0 + $0x180] sm:$0xff]  ;;  %v75_v7 = vld [vmem:[%s3158_s0 + $0x1c8] sm:$0xff]  ;;  %v21_v63 = vld [vmem:[%s3158_s0 + $0x18] sm:$0xff] }
  0x17   :  { %582 = vmatprep.subr.bf16.mxu0 %v1894_v0  ;;  %1754 = vmatprep.subr.bf16.mxu1 %v1894_v0  ;;  %v70_v5 = vld [vmem:[%s3158_s0 + $0x1a0] sm:$0xff]  ;;  %v79_v8 = vld [vmem:[%s3158_s0 + $0x1e8] sm:$0xff] }
  0x18   :  { %v238_v9 = vpack.c.bf16 %v70_v5, %v66_v4  ;;  %v82_v20 = vld [vmem:[%s3158_s0 + $0x200] sm:$0xff]  ;;  %v91_v23 = vld [vmem:[%s3158_s0 + $0x248] sm:$0xff]  ;;  %v20_v5 = vld [vmem:[%s3158_s0 + $0x10] sm:$0xff] }
  0x19   :  { %v86_v21 = vld [vmem:[%s3158_s0 + $0x220] sm:$0xff]  ;;  %v107_v39 = vld [vmem:[%s3158_s0 + $0x2c8] sm:$0xff] }
  0x1a   :  { %583 = vmatpush1.bf16.msra.mxu0 %v1864_v10  ;;  %1770 = vmatpush1.bf16.msra.mxu1 %v1864_v10  ;;  %v243_v10 = vpack.c.bf16 %v79_v8, %v75_v7  ;;  %v90_v27 = vld [vmem:[%s3158_s0 + $0x240] sm:$0xff]  ;;  %v131_v44 = vld [vmem:[%s3158_s0 + $0x388] sm:$0xff] }
  0x1b   :  { %584 = vmatprep.subr.bf16.mxu0 %v1894_v0  ;;  %1755 = vmatprep.subr.bf16.mxu1 %v1894_v0  ;;  %v94_v28 = vld [vmem:[%s3158_s0 + $0x260] sm:$0xff]  ;;  %v115_v51 = vld [vmem:[%s3158_s0 + $0x308] sm:$0xff] }
  0x1c   :  { %v250_v30 = vpack.c.bf16 %v94_v28, %v90_v27  ;;  %v98_v35 = vld [vmem:[%s3158_s0 + $0x280] sm:$0xff]  ;;  %v119_v52 = vld [vmem:[%s3158_s0 + $0x328] sm:$0xff]  ;;  %v41_v27 = vld [vmem:[%s3158_s0 + $0xb8] sm:$0xff] }
  0x1d   :  { %v102_v36 = vld [vmem:[%s3158_s0 + $0x2a0] sm:$0xff]  ;;  %v263_v55 = vpack.c.bf16 %v119_v52, %v115_v51  ;;  %v147_v7 = vld [vmem:[%s3158_s0 + $0x408] sm:$0xff]  ;;  %v57_v51 = vld [vmem:[%s3158_s0 + $0x138] sm:$0xff] }
  0x1e   :  { %585 = vmatpush1.bf16.msra.mxu0 %v1865_v11  ;;  %1771 = vmatpush1.bf16.msra.mxu1 %v1865_v11  ;;  %v1886_v11 = vld [vmem:[%s3157_s1 + $0xe0] sm:$0xff]   ;;  %v151_v8 = vld [vmem:[%s3158_s0 + $0x428] sm:$0xff] }
  0x1f   :  { %586 = vmatprep.subr.bf16.mxu0 %v1894_v0  ;;  %1756 = vmatprep.subr.bf16.mxu1 %v1894_v0  ;;  %v126_v38 = vld [vmem:[%s3158_s0 + $0x360] sm:$0xff] }
  0x20   :  { %v130_v46 = vld [vmem:[%s3158_s0 + $0x380] sm:$0xff] }
  0x21   :  { %v106_v47 = vld [vmem:[%s3158_s0 + $0x2c0] sm:$0xff] }
  0x22   :  { %587 = vmatpush1.bf16.msra.mxu0 %v1866_v12  ;;  %1772 = vmatpush1.bf16.msra.mxu1 %v1866_v12  ;;  %v74_v12 = vld [vmem:[%s3158_s0 + $0x1c0] sm:$0xff] }
  0x23   :  { %588 = vmatprep.subr.bf16.mxu0 %v1894_v0  ;;  %1757 = vmatprep.subr.bf16.mxu1 %v1894_v0  ;;  %v114_v59 = vld [vmem:[%s3158_s0 + $0x300] sm:$0xff] }
  0x24   :  { %v118_v60 = vld [vmem:[%s3158_s0 + $0x320] sm:$0xff] }
  0x25   :  { %v142_v62 = vld [vmem:[%s3158_s0 + $0x3e0] sm:$0xff] }
  0x26   :  { %589 = vmatpush1.bf16.msra.mxu0 %v1867_v13  ;;  %1773 = vmatpush1.bf16.msra.mxu1 %v1867_v13  ;;  %v78_v13 = vld [vmem:[%s3158_s0 + $0x1e0] sm:$0xff] }
  0x27   :  { %590 = vmatprep.subr.bf16.mxu0 %v1894_v0  ;;  %1758 = vmatprep.subr.bf16.mxu1 %v1894_v0 }
  0x2a   :  { %591 = vmatpush1.bf16.msra.mxu0 %v1868_v14  ;;  %1774 = vmatpush1.bf16.msra.mxu1 %v1868_v14  ;;  %v1887_v14 = vld [vmem:[%s3157_s1 + $0xe8] sm:$0xff]  }
  0x2b   :  { %592 = vmatprep.subr.bf16.mxu0 %v1894_v0  ;;  %1759 = vmatprep.subr.bf16.mxu1 %v1894_v0 }
  0x2e   :  { %593 = vmatpush1.bf16.msra.mxu0 %v1869_v15  ;;  %1775 = vmatpush1.bf16.msra.mxu1 %v1869_v15  ;;  %v83_v15 = vld [vmem:[%s3158_s0 + $0x208] sm:$0xff] }
  0x2f   :  { %594 = vmatprep.subr.bf16.mxu0 %v1894_v0  ;;  %1760 = vmatprep.subr.bf16.mxu1 %v1894_v0 }
  0x32   :  { %595 = vmatpush1.bf16.msra.mxu0 %v1870_v16  ;;  %1776 = vmatpush1.bf16.msra.mxu1 %v1870_v16  ;;  %v87_v16 = vld [vmem:[%s3158_s0 + $0x228] sm:$0xff] }
  0x33   :  { %596 = vmatprep.subr.bf16.mxu0 %v1894_v0  ;;  %1761 = vmatprep.subr.bf16.mxu1 %v1894_v0 }
  0x36   :  { %597 = vmatpush1.bf16.msra.mxu0 %v1871_v17  ;;  %1777 = vmatpush1.bf16.msra.mxu1 %v1871_v17  ;;  %v242_v17 = vpack.c.bf16 %v78_v13, %v74_v12  ;;  %v1890_v12 = vld [vmem:[%s3159_s2] sm:$0xff]   ;;  %v29_v13 = vld [vmem:[%s3158_s0 + $0x58] sm:$0xff] }
  0x37   :  { %598 = vmatprep.subr.bf16.mxu0 %v1894_v0  ;;  %1762 = vmatprep.subr.bf16.mxu1 %v1894_v0 }
  0x3a   :  { %599 = vmatpush1.bf16.msra.mxu0 %v1872_v18  ;;  %1778 = vmatpush1.bf16.msra.mxu1 %v1872_v18  ;;  %v247_v18 = vpack.c.bf16 %v87_v16, %v83_v15  ;;  %v150_v15 = vld [vmem:[%s3158_s0 + $0x420] sm:$0xff] }
  0x3b   :  { %600 = vmatprep.subr.bf16.mxu0 %v1894_v0  ;;  %1763 = vmatprep.subr.bf16.mxu1 %v1894_v0 }
  0x3e   :  { %601 = vmatpush1.bf16.msra.mxu0 %v1873_v19  ;;  %1779 = vmatpush1.bf16.msra.mxu1 %v1873_v19  ;;  %v1888_v19 = vld [vmem:[%s3157_s1 + $0xf0] sm:$0xff]  }
  0x3f   :  { %802 = vmatprep.subr.bf16.mxu0 %v1894_v0 }
  0x41   :  { %603 = vmatmul.mubr.bf16.vlgmr.msra.gmra.mrb[0].mxu0 %v214_v24  ;;  %v95_v24 = vld [vmem:[%s3158_s0 + $0x268] sm:$0xff] }
  0x42   :  { %803 = vmatpush1.bf16.msra.mxu0 %v1874_v25  ;;  %610 = vmatprep.mubr.bf16.mxu0 %v219_v26  ;;  %v246_v25 = vpack.c.bf16 %v86_v21, %v82_v20  ;;  %v251_v26 = vpack.c.bf16 %v95_v24, %v91_v23  ;;  %v159_v20 = vld [vmem:[%s3158_s0 + $0x468] sm:$0xff]  ;;  %v154_v21 = vld [vmem:[%s3158_s0 + $0x440] sm:$0xff]  ;;  %v32_v23 = vld [vmem:[%s3158_s0 + $0x70] sm:$0xff] }
  0x43   :  { %804 = vmatprep.subr.bf16.mxu0 %v1894_v0 }
  0x46   :  { %805 = vmatpush1.bf16.msra.mxu0 %v1875_v29  ;;  %v99_v29 = vld [vmem:[%s3158_s0 + $0x288] sm:$0xff] }
  0x47   :  { %806 = vmatprep.subr.bf16.mxu0 %v1894_v0 }
  0x49   :  { %611 = vmatmul.mubr.bf16.gmra.mrb[4].mxu0 %v218_v32  ;;  %v123_v32 = vld [vmem:[%s3158_s0 + $0x348] sm:$0xff] }
  0x4a   :  { %807 = vmatpush1.bf16.msra.mxu0 %v1876_v33  ;;  %618 = vmatprep.mubr.bf16.mxu0 %v223_v34  ;;  %v127_v33 = vld [vmem:[%s3158_s0 + $0x368] sm:$0xff]  ;;  %v122_v34 = vld [vmem:[%s3158_s0 + $0x340] sm:$0xff] }
  0x4b   :  { %808 = vmatprep.subr.bf16.mxu0 %v1894_v0 }
  0x4e   :  { %809 = vmatpush1.bf16.msra.mxu0 %v1877_v37  ;;  %v267_v37 = vpack.c.bf16 %v127_v33, %v123_v32  ;;  %v162_v32 = vld [vmem:[%s3158_s0 + $0x480] sm:$0xff]  ;;  %v36_v33 = vld [vmem:[%s3158_s0 + $0x90] sm:$0xff] }
  0x4f   :  { %810 = vmatprep.subr.bf16.mxu0 %v1894_v0 }
  0x50   :  { %706 = vmatprep.mubr.bf16.mxu1 %v267_v37  ;;  %v45_v37 = vld [vmem:[%s3158_s0 + $0xd8] sm:$0xff] }
  0x51   :  { %619 = vmatmul.mubr.bf16.gmra.mrb[8].mxu0 %v222_v40  ;;  %v111_v40 = vld [vmem:[%s3158_s0 + $0x2e8] sm:$0xff] }
  0x52   :  { %626 = vmatprep.mubr.bf16.mxu0 %v227_v41  ;;  %811 = vmatpush1.bf16.msra.mxu0 %v1878_v42  ;;  %v266_v41 = vpack.c.bf16 %v126_v38, %v122_v34  ;;  %v254_v42 = vpack.c.bf16 %v102_v36, %v98_v35  ;;  %v259_v43 = vpack.c.bf16 %v111_v40, %v107_v39  ;;  %v40_v34 = vld [vmem:[%s3158_s0 + $0xb0] sm:$0xff]  ;;  %v166_v36 = vld [vmem:[%s3158_s0 + $0x4a0] sm:$0xff]  ;;  %v49_v38 = vld [vmem:[%s3158_s0 + $0xf8] sm:$0xff] }
  0x53   :  { %812 = vmatprep.subr.bf16.mxu0 %v1894_v0  ;;  %v286_v39 = vpack.c.bf16 %v166_v36, %v162_v32  ;;  %v224_v40 = vpack.c.bf16 %v40_v34, %v36_v33  ;;  %v76_v32 = vld [vmem:[%s3158_s0 + $0x1d0] sm:$0xff]  ;;  %v85_v36 = vld [vmem:[%s3158_s0 + $0x218] sm:$0xff] }
  0x54   :  { %707 = vmatmul.mubr.bf16.vlgmr.msra.gmra.mrb[0].mxu1 %v266_v41  ;;  %v229_v41 = vpack.c.bf16 %v49_v38, %v45_v37  ;;  %v80_v33 = vld [vmem:[%s3158_s0 + $0x1f0] sm:$0xff]  ;;  %v89_v37 = vld [vmem:[%s3158_s0 + $0x238] sm:$0xff] }
  0x56   :  { %813 = vmatpush1.bf16.msra.mxu0 %v1879_v45  ;;  %v135_v45 = vld [vmem:[%s3158_s0 + $0x3a8] sm:$0xff] }
  0x57   :  { %814 = vmatprep.subr.bf16.mxu0 %v1894_v0 }
  0x59   :  { %627 = vmatmul.mubr.bf16.gmra.mrb[12].mxu0 %v226_v48  ;;  %v110_v48 = vld [vmem:[%s3158_s0 + $0x2e0] sm:$0xff] }
  0x5a   :  { %634 = vmatprep.mubr.bf16.mxu0 %v231_v49  ;;  %815 = vmatpush1.bf16.msra.mxu0 %v1880_v50  ;;  %v271_v49 = vpack.c.bf16 %v135_v45, %v131_v44  ;;  %v134_v50 = vld [vmem:[%s3158_s0 + $0x3a0] sm:$0xff]  ;;  %v258_v54 = vpack.c.bf16 %v110_v48, %v106_v47  ;;  %v175_v44 = vld [vmem:[%s3158_s0 + $0x4e8] sm:$0xff] }
  0x5b   :  { %816 = vmatprep.subr.bf16.mxu0 %v1894_v0  ;;  %v1891_v45 = vld [vmem:[%s3159_s2 + $0x8] sm:$0xff]   ;;  %v170_v48 = vld [vmem:[%s3158_s0 + $0x4c0] sm:$0xff] }
  0x5c   :  { %714 = vmatprep.mubr.bf16.mxu1 %v271_v49  ;;  %v174_v49 = vld [vmem:[%s3158_s0 + $0x4e0] sm:$0xff] }
  0x5d   :  { %v290_v52 = vpack.c.bf16 %v174_v49, %v170_v48 }
  0x5e   :  { %817 = vmatpush1.bf16.msra.mxu0 %v1881_v53  ;;  %v270_v53 = vpack.c.bf16 %v134_v50, %v130_v46  ;;  %v48_v46 = vld [vmem:[%s3158_s0 + $0xf0] sm:$0xff]  ;;  %v53_v50 = vld [vmem:[%s3158_s0 + $0x118] sm:$0xff] }
  0x5f   :  { %818 = vmatprep.subr.bf16.mxu0 %v1894_v0 }
  0x60   :  { %715 = vmatmul.mubr.bf16.gmra.mrb[4].mxu1 %v270_v53 }
  0x61   :  { %635 = vmatmul.mubr.bf16.gmra.mrb[16].mxu0 %v230_v56  ;;  %v139_v56 = vld [vmem:[%s3158_s0 + $0x3c8] sm:$0xff] }
  0x62   :  { %642 = vmatprep.mubr.bf16.mxu0 %v235_v57  ;;  %819 = vmatpush1.bf16.msra.mxu0 %v1882_v58  ;;  %v143_v57 = vld [vmem:[%s3158_s0 + $0x3e8] sm:$0xff]  ;;  %v138_v58 = vld [vmem:[%s3158_s0 + $0x3c0] sm:$0xff] }
  0x63   :  { %820 = vmatprep.subr.bf16.mxu0 %v1894_v0 }
  0x66   :  { %821 = vmatpush1.bf16.msra.mxu0 %v1883_v61  ;;  %v275_v61 = vpack.c.bf16 %v143_v57, %v139_v56  ;;  %v183_v56 = vld [vmem:[%s3158_s0 + $0x528] sm:$0xff]  ;;  %v178_v57 = vld [vmem:[%s3158_s0 + $0x500] sm:$0xff] }
  0x67   :  { %822 = vmatprep.subr.bf16.mxu0 %v1894_v0 }
  0x68   :  { %722 = vmatprep.mubr.bf16.mxu1 %v275_v61  ;;  %v182_v61 = vld [vmem:[%s3158_s0 + $0x520] sm:$0xff] }
  0x69   :  { %643 = vmatmul.mubr.bf16.gmra.mrb[20].mxu0 %v234_v1  ;;  %v25_v1 = vld [vmem:[%s3158_s0 + $0x38] sm:$0xff] }
  0x6a   :  { %650 = vmatprep.mubr.bf16.mxu0 %v239_v2  ;;  %823 = vmatpush1.bf16.msra.mxu0 %v1884_v3  ;;  %v274_v2 = vpack.c.bf16 %v142_v62, %v138_v58  ;;  %v262_v3 = vpack.c.bf16 %v118_v60, %v114_v59  ;;  %v217_v4 = vpack.c.bf16 %v25_v1, %v21_v63  ;;  %v52_v58 = vld [vmem:[%s3158_s0 + $0x110] sm:$0xff]  ;;  %v61_v62 = vld [vmem:[%s3158_s0 + $0x158] sm:$0xff] }
  0x6b   :  { %824 = vmatprep.subr.bf16.mxu0 %v1894_v0  ;;  %v56_v59 = vld [vmem:[%s3158_s0 + $0x130] sm:$0xff]  ;;  %v65_v63 = vld [vmem:[%s3158_s0 + $0x178] sm:$0xff]  ;;  %v294_v1 = vpack.c.bf16 %v182_v61, %v178_v57 }
  0x6c   :  { %723 = vmatmul.mubr.bf16.gmra.mrb[8].mxu1 %v274_v2  ;;  %v232_v2 = vpack.c.bf16 %v56_v59, %v52_v58  ;;  %v100_v58 = vld [vmem:[%s3158_s0 + $0x290] sm:$0xff]  ;;  %v113_v61 = vld [vmem:[%s3158_s0 + $0x2f8] sm:$0xff] }
  0x6d   :  { %v104_v59 = vld [vmem:[%s3158_s0 + $0x2b0] sm:$0xff] }
  0x6e   :  { %825 = vmatpush1.bf16.msra.mxu0 %v1885_v6  ;;  %v24_v6 = vld [vmem:[%s3158_s0 + $0x30] sm:$0xff] }
  0x6f   :  { %826 = vmatprep.subr.bf16.mxu0 %v1894_v0 }
  0x71   :  { %651 = vmatmul.mubr.bf16.gmra.mrb[24].mxu0 %v238_v9  ;;  %v146_v9 = vld [vmem:[%s3158_s0 + $0x400] sm:$0xff] }
  0x72   :  { %658 = vmatprep.mubr.bf16.mxu0 %v243_v10  ;;  %827 = vmatpush1.bf16.msra.mxu0 %v1886_v11  ;;  %v1895_v10 = vmov 0.0   ;;  %v279_v11 = vpack.c.bf16 %v151_v8, %v147_v7  ;;  %v278_v16 = vpack.c.bf16 %v150_v15, %v146_v9  ;;  %v60_v7 = vld [vmem:[%s3158_s0 + $0x150] sm:$0xff] }
  0x73   :  { %828 = vmatprep.subr.bf16.mxu0 %v1894_v0  ;;  %1640 = vmatprep.subr.bf16.mxu1 %v1895_v10  ;;  %v64_v8 = vld [vmem:[%s3158_s0 + $0x170] sm:$0xff] }
  0x74   :  { %730 = vmatprep.mubr.bf16.mxu1 %v279_v11  ;;  %1641 = vmatpush3.bf16.msra.mxu1 %v1890_v12  ;;  %v190_v11 = vld [vmem:[%s3158_s0 + $0x560] sm:$0xff]  ;;  %v69_v12 = vld [vmem:[%s3158_s0 + $0x198] sm:$0xff]  ;;  %v236_v15 = vpack.c.bf16 %v64_v8, %v60_v7  ;;  %v116_v7 = vld [vmem:[%s3158_s0 + $0x310] sm:$0xff] }
  0x75   :  { %1642 = vmatprep.subr.bf16.mxu1 %v1895_v10  ;;  %731 = vmatmul.mubr.bf16.gmra.mrb[12].mxu1 %v278_v16  ;;  %v120_v8 = vld [vmem:[%s3158_s0 + $0x330] sm:$0xff] }
  0x76   :  { %829 = vmatpush1.bf16.msra.mxu0 %v1887_v14  ;;  %v33_v14 = vld [vmem:[%s3158_s0 + $0x78] sm:$0xff] }
  0x77   :  { %830 = vmatprep.subr.bf16.mxu0 %v1894_v0 }
  0x78   :  { %1643 = vmatpush3.bf16.msra.mxu1 %v1891_v45  ;;  %v210_v45 = vld [vmem:[%s3158_s0 + $0x600] sm:$0xff] }
  0x79   :  { %659 = vmatmul.mubr.bf16.gmra.mrb[28].mxu0 %v242_v17  ;;  %v216_v17 = vpack.c.bf16 %v24_v6, %v20_v5  ;;  %1644 = vmatprep.subr.bf16.mxu1 %v1895_v10  ;;  %v191_v5 = vld [vmem:[%s3158_s0 + $0x568] sm:$0xff]  ;;  %v186_v6 = vld [vmem:[%s3158_s0 + $0x540] sm:$0xff]  ;;  %v310_v48 = vpack.c.bf16 %v210_v45, %v210_v45  ;;  %v173_v45 = vld [vmem:[%s3158_s0 + $0x4d8] sm:$0xff] }
  0x7a   :  { %666 = vmatprep.mubr.bf16.mxu0 %v247_v18  ;;  %831 = vmatpush1.bf16.msra.mxu0 %v1888_v19  ;;  %v221_v18 = vpack.c.bf16 %v33_v14, %v29_v13  ;;  %v155_v19 = vld [vmem:[%s3158_s0 + $0x448] sm:$0xff]  ;;  %v73_v13 = vld [vmem:[%s3158_s0 + $0x1b8] sm:$0xff]  ;;  %v298_v14 = vpack.c.bf16 %v190_v11, %v186_v6 }
  0x7b   :  { %832 = vmatprep.subr.bf16.mxu0 %v1894_v0  ;;  %v103_v0 = vld [vmem:[%s3158_s0 + $0x2a8] sm:$0xff]  ;;  %v283_v24 = vpack.c.bf16 %v159_v20, %v155_v19  ;;  %v241_v16 = vpack.c.bf16 %v73_v13, %v69_v12  ;;  %v1892_v20 = vld [vmem:[%s3159_s2 + $0x10] sm:$0xff]   ;;  %v129_v11 = vld [vmem:[%s3158_s0 + $0x378] sm:$0xff]  ;;  %v264_v12 = vpack.c.bf16 %v120_v8, %v116_v7 }
  0x7c   :  { %v255_v31 = vpack.c.bf16 %v103_v0, %v99_v29  ;;  %v199_v19 = vld [vmem:[%s3158_s0 + $0x5a8] sm:$0xff]  ;;  %1645 = vmatpush3.bf16.msra.mxu1 %v1892_v20  ;;  %v132_v20 = vld [vmem:[%s3158_s0 + $0x390] sm:$0xff]  ;;  %v209_v7 = vld [vmem:[%s3158_s0 + $0x5f8] sm:$0xff] }
  0x7d   :  { %738 = vmatprep.mubr.bf16.mxu1 %v283_v24  ;;  %v198_v24 = vld [vmem:[%s3158_s0 + $0x5a0] sm:$0xff]  ;;  %1646 = vmatprep.subr.bf16.mxu1 %v1895_v10 }
  0x7e   :  { %833 = vmatpush1.bf16.msra.mxu0 %v1889_v22  ;;  %v28_v22 = vld [vmem:[%s3158_s0 + $0x50] sm:$0xff] }
  0x7f   :  { %v220_v29 = vpack.c.bf16 %v32_v23, %v28_v22  ;;  %v194_v23 = vld [vmem:[%s3158_s0 + $0x580] sm:$0xff] }
  0x81   :  { %667 = vmatmul.mubr.bf16.gmra.mrb[32].mxu0 %v246_v25  ;;  %v158_v25 = vld [vmem:[%s3158_s0 + $0x460] sm:$0xff] }
  0x82   :  { %674 = vmatprep.mubr.bf16.mxu0 %v251_v26  ;;  %v37_v26 = vld [vmem:[%s3158_s0 + $0x98] sm:$0xff]  ;;  %v282_v28 = vpack.c.bf16 %v158_v25, %v154_v21  ;;  %v72_v21 = vld [vmem:[%s3158_s0 + $0x1b0] sm:$0xff] }
  0x83   :  { %v225_v0 = vpack.c.bf16 %v41_v27, %v37_v26  ;;  %v77_v25 = vld [vmem:[%s3158_s0 + $0x1d8] sm:$0xff]  ;;  %v302_v27 = vpack.c.bf16 %v198_v24, %v194_v23 }
  0x84   :  { %739 = vmatmul.mubr.bf16.gmra.mrb[16].mxu1 %v282_v28  ;;  %v81_v26 = vld [vmem:[%s3158_s0 + $0x1f8] sm:$0xff] }
  0x85   :  { %v145_v23 = vld [vmem:[%s3158_s0 + $0x3f8] sm:$0xff] }
  0x89   :  { %675 = vmatmul.mubr.bf16.gmra.mrb[36].mxu0 %v250_v30  ;;  %v163_v30 = vld [vmem:[%s3158_s0 + $0x488] sm:$0xff] }
  0x8a   :  { %682 = vmatprep.mubr.bf16.mxu0 %v255_v31  ;;  %v167_v31 = vld [vmem:[%s3158_s0 + $0x4a8] sm:$0xff] }
  0x8b   :  { %v287_v35 = vpack.c.bf16 %v167_v31, %v163_v30  ;;  %v207_v30 = vld [vmem:[%s3158_s0 + $0x5e8] sm:$0xff]  ;;  %v202_v31 = vld [vmem:[%s3158_s0 + $0x5c0] sm:$0xff] }
  0x8d   :  { %746 = vmatprep.mubr.bf16.mxu1 %v287_v35  ;;  %v206_v35 = vld [vmem:[%s3158_s0 + $0x5e0] sm:$0xff] }
  0x8e   :  { %747 = vmatmul.mubr.bf16.gmra.mrb[20].mxu1 %v286_v39  ;;  %v306_v38 = vpack.c.bf16 %v206_v35, %v202_v31  ;;  %v244_v39 = vpack.c.bf16 %v80_v33, %v76_v32  ;;  %v148_v31 = vld [vmem:[%s3158_s0 + $0x410] sm:$0xff]  ;;  %v157_v33 = vld [vmem:[%s3158_s0 + $0x458] sm:$0xff] }
  0x8f   :  { %v152_v32 = vld [vmem:[%s3158_s0 + $0x430] sm:$0xff] }
  0x90   :  { %v280_v35 = vpack.c.bf16 %v152_v32, %v148_v31 }
  0x91   :  { %683 = vmatmul.mubr.bf16.gmra.mrb[40].mxu0 %v254_v42  ;;  %v44_v42 = vld [vmem:[%s3158_s0 + $0xd0] sm:$0xff] }
  0x92   :  { %690 = vmatprep.mubr.bf16.mxu0 %v259_v43  ;;  %v171_v43 = vld [vmem:[%s3158_s0 + $0x4c8] sm:$0xff]  ;;  %v228_v53 = vpack.c.bf16 %v48_v46, %v44_v42  ;;  %v84_v42 = vld [vmem:[%s3158_s0 + $0x210] sm:$0xff]  ;;  %v93_v46 = vld [vmem:[%s3158_s0 + $0x258] sm:$0xff] }
  0x93   :  { %v291_v47 = vpack.c.bf16 %v175_v44, %v171_v43  ;;  %v88_v43 = vld [vmem:[%s3158_s0 + $0x230] sm:$0xff] }
  0x94   :  { %v248_v49 = vpack.c.bf16 %v88_v43, %v84_v42  ;;  %v164_v43 = vld [vmem:[%s3158_s0 + $0x490] sm:$0xff] }
  0x95   :  { %754 = vmatprep.mubr.bf16.mxu1 %v291_v47  ;;  %v97_v47 = vld [vmem:[%s3158_s0 + $0x278] sm:$0xff] }
  0x96   :  { %755 = vmatmul.mubr.bf16.gmra.mrb[24].mxu1 %v290_v52  ;;  %v92_v52 = vld [vmem:[%s3158_s0 + $0x250] sm:$0xff] }
  0x99   :  { %691 = vmatmul.mubr.bf16.gmra.mrb[44].mxu0 %v258_v54  ;;  %v233_v54 = vpack.c.bf16 %v57_v51, %v53_v50  ;;  %v253_v50 = vpack.c.bf16 %v97_v47, %v93_v46  ;;  %v1893_v51 = vld [vmem:[%s3159_s2 + $0x18] sm:$0xff]  }
  0x9a   :  { %698 = vmatprep.mubr.bf16.mxu0 %v263_v55  ;;  %v179_v55 = vld [vmem:[%s3158_s0 + $0x508] sm:$0xff]  ;;  %1647 = vmatpush3.bf16.msra.mxu1 %v1893_v51  ;;  %v177_v46 = vld [vmem:[%s3158_s0 + $0x4f8] sm:$0xff] }
  0x9b   :  { %v295_v60 = vpack.c.bf16 %v183_v56, %v179_v55  ;;  %v105_v55 = vld [vmem:[%s3158_s0 + $0x2b8] sm:$0xff] }
  0x9c   :  { %v181_v51 = vld [vmem:[%s3158_s0 + $0x518] sm:$0xff] }
  0x9d   :  { %762 = vmatprep.mubr.bf16.mxu1 %v295_v60  ;;  %v109_v60 = vld [vmem:[%s3158_s0 + $0x2d8] sm:$0xff] }
  0x9e   :  { %763 = vmatmul.mubr.bf16.gmra.mrb[28].mxu1 %v294_v1  ;;  %v108_v1 = vld [vmem:[%s3158_s0 + $0x2d0] sm:$0xff] }
  0xa1   :  { %699 = vmatmul.mubr.bf16.gmra.mrb[48].mxu0 %v262_v3  ;;  %v237_v3 = vpack.c.bf16 %v65_v63, %v61_v62  ;;  %v256_v62 = vpack.c.bf16 %v104_v59, %v100_v58  ;;  %v261_v63 = vpack.c.bf16 %v113_v61, %v109_v60  ;;  %v193_v58 = vld [vmem:[%s3158_s0 + $0x578] sm:$0xff]  ;;  %v188_v61 = vld [vmem:[%s3158_s0 + $0x550] sm:$0xff] }
  0xa2   :  { %834 = vmatprep.mubr.bf16.mxu0 %v217_v4  ;;  %v187_v4 = vld [vmem:[%s3158_s0 + $0x548] sm:$0xff] }
  0xa3   :  { %v299_v9 = vpack.c.bf16 %v191_v5, %v187_v4  ;;  %v121_v4 = vld [vmem:[%s3158_s0 + $0x338] sm:$0xff] }
  0xa5   :  { %770 = vmatprep.mubr.bf16.mxu1 %v299_v9  ;;  %v125_v9 = vld [vmem:[%s3158_s0 + $0x358] sm:$0xff] }
  0xa6   :  { %771 = vmatmul.mubr.bf16.gmra.mrb[32].mxu1 %v298_v14  ;;  %v269_v13 = vpack.c.bf16 %v129_v11, %v125_v9  ;;  %v124_v14 = vld [vmem:[%s3158_s0 + $0x350] sm:$0xff] }
  0xa7   :  { %v204_v11 = vld [vmem:[%s3158_s0 + $0x5d0] sm:$0xff] }
  0xa9   :  { %835 = vmatmul.mubr.bf16.vlgmr.msra.gmra.mrb[0].mxu0 %v216_v17  ;;  %v68_v17 = vld [vmem:[%s3158_s0 + $0x190] sm:$0xff] }
  0xaa   :  { %842 = vmatprep.mubr.bf16.mxu0 %v221_v18  ;;  %v195_v18 = vld [vmem:[%s3158_s0 + $0x588] sm:$0xff]  ;;  %v240_v28 = vpack.c.bf16 %v72_v21, %v68_v17  ;;  %v137_v17 = vld [vmem:[%s3158_s0 + $0x3b8] sm:$0xff]  ;;  %v136_v21 = vld [vmem:[%s3158_s0 + $0x3b0] sm:$0xff] }
  0xab   :  { %v303_v22 = vpack.c.bf16 %v199_v19, %v195_v18  ;;  %v272_v24 = vpack.c.bf16 %v136_v21, %v132_v20 }
  0xad   :  { %778 = vmatprep.mubr.bf16.mxu1 %v303_v22  ;;  %v141_v22 = vld [vmem:[%s3158_s0 + $0x3d8] sm:$0xff] }
  0xae   :  { %779 = vmatmul.mubr.bf16.gmra.mrb[36].mxu1 %v302_v27  ;;  %v144_v27 = vld [vmem:[%s3158_s0 + $0x3f0] sm:$0xff] }
  0xb1   :  { %843 = vmatmul.mubr.bf16.gmra.mrb[4].mxu0 %v220_v29  ;;  %v245_v29 = vpack.c.bf16 %v81_v26, %v77_v25  ;;  %v277_v25 = vpack.c.bf16 %v145_v23, %v141_v22  ;;  %v140_v26 = vld [vmem:[%s3158_s0 + $0x3d0] sm:$0xff] }
  0xb2   :  { %850 = vmatprep.mubr.bf16.mxu0 %v225_v0  ;;  %v203_v0 = vld [vmem:[%s3158_s0 + $0x5c8] sm:$0xff] }
  0xb3   :  { %v307_v34 = vpack.c.bf16 %v207_v30, %v203_v0  ;;  %v276_v0 = vpack.c.bf16 %v144_v27, %v140_v26 }
  0xb5   :  { %786 = vmatprep.mubr.bf16.mxu1 %v307_v34  ;;  %v161_v34 = vld [vmem:[%s3158_s0 + $0x478] sm:$0xff] }
  0xb6   :  { %787 = vmatmul.mubr.bf16.gmra.mrb[40].mxu1 %v306_v38  ;;  %v160_v38 = vld [vmem:[%s3158_s0 + $0x470] sm:$0xff] }
  0xb9   :  { %851 = vmatmul.mubr.bf16.gmra.mrb[8].mxu0 %v224_v40  ;;  %v249_v40 = vpack.c.bf16 %v89_v37, %v85_v36  ;;  %v285_v36 = vpack.c.bf16 %v161_v34, %v157_v33  ;;  %v156_v37 = vld [vmem:[%s3158_s0 + $0x450] sm:$0xff] }
  0xba   :  { %858 = vmatprep.mubr.bf16.mxu0 %v229_v41  ;;  %v211_v41 = vld [vmem:[%s3158_s0 + $0x608] sm:$0xff] }
  0xbb   :  { %v311_v44 = vpack.c.bf16 %v211_v41, %v211_v41  ;;  %v284_v41 = vpack.c.bf16 %v160_v38, %v156_v37 }
  0xbd   :  { %794 = vmatprep.mubr.bf16.mxu1 %v311_v44  ;;  %v168_v44 = vld [vmem:[%s3158_s0 + $0x4b0] sm:$0xff] }
  0xbe   :  { %795 = vmatmul.mubr.bf16.gmra.mrb[44].mxu1 %v310_v48  ;;  %v288_v47 = vpack.c.bf16 %v168_v44, %v164_v43  ;;  %v293_v48 = vpack.c.bf16 %v177_v46, %v173_v45 }
  0xbf   :  { %1648 = vmatprep.mubr.msk.bf16.mxu1 %vm1896_vm0, %v1895_v10 }
  0xc1   :  { %859 = vmatmul.mubr.bf16.gmra.mrb[12].mxu0 %v228_v53  ;;  %v96_v53 = vld [vmem:[%s3158_s0 + $0x270] sm:$0xff] }
  0xc2   :  { %866 = vmatprep.mubr.bf16.mxu0 %v233_v54  ;;  %v101_v54 = vld [vmem:[%s3158_s0 + $0x298] sm:$0xff]  ;;  %v252_v56 = vpack.c.bf16 %v96_v53, %v92_v52 }
  0xc3   :  { %v257_v57 = vpack.c.bf16 %v105_v55, %v101_v54  ;;  %v185_v52 = vld [vmem:[%s3158_s0 + $0x538] sm:$0xff]  ;;  %v180_v55 = vld [vmem:[%s3158_s0 + $0x510] sm:$0xff] }
  0xc4   :  { %v297_v54 = vpack.c.bf16 %v185_v52, %v181_v51 }
  0xc9   :  { %867 = vmatmul.mubr.bf16.gmra.mrb[16].mxu0 %v232_v2  ;;  %v112_v2 = vld [vmem:[%s3158_s0 + $0x2f0] sm:$0xff] }
  0xca   :  { %874 = vmatprep.mubr.bf16.mxu0 %v237_v3  ;;  %v117_v3 = vld [vmem:[%s3158_s0 + $0x318] sm:$0xff]  ;;  %v260_v5 = vpack.c.bf16 %v112_v2, %v108_v1 }
  0xcb   :  { %v265_v6 = vpack.c.bf16 %v121_v4, %v117_v3  ;;  %v201_v1 = vld [vmem:[%s3158_s0 + $0x5b8] sm:$0xff]  ;;  %v196_v4 = vld [vmem:[%s3158_s0 + $0x590] sm:$0xff] }
  0xd1   :  { %875 = vmatmul.mubr.bf16.gmra.mrb[20].mxu0 %v236_v15  ;;  %v128_v15 = vld [vmem:[%s3158_s0 + $0x370] sm:$0xff] }
  0xd2   :  { %882 = vmatprep.mubr.bf16.mxu0 %v241_v16  ;;  %v133_v16 = vld [vmem:[%s3158_s0 + $0x398] sm:$0xff]  ;;  %v268_v18 = vpack.c.bf16 %v128_v15, %v124_v14 }
  0xd3   :  { %v273_v19 = vpack.c.bf16 %v137_v17, %v133_v16  ;;  %v212_v17 = vld [vmem:[%s3158_s0 + $0x610] sm:$0xff] }
  0xd4   :  { %v312_v21 = vpack.c.bf16 %v212_v17, %v212_v17 }
  0xd9   :  { %883 = vmatmul.mubr.bf16.gmra.mrb[24].mxu0 %v240_v28  ;;  %v149_v28 = vld [vmem:[%s3158_s0 + $0x418] sm:$0xff] }
  0xda   :  { %890 = vmatprep.mubr.bf16.mxu0 %v245_v29  ;;  %v153_v29 = vld [vmem:[%s3158_s0 + $0x438] sm:$0xff] }
  0xdb   :  { %v281_v30 = vpack.c.bf16 %v153_v29, %v149_v28 }
  0xe1   :  { %891 = vmatmul.mubr.bf16.gmra.mrb[28].mxu0 %v244_v39  ;;  %v165_v39 = vld [vmem:[%s3158_s0 + $0x498] sm:$0xff] }
  0xe2   :  { %898 = vmatprep.mubr.bf16.mxu0 %v249_v40  ;;  %v169_v40 = vld [vmem:[%s3158_s0 + $0x4b8] sm:$0xff] }
  0xe3   :  { %v289_v42 = vpack.c.bf16 %v169_v40, %v165_v39 }
  0xe9   :  { %899 = vmatmul.mubr.bf16.gmra.mrb[32].mxu0 %v248_v49  ;;  %v172_v49 = vld [vmem:[%s3158_s0 + $0x4d0] sm:$0xff] }
  0xea   :  { %906 = vmatprep.mubr.bf16.mxu0 %v253_v50  ;;  %v176_v50 = vld [vmem:[%s3158_s0 + $0x4f0] sm:$0xff] }
  0xeb   :  { %v292_v53 = vpack.c.bf16 %v176_v50, %v172_v49 }
  0xf1   :  { %907 = vmatmul.mubr.bf16.gmra.mrb[36].mxu0 %v252_v56  ;;  %v184_v56 = vld [vmem:[%s3158_s0 + $0x530] sm:$0xff] }
  0xf2   :  { %914 = vmatprep.mubr.bf16.mxu0 %v257_v57  ;;  %v189_v57 = vld [vmem:[%s3158_s0 + $0x558] sm:$0xff]  ;;  %v296_v59 = vpack.c.bf16 %v184_v56, %v180_v55 }
  0xf3   :  { %v301_v60 = vpack.c.bf16 %v193_v58, %v189_v57 }
  0xf9   :  { %915 = vmatmul.mubr.bf16.gmra.mrb[40].mxu0 %v256_v62  ;;  %v192_v62 = vld [vmem:[%s3158_s0 + $0x570] sm:$0xff] }
  0xfa   :  { %922 = vmatprep.mubr.bf16.mxu0 %v261_v63  ;;  %v197_v63 = vld [vmem:[%s3158_s0 + $0x598] sm:$0xff]  ;;  %v300_v2 = vpack.c.bf16 %v192_v62, %v188_v61 }
  0xfb   :  { %v305_v3 = vpack.c.bf16 %v201_v1, %v197_v63 }
 0x101   :  { %923 = vmatmul.mubr.bf16.gmra.mrb[44].mxu0 %v260_v5  ;;  %v200_v5 = vld [vmem:[%s3158_s0 + $0x5b0] sm:$0xff] }
 0x102   :  { %930 = vmatprep.mubr.bf16.mxu0 %v265_v6  ;;  %v205_v6 = vld [vmem:[%s3158_s0 + $0x5d8] sm:$0xff]  ;;  %v304_v8 = vpack.c.bf16 %v200_v5, %v196_v4 }
 0x103   :  { %v309_v9 = vpack.c.bf16 %v209_v7, %v205_v6 }
 0x109   :  { %931 = vmatmul.mubr.bf16.gmra.mrb[48].mxu0 %v264_v12  ;;  %v208_v12 = vld [vmem:[%s3158_s0 + $0x5f0] sm:$0xff] }
 0x10a   :  { %938 = vmatprep.mubr.bf16.mxu0 %v269_v13  ;;  %v213_v13 = vld [vmem:[%s3158_s0 + $0x618] sm:$0xff]  ;;  %v308_v14 = vpack.c.bf16 %v208_v12, %v204_v11 }
 0x10b   :  { %v313_v15 = vpack.c.bf16 %v213_v13, %v213_v13 }
 0x111   :  { %939 = vmatmul.mubr.bf16.gmra.mrb[52].mxu0 %v268_v18 }
 0x112   :  { %946 = vmatprep.mubr.bf16.mxu0 %v273_v19 }
 0x119   :  { %947 = vmatmul.mubr.bf16.gmra.mrb[56].mxu0 %v272_v24 }
 0x11a   :  { %954 = vmatprep.mubr.bf16.mxu0 %v277_v25 }
 0x121   :  { %955 = vmatmul.mubr.bf16.gmra.mrb[60].mxu0 %v276_v0 }
 0x122   :  { %962 = vmatprep.mubr.bf16.mxu0 %v281_v30 }
 0x127   :  { %v2669_v16 = vpop.f32.mrb[0].mxu1 }
 0x128   :  { %v710_v18 = vpop.f32.mrb[1].mxu1 }
 0x129   :  { %963 = vmatmul.mubr.bf16.gmra.mrb[64].mxu0 %v280_v35  ;;  %v2674_v19 = vpop.f32.mrb[2].mxu1 }
 0x12a   :  { %970 = vmatprep.mubr.bf16.mxu0 %v285_v36  ;;  %v713_v20 = vpop.f32.mrb[3].mxu1 }
 0x131   :  { %971 = vmatmul.mubr.bf16.gmra.mrb[68].mxu0 %v284_v41 }
 0x132   :  { %978 = vmatprep.mubr.bf16.mxu0 %v289_v42 }
 0x133   :  { %v2676_v22 = vpop.f32.mrb[4].mxu1 }
 0x134   :  { %v718_v23 = vpop.f32.mrb[5].mxu1 }
 0x135   :  { %v2678_v24 = vpop.f32.mrb[6].mxu1 }
 0x136   :  { %v721_v25 = vpop.f32.mrb[7].mxu1 }
 0x139   :  { %979 = vmatmul.mubr.bf16.gmra.mrb[72].mxu0 %v288_v47 }
 0x13a   :  { %986 = vmatprep.mubr.bf16.mxu0 %v293_v48 }
 0x13f   :  { %v2680_v26 = vpop.f32.mrb[8].mxu1 }
 0x140   :  { %v726_v27 = vpop.f32.mrb[9].mxu1 }
 0x141   :  { %987 = vmatmul.mubr.bf16.gmra.mrb[76].mxu0 %v292_v53  ;;  %v2682_v28 = vpop.f32.mrb[10].mxu1 }
 0x142   :  { %994 = vmatprep.mubr.bf16.mxu0 %v297_v54  ;;  %v729_v29 = vpop.f32.mrb[11].mxu1 }
 0x148   :  { %v2684_v0 = vpop.f32.mrb[12].mxu1 }
 0x149   :  { %995 = vmatmul.mubr.bf16.gmra.mrb[80].mxu0 %v296_v59  ;;  %v734_v30 = vpop.f32.mrb[13].mxu1 }
 0x14a   :  { %1002 = vmatprep.mubr.bf16.mxu0 %v301_v60  ;;  %v2686_v31 = vpop.f32.mrb[14].mxu1 }
 0x14b   :  { %v737_v33 = vpop.f32.mrb[15].mxu1 }
 0x151   :  { %1003 = vmatmul.mubr.bf16.gmra.mrb[84].mxu0 %v300_v2 }
 0x152   :  { %1010 = vmatprep.mubr.bf16.mxu0 %v305_v3 }
 0x157   :  { %v2688_v40 = vpop.f32.mrb[16].mxu1 }
 0x158   :  { %v742_v41 = vpop.f32.mrb[17].mxu1 }
 0x159   :  { %1011 = vmatmul.mubr.bf16.gmra.mrb[88].mxu0 %v304_v8  ;;  %v2691_v42 = vpop.f32.mrb[18].mxu1 }
 0x15a   :  { %1018 = vmatprep.mubr.bf16.mxu0 %v309_v9  ;;  %v745_v44 = vpop.f32.mrb[19].mxu1 }
 0x161   :  { %1019 = vmatmul.mubr.bf16.gmra.mrb[92].mxu0 %v308_v14  ;;  %v2695_v51 = vpop.f32.mrb[20].mxu1 }
 0x162   :  { %1026 = vmatprep.mubr.bf16.mxu0 %v313_v15  ;;  %v750_v52 = vpop.f32.mrb[21].mxu1 }
 0x163   :  { %v2698_v53 = vpop.f32.mrb[22].mxu1 }
 0x164   :  { %v753_v55 = vpop.f32.mrb[23].mxu1 }
 0x169   :  { %1027 = vmatmul.mubr.bf16.gmra.mrb[96].mxu0 %v312_v21  ;;  %v2702_v62 = vpop.f32.mrb[24].mxu1 }
 0x16a   :  { %v758_v63 = vpop.f32.mrb[25].mxu1 }
 0x16b   :  { %v2705_v1 = vpop.f32.mrb[26].mxu1 }
 0x16c   :  { %v761_v3 = vpop.f32.mrb[27].mxu1 }
 0x171   :  { %v2709_v11 = vpop.f32.mrb[28].mxu1 }
 0x172   :  { %v766_v12 = vpop.f32.mrb[29].mxu1 }
 0x173   :  { %v2712_v13 = vpop.f32.mrb[30].mxu1 }
 0x174   :  { %v769_v15 = vpop.f32.mrb[31].mxu1 }
 0x179   :  { %v2716_v27 = vpop.f32.mrb[32].mxu1 }
 0x17a   :  { %v774_v29 = vpop.f32.mrb[33].mxu1 }
 0x17b   :  { %v2719_v30 = vpop.f32.mrb[34].mxu1 }
 0x17c   :  { %v836_v32 = vpop.f32.mrb[0].mxu0  ;;  %v777_v33 = vpop.f32.mrb[35].mxu1 }
 0x17d   :  { %v838_v34 = vpop.f32.mrb[1].mxu0  ;;  %v1034_v36 = vmax.f32 %v836_v32, 0.0 }
 0x17e   :  { %v839_v35 = vpop.f32.mrb[2].mxu0 }
 0x17f   :  { %v1035_v37 = vmax.f32 %v839_v35, 0.0  ;;  %v841_v38 = vpop.f32.mrb[3].mxu0 }
 0x181   :  { %v1083_v39 = vpack.c.bf16 %v1035_v37, %v1034_v36  ;;  %v2723_v41 = vpop.f32.mrb[36].mxu1 }
 0x183   :  { %1649 = vmatmul.mubr.msk.bf16.vlgmr.msra.gmra.mrb[48].mxu1 %vm1189_vm1, %v1083_v39 }
 0x184   :  { %v844_v43 = vpop.f32.mrb[4].mxu0  ;;  %1652 = vmatprep.mubr.msk.bf16.mxu1 %vm1896_vm0, %v1895_v10 }
 0x185   :  { %v846_v45 = vpop.f32.mrb[5].mxu0  ;;  %v1036_v47 = vmax.f32 %v844_v43, 0.0  ;;  %v782_v43 = vpop.f32.mrb[37].mxu1 }
 0x186   :  { %v847_v46 = vpop.f32.mrb[6].mxu0  ;;  %v2726_v44 = vpop.f32.mrb[38].mxu1 }
 0x187   :  { %v1037_v48 = vmax.f32 %v847_v46, 0.0  ;;  %v849_v49 = vpop.f32.mrb[7].mxu0  ;;  %v785_v46 = vpop.f32.mrb[39].mxu1 }
 0x189   :  { %v1084_v50 = vpack.c.bf16 %v1037_v48, %v1036_v47  ;;  %v2730_v55 = vpop.f32.mrb[40].mxu1 }
 0x18b   :  { %1653 = vmatmul.mubr.msk.bf16.gmra.mrb[52].mxu1 %vm1189_vm1, %v1084_v50 }
 0x18c   :  { %v852_v54 = vpop.f32.mrb[8].mxu0  ;;  %1656 = vmatprep.mubr.msk.bf16.mxu1 %vm1896_vm0, %v1895_v10 }
 0x18d   :  { %v854_v56 = vpop.f32.mrb[9].mxu0  ;;  %v1038_v58 = vmax.f32 %v852_v54, 0.0 }
 0x18e   :  { %v855_v57 = vpop.f32.mrb[10].mxu0  ;;  %v790_v56 = vpop.f32.mrb[41].mxu1 }
 0x18f   :  { %v1039_v59 = vmax.f32 %v855_v57, 0.0  ;;  %v857_v60 = vpop.f32.mrb[11].mxu0  ;;  %v2733_v57 = vpop.f32.mrb[42].mxu1 }
 0x191   :  { %v1085_v61 = vpack.c.bf16 %v1039_v59, %v1038_v58  ;;  %v793_v59 = vpop.f32.mrb[43].mxu1 }
 0x193   :  { %1657 = vmatmul.mubr.msk.bf16.gmra.mrb[56].mxu1 %vm1189_vm1, %v1085_v61 }
 0x194   :  { %v860_v2 = vpop.f32.mrb[12].mxu0  ;;  %1660 = vmatprep.mubr.msk.bf16.mxu1 %vm1896_vm0, %v1895_v10 }
 0x195   :  { %v862_v4 = vpop.f32.mrb[13].mxu0  ;;  %v1040_v6 = vmax.f32 %v860_v2, 0.0 }
 0x196   :  { %v863_v5 = vpop.f32.mrb[14].mxu0 }
 0x197   :  { %v1041_v7 = vmax.f32 %v863_v5, 0.0  ;;  %v865_v8 = vpop.f32.mrb[15].mxu0  ;;  %v2738_v5 = vpop.f32.mrb[44].mxu1 }
 0x199   :  { %v1086_v9 = vpack.c.bf16 %v1041_v7, %v1040_v6  ;;  %v798_v7 = vpop.f32.mrb[45].mxu1 }
 0x19b   :  { %1661 = vmatmul.mubr.msk.bf16.gmra.mrb[60].mxu1 %vm1189_vm1, %v1086_v9  ;;  %v799_v9 = vpop.f32.mrb[46].mxu1 }
 0x19c   :  { %v868_v14 = vpop.f32.mrb[16].mxu0  ;;  %1664 = vmatprep.mubr.msk.bf16.mxu1 %vm1896_vm0, %v1895_v10 }
 0x19d   :  { %v870_v17 = vpop.f32.mrb[17].mxu0  ;;  %v1042_v20 = vmax.f32 %v868_v14, 0.0  ;;  %v800_v14 = vpop.f32.mrb[47].mxu1 }
 0x19e   :  { %v871_v18 = vpop.f32.mrb[18].mxu0 }
 0x19f   :  { %v1043_v21 = vmax.f32 %v871_v18, 0.0  ;;  %v873_v23 = vpop.f32.mrb[19].mxu0 }
 0x1a1   :  { %v1087_v25 = vpack.c.bf16 %v1043_v21, %v1042_v20 }
 0x1a3   :  { %1665 = vmatmul.mubr.msk.bf16.gmra.mrb[64].mxu1 %vm1189_vm1, %v1087_v25 }
 0x1a4   :  { %v876_v32 = vpop.f32.mrb[20].mxu0  ;;  %1668 = vmatprep.mubr.msk.bf16.mxu1 %vm1896_vm0, %v1895_v10 }
 0x1a5   :  { %v878_v34 = vpop.f32.mrb[21].mxu0  ;;  %v1044_v36 = vmax.f32 %v876_v32, 0.0 }
 0x1a6   :  { %v879_v35 = vpop.f32.mrb[22].mxu0 }
 0x1a7   :  { %v1045_v37 = vmax.f32 %v879_v35, 0.0  ;;  %v881_v38 = vpop.f32.mrb[23].mxu0 }
 0x1a9   :  { %v1088_v39 = vpack.c.bf16 %v1045_v37, %v1044_v36 }
 0x1ab   :  { %1669 = vmatmul.mubr.msk.bf16.gmra.mrb[68].mxu1 %vm1189_vm1, %v1088_v39 }
 0x1ac   :  { %v884_v45 = vpop.f32.mrb[24].mxu0  ;;  %1672 = vmatprep.mubr.msk.bf16.mxu1 %vm1896_vm0, %v1895_v10 }
 0x1ad   :  { %v886_v47 = vpop.f32.mrb[25].mxu0  ;;  %v1046_v49 = vmax.f32 %v884_v45, 0.0 }
 0x1ae   :  { %v887_v48 = vpop.f32.mrb[26].mxu0 }
 0x1af   :  { %v1047_v50 = vmax.f32 %v887_v48, 0.0  ;;  %v889_v52 = vpop.f32.mrb[27].mxu0 }
 0x1b1   :  { %v1089_v54 = vpack.c.bf16 %v1047_v50, %v1046_v49 }
 0x1b3   :  { %1673 = vmatmul.mubr.msk.bf16.gmra.mrb[72].mxu1 %vm1189_vm1, %v1089_v54 }
 0x1b4   :  { %v892_v58 = vpop.f32.mrb[28].mxu0  ;;  %1676 = vmatprep.mubr.msk.bf16.mxu1 %vm1896_vm0, %v1895_v10 }
 0x1b5   :  { %v894_v60 = vpop.f32.mrb[29].mxu0  ;;  %v1048_v63 = vmax.f32 %v892_v58, 0.0 }
 0x1b6   :  { %v895_v61 = vpop.f32.mrb[30].mxu0 }
 0x1b7   :  { %v1049_v2 = vmax.f32 %v895_v61, 0.0  ;;  %v897_v3 = vpop.f32.mrb[31].mxu0 }
 0x1b9   :  { %v1090_v4 = vpack.c.bf16 %v1049_v2, %v1048_v63 }
 0x1bb   :  { %1677 = vmatmul.mubr.msk.bf16.gmra.mrb[76].mxu1 %vm1189_vm1, %v1090_v4 }
 0x1bc   :  { %v900_v6 = vpop.f32.mrb[32].mxu0  ;;  %1680 = vmatprep.mubr.msk.bf16.mxu1 %vm1896_vm0, %v1895_v10 }
 0x1bd   :  { %v902_v8 = vpop.f32.mrb[33].mxu0  ;;  %v1050_v15 = vmax.f32 %v900_v6, 0.0 }
 0x1be   :  { %v903_v12 = vpop.f32.mrb[34].mxu0 }
 0x1bf   :  { %v1051_v17 = vmax.f32 %v903_v12, 0.0  ;;  %v905_v18 = vpop.f32.mrb[35].mxu0 }
 0x1c1   :  { %v1091_v20 = vpack.c.bf16 %v1051_v17, %v1050_v15 }
 0x1c3   :  { %1681 = vmatmul.mubr.msk.bf16.gmra.mrb[80].mxu1 %vm1189_vm1, %v1091_v20 }
 0x1c4   :  { %v908_v21 = vpop.f32.mrb[36].mxu0  ;;  %1684 = vmatprep.mubr.msk.bf16.mxu1 %vm1896_vm0, %v1895_v10 }
 0x1c5   :  { %v910_v23 = vpop.f32.mrb[37].mxu0  ;;  %v1052_v29 = vmax.f32 %v908_v21, 0.0 }
 0x1c6   :  { %v911_v25 = vpop.f32.mrb[38].mxu0 }
 0x1c7   :  { %v1053_v32 = vmax.f32 %v911_v25, 0.0  ;;  %v913_v33 = vpop.f32.mrb[39].mxu0 }
 0x1c9   :  { %v1092_v34 = vpack.c.bf16 %v1053_v32, %v1052_v29 }
 0x1cb   :  { %1685 = vmatmul.mubr.msk.bf16.gmra.mrb[84].mxu1 %vm1189_vm1, %v1092_v34 }
 0x1cc   :  { %v916_v35 = vpop.f32.mrb[40].mxu0  ;;  %1688 = vmatprep.mubr.msk.bf16.mxu1 %vm1896_vm0, %v1895_v10 }
 0x1cd   :  { %v918_v36 = vpop.f32.mrb[41].mxu0  ;;  %v1054_v38 = vmax.f32 %v916_v35, 0.0 }
 0x1ce   :  { %v919_v37 = vpop.f32.mrb[42].mxu0 }
 0x1cf   :  { %v1055_v39 = vmax.f32 %v919_v37, 0.0  ;;  %v921_v43 = vpop.f32.mrb[43].mxu0 }
 0x1d1   :  { %v1093_v45 = vpack.c.bf16 %v1055_v39, %v1054_v38 }
 0x1d3   :  { %1689 = vmatmul.mubr.msk.bf16.gmra.mrb[88].mxu1 %vm1189_vm1, %v1093_v45 }
 0x1d4   :  { %v924_v46 = vpop.f32.mrb[44].mxu0  ;;  %1692 = vmatprep.mubr.msk.bf16.mxu1 %vm1896_vm0, %v1895_v10 }
 0x1d5   :  { %v926_v47 = vpop.f32.mrb[45].mxu0  ;;  %v1056_v49 = vmax.f32 %v924_v46, 0.0 }
 0x1d6   :  { %v927_v48 = vpop.f32.mrb[46].mxu0 }
 0x1d7   :  { %v1057_v50 = vmax.f32 %v927_v48, 0.0  ;;  %v929_v52 = vpop.f32.mrb[47].mxu0 }
 0x1d9   :  { %v1094_v54 = vpack.c.bf16 %v1057_v50, %v1056_v49 }
 0x1db   :  { %1693 = vmatmul.mubr.msk.bf16.gmra.mrb[92].mxu1 %vm1189_vm1, %v1094_v54 }
 0x1dc   :  { %v932_v56 = vpop.f32.mrb[48].mxu0  ;;  %1696 = vmatprep.mubr.msk.bf16.mxu1 %vm1896_vm0, %v1895_v10 }
 0x1dd   :  { %v934_v58 = vpop.f32.mrb[49].mxu0  ;;  %v1058_v60 = vmax.f32 %v932_v56, 0.0 }
 0x1de   :  { %v935_v59 = vpop.f32.mrb[50].mxu0 }
 0x1df   :  { %v1059_v61 = vmax.f32 %v935_v59, 0.0  ;;  %v937_v63 = vpop.f32.mrb[51].mxu0 }
 0x1e1   :  { %v1095_v2 = vpack.c.bf16 %v1059_v61, %v1058_v60 }
 0x1e3   :  { %1697 = vmatmul.mubr.msk.bf16.gmra.mrb[96].mxu1 %vm1189_vm1, %v1095_v2 }
 0x1e4   :  { %v940_v3 = vpop.f32.mrb[52].mxu0  ;;  %1700 = vmatprep.mubr.msk.bf16.mxu1 %vm1896_vm0, %v1895_v10 }
 0x1e5   :  { %v941_v4 = vadd.f32 %v940_v3, %v2669_v16  ;;  %v942_v6 = vpop.f32.mrb[53].mxu0 }
 0x1e6   :  { %v943_v7 = vpop.f32.mrb[54].mxu0 }
 0x1e7   :  { %v944_v8 = vadd.f32 %v943_v7, %v2674_v19  ;;  %v945_v9 = vpop.f32.mrb[55].mxu0  ;;  %v1060_v12 = vmax.f32 %v941_v4, 0.0 }
 0x1e9   :  { %v1061_v14 = vmax.f32 %v944_v8, 0.0 }
 0x1eb   :  { %v1096_v15 = vpack.c.bf16 %v1061_v14, %v1060_v12 }
 0x1ec   :  { %v948_v17 = vpop.f32.mrb[56].mxu0 }
 0x1ed   :  { %v949_v18 = vadd.f32 %v948_v17, %v2676_v22  ;;  %v950_v20 = vpop.f32.mrb[57].mxu0  ;;  %1701 = vmatmul.mubr.msk.bf16.gmra.mrb[100].mxu1 %vm1189_vm1, %v1096_v15 }
 0x1ee   :  { %v951_v21 = vpop.f32.mrb[58].mxu0  ;;  %1704 = vmatprep.mubr.msk.bf16.mxu1 %vm1896_vm0, %v1895_v10 }
 0x1ef   :  { %v952_v16 = vadd.f32 %v951_v21, %v2678_v24  ;;  %v953_v23 = vpop.f32.mrb[59].mxu0  ;;  %v1062_v25 = vmax.f32 %v949_v18, 0.0 }
 0x1f1   :  { %v1063_v29 = vmax.f32 %v952_v16, 0.0 }
 0x1f3   :  { %v1097_v19 = vpack.c.bf16 %v1063_v29, %v1062_v25 }
 0x1f4   :  { %v956_v32 = vpop.f32.mrb[60].mxu0 }
 0x1f5   :  { %v957_v33 = vadd.f32 %v956_v32, %v2680_v26  ;;  %v958_v34 = vpop.f32.mrb[61].mxu0  ;;  %1705 = vmatmul.mubr.msk.bf16.gmra.mrb[104].mxu1 %vm1189_vm1, %v1097_v19 }
 0x1f6   :  { %v959_v22 = vpop.f32.mrb[62].mxu0  ;;  %1708 = vmatprep.mubr.msk.bf16.mxu1 %vm1896_vm0, %v1895_v10 }
 0x1f7   :  { %v960_v35 = vadd.f32 %v959_v22, %v2682_v28  ;;  %v961_v36 = vpop.f32.mrb[63].mxu0  ;;  %v1064_v37 = vmax.f32 %v957_v33, 0.0 }
 0x1f9   :  { %v1065_v38 = vmax.f32 %v960_v35, 0.0 }
 0x1fb   :  { %v1098_v24 = vpack.c.bf16 %v1065_v38, %v1064_v37 }
 0x1fc   :  { %v964_v39 = vpop.f32.mrb[64].mxu0 }
 0x1fd   :  { %v965_v43 = vadd.f32 %v964_v39, %v2684_v0  ;;  %v966_v45 = vpop.f32.mrb[65].mxu0  ;;  %1709 = vmatmul.mubr.msk.bf16.gmra.mrb[108].mxu1 %vm1189_vm1, %v1098_v24 }
 0x1fe   :  { %v967_v26 = vpop.f32.mrb[66].mxu0  ;;  %1712 = vmatprep.mubr.msk.bf16.mxu1 %vm1896_vm0, %v1895_v10 }
 0x1ff   :  { %v968_v46 = vadd.f32 %v967_v26, %v2686_v31  ;;  %v969_v47 = vpop.f32.mrb[67].mxu0  ;;  %v1066_v48 = vmax.f32 %v965_v43, 0.0 }
 0x201   :  { %v1067_v49 = vmax.f32 %v968_v46, 0.0 }
 0x203   :  { %v1099_v28 = vpack.c.bf16 %v1067_v49, %v1066_v48 }
 0x204   :  { %v972_v50 = vpop.f32.mrb[68].mxu0 }
 0x205   :  { %v973_v52 = vadd.f32 %v972_v50, %v2688_v40  ;;  %v974_v54 = vpop.f32.mrb[69].mxu0  ;;  %1713 = vmatmul.mubr.msk.bf16.gmra.mrb[112].mxu1 %vm1189_vm1, %v1099_v28 }
 0x206   :  { %v975_v0 = vpop.f32.mrb[70].mxu0  ;;  %1716 = vmatprep.mubr.msk.bf16.mxu1 %vm1896_vm0, %v1895_v10 }
 0x207   :  { %v976_v56 = vadd.f32 %v975_v0, %v2691_v42  ;;  %v977_v58 = vpop.f32.mrb[71].mxu0  ;;  %v1068_v59 = vmax.f32 %v973_v52, 0.0 }
 0x209   :  { %v1069_v60 = vmax.f32 %v976_v56, 0.0 }
 0x20b   :  { %v1100_v31 = vpack.c.bf16 %v1069_v60, %v1068_v59 }
 0x20c   :  { %v980_v61 = vpop.f32.mrb[72].mxu0 }
 0x20d   :  { %v981_v63 = vadd.f32 %v980_v61, %v2695_v51  ;;  %v982_v2 = vpop.f32.mrb[73].mxu0  ;;  %1717 = vmatmul.mubr.msk.bf16.gmra.mrb[116].mxu1 %vm1189_vm1, %v1100_v31 }
 0x20e   :  { %v983_v40 = vpop.f32.mrb[74].mxu0  ;;  %1720 = vmatprep.mubr.msk.bf16.mxu1 %vm1896_vm0, %v1895_v10 }
 0x20f   :  { %v984_v3 = vadd.f32 %v983_v40, %v2698_v53  ;;  %v985_v4 = vpop.f32.mrb[75].mxu0  ;;  %v1070_v6 = vmax.f32 %v981_v63, 0.0 }
 0x210   :  { %v1118_v4 = vld [vmem:[%s3160_s3 + $0x10] sm:$0xff] }
 0x211   :  { %v1071_v7 = vmax.f32 %v984_v3, 0.0 }
 0x213   :  { %v1101_v42 = vpack.c.bf16 %v1071_v7, %v1070_v6  ;;  %v1119_v7 = vld [vmem:[%s3160_s3 + $0x18] sm:$0xff] }
 0x214   :  { %v988_v8 = vpop.f32.mrb[76].mxu0 }
 0x215   :  { %v989_v9 = vadd.f32 %v988_v8, %v2702_v62  ;;  %v990_v12 = vpop.f32.mrb[77].mxu0  ;;  %1721 = vmatmul.mubr.msk.bf16.gmra.mrb[120].mxu1 %vm1189_vm1, %v1101_v42 }
 0x216   :  { %v991_v51 = vpop.f32.mrb[78].mxu0  ;;  %1724 = vmatprep.mubr.msk.bf16.mxu1 %vm1896_vm0, %v1895_v10 }
 0x217   :  { %v992_v14 = vadd.f32 %v991_v51, %v2705_v1  ;;  %v993_v15 = vpop.f32.mrb[79].mxu0  ;;  %v1072_v17 = vmax.f32 %v989_v9, 0.0 }
 0x219   :  { %v1073_v18 = vmax.f32 %v992_v14, 0.0  ;;  %v1120_v14 = vld [vmem:[%s3160_s3 + $0x20] sm:$0xff] }
 0x21b   :  { %v1102_v53 = vpack.c.bf16 %v1073_v18, %v1072_v17  ;;  %v1121_v17 = vld [vmem:[%s3160_s3 + $0x28] sm:$0xff] }
 0x21c   :  { %v996_v20 = vpop.f32.mrb[80].mxu0 }
 0x21d   :  { %v997_v21 = vadd.f32 %v996_v20, %v2709_v11  ;;  %v998_v16 = vpop.f32.mrb[81].mxu0  ;;  %1725 = vmatmul.mubr.msk.bf16.gmra.mrb[124].mxu1 %vm1189_vm1, %v1102_v53 }
 0x21e   :  { %v999_v62 = vpop.f32.mrb[82].mxu0  ;;  %1728 = vmatprep.mubr.msk.bf16.mxu1 %vm1896_vm0, %v1895_v10 }
 0x21f   :  { %v1000_v23 = vadd.f32 %v999_v62, %v2712_v13  ;;  %v1001_v25 = vpop.f32.mrb[83].mxu0  ;;  %v1074_v29 = vmax.f32 %v997_v21, 0.0  ;;  %v1122_v62 = vld [vmem:[%s3160_s3 + $0x30] sm:$0xff] }
 0x220   :  { %v1123_v25 = vld [vmem:[%s3160_s3 + $0x38] sm:$0xff] }
 0x221   :  { %v1075_v19 = vmax.f32 %v1000_v23, 0.0 }
 0x223   :  { %v1103_v1 = vpack.c.bf16 %v1075_v19, %v1074_v29 }
 0x224   :  { %v1004_v32 = vpop.f32.mrb[84].mxu0 }
 0x225   :  { %v1005_v33 = vadd.f32 %v1004_v32, %v2716_v27  ;;  %v1006_v34 = vpop.f32.mrb[85].mxu0  ;;  %1729 = vmatmul.mubr.msk.bf16.gmra.mrb[128].mxu1 %vm1189_vm1, %v1103_v1 }
 0x226   :  { %v1007_v11 = vpop.f32.mrb[86].mxu0  ;;  %1732 = vmatprep.mubr.msk.bf16.mxu1 %vm1896_vm0, %v1895_v10  ;;  %v1124_v34 = vld [vmem:[%s3160_s3 + $0x40] sm:$0xff] }
 0x227   :  { %v1008_v22 = vadd.f32 %v1007_v11, %v2719_v30  ;;  %v1009_v35 = vpop.f32.mrb[87].mxu0  ;;  %v1076_v36 = vmax.f32 %v1005_v33, 0.0 }
 0x229   :  { %v1077_v37 = vmax.f32 %v1008_v22, 0.0  ;;  %v1125_v22 = vld [vmem:[%s3160_s3 + $0x48] sm:$0xff] }
 0x22b   :  { %v1104_v13 = vpack.c.bf16 %v1077_v37, %v1076_v36 }
 0x22c   :  { %v1012_v38 = vpop.f32.mrb[88].mxu0 }
 0x22d   :  { %v1013_v24 = vadd.f32 %v1012_v38, %v2723_v41  ;;  %v1014_v39 = vpop.f32.mrb[89].mxu0  ;;  %1733 = vmatmul.mubr.msk.bf16.gmra.mrb[132].mxu1 %vm1189_vm1, %v1104_v13 }
 0x22e   :  { %v1015_v27 = vpop.f32.mrb[90].mxu0  ;;  %1736 = vmatprep.mubr.msk.bf16.mxu1 %vm1896_vm0, %v1895_v10 }
 0x22f   :  { %v1016_v43 = vadd.f32 %v1015_v27, %v2726_v44  ;;  %v1017_v45 = vpop.f32.mrb[91].mxu0  ;;  %v1078_v26 = vmax.f32 %v1013_v24, 0.0  ;;  %v1126_v24 = vld [vmem:[%s3160_s3 + $0x50] sm:$0xff]  ;;  %v1127_v27 = vld [vmem:[%s3160_s3 + $0x58] sm:$0xff] }
 0x231   :  { %v1079_v46 = vmax.f32 %v1016_v43, 0.0 }
 0x233   :  { %v1105_v30 = vpack.c.bf16 %v1079_v46, %v1078_v26 }
 0x234   :  { %v1020_v47 = vpop.f32.mrb[92].mxu0 }
 0x235   :  { %v1021_v48 = vadd.f32 %v1020_v47, %v2730_v55  ;;  %v1022_v49 = vpop.f32.mrb[93].mxu0  ;;  %1737 = vmatmul.mubr.msk.bf16.gmra.mrb[136].mxu1 %vm1189_vm1, %v1105_v30  ;;  %v1128_v47 = vld [vmem:[%s3160_s3 + $0x60] sm:$0xff] }
 0x236   :  { %v1023_v41 = vpop.f32.mrb[94].mxu0  ;;  %1740 = vmatprep.mubr.msk.bf16.mxu1 %vm1896_vm0, %v1895_v10  ;;  %v1129_v49 = vld [vmem:[%s3160_s3 + $0x68] sm:$0xff] }
 0x237   :  { %v1024_v28 = vadd.f32 %v1023_v41, %v2733_v57  ;;  %v1025_v50 = vpop.f32.mrb[95].mxu0  ;;  %v1080_v52 = vmax.f32 %v1021_v48, 0.0  ;;  %v1116_v57 = vld [vmem:[%s3160_s3] sm:$0xff] }
 0x239   :  { %v1081_v54 = vmax.f32 %v1024_v28, 0.0 }
 0x23b   :  { %v1106_v44 = vpack.c.bf16 %v1081_v54, %v1080_v52 }
 0x23c   :  { %v1028_v0 = vpop.f32.mrb[96].mxu0 }
 0x23d   :  { %v1029_v56 = vadd.f32 %v1028_v0, %v2738_v5  ;;  %v1030_v58 = vpop.f32.mrb[97].mxu0  ;;  %1741 = vmatmul.mubr.msk.bf16.gmra.mrb[140].mxu1 %vm1189_vm1, %v1106_v44  ;;  %v1117_v5 = vld [vmem:[%s3160_s3 + $0x8] sm:$0xff]  ;;  %v1130_v44 = vld [vmem:[%s3160_s3 + $0x70] sm:$0xff] }
 0x23e   :  { %v1031_v55 = vpop.f32.mrb[98].mxu0  ;;  %1744 = vmatprep.mubr.msk.bf16.mxu1 %vm1896_vm0, %v1895_v10 }
 0x23f   :  { %v1082_v59 = vmax.f32 %v1029_v56, 0.0  ;;  %v1032_v60 = vpop.f32.mrb[99].mxu0  ;;  %v1131_v56 = vld [vmem:[%s3160_s3 + $0x78] sm:$0xff] }
 0x241   :  { %v1107_v31 = vpack.c.bf16 %v1082_v59, %v1082_v59 }
 0x245   :  { %1745 = vmatmul.mubr.msk.bf16.gmra.mrb[144].mxu1 %vm1189_vm1, %v1107_v31 }
 0x256   :  { %v1299_v61 = vpop.f32.mrb[48].mxu1 }
 0x257   :  { %v1300_v63 = vadd.f32 %v1299_v61, %v1116_v57  ;;  %v1650_v2 = vpop.f32.mrb[49].mxu1  ;;  %v1132_v57 = vld [vmem:[%s3160_s3 + $0x80] sm:$0xff] }
 0x258   :  { %v1302_v40 = vpop.f32.mrb[50].mxu1 }
 0x259   :  { %1497 = vst.msk [vmem:[%s3161_s4] sm:$0xff] %vm1189_vm1, %v1300_v63  ;;  %v1303_v10 = vadd.f32 %v1302_v40, %v1117_v5  ;;  %v1651_v3 = vpop.f32.mrb[51].mxu1  ;;  %v1133_v5 = vld [vmem:[%s3160_s3 + $0x88] sm:$0xff] }
 0x25b   :  { %1498 = vst.msk [vmem:[%s3161_s4 + $0x8] sm:$0xff] %vm1189_vm1, %v1303_v10 }
 0x25e   :  { %v1307_v6 = vpop.f32.mrb[52].mxu1 }
 0x25f   :  { %v1308_v42 = vadd.f32 %v1307_v6, %v1118_v4  ;;  %v1654_v8 = vpop.f32.mrb[53].mxu1  ;;  %v1134_v4 = vld [vmem:[%s3160_s3 + $0x90] sm:$0xff] }
 0x260   :  { %v1310_v9 = vpop.f32.mrb[54].mxu1 }
 0x261   :  { %1499 = vst.msk [vmem:[%s3161_s4 + $0x10] sm:$0xff] %vm1189_vm1, %v1308_v42  ;;  %v1311_v12 = vadd.f32 %v1310_v9, %v1119_v7  ;;  %v1655_v51 = vpop.f32.mrb[55].mxu1  ;;  %v1135_v7 = vld [vmem:[%s3160_s3 + $0x98] sm:$0xff] }
 0x263   :  { %1500 = vst.msk [vmem:[%s3161_s4 + $0x18] sm:$0xff] %vm1189_vm1, %v1311_v12 }
 0x266   :  { %v1315_v15 = vpop.f32.mrb[56].mxu1 }
 0x267   :  { %v1316_v18 = vadd.f32 %v1315_v15, %v1120_v14  ;;  %v1658_v53 = vpop.f32.mrb[57].mxu1  ;;  %v1136_v14 = vld [vmem:[%s3160_s3 + $0xa0] sm:$0xff] }
 0x268   :  { %v1318_v20 = vpop.f32.mrb[58].mxu1 }
 0x269   :  { %1501 = vst.msk [vmem:[%s3161_s4 + $0x20] sm:$0xff] %vm1189_vm1, %v1316_v18  ;;  %v1319_v21 = vadd.f32 %v1318_v20, %v1121_v17  ;;  %v1659_v16 = vpop.f32.mrb[59].mxu1  ;;  %v1137_v17 = vld [vmem:[%s3160_s3 + $0xa8] sm:$0xff] }
 0x26b   :  { %1502 = vst.msk [vmem:[%s3161_s4 + $0x28] sm:$0xff] %vm1189_vm1, %v1319_v21 }
 0x26e   :  { %v1323_v23 = vpop.f32.mrb[60].mxu1 }
 0x26f   :  { %v1324_v29 = vadd.f32 %v1323_v23, %v1122_v62  ;;  %v1662_v19 = vpop.f32.mrb[61].mxu1  ;;  %v1138_v62 = vld [vmem:[%s3160_s3 + $0xb0] sm:$0xff] }
 0x270   :  { %v1326_v1 = vpop.f32.mrb[62].mxu1 }
 0x271   :  { %1503 = vst.msk [vmem:[%s3161_s4 + $0x30] sm:$0xff] %vm1189_vm1, %v1324_v29  ;;  %v1327_v32 = vadd.f32 %v1326_v1, %v1123_v25  ;;  %v1663_v33 = vpop.f32.mrb[63].mxu1  ;;  %v1139_v25 = vld [vmem:[%s3160_s3 + $0xb8] sm:$0xff] }
 0x273   :  { %1504 = vst.msk [vmem:[%s3161_s4 + $0x38] sm:$0xff] %vm1189_vm1, %v1327_v32 }
 0x276   :  { %v1331_v11 = vpop.f32.mrb[64].mxu1 }
 0x277   :  { %v1332_v35 = vadd.f32 %v1331_v11, %v1124_v34  ;;  %v1666_v36 = vpop.f32.mrb[65].mxu1  ;;  %v1140_v34 = vld [vmem:[%s3160_s3 + $0xc0] sm:$0xff] }
 0x278   :  { %v1334_v37 = vpop.f32.mrb[66].mxu1 }
 0x279   :  { %1505 = vst.msk [vmem:[%s3161_s4 + $0x40] sm:$0xff] %vm1189_vm1, %v1332_v35  ;;  %v1335_v13 = vadd.f32 %v1334_v37, %v1125_v22  ;;  %v1667_v38 = vpop.f32.mrb[67].mxu1  ;;  %v1141_v22 = vld [vmem:[%s3160_s3 + $0xc8] sm:$0xff] }
 0x27b   :  { %1506 = vst.msk [vmem:[%s3161_s4 + $0x48] sm:$0xff] %vm1189_vm1, %v1335_v13 }
 0x27e   :  { %v1339_v39 = vpop.f32.mrb[68].mxu1 }
 0x27f   :  { %v1340_v43 = vadd.f32 %v1339_v39, %v1126_v24  ;;  %v1670_v45 = vpop.f32.mrb[69].mxu1  ;;  %v1142_v24 = vld [vmem:[%s3160_s3 + $0xd0] sm:$0xff] }
 0x280   :  { %v1342_v26 = vpop.f32.mrb[70].mxu1 }
 0x281   :  { %1507 = vst.msk [vmem:[%s3161_s4 + $0x50] sm:$0xff] %vm1189_vm1, %v1340_v43  ;;  %v1343_v46 = vadd.f32 %v1342_v26, %v1127_v27  ;;  %v1671_v30 = vpop.f32.mrb[71].mxu1  ;;  %v1143_v27 = vld [vmem:[%s3160_s3 + $0xd8] sm:$0xff] }
 0x283   :  { %1508 = vst.msk [vmem:[%s3161_s4 + $0x58] sm:$0xff] %vm1189_vm1, %v1343_v46 }
 0x286   :  { %v1347_v48 = vpop.f32.mrb[72].mxu1 }
 0x287   :  { %v1348_v41 = vadd.f32 %v1347_v48, %v1128_v47  ;;  %v1674_v28 = vpop.f32.mrb[73].mxu1  ;;  %v1144_v47 = vld [vmem:[%s3160_s3 + $0xe0] sm:$0xff] }
 0x288   :  { %v1350_v50 = vpop.f32.mrb[74].mxu1 }
 0x289   :  { %1509 = vst.msk [vmem:[%s3161_s4 + $0x60] sm:$0xff] %vm1189_vm1, %v1348_v41  ;;  %v1351_v52 = vadd.f32 %v1350_v50, %v1129_v49  ;;  %v1675_v54 = vpop.f32.mrb[75].mxu1  ;;  %v1145_v49 = vld [vmem:[%s3160_s3 + $0xe8] sm:$0xff] }
 0x28b   :  { %1510 = vst.msk [vmem:[%s3161_s4 + $0x68] sm:$0xff] %vm1189_vm1, %v1351_v52 }
 0x28e   :  { %v1355_v0 = vpop.f32.mrb[76].mxu1 }
 0x28f   :  { %v1356_v58 = vadd.f32 %v1355_v0, %v1130_v44  ;;  %v1678_v55 = vpop.f32.mrb[77].mxu1  ;;  %v1146_v44 = vld [vmem:[%s3160_s3 + $0xf0] sm:$0xff] }
 0x290   :  { %v1358_v59 = vpop.f32.mrb[78].mxu1 }
 0x291   :  { %1511 = vst.msk [vmem:[%s3161_s4 + $0x70] sm:$0xff] %vm1189_vm1, %v1356_v58  ;;  %v1359_v60 = vadd.f32 %v1358_v59, %v1131_v56  ;;  %v1679_v31 = vpop.f32.mrb[79].mxu1  ;;  %v1147_v56 = vld [vmem:[%s3160_s3 + $0xf8] sm:$0xff] }
 0x293   :  { %1512 = vst.msk [vmem:[%s3161_s4 + $0x78] sm:$0xff] %vm1189_vm1, %v1359_v60 }
 0x296   :  { %v1363_v61 = vpop.f32.mrb[80].mxu1 }
 0x297   :  { %v1364_v63 = vadd.f32 %v1363_v61, %v1132_v57  ;;  %v1682_v2 = vpop.f32.mrb[81].mxu1  ;;  %v1148_v57 = vld [vmem:[%s3160_s3 + $0x100] sm:$0xff] }
 0x298   :  { %v1366_v40 = vpop.f32.mrb[82].mxu1 }
 0x299   :  { %1513 = vst.msk [vmem:[%s3161_s4 + $0x80] sm:$0xff] %vm1189_vm1, %v1364_v63  ;;  %v1367_v10 = vadd.f32 %v1366_v40, %v1133_v5  ;;  %v1683_v3 = vpop.f32.mrb[83].mxu1  ;;  %v1149_v5 = vld [vmem:[%s3160_s3 + $0x108] sm:$0xff] }
 0x29b   :  { %1514 = vst.msk [vmem:[%s3161_s4 + $0x88] sm:$0xff] %vm1189_vm1, %v1367_v10 }
 0x29e   :  { %v1371_v6 = vpop.f32.mrb[84].mxu1 }
 0x29f   :  { %v1372_v42 = vadd.f32 %v1371_v6, %v1134_v4  ;;  %v1686_v8 = vpop.f32.mrb[85].mxu1  ;;  %v1150_v4 = vld [vmem:[%s3160_s3 + $0x110] sm:$0xff] }
 0x2a0   :  { %v1374_v9 = vpop.f32.mrb[86].mxu1 }
 0x2a1   :  { %1515 = vst.msk [vmem:[%s3161_s4 + $0x90] sm:$0xff] %vm1189_vm1, %v1372_v42  ;;  %v1375_v12 = vadd.f32 %v1374_v9, %v1135_v7  ;;  %v1687_v51 = vpop.f32.mrb[87].mxu1  ;;  %v1151_v7 = vld [vmem:[%s3160_s3 + $0x118] sm:$0xff] }
 0x2a3   :  { %1516 = vst.msk [vmem:[%s3161_s4 + $0x98] sm:$0xff] %vm1189_vm1, %v1375_v12 }
 0x2a6   :  { %v1379_v15 = vpop.f32.mrb[88].mxu1 }
 0x2a7   :  { %v1380_v18 = vadd.f32 %v1379_v15, %v1136_v14  ;;  %v1690_v53 = vpop.f32.mrb[89].mxu1  ;;  %v1152_v14 = vld [vmem:[%s3160_s3 + $0x120] sm:$0xff] }
 0x2a8   :  { %v1382_v20 = vpop.f32.mrb[90].mxu1 }
 0x2a9   :  { %1517 = vst.msk [vmem:[%s3161_s4 + $0xa0] sm:$0xff] %vm1189_vm1, %v1380_v18  ;;  %v1383_v21 = vadd.f32 %v1382_v20, %v1137_v17  ;;  %v1691_v16 = vpop.f32.mrb[91].mxu1  ;;  %v1153_v17 = vld [vmem:[%s3160_s3 + $0x128] sm:$0xff] }
 0x2ab   :  { %1518 = vst.msk [vmem:[%s3161_s4 + $0xa8] sm:$0xff] %vm1189_vm1, %v1383_v21 }
 0x2ae   :  { %v1387_v23 = vpop.f32.mrb[92].mxu1 }
 0x2af   :  { %v1388_v29 = vadd.f32 %v1387_v23, %v1138_v62  ;;  %v1694_v19 = vpop.f32.mrb[93].mxu1  ;;  %v1154_v62 = vld [vmem:[%s3160_s3 + $0x130] sm:$0xff] }
 0x2b0   :  { %v1390_v1 = vpop.f32.mrb[94].mxu1 }
 0x2b1   :  { %1519 = vst.msk [vmem:[%s3161_s4 + $0xb0] sm:$0xff] %vm1189_vm1, %v1388_v29  ;;  %v1391_v32 = vadd.f32 %v1390_v1, %v1139_v25  ;;  %v1695_v33 = vpop.f32.mrb[95].mxu1  ;;  %v1155_v25 = vld [vmem:[%s3160_s3 + $0x138] sm:$0xff] }
 0x2b3   :  { %1520 = vst.msk [vmem:[%s3161_s4 + $0xb8] sm:$0xff] %vm1189_vm1, %v1391_v32 }
 0x2b6   :  { %v1395_v11 = vpop.f32.mrb[96].mxu1 }
 0x2b7   :  { %v1396_v35 = vadd.f32 %v1395_v11, %v1140_v34  ;;  %v1698_v36 = vpop.f32.mrb[97].mxu1  ;;  %v1156_v34 = vld [vmem:[%s3160_s3 + $0x140] sm:$0xff] }
 0x2b8   :  { %v1398_v37 = vpop.f32.mrb[98].mxu1 }
 0x2b9   :  { %1521 = vst.msk [vmem:[%s3161_s4 + $0xc0] sm:$0xff] %vm1189_vm1, %v1396_v35  ;;  %v1399_v13 = vadd.f32 %v1398_v37, %v1141_v22  ;;  %v1699_v38 = vpop.f32.mrb[99].mxu1  ;;  %v1157_v22 = vld [vmem:[%s3160_s3 + $0x148] sm:$0xff] }
 0x2bb   :  { %1522 = vst.msk [vmem:[%s3161_s4 + $0xc8] sm:$0xff] %vm1189_vm1, %v1399_v13 }
 0x2c0   :  { %v1403_v39 = vpop.f32.mrb[100].mxu1 }
 0x2c1   :  { %v1404_v43 = vadd.f32 %v1403_v39, %v1142_v24  ;;  %v1702_v45 = vpop.f32.mrb[101].mxu1  ;;  %v1158_v24 = vld [vmem:[%s3160_s3 + $0x150] sm:$0xff] }
 0x2c2   :  { %v1406_v26 = vpop.f32.mrb[102].mxu1 }
 0x2c3   :  { %1523 = vst.msk [vmem:[%s3161_s4 + $0xd0] sm:$0xff] %vm1189_vm1, %v1404_v43  ;;  %v1407_v46 = vadd.f32 %v1406_v26, %v1143_v27  ;;  %v1703_v30 = vpop.f32.mrb[103].mxu1  ;;  %v1159_v27 = vld [vmem:[%s3160_s3 + $0x158] sm:$0xff] }
 0x2c5   :  { %1524 = vst.msk [vmem:[%s3161_s4 + $0xd8] sm:$0xff] %vm1189_vm1, %v1407_v46 }
 0x2c8   :  { %v1411_v48 = vpop.f32.mrb[104].mxu1 }
 0x2c9   :  { %v1412_v41 = vadd.f32 %v1411_v48, %v1144_v47  ;;  %v1706_v28 = vpop.f32.mrb[105].mxu1  ;;  %v1160_v47 = vld [vmem:[%s3160_s3 + $0x160] sm:$0xff] }
 0x2ca   :  { %v1414_v50 = vpop.f32.mrb[106].mxu1 }
 0x2cb   :  { %1525 = vst.msk [vmem:[%s3161_s4 + $0xe0] sm:$0xff] %vm1189_vm1, %v1412_v41  ;;  %v1415_v52 = vadd.f32 %v1414_v50, %v1145_v49  ;;  %v1707_v54 = vpop.f32.mrb[107].mxu1  ;;  %v1161_v49 = vld [vmem:[%s3160_s3 + $0x168] sm:$0xff] }
 0x2cd   :  { %1526 = vst.msk [vmem:[%s3161_s4 + $0xe8] sm:$0xff] %vm1189_vm1, %v1415_v52 }
 0x2d0   :  { %v1419_v0 = vpop.f32.mrb[108].mxu1 }
 0x2d1   :  { %v1420_v58 = vadd.f32 %v1419_v0, %v1146_v44  ;;  %v1710_v55 = vpop.f32.mrb[109].mxu1  ;;  %v1162_v44 = vld [vmem:[%s3160_s3 + $0x170] sm:$0xff] }
 0x2d2   :  { %v1422_v59 = vpop.f32.mrb[110].mxu1 }
 0x2d3   :  { %1527 = vst.msk [vmem:[%s3161_s4 + $0xf0] sm:$0xff] %vm1189_vm1, %v1420_v58  ;;  %v1423_v60 = vadd.f32 %v1422_v59, %v1147_v56  ;;  %v1711_v31 = vpop.f32.mrb[111].mxu1  ;;  %v1163_v56 = vld [vmem:[%s3160_s3 + $0x178] sm:$0xff] }
 0x2d5   :  { %1528 = vst.msk [vmem:[%s3161_s4 + $0xf8] sm:$0xff] %vm1189_vm1, %v1423_v60 }
 0x2d8   :  { %v1427_v61 = vpop.f32.mrb[112].mxu1 }
 0x2d9   :  { %v1428_v63 = vadd.f32 %v1427_v61, %v1148_v57  ;;  %v1714_v2 = vpop.f32.mrb[113].mxu1  ;;  %v1164_v57 = vld [vmem:[%s3160_s3 + $0x180] sm:$0xff] }
 0x2da   :  { %v1430_v40 = vpop.f32.mrb[114].mxu1 }
 0x2db   :  { %1529 = vst.msk [vmem:[%s3161_s4 + $0x100] sm:$0xff] %vm1189_vm1, %v1428_v63  ;;  %v1431_v10 = vadd.f32 %v1430_v40, %v1149_v5  ;;  %v1715_v3 = vpop.f32.mrb[115].mxu1 }
 0x2dd   :  { %1530 = vst.msk [vmem:[%s3161_s4 + $0x108] sm:$0xff] %vm1189_vm1, %v1431_v10 }
 0x2e0   :  { %v1435_v6 = vpop.f32.mrb[116].mxu1 }
 0x2e1   :  { %v1436_v42 = vadd.f32 %v1435_v6, %v1150_v4  ;;  %v1718_v8 = vpop.f32.mrb[117].mxu1 }
 0x2e2   :  { %v1438_v9 = vpop.f32.mrb[118].mxu1 }
 0x2e3   :  { %1531 = vst.msk [vmem:[%s3161_s4 + $0x110] sm:$0xff] %vm1189_vm1, %v1436_v42  ;;  %v1439_v12 = vadd.f32 %v1438_v9, %v1151_v7  ;;  %v1719_v51 = vpop.f32.mrb[119].mxu1 }
 0x2e5   :  { %1532 = vst.msk [vmem:[%s3161_s4 + $0x118] sm:$0xff] %vm1189_vm1, %v1439_v12 }
 0x2e8   :  { %v1443_v15 = vpop.f32.mrb[120].mxu1 }
 0x2e9   :  { %v1444_v18 = vadd.f32 %v1443_v15, %v1152_v14  ;;  %v1722_v53 = vpop.f32.mrb[121].mxu1 }
 0x2ea   :  { %v1446_v20 = vpop.f32.mrb[122].mxu1 }
 0x2eb   :  { %1533 = vst.msk [vmem:[%s3161_s4 + $0x120] sm:$0xff] %vm1189_vm1, %v1444_v18  ;;  %v1447_v21 = vadd.f32 %v1446_v20, %v1153_v17  ;;  %v1723_v16 = vpop.f32.mrb[123].mxu1 }
 0x2ed   :  { %1534 = vst.msk [vmem:[%s3161_s4 + $0x128] sm:$0xff] %vm1189_vm1, %v1447_v21 }
 0x2f0   :  { %v1451_v23 = vpop.f32.mrb[124].mxu1 }
 0x2f1   :  { %v1452_v29 = vadd.f32 %v1451_v23, %v1154_v62  ;;  %v1726_v19 = vpop.f32.mrb[125].mxu1 }
 0x2f2   :  { %v1454_v1 = vpop.f32.mrb[126].mxu1 }
 0x2f3   :  { %1535 = vst.msk [vmem:[%s3161_s4 + $0x130] sm:$0xff] %vm1189_vm1, %v1452_v29  ;;  %v1455_v32 = vadd.f32 %v1454_v1, %v1155_v25  ;;  %v1727_v33 = vpop.f32.mrb[127].mxu1 }
 0x2f5   :  { %1536 = vst.msk [vmem:[%s3161_s4 + $0x138] sm:$0xff] %vm1189_vm1, %v1455_v32 }
 0x2f8   :  { %v1459_v11 = vpop.f32.mrb[128].mxu1 }
 0x2f9   :  { %v1460_v35 = vadd.f32 %v1459_v11, %v1156_v34  ;;  %v1730_v36 = vpop.f32.mrb[129].mxu1 }
 0x2fa   :  { %v1462_v37 = vpop.f32.mrb[130].mxu1 }
 0x2fb   :  { %1537 = vst.msk [vmem:[%s3161_s4 + $0x140] sm:$0xff] %vm1189_vm1, %v1460_v35  ;;  %v1463_v13 = vadd.f32 %v1462_v37, %v1157_v22  ;;  %v1731_v38 = vpop.f32.mrb[131].mxu1 }
 0x2fd   :  { %1538 = vst.msk [vmem:[%s3161_s4 + $0x148] sm:$0xff] %vm1189_vm1, %v1463_v13 }
 0x300   :  { %v1467_v39 = vpop.f32.mrb[132].mxu1 }
 0x301   :  { %v1468_v43 = vadd.f32 %v1467_v39, %v1158_v24  ;;  %v1734_v45 = vpop.f32.mrb[133].mxu1 }
 0x302   :  { %v1470_v26 = vpop.f32.mrb[134].mxu1 }
 0x303   :  { %1539 = vst.msk [vmem:[%s3161_s4 + $0x150] sm:$0xff] %vm1189_vm1, %v1468_v43  ;;  %v1471_v46 = vadd.f32 %v1470_v26, %v1159_v27  ;;  %v1735_v30 = vpop.f32.mrb[135].mxu1 }
 0x305   :  { %1540 = vst.msk [vmem:[%s3161_s4 + $0x158] sm:$0xff] %vm1189_vm1, %v1471_v46 }
 0x308   :  { %v1475_v48 = vpop.f32.mrb[136].mxu1 }
 0x309   :  { %v1476_v41 = vadd.f32 %v1475_v48, %v1160_v47  ;;  %v1738_v28 = vpop.f32.mrb[137].mxu1 }
 0x30a   :  { %v1478_v50 = vpop.f32.mrb[138].mxu1 }
 0x30b   :  { %1541 = vst.msk [vmem:[%s3161_s4 + $0x160] sm:$0xff] %vm1189_vm1, %v1476_v41  ;;  %v1479_v52 = vadd.f32 %v1478_v50, %v1161_v49  ;;  %v1739_v54 = vpop.f32.mrb[139].mxu1 }
 0x30d   :  { %1542 = vst.msk [vmem:[%s3161_s4 + $0x168] sm:$0xff] %vm1189_vm1, %v1479_v52 }
 0x310   :  { %v1483_v0 = vpop.f32.mrb[140].mxu1 }
 0x311   :  { %v1484_v58 = vadd.f32 %v1483_v0, %v1162_v44  ;;  %v1742_v55 = vpop.f32.mrb[141].mxu1 }
 0x312   :  { %v1486_v59 = vpop.f32.mrb[142].mxu1 }
 0x313   :  { %1543 = vst.msk [vmem:[%s3161_s4 + $0x170] sm:$0xff] %vm1189_vm1, %v1484_v58  ;;  %v1487_v60 = vadd.f32 %v1486_v59, %v1163_v56  ;;  %v1743_v31 = vpop.f32.mrb[143].mxu1 }
 0x315   :  { %1544 = vst.msk [vmem:[%s3161_s4 + $0x178] sm:$0xff] %vm1189_vm1, %v1487_v60 }
 0x318   :  { %v1491_v61 = vpop.f32.mrb[144].mxu1 }
 0x319   :  { %v1492_v5 = vadd.f32 %v1491_v61, %v1164_v57  ;;  %v1746_v63 = vpop.f32.mrb[145].mxu1 }
 0x31a   :  { %v1494_v2 = vpop.f32.mrb[146].mxu1 }
 0x31b   :  { %1545 = vst.msk [vmem:[%s3161_s4 + $0x180] sm:$0xff] %vm1189_vm1, %v1492_v5  ;;  %v1747_v40 = vpop.f32.mrb[147].mxu1 }

// kernel: amdim_forward.24
= control target key start
LH: loop header
LB: loop body
LE: loop exit
PB: predicated region body
PF: predicated region fallthrough
CT: control target
= control target key end

     0   :  { %v1237_v0 = vmov 0.0   ;;  %vm1238_vm0 = vmmov 0   ;;  %vm121_vm1 = vcmask 523264   ;;  %s1981_s1 = inlined_call_operand.vmem [shape: bf16[64,64], index: 1, kind: input, shape index: {}]   ;;  %s1982_s0 = inlined_call_operand.vmem [shape: f32[392,64], index: 0, kind: input, shape index: {}]   ;;  %s1983_s2 = inlined_call_operand.vmem [shape: bf16[64,64], index: 2, kind: input, shape index: {}]   ;;  %s1984_s3 = inlined_call_operand.vmem [shape: f32[392,64], index: 3, kind: output, shape index: {}]  }
   0x1   :  { %1011 = vmatprep.subr.bf16.mxu0 %v1237_v0  ;;  %v1229_v1 = vld [vmem:[%s1981_s1] sm:$0xff]   ;;  %1019 = vmatprep.mubr.msk.bf16.mxu0 %vm1238_vm0, %v1237_v0  ;;  %v1230_v2 = vld [vmem:[%s1981_s1 + $0x8] sm:$0xff]   ;;  %v1231_v3 = vld [vmem:[%s1981_s1 + $0x10] sm:$0xff]  }
   0x2   :  { %1119 = vmatprep.subr.bf16.mxu1 %v1237_v0  ;;  %1127 = vmatprep.mubr.msk.bf16.mxu1 %vm1238_vm0, %v1237_v0  ;;  %v1232_v4 = vld [vmem:[%s1981_s1 + $0x18] sm:$0xff]   ;;  %v1282_v5 = vld [vmem:[%s1982_s0] sm:$0xff]  ;;  %v1287_v6 = vld [vmem:[%s1982_s0 + $0x8] sm:$0xff] }
   0x3   :  { %1012 = vmatpush3.bf16.msra.mxu0 %v1229_v1  ;;  %v64_v7 = vpack.c.bf16 %v1287_v6, %v1282_v5  ;;  %v1298_v8 = vld [vmem:[%s1982_s0 + $0x10] sm:$0xff]  ;;  %v1303_v9 = vld [vmem:[%s1982_s0 + $0x18] sm:$0xff]  ;;  %v1313_v11 = vld [vmem:[%s1982_s0 + $0x20] sm:$0xff] }
   0x4   :  { %1013 = vmatprep.subr.bf16.mxu0 %v1237_v0  ;;  %v65_v10 = vpack.c.bf16 %v1303_v9, %v1298_v8  ;;  %v1318_v12 = vld [vmem:[%s1982_s0 + $0x28] sm:$0xff]  ;;  %v1328_v14 = vld [vmem:[%s1982_s0 + $0x30] sm:$0xff]  ;;  %v1333_v15 = vld [vmem:[%s1982_s0 + $0x38] sm:$0xff] }
   0x5   :  { %v66_v13 = vpack.c.bf16 %v1318_v12, %v1313_v11  ;;  %v67_v16 = vpack.c.bf16 %v1333_v15, %v1328_v14  ;;  %v1343_v17 = vld [vmem:[%s1982_s0 + $0x40] sm:$0xff]  ;;  %v1348_v18 = vld [vmem:[%s1982_s0 + $0x48] sm:$0xff]  ;;  %v1358_v20 = vld [vmem:[%s1982_s0 + $0x50] sm:$0xff] }
   0x6   :  { %v68_v19 = vpack.c.bf16 %v1348_v18, %v1343_v17  ;;  %v1363_v21 = vld [vmem:[%s1982_s0 + $0x58] sm:$0xff]  ;;  %v1373_v23 = vld [vmem:[%s1982_s0 + $0x60] sm:$0xff]  ;;  %v1378_v24 = vld [vmem:[%s1982_s0 + $0x68] sm:$0xff] }
   0x7   :  { %1014 = vmatpush3.bf16.msra.mxu0 %v1230_v2  ;;  %v69_v22 = vpack.c.bf16 %v1363_v21, %v1358_v20  ;;  %v70_v25 = vpack.c.bf16 %v1378_v24, %v1373_v23  ;;  %v1388_v26 = vld [vmem:[%s1982_s0 + $0x70] sm:$0xff]  ;;  %v1393_v27 = vld [vmem:[%s1982_s0 + $0x78] sm:$0xff]  ;;  %v1403_v29 = vld [vmem:[%s1982_s0 + $0x80] sm:$0xff] }
   0x8   :  { %1015 = vmatprep.subr.bf16.mxu0 %v1237_v0  ;;  %v71_v28 = vpack.c.bf16 %v1393_v27, %v1388_v26  ;;  %v1408_v30 = vld [vmem:[%s1982_s0 + $0x88] sm:$0xff]  ;;  %v1416_v32 = vld [vmem:[%s1982_s0 + $0x90] sm:$0xff]  ;;  %v1421_v33 = vld [vmem:[%s1982_s0 + $0x98] sm:$0xff] }
   0x9   :  { %v72_v31 = vpack.c.bf16 %v1408_v30, %v1403_v29  ;;  %v1233_v34 = vld [vmem:[%s1983_s2] sm:$0xff]   ;;  %v1234_v35 = vld [vmem:[%s1983_s2 + $0x8] sm:$0xff]   ;;  %v73_v36 = vpack.c.bf16 %v1421_v33, %v1416_v32  ;;  %v1456_v40 = vld [vmem:[%s1982_s0 + $0xb0] sm:$0xff] }
   0xa   :  { %1120 = vmatpush3.bf16.msra.mxu1 %v1233_v34  ;;  %v1441_v37 = vld [vmem:[%s1982_s0 + $0xa0] sm:$0xff]  ;;  %v1446_v38 = vld [vmem:[%s1982_s0 + $0xa8] sm:$0xff]  ;;  %v1461_v41 = vld [vmem:[%s1982_s0 + $0xb8] sm:$0xff] }
   0xb   :  { %1016 = vmatpush3.bf16.msra.mxu0 %v1231_v3  ;;  %1121 = vmatprep.subr.bf16.mxu1 %v1237_v0  ;;  %v74_v39 = vpack.c.bf16 %v1446_v38, %v1441_v37  ;;  %v1235_v42 = vld [vmem:[%s1983_s2 + $0x10] sm:$0xff]   ;;  %v75_v43 = vpack.c.bf16 %v1461_v41, %v1456_v40  ;;  %v1236_v44 = vld [vmem:[%s1983_s2 + $0x18] sm:$0xff]   ;;  %v1478_v45 = vld [vmem:[%s1982_s0 + $0xc0] sm:$0xff] }
   0xc   :  { %1017 = vmatprep.subr.bf16.mxu0 %v1237_v0  ;;  %v1483_v46 = vld [vmem:[%s1982_s0 + $0xc8] sm:$0xff]  ;;  %v1493_v48 = vld [vmem:[%s1982_s0 + $0xd0] sm:$0xff]  ;;  %v1498_v49 = vld [vmem:[%s1982_s0 + $0xd8] sm:$0xff] }
   0xd   :  { %v76_v47 = vpack.c.bf16 %v1483_v46, %v1478_v45  ;;  %v77_v50 = vpack.c.bf16 %v1498_v49, %v1493_v48  ;;  %v1508_v51 = vld [vmem:[%s1982_s0 + $0xe0] sm:$0xff]  ;;  %v1513_v52 = vld [vmem:[%s1982_s0 + $0xe8] sm:$0xff]  ;;  %v1523_v54 = vld [vmem:[%s1982_s0 + $0xf0] sm:$0xff] }
   0xe   :  { %1122 = vmatpush3.bf16.msra.mxu1 %v1234_v35  ;;  %v78_v53 = vpack.c.bf16 %v1513_v52, %v1508_v51  ;;  %v1528_v55 = vld [vmem:[%s1982_s0 + $0xf8] sm:$0xff]  ;;  %v1538_v57 = vld [vmem:[%s1982_s0 + $0x100] sm:$0xff]  ;;  %v1543_v58 = vld [vmem:[%s1982_s0 + $0x108] sm:$0xff] }
   0xf   :  { %1018 = vmatpush3.bf16.msra.mxu0 %v1232_v4  ;;  %1123 = vmatprep.subr.bf16.mxu1 %v1237_v0  ;;  %v79_v56 = vpack.c.bf16 %v1528_v55, %v1523_v54  ;;  %v80_v59 = vpack.c.bf16 %v1543_v58, %v1538_v57  ;;  %v1553_v60 = vld [vmem:[%s1982_s0 + $0x110] sm:$0xff]  ;;  %v1558_v61 = vld [vmem:[%s1982_s0 + $0x118] sm:$0xff]  ;;  %v1568_v63 = vld [vmem:[%s1982_s0 + $0x120] sm:$0xff] }
  0x10   :  { %v81_v62 = vpack.c.bf16 %v1558_v61, %v1553_v60  ;;  %v1573_v1 = vld [vmem:[%s1982_s0 + $0x128] sm:$0xff]  ;;  %v1583_v3 = vld [vmem:[%s1982_s0 + $0x130] sm:$0xff]  ;;  %v1588_v4 = vld [vmem:[%s1982_s0 + $0x138] sm:$0xff] }
  0x11   :  { %v82_v2 = vpack.c.bf16 %v1573_v1, %v1568_v63  ;;  %v1643_v35 = vld [vmem:[%s1982_s0 + $0x170] sm:$0xff] }
  0x12   :  { %1020 = vmatmul.mubr.msk.bf16.vlgmr.msra.gmra.mrb[0].mxu0 %vm121_vm1, %v64_v7  ;;  %1124 = vmatpush3.bf16.msra.mxu1 %v1235_v42  ;;  %v83_v7 = vpack.c.bf16 %v1588_v4, %v1583_v3  ;;  %v1658_v42 = vld [vmem:[%s1982_s0 + $0x180] sm:$0xff] }
  0x13   :  { %1023 = vmatprep.mubr.msk.bf16.mxu0 %vm1238_vm0, %v1237_v0  ;;  %1125 = vmatprep.subr.bf16.mxu1 %v1237_v0  ;;  %1986 = vst [vmem:[#allocation2_spill] sm:$0xff] %v1658_v42 }
  0x16   :  { %1126 = vmatpush3.bf16.msra.mxu1 %v1236_v44 }
  0x1a   :  { %1024 = vmatmul.mubr.msk.bf16.gmra.mrb[4].mxu0 %vm121_vm1, %v65_v10  ;;  %v1598_v10 = vld [vmem:[%s1982_s0 + $0x140] sm:$0xff] }
  0x1b   :  { %1027 = vmatprep.mubr.msk.bf16.mxu0 %vm1238_vm0, %v1237_v0 }
  0x22   :  { %1028 = vmatmul.mubr.msk.bf16.gmra.mrb[8].mxu0 %vm121_vm1, %v66_v13  ;;  %v1603_v13 = vld [vmem:[%s1982_s0 + $0x148] sm:$0xff] }
  0x23   :  { %1031 = vmatprep.mubr.msk.bf16.mxu0 %vm1238_vm0, %v1237_v0 }
  0x2a   :  { %1032 = vmatmul.mubr.msk.bf16.gmra.mrb[12].mxu0 %vm121_vm1, %v67_v16  ;;  %v84_v16 = vpack.c.bf16 %v1603_v13, %v1598_v10 }
  0x2b   :  { %1035 = vmatprep.mubr.msk.bf16.mxu0 %vm1238_vm0, %v1237_v0 }
  0x32   :  { %1036 = vmatmul.mubr.msk.bf16.gmra.mrb[16].mxu0 %vm121_vm1, %v68_v19  ;;  %v1613_v19 = vld [vmem:[%s1982_s0 + $0x150] sm:$0xff] }
  0x33   :  { %1039 = vmatprep.mubr.msk.bf16.mxu0 %vm1238_vm0, %v1237_v0 }
  0x3a   :  { %1040 = vmatmul.mubr.msk.bf16.gmra.mrb[20].mxu0 %vm121_vm1, %v69_v22  ;;  %v1618_v22 = vld [vmem:[%s1982_s0 + $0x158] sm:$0xff] }
  0x3b   :  { %1043 = vmatprep.mubr.msk.bf16.mxu0 %vm1238_vm0, %v1237_v0 }
  0x42   :  { %1044 = vmatmul.mubr.msk.bf16.gmra.mrb[24].mxu0 %vm121_vm1, %v70_v25  ;;  %v85_v25 = vpack.c.bf16 %v1618_v22, %v1613_v19 }
  0x43   :  { %1047 = vmatprep.mubr.msk.bf16.mxu0 %vm1238_vm0, %v1237_v0 }
  0x4a   :  { %1048 = vmatmul.mubr.msk.bf16.gmra.mrb[28].mxu0 %vm121_vm1, %v71_v28  ;;  %v1628_v28 = vld [vmem:[%s1982_s0 + $0x160] sm:$0xff] }
  0x4b   :  { %1051 = vmatprep.mubr.msk.bf16.mxu0 %vm1238_vm0, %v1237_v0 }
  0x52   :  { %1052 = vmatmul.mubr.msk.bf16.gmra.mrb[32].mxu0 %vm121_vm1, %v72_v31  ;;  %v1633_v31 = vld [vmem:[%s1982_s0 + $0x168] sm:$0xff] }
  0x53   :  { %1055 = vmatprep.mubr.msk.bf16.mxu0 %vm1238_vm0, %v1237_v0  ;;  %v86_v34 = vpack.c.bf16 %v1633_v31, %v1628_v28 }
  0x5a   :  { %1056 = vmatmul.mubr.msk.bf16.gmra.mrb[36].mxu0 %vm121_vm1, %v73_v36  ;;  %v1648_v36 = vld [vmem:[%s1982_s0 + $0x178] sm:$0xff] }
  0x5b   :  { %1059 = vmatprep.mubr.msk.bf16.mxu0 %vm1238_vm0, %v1237_v0 }
  0x62   :  { %1060 = vmatmul.mubr.msk.bf16.gmra.mrb[40].mxu0 %vm121_vm1, %v74_v39  ;;  %v87_v39 = vpack.c.bf16 %v1648_v36, %v1643_v35 }
  0x63   :  { %1063 = vmatprep.mubr.msk.bf16.mxu0 %vm1238_vm0, %v1237_v0 }
  0x6a   :  { %1064 = vmatmul.mubr.msk.bf16.gmra.mrb[44].mxu0 %vm121_vm1, %v75_v43  ;;  %v88_v43 = vpack.c.bf16 %v1658_v42, %v1658_v42 }
  0x6b   :  { %1067 = vmatprep.mubr.msk.bf16.mxu0 %vm1238_vm0, %v1237_v0 }
  0x72   :  { %1068 = vmatmul.mubr.msk.bf16.gmra.mrb[48].mxu0 %vm121_vm1, %v76_v47 }
  0x73   :  { %1071 = vmatprep.mubr.msk.bf16.mxu0 %vm1238_vm0, %v1237_v0 }
  0x7a   :  { %1072 = vmatmul.mubr.msk.bf16.gmra.mrb[52].mxu0 %vm121_vm1, %v77_v50 }
  0x7b   :  { %1075 = vmatprep.mubr.msk.bf16.mxu0 %vm1238_vm0, %v1237_v0 }
  0x82   :  { %1076 = vmatmul.mubr.msk.bf16.gmra.mrb[56].mxu0 %vm121_vm1, %v78_v53 }
  0x83   :  { %1079 = vmatprep.mubr.msk.bf16.mxu0 %vm1238_vm0, %v1237_v0 }
  0x8a   :  { %1080 = vmatmul.mubr.msk.bf16.gmra.mrb[60].mxu0 %vm121_vm1, %v79_v56 }
  0x8b   :  { %1083 = vmatprep.mubr.msk.bf16.mxu0 %vm1238_vm0, %v1237_v0 }
  0x92   :  { %1084 = vmatmul.mubr.msk.bf16.gmra.mrb[64].mxu0 %vm121_vm1, %v80_v59 }
  0x93   :  { %1087 = vmatprep.mubr.msk.bf16.mxu0 %vm1238_vm0, %v1237_v0 }
  0x9a   :  { %1088 = vmatmul.mubr.msk.bf16.gmra.mrb[68].mxu0 %vm121_vm1, %v81_v62 }
  0x9b   :  { %1091 = vmatprep.mubr.msk.bf16.mxu0 %vm1238_vm0, %v1237_v0 }
  0xa2   :  { %1092 = vmatmul.mubr.msk.bf16.gmra.mrb[72].mxu0 %vm121_vm1, %v82_v2 }
  0xa3   :  { %1095 = vmatprep.mubr.msk.bf16.mxu0 %vm1238_vm0, %v1237_v0 }
  0xaa   :  { %1096 = vmatmul.mubr.msk.bf16.gmra.mrb[76].mxu0 %vm121_vm1, %v83_v7 }
  0xab   :  { %1099 = vmatprep.mubr.msk.bf16.mxu0 %vm1238_vm0, %v1237_v0 }
  0xb2   :  { %1100 = vmatmul.mubr.msk.bf16.gmra.mrb[80].mxu0 %vm121_vm1, %v84_v16 }
  0xb3   :  { %1103 = vmatprep.mubr.msk.bf16.mxu0 %vm1238_vm0, %v1237_v0 }
  0xba   :  { %1104 = vmatmul.mubr.msk.bf16.gmra.mrb[84].mxu0 %vm121_vm1, %v85_v25 }
  0xbb   :  { %1107 = vmatprep.mubr.msk.bf16.mxu0 %vm1238_vm0, %v1237_v0 }
  0xc2   :  { %1108 = vmatmul.mubr.msk.bf16.gmra.mrb[88].mxu0 %vm121_vm1, %v86_v34 }
  0xc3   :  { %1111 = vmatprep.mubr.msk.bf16.mxu0 %vm1238_vm0, %v1237_v0 }
  0xca   :  { %1112 = vmatmul.mubr.msk.bf16.gmra.mrb[92].mxu0 %vm121_vm1, %v87_v39 }
  0xcb   :  { %1115 = vmatprep.mubr.msk.bf16.mxu0 %vm1238_vm0, %v1237_v0 }
  0xd2   :  { %1116 = vmatmul.mubr.msk.bf16.gmra.mrb[96].mxu0 %vm121_vm1, %v88_v43 }
  0xe5   :  { %v231_v44 = vpop.f32.mrb[0].mxu0 }
  0xe6   :  { %v1021_v47 = vpop.f32.mrb[1].mxu0  ;;  %v429_v53 = vmax.f32 %v231_v44, 0.0 }
  0xe7   :  { %v234_v50 = vpop.f32.mrb[2].mxu0 }
  0xe8   :  { %v430_v56 = vmax.f32 %v234_v50, 0.0  ;;  %v1022_v59 = vpop.f32.mrb[3].mxu0 }
  0xea   :  { %v478_v62 = vpack.c.bf16 %v430_v56, %v429_v53 }
  0xec   :  { %1128 = vmatmul.mubr.msk.bf16.vlgmr.msra.gmra.mrb[0].mxu1 %vm121_vm1, %v478_v62 }
  0xed   :  { %v239_v2 = vpop.f32.mrb[4].mxu0  ;;  %1131 = vmatprep.mubr.msk.bf16.mxu1 %vm1238_vm0, %v1237_v0 }
  0xee   :  { %v1025_v7 = vpop.f32.mrb[5].mxu0  ;;  %v431_v25 = vmax.f32 %v239_v2, 0.0 }
  0xef   :  { %v242_v16 = vpop.f32.mrb[6].mxu0 }
  0xf0   :  { %v432_v34 = vmax.f32 %v242_v16, 0.0  ;;  %v1026_v39 = vpop.f32.mrb[7].mxu0 }
  0xf2   :  { %v479_v42 = vpack.c.bf16 %v432_v34, %v431_v25 }
  0xf4   :  { %1132 = vmatmul.mubr.msk.bf16.gmra.mrb[4].mxu1 %vm121_vm1, %v479_v42 }
  0xf5   :  { %v247_v43 = vpop.f32.mrb[8].mxu0  ;;  %1135 = vmatprep.mubr.msk.bf16.mxu1 %vm1238_vm0, %v1237_v0 }
  0xf6   :  { %v1029_v44 = vpop.f32.mrb[9].mxu0  ;;  %v433_v50 = vmax.f32 %v247_v43, 0.0 }
  0xf7   :  { %v250_v47 = vpop.f32.mrb[10].mxu0 }
  0xf8   :  { %v434_v53 = vmax.f32 %v250_v47, 0.0  ;;  %v1030_v56 = vpop.f32.mrb[11].mxu0 }
  0xfa   :  { %v480_v59 = vpack.c.bf16 %v434_v53, %v433_v50 }
  0xfc   :  { %1136 = vmatmul.mubr.msk.bf16.gmra.mrb[8].mxu1 %vm121_vm1, %v480_v59 }
  0xfd   :  { %v255_v62 = vpop.f32.mrb[12].mxu0  ;;  %1139 = vmatprep.mubr.msk.bf16.mxu1 %vm1238_vm0, %v1237_v0 }
  0xfe   :  { %v1033_v2 = vpop.f32.mrb[13].mxu0  ;;  %v435_v16 = vmax.f32 %v255_v62, 0.0 }
  0xff   :  { %v258_v7 = vpop.f32.mrb[14].mxu0 }
 0x100   :  { %v436_v42 = vmax.f32 %v258_v7, 0.0  ;;  %v1034_v25 = vpop.f32.mrb[15].mxu0 }
 0x102   :  { %v481_v34 = vpack.c.bf16 %v436_v42, %v435_v16 }
 0x104   :  { %1140 = vmatmul.mubr.msk.bf16.gmra.mrb[12].mxu1 %vm121_vm1, %v481_v34 }
 0x105   :  { %v263_v39 = vpop.f32.mrb[16].mxu0  ;;  %1143 = vmatprep.mubr.msk.bf16.mxu1 %vm1238_vm0, %v1237_v0 }
 0x106   :  { %v1037_v43 = vpop.f32.mrb[17].mxu0  ;;  %v437_v47 = vmax.f32 %v263_v39, 0.0 }
 0x107   :  { %v266_v44 = vpop.f32.mrb[18].mxu0 }
 0x108   :  { %v438_v50 = vmax.f32 %v266_v44, 0.0  ;;  %v1038_v53 = vpop.f32.mrb[19].mxu0 }
 0x10a   :  { %v482_v56 = vpack.c.bf16 %v438_v50, %v437_v47 }
 0x10c   :  { %1144 = vmatmul.mubr.msk.bf16.gmra.mrb[16].mxu1 %vm121_vm1, %v482_v56 }
 0x10d   :  { %v271_v59 = vpop.f32.mrb[20].mxu0  ;;  %1147 = vmatprep.mubr.msk.bf16.mxu1 %vm1238_vm0, %v1237_v0 }
 0x10e   :  { %v1041_v62 = vpop.f32.mrb[21].mxu0  ;;  %v439_v7 = vmax.f32 %v271_v59, 0.0 }
 0x10f   :  { %v274_v2 = vpop.f32.mrb[22].mxu0 }
 0x110   :  { %v440_v16 = vmax.f32 %v274_v2, 0.0  ;;  %v1042_v42 = vpop.f32.mrb[23].mxu0 }
 0x112   :  { %v483_v25 = vpack.c.bf16 %v440_v16, %v439_v7 }
 0x114   :  { %1148 = vmatmul.mubr.msk.bf16.gmra.mrb[20].mxu1 %vm121_vm1, %v483_v25 }
 0x115   :  { %v279_v34 = vpop.f32.mrb[24].mxu0  ;;  %1151 = vmatprep.mubr.msk.bf16.mxu1 %vm1238_vm0, %v1237_v0 }
 0x116   :  { %v1045_v39 = vpop.f32.mrb[25].mxu0  ;;  %v441_v44 = vmax.f32 %v279_v34, 0.0 }
 0x117   :  { %v282_v43 = vpop.f32.mrb[26].mxu0 }
 0x118   :  { %v442_v47 = vmax.f32 %v282_v43, 0.0  ;;  %v1046_v50 = vpop.f32.mrb[27].mxu0 }
 0x11a   :  { %v484_v53 = vpack.c.bf16 %v442_v47, %v441_v44 }
 0x11c   :  { %1152 = vmatmul.mubr.msk.bf16.gmra.mrb[24].mxu1 %vm121_vm1, %v484_v53 }
 0x11d   :  { %v287_v56 = vpop.f32.mrb[28].mxu0  ;;  %1155 = vmatprep.mubr.msk.bf16.mxu1 %vm1238_vm0, %v1237_v0 }
 0x11e   :  { %v1049_v59 = vpop.f32.mrb[29].mxu0  ;;  %v443_v2 = vmax.f32 %v287_v56, 0.0 }
 0x11f   :  { %v290_v62 = vpop.f32.mrb[30].mxu0 }
 0x120   :  { %v444_v7 = vmax.f32 %v290_v62, 0.0  ;;  %v1050_v16 = vpop.f32.mrb[31].mxu0 }
 0x122   :  { %v485_v42 = vpack.c.bf16 %v444_v7, %v443_v2 }
 0x124   :  { %1156 = vmatmul.mubr.msk.bf16.gmra.mrb[28].mxu1 %vm121_vm1, %v485_v42 }
 0x125   :  { %v295_v25 = vpop.f32.mrb[32].mxu0  ;;  %1159 = vmatprep.mubr.msk.bf16.mxu1 %vm1238_vm0, %v1237_v0 }
 0x126   :  { %v1053_v34 = vpop.f32.mrb[33].mxu0  ;;  %v445_v43 = vmax.f32 %v295_v25, 0.0 }
 0x127   :  { %v298_v39 = vpop.f32.mrb[34].mxu0 }
 0x128   :  { %v446_v44 = vmax.f32 %v298_v39, 0.0  ;;  %v1054_v47 = vpop.f32.mrb[35].mxu0 }
 0x12a   :  { %v486_v50 = vpack.c.bf16 %v446_v44, %v445_v43 }
 0x12c   :  { %1160 = vmatmul.mubr.msk.bf16.gmra.mrb[32].mxu1 %vm121_vm1, %v486_v50 }
 0x12d   :  { %v303_v53 = vpop.f32.mrb[36].mxu0  ;;  %1163 = vmatprep.mubr.msk.bf16.mxu1 %vm1238_vm0, %v1237_v0 }
 0x12e   :  { %v1057_v56 = vpop.f32.mrb[37].mxu0  ;;  %v447_v62 = vmax.f32 %v303_v53, 0.0 }
 0x12f   :  { %v306_v59 = vpop.f32.mrb[38].mxu0 }
 0x130   :  { %v448_v2 = vmax.f32 %v306_v59, 0.0  ;;  %v1058_v7 = vpop.f32.mrb[39].mxu0 }
 0x132   :  { %v487_v16 = vpack.c.bf16 %v448_v2, %v447_v62 }
 0x134   :  { %1164 = vmatmul.mubr.msk.bf16.gmra.mrb[36].mxu1 %vm121_vm1, %v487_v16 }
 0x135   :  { %v311_v42 = vpop.f32.mrb[40].mxu0  ;;  %1167 = vmatprep.mubr.msk.bf16.mxu1 %vm1238_vm0, %v1237_v0 }
 0x136   :  { %v1061_v25 = vpop.f32.mrb[41].mxu0  ;;  %v449_v39 = vmax.f32 %v311_v42, 0.0 }
 0x137   :  { %v314_v34 = vpop.f32.mrb[42].mxu0 }
 0x138   :  { %v450_v43 = vmax.f32 %v314_v34, 0.0  ;;  %v1062_v44 = vpop.f32.mrb[43].mxu0 }
 0x13a   :  { %v488_v47 = vpack.c.bf16 %v450_v43, %v449_v39 }
 0x13c   :  { %1168 = vmatmul.mubr.msk.bf16.gmra.mrb[40].mxu1 %vm121_vm1, %v488_v47 }
 0x13d   :  { %v319_v50 = vpop.f32.mrb[44].mxu0  ;;  %1171 = vmatprep.mubr.msk.bf16.mxu1 %vm1238_vm0, %v1237_v0 }
 0x13e   :  { %v1065_v53 = vpop.f32.mrb[45].mxu0  ;;  %v451_v59 = vmax.f32 %v319_v50, 0.0 }
 0x13f   :  { %v322_v56 = vpop.f32.mrb[46].mxu0 }
 0x140   :  { %v452_v62 = vmax.f32 %v322_v56, 0.0  ;;  %v1066_v2 = vpop.f32.mrb[47].mxu0 }
 0x142   :  { %v489_v7 = vpack.c.bf16 %v452_v62, %v451_v59 }
 0x144   :  { %1172 = vmatmul.mubr.msk.bf16.gmra.mrb[44].mxu1 %vm121_vm1, %v489_v7 }
 0x145   :  { %v327_v16 = vpop.f32.mrb[48].mxu0  ;;  %1175 = vmatprep.mubr.msk.bf16.mxu1 %vm1238_vm0, %v1237_v0 }
 0x146   :  { %v1069_v42 = vpop.f32.mrb[49].mxu0  ;;  %v453_v34 = vmax.f32 %v327_v16, 0.0 }
 0x147   :  { %v330_v25 = vpop.f32.mrb[50].mxu0 }
 0x148   :  { %v454_v39 = vmax.f32 %v330_v25, 0.0  ;;  %v1070_v43 = vpop.f32.mrb[51].mxu0 }
 0x14a   :  { %v490_v44 = vpack.c.bf16 %v454_v39, %v453_v34 }
 0x14c   :  { %1176 = vmatmul.mubr.msk.bf16.gmra.mrb[48].mxu1 %vm121_vm1, %v490_v44 }
 0x14d   :  { %v335_v47 = vpop.f32.mrb[52].mxu0  ;;  %1179 = vmatprep.mubr.msk.bf16.mxu1 %vm1238_vm0, %v1237_v0 }
 0x14e   :  { %v1073_v50 = vpop.f32.mrb[53].mxu0  ;;  %v455_v56 = vmax.f32 %v335_v47, 0.0 }
 0x14f   :  { %v338_v53 = vpop.f32.mrb[54].mxu0 }
 0x150   :  { %v456_v59 = vmax.f32 %v338_v53, 0.0  ;;  %v1074_v62 = vpop.f32.mrb[55].mxu0 }
 0x152   :  { %v491_v2 = vpack.c.bf16 %v456_v59, %v455_v56 }
 0x154   :  { %1180 = vmatmul.mubr.msk.bf16.gmra.mrb[52].mxu1 %vm121_vm1, %v491_v2 }
 0x155   :  { %v343_v7 = vpop.f32.mrb[56].mxu0  ;;  %1183 = vmatprep.mubr.msk.bf16.mxu1 %vm1238_vm0, %v1237_v0 }
 0x156   :  { %v1077_v16 = vpop.f32.mrb[57].mxu0  ;;  %v457_v25 = vmax.f32 %v343_v7, 0.0 }
 0x157   :  { %v346_v42 = vpop.f32.mrb[58].mxu0 }
 0x158   :  { %v458_v34 = vmax.f32 %v346_v42, 0.0  ;;  %v1078_v39 = vpop.f32.mrb[59].mxu0 }
 0x15a   :  { %v492_v43 = vpack.c.bf16 %v458_v34, %v457_v25 }
 0x15c   :  { %1184 = vmatmul.mubr.msk.bf16.gmra.mrb[56].mxu1 %vm121_vm1, %v492_v43 }
 0x15d   :  { %v351_v44 = vpop.f32.mrb[60].mxu0  ;;  %1187 = vmatprep.mubr.msk.bf16.mxu1 %vm1238_vm0, %v1237_v0 }
 0x15e   :  { %v1081_v47 = vpop.f32.mrb[61].mxu0  ;;  %v459_v53 = vmax.f32 %v351_v44, 0.0 }
 0x15f   :  { %v354_v50 = vpop.f32.mrb[62].mxu0 }
 0x160   :  { %v460_v56 = vmax.f32 %v354_v50, 0.0  ;;  %v1082_v59 = vpop.f32.mrb[63].mxu0 }
 0x162   :  { %v493_v62 = vpack.c.bf16 %v460_v56, %v459_v53 }
 0x164   :  { %1188 = vmatmul.mubr.msk.bf16.gmra.mrb[60].mxu1 %vm121_vm1, %v493_v62 }
 0x165   :  { %v359_v2 = vpop.f32.mrb[64].mxu0  ;;  %1191 = vmatprep.mubr.msk.bf16.mxu1 %vm1238_vm0, %v1237_v0 }
 0x166   :  { %v1085_v7 = vpop.f32.mrb[65].mxu0  ;;  %v461_v42 = vmax.f32 %v359_v2, 0.0 }
 0x167   :  { %v362_v16 = vpop.f32.mrb[66].mxu0 }
 0x168   :  { %v462_v25 = vmax.f32 %v362_v16, 0.0  ;;  %v1086_v34 = vpop.f32.mrb[67].mxu0 }
 0x16a   :  { %v494_v39 = vpack.c.bf16 %v462_v25, %v461_v42 }
 0x16c   :  { %1192 = vmatmul.mubr.msk.bf16.gmra.mrb[64].mxu1 %vm121_vm1, %v494_v39 }
 0x16d   :  { %v367_v43 = vpop.f32.mrb[68].mxu0  ;;  %1195 = vmatprep.mubr.msk.bf16.mxu1 %vm1238_vm0, %v1237_v0 }
 0x16e   :  { %v1089_v44 = vpop.f32.mrb[69].mxu0  ;;  %v463_v50 = vmax.f32 %v367_v43, 0.0 }
 0x16f   :  { %v370_v47 = vpop.f32.mrb[70].mxu0 }
 0x170   :  { %v464_v53 = vmax.f32 %v370_v47, 0.0  ;;  %v1090_v56 = vpop.f32.mrb[71].mxu0 }
 0x172   :  { %v495_v59 = vpack.c.bf16 %v464_v53, %v463_v50 }
 0x174   :  { %1196 = vmatmul.mubr.msk.bf16.gmra.mrb[68].mxu1 %vm121_vm1, %v495_v59 }
 0x175   :  { %v375_v62 = vpop.f32.mrb[72].mxu0  ;;  %1199 = vmatprep.mubr.msk.bf16.mxu1 %vm1238_vm0, %v1237_v0 }
 0x176   :  { %v1093_v2 = vpop.f32.mrb[73].mxu0  ;;  %v465_v16 = vmax.f32 %v375_v62, 0.0 }
 0x177   :  { %v378_v7 = vpop.f32.mrb[74].mxu0 }
 0x178   :  { %v466_v42 = vmax.f32 %v378_v7, 0.0  ;;  %v1094_v25 = vpop.f32.mrb[75].mxu0 }
 0x17a   :  { %v496_v34 = vpack.c.bf16 %v466_v42, %v465_v16 }
 0x17c   :  { %1200 = vmatmul.mubr.msk.bf16.gmra.mrb[72].mxu1 %vm121_vm1, %v496_v34 }
 0x17d   :  { %v383_v39 = vpop.f32.mrb[76].mxu0  ;;  %1203 = vmatprep.mubr.msk.bf16.mxu1 %vm1238_vm0, %v1237_v0 }
 0x17e   :  { %v1097_v43 = vpop.f32.mrb[77].mxu0  ;;  %v467_v47 = vmax.f32 %v383_v39, 0.0 }
 0x17f   :  { %v386_v44 = vpop.f32.mrb[78].mxu0 }
 0x180   :  { %v468_v50 = vmax.f32 %v386_v44, 0.0  ;;  %v1098_v53 = vpop.f32.mrb[79].mxu0 }
 0x182   :  { %v497_v56 = vpack.c.bf16 %v468_v50, %v467_v47 }
 0x184   :  { %1204 = vmatmul.mubr.msk.bf16.gmra.mrb[76].mxu1 %vm121_vm1, %v497_v56 }
 0x185   :  { %v391_v59 = vpop.f32.mrb[80].mxu0  ;;  %1207 = vmatprep.mubr.msk.bf16.mxu1 %vm1238_vm0, %v1237_v0 }
 0x186   :  { %v1101_v62 = vpop.f32.mrb[81].mxu0  ;;  %v469_v7 = vmax.f32 %v391_v59, 0.0 }
 0x187   :  { %v394_v2 = vpop.f32.mrb[82].mxu0 }
 0x188   :  { %v470_v16 = vmax.f32 %v394_v2, 0.0  ;;  %v1102_v42 = vpop.f32.mrb[83].mxu0 }
 0x18a   :  { %v498_v25 = vpack.c.bf16 %v470_v16, %v469_v7 }
 0x18c   :  { %1208 = vmatmul.mubr.msk.bf16.gmra.mrb[80].mxu1 %vm121_vm1, %v498_v25 }
 0x18d   :  { %v399_v34 = vpop.f32.mrb[84].mxu0  ;;  %1211 = vmatprep.mubr.msk.bf16.mxu1 %vm1238_vm0, %v1237_v0 }
 0x18e   :  { %v1105_v39 = vpop.f32.mrb[85].mxu0  ;;  %v471_v44 = vmax.f32 %v399_v34, 0.0 }
 0x18f   :  { %v402_v43 = vpop.f32.mrb[86].mxu0 }
 0x190   :  { %v472_v47 = vmax.f32 %v402_v43, 0.0  ;;  %v1106_v50 = vpop.f32.mrb[87].mxu0 }
 0x192   :  { %v499_v53 = vpack.c.bf16 %v472_v47, %v471_v44 }
 0x194   :  { %1212 = vmatmul.mubr.msk.bf16.gmra.mrb[84].mxu1 %vm121_vm1, %v499_v53 }
 0x195   :  { %v407_v56 = vpop.f32.mrb[88].mxu0  ;;  %1215 = vmatprep.mubr.msk.bf16.mxu1 %vm1238_vm0, %v1237_v0 }
 0x196   :  { %v1109_v59 = vpop.f32.mrb[89].mxu0  ;;  %v473_v2 = vmax.f32 %v407_v56, 0.0 }
 0x197   :  { %v410_v62 = vpop.f32.mrb[90].mxu0 }
 0x198   :  { %v474_v7 = vmax.f32 %v410_v62, 0.0  ;;  %v1110_v16 = vpop.f32.mrb[91].mxu0 }
 0x19a   :  { %v500_v42 = vpack.c.bf16 %v474_v7, %v473_v2 }
 0x19c   :  { %1216 = vmatmul.mubr.msk.bf16.gmra.mrb[88].mxu1 %vm121_vm1, %v500_v42 }
 0x19d   :  { %v415_v25 = vpop.f32.mrb[92].mxu0  ;;  %1219 = vmatprep.mubr.msk.bf16.mxu1 %vm1238_vm0, %v1237_v0 }
 0x19e   :  { %v1113_v34 = vpop.f32.mrb[93].mxu0  ;;  %v475_v43 = vmax.f32 %v415_v25, 0.0 }
 0x19f   :  { %v418_v39 = vpop.f32.mrb[94].mxu0 }
 0x1a0   :  { %v476_v44 = vmax.f32 %v418_v39, 0.0  ;;  %v1114_v47 = vpop.f32.mrb[95].mxu0 }
 0x1a2   :  { %v501_v50 = vpack.c.bf16 %v476_v44, %v475_v43 }
 0x1a4   :  { %1220 = vmatmul.mubr.msk.bf16.gmra.mrb[92].mxu1 %vm121_vm1, %v501_v50 }
 0x1a5   :  { %v423_v53 = vpop.f32.mrb[96].mxu0  ;;  %1223 = vmatprep.mubr.msk.bf16.mxu1 %vm1238_vm0, %v1237_v0 }
 0x1a6   :  { %v477_v56 = vmax.f32 %v423_v53, 0.0  ;;  %v1117_v59 = vpop.f32.mrb[97].mxu0 }
 0x1a7   :  { %v426_v62 = vpop.f32.mrb[98].mxu0 }
 0x1a8   :  { %v502_v2 = vpack.c.bf16 %v477_v56, %v477_v56  ;;  %v1118_v7 = vpop.f32.mrb[99].mxu0 }
 0x1ac   :  { %1224 = vmatmul.mubr.msk.bf16.gmra.mrb[96].mxu1 %vm121_vm1, %v502_v2 }
 0x1bf   :  { %v644_v16 = vpop.f32.mrb[0].mxu1 }
 0x1c0   :  { %v645_v42 = vadd.f32 %v644_v16, %v1282_v5  ;;  %v1129_v25 = vpop.f32.mrb[1].mxu1 }
 0x1c1   :  { %v647_v34 = vpop.f32.mrb[2].mxu1 }
 0x1c2   :  { %842 = vst.msk [vmem:[%s1984_s3] sm:$0xff] %vm121_vm1, %v645_v42  ;;  %v648_v39 = vadd.f32 %v647_v34, %v1287_v6  ;;  %v1130_v0 = vpop.f32.mrb[3].mxu1 }
 0x1c4   :  { %843 = vst.msk [vmem:[%s1984_s3 + $0x8] sm:$0xff] %vm121_vm1, %v648_v39 }
 0x1c7   :  { %v652_v43 = vpop.f32.mrb[4].mxu1 }
 0x1c8   :  { %v653_v44 = vadd.f32 %v652_v43, %v1298_v8  ;;  %v1133_v47 = vpop.f32.mrb[5].mxu1 }
 0x1c9   :  { %v655_v5 = vpop.f32.mrb[6].mxu1 }
 0x1ca   :  { %844 = vst.msk [vmem:[%s1984_s3 + $0x10] sm:$0xff] %vm121_vm1, %v653_v44  ;;  %v656_v50 = vadd.f32 %v655_v5, %v1303_v9  ;;  %v1134_v53 = vpop.f32.mrb[7].mxu1 }
 0x1cc   :  { %845 = vst.msk [vmem:[%s1984_s3 + $0x18] sm:$0xff] %vm121_vm1, %v656_v50 }
 0x1cf   :  { %v660_v6 = vpop.f32.mrb[8].mxu1 }
 0x1d0   :  { %v661_v56 = vadd.f32 %v660_v6, %v1313_v11  ;;  %v1137_v59 = vpop.f32.mrb[9].mxu1 }
 0x1d1   :  { %v663_v8 = vpop.f32.mrb[10].mxu1 }
 0x1d2   :  { %846 = vst.msk [vmem:[%s1984_s3 + $0x20] sm:$0xff] %vm121_vm1, %v661_v56  ;;  %v664_v62 = vadd.f32 %v663_v8, %v1318_v12  ;;  %v1138_v2 = vpop.f32.mrb[11].mxu1 }
 0x1d4   :  { %847 = vst.msk [vmem:[%s1984_s3 + $0x28] sm:$0xff] %vm121_vm1, %v664_v62 }
 0x1d7   :  { %v668_v9 = vpop.f32.mrb[12].mxu1 }
 0x1d8   :  { %v669_v7 = vadd.f32 %v668_v9, %v1328_v14  ;;  %v1141_v16 = vpop.f32.mrb[13].mxu1 }
 0x1d9   :  { %v671_v11 = vpop.f32.mrb[14].mxu1 }
 0x1da   :  { %848 = vst.msk [vmem:[%s1984_s3 + $0x30] sm:$0xff] %vm121_vm1, %v669_v7  ;;  %v672_v42 = vadd.f32 %v671_v11, %v1333_v15  ;;  %v1142_v25 = vpop.f32.mrb[15].mxu1 }
 0x1dc   :  { %849 = vst.msk [vmem:[%s1984_s3 + $0x38] sm:$0xff] %vm121_vm1, %v672_v42 }
 0x1df   :  { %v676_v12 = vpop.f32.mrb[16].mxu1 }
 0x1e0   :  { %v677_v34 = vadd.f32 %v676_v12, %v1343_v17  ;;  %v1145_v39 = vpop.f32.mrb[17].mxu1 }
 0x1e1   :  { %v679_v14 = vpop.f32.mrb[18].mxu1 }
 0x1e2   :  { %850 = vst.msk [vmem:[%s1984_s3 + $0x40] sm:$0xff] %vm121_vm1, %v677_v34  ;;  %v680_v0 = vadd.f32 %v679_v14, %v1348_v18  ;;  %v1146_v43 = vpop.f32.mrb[19].mxu1 }
 0x1e4   :  { %851 = vst.msk [vmem:[%s1984_s3 + $0x48] sm:$0xff] %vm121_vm1, %v680_v0 }
 0x1e7   :  { %v684_v15 = vpop.f32.mrb[20].mxu1 }
 0x1e8   :  { %v685_v44 = vadd.f32 %v684_v15, %v1358_v20  ;;  %v1149_v47 = vpop.f32.mrb[21].mxu1 }
 0x1e9   :  { %v687_v17 = vpop.f32.mrb[22].mxu1 }
 0x1ea   :  { %852 = vst.msk [vmem:[%s1984_s3 + $0x50] sm:$0xff] %vm121_vm1, %v685_v44  ;;  %v688_v5 = vadd.f32 %v687_v17, %v1363_v21  ;;  %v1150_v50 = vpop.f32.mrb[23].mxu1 }
 0x1ec   :  { %853 = vst.msk [vmem:[%s1984_s3 + $0x58] sm:$0xff] %vm121_vm1, %v688_v5 }
 0x1ef   :  { %v692_v18 = vpop.f32.mrb[24].mxu1 }
 0x1f0   :  { %v693_v53 = vadd.f32 %v692_v18, %v1373_v23  ;;  %v1153_v6 = vpop.f32.mrb[25].mxu1 }
 0x1f1   :  { %v695_v20 = vpop.f32.mrb[26].mxu1 }
 0x1f2   :  { %854 = vst.msk [vmem:[%s1984_s3 + $0x60] sm:$0xff] %vm121_vm1, %v693_v53  ;;  %v696_v56 = vadd.f32 %v695_v20, %v1378_v24  ;;  %v1154_v59 = vpop.f32.mrb[27].mxu1 }
 0x1f4   :  { %855 = vst.msk [vmem:[%s1984_s3 + $0x68] sm:$0xff] %vm121_vm1, %v696_v56 }
 0x1f7   :  { %v700_v21 = vpop.f32.mrb[28].mxu1 }
 0x1f8   :  { %v701_v8 = vadd.f32 %v700_v21, %v1388_v26  ;;  %v1157_v62 = vpop.f32.mrb[29].mxu1 }
 0x1f9   :  { %v703_v23 = vpop.f32.mrb[30].mxu1 }
 0x1fa   :  { %856 = vst.msk [vmem:[%s1984_s3 + $0x70] sm:$0xff] %vm121_vm1, %v701_v8  ;;  %v704_v2 = vadd.f32 %v703_v23, %v1393_v27  ;;  %v1158_v9 = vpop.f32.mrb[31].mxu1 }
 0x1fc   :  { %857 = vst.msk [vmem:[%s1984_s3 + $0x78] sm:$0xff] %vm121_vm1, %v704_v2 }
 0x1ff   :  { %v708_v24 = vpop.f32.mrb[32].mxu1 }
 0x200   :  { %v709_v7 = vadd.f32 %v708_v24, %v1403_v29  ;;  %v1161_v16 = vpop.f32.mrb[33].mxu1 }
 0x201   :  { %v711_v26 = vpop.f32.mrb[34].mxu1 }
 0x202   :  { %858 = vst.msk [vmem:[%s1984_s3 + $0x80] sm:$0xff] %vm121_vm1, %v709_v7  ;;  %v712_v11 = vadd.f32 %v711_v26, %v1408_v30  ;;  %v1162_v42 = vpop.f32.mrb[35].mxu1 }
 0x204   :  { %859 = vst.msk [vmem:[%s1984_s3 + $0x88] sm:$0xff] %vm121_vm1, %v712_v11 }
 0x207   :  { %v716_v27 = vpop.f32.mrb[36].mxu1 }
 0x208   :  { %v717_v25 = vadd.f32 %v716_v27, %v1416_v32  ;;  %v1165_v12 = vpop.f32.mrb[37].mxu1 }
 0x209   :  { %v719_v29 = vpop.f32.mrb[38].mxu1 }
 0x20a   :  { %860 = vst.msk [vmem:[%s1984_s3 + $0x90] sm:$0xff] %vm121_vm1, %v717_v25  ;;  %v720_v34 = vadd.f32 %v719_v29, %v1421_v33  ;;  %v1166_v39 = vpop.f32.mrb[39].mxu1 }
 0x20c   :  { %861 = vst.msk [vmem:[%s1984_s3 + $0x98] sm:$0xff] %vm121_vm1, %v720_v34 }
 0x20f   :  { %v724_v30 = vpop.f32.mrb[40].mxu1 }
 0x210   :  { %v725_v14 = vadd.f32 %v724_v30, %v1441_v37  ;;  %v1169_v0 = vpop.f32.mrb[41].mxu1 }
 0x211   :  { %v727_v32 = vpop.f32.mrb[42].mxu1 }
 0x212   :  { %862 = vst.msk [vmem:[%s1984_s3 + $0xa0] sm:$0xff] %vm121_vm1, %v725_v14  ;;  %v728_v43 = vadd.f32 %v727_v32, %v1446_v38  ;;  %v1170_v15 = vpop.f32.mrb[43].mxu1 }
 0x214   :  { %863 = vst.msk [vmem:[%s1984_s3 + $0xa8] sm:$0xff] %vm121_vm1, %v728_v43 }
 0x217   :  { %v732_v33 = vpop.f32.mrb[44].mxu1 }
 0x218   :  { %v733_v44 = vadd.f32 %v732_v33, %v1456_v40  ;;  %v1173_v47 = vpop.f32.mrb[45].mxu1 }
 0x219   :  { %v735_v37 = vpop.f32.mrb[46].mxu1 }
 0x21a   :  { %864 = vst.msk [vmem:[%s1984_s3 + $0xb0] sm:$0xff] %vm121_vm1, %v733_v44  ;;  %v736_v17 = vadd.f32 %v735_v37, %v1461_v41  ;;  %v1174_v5 = vpop.f32.mrb[47].mxu1 }
 0x21c   :  { %865 = vst.msk [vmem:[%s1984_s3 + $0xb8] sm:$0xff] %vm121_vm1, %v736_v17 }
 0x21f   :  { %v740_v38 = vpop.f32.mrb[48].mxu1 }
 0x220   :  { %v741_v50 = vadd.f32 %v740_v38, %v1478_v45  ;;  %v1177_v18 = vpop.f32.mrb[49].mxu1 }
 0x221   :  { %v743_v40 = vpop.f32.mrb[50].mxu1 }
 0x222   :  { %866 = vst.msk [vmem:[%s1984_s3 + $0xc0] sm:$0xff] %vm121_vm1, %v741_v50  ;;  %v744_v53 = vadd.f32 %v743_v40, %v1483_v46  ;;  %v1178_v6 = vpop.f32.mrb[51].mxu1 }
 0x224   :  { %867 = vst.msk [vmem:[%s1984_s3 + $0xc8] sm:$0xff] %vm121_vm1, %v744_v53 }
 0x227   :  { %v748_v41 = vpop.f32.mrb[52].mxu1 }
 0x228   :  { %v749_v20 = vadd.f32 %v748_v41, %v1493_v48  ;;  %v1181_v56 = vpop.f32.mrb[53].mxu1 }
 0x229   :  { %v751_v45 = vpop.f32.mrb[54].mxu1 }
 0x22a   :  { %868 = vst.msk [vmem:[%s1984_s3 + $0xd0] sm:$0xff] %vm121_vm1, %v749_v20  ;;  %v752_v59 = vadd.f32 %v751_v45, %v1498_v49  ;;  %v1182_v21 = vpop.f32.mrb[55].mxu1 }
 0x22b   :  { %v1987_v21 = vld [vmem:[#allocation2_spill] sm:$0xff] }
 0x22c   :  { %869 = vst.msk [vmem:[%s1984_s3 + $0xd8] sm:$0xff] %vm121_vm1, %v752_v59 }
 0x22f   :  { %v756_v46 = vpop.f32.mrb[56].mxu1 }
 0x230   :  { %v757_v8 = vadd.f32 %v756_v46, %v1508_v51  ;;  %v1185_v62 = vpop.f32.mrb[57].mxu1 }
 0x231   :  { %v759_v48 = vpop.f32.mrb[58].mxu1 }
 0x232   :  { %870 = vst.msk [vmem:[%s1984_s3 + $0xe0] sm:$0xff] %vm121_vm1, %v757_v8  ;;  %v760_v23 = vadd.f32 %v759_v48, %v1513_v52  ;;  %v1186_v2 = vpop.f32.mrb[59].mxu1 }
 0x234   :  { %871 = vst.msk [vmem:[%s1984_s3 + $0xe8] sm:$0xff] %vm121_vm1, %v760_v23 }
 0x237   :  { %v764_v49 = vpop.f32.mrb[60].mxu1 }
 0x238   :  { %v765_v9 = vadd.f32 %v764_v49, %v1523_v54  ;;  %v1189_v24 = vpop.f32.mrb[61].mxu1 }
 0x239   :  { %v767_v51 = vpop.f32.mrb[62].mxu1 }
 0x23a   :  { %872 = vst.msk [vmem:[%s1984_s3 + $0xf0] sm:$0xff] %vm121_vm1, %v765_v9  ;;  %v768_v7 = vadd.f32 %v767_v51, %v1528_v55  ;;  %v1190_v16 = vpop.f32.mrb[63].mxu1 }
 0x23c   :  { %873 = vst.msk [vmem:[%s1984_s3 + $0xf8] sm:$0xff] %vm121_vm1, %v768_v7 }
 0x23f   :  { %v772_v52 = vpop.f32.mrb[64].mxu1 }
 0x240   :  { %v773_v26 = vadd.f32 %v772_v52, %v1538_v57  ;;  %v1193_v11 = vpop.f32.mrb[65].mxu1 }
 0x241   :  { %v775_v54 = vpop.f32.mrb[66].mxu1 }
 0x242   :  { %874 = vst.msk [vmem:[%s1984_s3 + $0x100] sm:$0xff] %vm121_vm1, %v773_v26  ;;  %v776_v42 = vadd.f32 %v775_v54, %v1543_v58  ;;  %v1194_v27 = vpop.f32.mrb[67].mxu1 }
 0x244   :  { %875 = vst.msk [vmem:[%s1984_s3 + $0x108] sm:$0xff] %vm121_vm1, %v776_v42 }
 0x247   :  { %v780_v55 = vpop.f32.mrb[68].mxu1 }
 0x248   :  { %v781_v25 = vadd.f32 %v780_v55, %v1553_v60  ;;  %v1197_v12 = vpop.f32.mrb[69].mxu1 }
 0x249   :  { %v783_v57 = vpop.f32.mrb[70].mxu1 }
 0x24a   :  { %876 = vst.msk [vmem:[%s1984_s3 + $0x110] sm:$0xff] %vm121_vm1, %v781_v25  ;;  %v784_v29 = vadd.f32 %v783_v57, %v1558_v61  ;;  %v1198_v34 = vpop.f32.mrb[71].mxu1 }
 0x24c   :  { %877 = vst.msk [vmem:[%s1984_s3 + $0x118] sm:$0xff] %vm121_vm1, %v784_v29 }
 0x24f   :  { %v788_v58 = vpop.f32.mrb[72].mxu1 }
 0x250   :  { %v789_v39 = vadd.f32 %v788_v58, %v1568_v63  ;;  %v1201_v30 = vpop.f32.mrb[73].mxu1 }
 0x251   :  { %v791_v60 = vpop.f32.mrb[74].mxu1 }
 0x252   :  { %878 = vst.msk [vmem:[%s1984_s3 + $0x120] sm:$0xff] %vm121_vm1, %v789_v39  ;;  %v792_v14 = vadd.f32 %v791_v60, %v1573_v1  ;;  %v1202_v0 = vpop.f32.mrb[75].mxu1 }
 0x254   :  { %879 = vst.msk [vmem:[%s1984_s3 + $0x128] sm:$0xff] %vm121_vm1, %v792_v14 }
 0x257   :  { %v796_v61 = vpop.f32.mrb[76].mxu1 }
 0x258   :  { %v797_v32 = vadd.f32 %v796_v61, %v1583_v3  ;;  %v1205_v43 = vpop.f32.mrb[77].mxu1 }
 0x259   :  { %v799_v63 = vpop.f32.mrb[78].mxu1 }
 0x25a   :  { %880 = vst.msk [vmem:[%s1984_s3 + $0x130] sm:$0xff] %vm121_vm1, %v797_v32  ;;  %v800_v15 = vadd.f32 %v799_v63, %v1588_v4  ;;  %v1206_v33 = vpop.f32.mrb[79].mxu1 }
 0x25c   :  { %881 = vst.msk [vmem:[%s1984_s3 + $0x138] sm:$0xff] %vm121_vm1, %v800_v15 }
 0x25f   :  { %v804_v1 = vpop.f32.mrb[80].mxu1 }
 0x260   :  { %v805_v44 = vadd.f32 %v804_v1, %v1598_v10  ;;  %v1209_v47 = vpop.f32.mrb[81].mxu1 }
 0x261   :  { %v807_v3 = vpop.f32.mrb[82].mxu1 }
 0x262   :  { %882 = vst.msk [vmem:[%s1984_s3 + $0x140] sm:$0xff] %vm121_vm1, %v805_v44  ;;  %v808_v37 = vadd.f32 %v807_v3, %v1603_v13  ;;  %v1210_v17 = vpop.f32.mrb[83].mxu1 }
 0x264   :  { %883 = vst.msk [vmem:[%s1984_s3 + $0x148] sm:$0xff] %vm121_vm1, %v808_v37 }
 0x267   :  { %v812_v4 = vpop.f32.mrb[84].mxu1 }
 0x268   :  { %v813_v5 = vadd.f32 %v812_v4, %v1613_v19  ;;  %v1213_v38 = vpop.f32.mrb[85].mxu1 }
 0x269   :  { %v815_v10 = vpop.f32.mrb[86].mxu1 }
 0x26a   :  { %884 = vst.msk [vmem:[%s1984_s3 + $0x150] sm:$0xff] %vm121_vm1, %v813_v5  ;;  %v816_v50 = vadd.f32 %v815_v10, %v1618_v22  ;;  %v1214_v18 = vpop.f32.mrb[87].mxu1 }
 0x26c   :  { %885 = vst.msk [vmem:[%s1984_s3 + $0x158] sm:$0xff] %vm121_vm1, %v816_v50 }
 0x26f   :  { %v820_v13 = vpop.f32.mrb[88].mxu1 }
 0x270   :  { %v821_v40 = vadd.f32 %v820_v13, %v1628_v28  ;;  %v1217_v53 = vpop.f32.mrb[89].mxu1 }
 0x271   :  { %v823_v19 = vpop.f32.mrb[90].mxu1 }
 0x272   :  { %886 = vst.msk [vmem:[%s1984_s3 + $0x160] sm:$0xff] %vm121_vm1, %v821_v40  ;;  %v824_v6 = vadd.f32 %v823_v19, %v1633_v31  ;;  %v1218_v41 = vpop.f32.mrb[91].mxu1 }
 0x274   :  { %887 = vst.msk [vmem:[%s1984_s3 + $0x168] sm:$0xff] %vm121_vm1, %v824_v6 }
 0x277   :  { %v828_v22 = vpop.f32.mrb[92].mxu1 }
 0x278   :  { %v829_v20 = vadd.f32 %v828_v22, %v1643_v35  ;;  %v1221_v56 = vpop.f32.mrb[93].mxu1 }
 0x279   :  { %v831_v28 = vpop.f32.mrb[94].mxu1 }
 0x27a   :  { %888 = vst.msk [vmem:[%s1984_s3 + $0x170] sm:$0xff] %vm121_vm1, %v829_v20  ;;  %v832_v45 = vadd.f32 %v831_v28, %v1648_v36  ;;  %v1222_v59 = vpop.f32.mrb[95].mxu1 }
 0x27c   :  { %889 = vst.msk [vmem:[%s1984_s3 + $0x178] sm:$0xff] %vm121_vm1, %v832_v45 }
 0x27f   :  { %v836_v31 = vpop.f32.mrb[96].mxu1 }
 0x280   :  { %v837_v46 = vadd.f32 %v836_v31, %v1987_v21  ;;  %v1225_v8 = vpop.f32.mrb[97].mxu1 }
 0x281   :  { %v839_v35 = vpop.f32.mrb[98].mxu1 }
 0x282   :  { %890 = vst.msk [vmem:[%s1984_s3 + $0x180] sm:$0xff] %vm121_vm1, %v837_v46  ;;  %v1226_v62 = vpop.f32.mrb[99].mxu1 }

// kernel: amdim_forward.26
= control target key start
LH: loop header
LB: loop body
LE: loop exit
PB: predicated region body
PF: predicated region fallthrough
CT: control target
= control target key end

     0   :  { %v643_v1 = vmov 0.0   ;;  %vm644_vm0 = vmmov 0   ;;  %s920_s1 = inlined_call_operand.vmem [shape: bf16[256,128], index: 1, kind: input, shape index: {}]   ;;  %s921_s0 = inlined_call_operand.vmem [shape: f32[98,256], index: 0, kind: input, shape index: {}]   ;;  %s922_s2 = inlined_call_operand.vmem [shape: bf16[128,128], index: 2, kind: input, shape index: {}]   ;;  %s923_s3 = inlined_call_operand.vmem [shape: f32[98,128], index: 3, kind: input, shape index: {}]   ;;  %s924_s4 = inlined_call_operand.vmem [shape: f32[98,128], index: 4, kind: output, shape index: {}]  }
   0x1   :  { %v619_v0 = vld [vmem:[%s920_s1 + $0x40] sm:$0xff]   ;;  %573 = vmatprep.subr.bf16.mxu1 %v643_v1  ;;  %v621_v3 = vld [vmem:[%s920_s1 + $0x48] sm:$0xff]   ;;  %v623_v5 = vld [vmem:[%s920_s1 + $0x50] sm:$0xff]   ;;  %589 = vmatprep.mubr.msk.bf16.mxu1 %vm644_vm0, %v643_v1 }
   0x2   :  { %v620_v2 = vld [vmem:[%s920_s1] sm:$0xff]   ;;  %500 = vmatprep.subr.bf16.mxu0 %v619_v0  ;;  %v622_v4 = vld [vmem:[%s920_s1 + $0x8] sm:$0xff]   ;;  %v624_v6 = vld [vmem:[%s920_s1 + $0x10] sm:$0xff]  }
   0x3   :  { %501 = vmatpush3.bf16.msra.mxu0 %v620_v2  ;;  %v625_v7 = vld [vmem:[%s920_s1 + $0x58] sm:$0xff]   ;;  %v627_v9 = vld [vmem:[%s920_s1 + $0x60] sm:$0xff]   ;;  %v629_v11 = vld [vmem:[%s920_s1 + $0x68] sm:$0xff]  }
   0x4   :  { %502 = vmatprep.subr.bf16.mxu0 %v621_v3  ;;  %v626_v8 = vld [vmem:[%s920_s1 + $0x18] sm:$0xff]   ;;  %v628_v10 = vld [vmem:[%s920_s1 + $0x20] sm:$0xff]   ;;  %v19_v12 = vld [vmem:[%s921_s0 + $0x8] sm:$0xff] }
   0x5   :  { %v21_v13 = vld [vmem:[%s921_s0 + $0x18] sm:$0xff]  ;;  %v630_v15 = vld [vmem:[%s920_s1 + $0x28] sm:$0xff]   ;;  %v631_v16 = vld [vmem:[%s920_s1 + $0x70] sm:$0xff]  }
   0x6   :  { %v45_v14 = vpack.c.bf16 %v21_v13, %v19_v12  ;;  %v632_v17 = vld [vmem:[%s920_s1 + $0x30] sm:$0xff]   ;;  %v633_v18 = vld [vmem:[%s920_s1 + $0x78] sm:$0xff]   ;;  %v18_v20 = vld [vmem:[%s921_s0] sm:$0xff] }
   0x7   :  { %503 = vmatpush3.bf16.msra.mxu0 %v622_v4  ;;  %v634_v19 = vld [vmem:[%s920_s1 + $0x38] sm:$0xff]   ;;  %v20_v21 = vld [vmem:[%s921_s0 + $0x10] sm:$0xff]  ;;  %v635_v22 = vld [vmem:[%s922_s2] sm:$0xff]  }
   0x8   :  { %504 = vmatprep.subr.bf16.mxu0 %v623_v5  ;;  %218 = vmatprep.mubr.bf16.mxu0 %v45_v14  ;;  %v23_v23 = vld [vmem:[%s921_s0 + $0x28] sm:$0xff]  ;;  %v25_v25 = vld [vmem:[%s921_s0 + $0x38] sm:$0xff]  ;;  %v44_v26 = vpack.c.bf16 %v20_v21, %v18_v20  ;;  %v637_v27 = vld [vmem:[%s922_s2 + $0x10] sm:$0xff]  }
   0x9   :  { %574 = vmatpush3.bf16.msra.mxu1 %v635_v22  ;;  %v636_v24 = vld [vmem:[%s922_s2 + $0x8] sm:$0xff]   ;;  %v47_v28 = vpack.c.bf16 %v25_v25, %v23_v23  ;;  %v22_v29 = vld [vmem:[%s921_s0 + $0x20] sm:$0xff]  ;;  %v24_v30 = vld [vmem:[%s921_s0 + $0x30] sm:$0xff] }
   0xa   :  { %575 = vmatprep.subr.bf16.mxu1 %v643_v1  ;;  %v638_v31 = vld [vmem:[%s922_s2 + $0x18] sm:$0xff]   ;;  %v27_v32 = vld [vmem:[%s921_s0 + $0x48] sm:$0xff]  ;;  %v46_v34 = vpack.c.bf16 %v24_v30, %v22_v29  ;;  %v639_v36 = vld [vmem:[%s922_s2 + $0x20] sm:$0xff]  }
   0xb   :  { %505 = vmatpush3.bf16.msra.mxu0 %v624_v6  ;;  %v29_v33 = vld [vmem:[%s921_s0 + $0x58] sm:$0xff]  ;;  %v26_v37 = vld [vmem:[%s921_s0 + $0x40] sm:$0xff]  ;;  %v28_v38 = vld [vmem:[%s921_s0 + $0x50] sm:$0xff] }
   0xc   :  { %506 = vmatprep.subr.bf16.mxu0 %v625_v7  ;;  %v49_v35 = vpack.c.bf16 %v29_v33, %v27_v32  ;;  %v640_v39 = vld [vmem:[%s922_s2 + $0x28] sm:$0xff]   ;;  %v33_v41 = vld [vmem:[%s921_s0 + $0x78] sm:$0xff]  ;;  %v48_v42 = vpack.c.bf16 %v28_v38, %v26_v37  ;;  %v30_v44 = vld [vmem:[%s921_s0 + $0x60] sm:$0xff] }
   0xd   :  { %576 = vmatpush3.bf16.msra.mxu1 %v636_v24  ;;  %v31_v40 = vld [vmem:[%s921_s0 + $0x68] sm:$0xff]  ;;  %v32_v45 = vld [vmem:[%s921_s0 + $0x70] sm:$0xff]  ;;  %v37_v47 = vld [vmem:[%s921_s0 + $0x98] sm:$0xff] }
   0xe   :  { %577 = vmatprep.subr.bf16.mxu1 %v643_v1  ;;  %v51_v43 = vpack.c.bf16 %v33_v41, %v31_v40  ;;  %v35_v46 = vld [vmem:[%s921_s0 + $0x88] sm:$0xff]  ;;  %v50_v48 = vpack.c.bf16 %v32_v45, %v30_v44  ;;  %v34_v50 = vld [vmem:[%s921_s0 + $0x80] sm:$0xff]  ;;  %v36_v51 = vld [vmem:[%s921_s0 + $0x90] sm:$0xff] }
   0xf   :  { %507 = vmatpush3.bf16.msra.mxu0 %v626_v8  ;;  %v53_v49 = vpack.c.bf16 %v37_v47, %v35_v46  ;;  %v39_v52 = vld [vmem:[%s921_s0 + $0xa8] sm:$0xff]  ;;  %v41_v53 = vld [vmem:[%s921_s0 + $0xb8] sm:$0xff]  ;;  %v52_v54 = vpack.c.bf16 %v36_v51, %v34_v50  ;;  %v38_v56 = vld [vmem:[%s921_s0 + $0xa0] sm:$0xff] }
  0x10   :  { %508 = vmatprep.subr.bf16.mxu0 %v627_v9  ;;  %v55_v55 = vpack.c.bf16 %v41_v53, %v39_v52  ;;  %v40_v57 = vld [vmem:[%s921_s0 + $0xb0] sm:$0xff]  ;;  %v43_v58 = vld [vmem:[%s921_s0 + $0xc8] sm:$0x3]  ;;  %v42_v61 = vld [vmem:[%s921_s0 + $0xc0] sm:$0x3] }
  0x11   :  { %578 = vmatpush3.bf16.msra.mxu1 %v637_v27  ;;  %v54_v59 = vpack.c.bf16 %v40_v57, %v38_v56  ;;  %v57_v60 = vpack.c.bf16 %v43_v58, %v43_v58  ;;  %v56_v62 = vpack.c.bf16 %v42_v61, %v42_v61  ;;  %v641_v63 = vld [vmem:[%s922_s2 + $0x30] sm:$0xff]   ;;  %v642_v0 = vld [vmem:[%s922_s2 + $0x38] sm:$0xff]  }
  0x12   :  { %579 = vmatprep.subr.bf16.mxu1 %v643_v1 }
  0x13   :  { %509 = vmatpush3.bf16.msra.mxu0 %v628_v10 }
  0x14   :  { %510 = vmatprep.subr.bf16.mxu0 %v629_v11 }
  0x15   :  { %580 = vmatpush3.bf16.msra.mxu1 %v638_v31 }
  0x16   :  { %581 = vmatprep.subr.bf16.mxu1 %v643_v1 }
  0x17   :  { %511 = vmatpush3.bf16.msra.mxu0 %v630_v15 }
  0x18   :  { %512 = vmatprep.subr.bf16.mxu0 %v631_v16 }
  0x19   :  { %582 = vmatpush3.bf16.msra.mxu1 %v639_v36 }
  0x1a   :  { %583 = vmatprep.subr.bf16.mxu1 %v643_v1 }
  0x1b   :  { %513 = vmatpush3.bf16.msra.mxu0 %v632_v17 }
  0x1c   :  { %514 = vmatprep.subr.bf16.mxu0 %v633_v18 }
  0x1d   :  { %584 = vmatpush3.bf16.msra.mxu1 %v640_v39 }
  0x1e   :  { %585 = vmatprep.subr.bf16.mxu1 %v643_v1 }
  0x1f   :  { %515 = vmatpush3.bf16.msra.mxu0 %v634_v19 }
  0x21   :  { %586 = vmatpush3.bf16.msra.mxu1 %v641_v63  ;;  %v310_v63 = vld [vmem:[%s923_s3] sm:$0xff] }
  0x22   :  { %219 = vmatmul.mubr.bf16.vlgmr.msra.gmra.mrb[0].mxu0 %v44_v26  ;;  %587 = vmatprep.subr.bf16.mxu1 %v643_v1 }
  0x23   :  { %226 = vmatprep.mubr.bf16.mxu0 %v47_v28 }
  0x25   :  { %588 = vmatpush3.bf16.msra.mxu1 %v642_v0 }
  0x2a   :  { %227 = vmatmul.mubr.bf16.gmra.mrb[4].mxu0 %v46_v34 }
  0x2b   :  { %234 = vmatprep.mubr.bf16.mxu0 %v49_v35 }
  0x32   :  { %235 = vmatmul.mubr.bf16.gmra.mrb[8].mxu0 %v48_v42 }
  0x33   :  { %242 = vmatprep.mubr.bf16.mxu0 %v51_v43 }
  0x3a   :  { %243 = vmatmul.mubr.bf16.gmra.mrb[12].mxu0 %v50_v48 }
  0x3b   :  { %250 = vmatprep.mubr.bf16.mxu0 %v53_v49 }
  0x42   :  { %251 = vmatmul.mubr.bf16.gmra.mrb[16].mxu0 %v52_v54 }
  0x43   :  { %258 = vmatprep.mubr.bf16.mxu0 %v55_v55 }
  0x4a   :  { %259 = vmatmul.mubr.bf16.gmra.mrb[20].mxu0 %v54_v59 }
  0x4b   :  { %266 = vmatprep.mubr.bf16.mxu0 %v57_v60 }
  0x52   :  { %267 = vmatmul.mubr.bf16.gmra.mrb[24].mxu0 %v56_v62 }
  0xf5   :  { %v516_v2 = vpop.f32.mrb[0].mxu0 }
  0xf6   :  { %v517_v3 = vpop.f32.mrb[1].mxu0 }
  0xf7   :  { %v518_v4 = vadd.f32 %v517_v3, %v516_v2  ;;  %v519_v5 = vpop.f32.mrb[2].mxu0  ;;  %v311_v2 = vld [vmem:[%s923_s3 + $0x8] sm:$0xff] }
  0xf8   :  { %v520_v6 = vpop.f32.mrb[3].mxu0 }
  0xf9   :  { %v521_v7 = vadd.f32 %v520_v6, %v519_v5  ;;  %v274_v8 = vmax.f32 %v518_v4, 0.0 }
  0xfb   :  { %v275_v9 = vmax.f32 %v521_v7, 0.0  ;;  %v312_v7 = vld [vmem:[%s923_s3 + $0x10] sm:$0xff] }
  0xfd   :  { %v287_v10 = vpack.c.bf16 %v275_v9, %v274_v8  ;;  %v522_v11 = vpop.f32.mrb[4].mxu0  ;;  %v313_v9 = vld [vmem:[%s923_s3 + $0x18] sm:$0xff] }
  0xfe   :  { %v523_v12 = vpop.f32.mrb[5].mxu0 }
  0xff   :  { %v524_v13 = vadd.f32 %v523_v12, %v522_v11  ;;  %v525_v14 = vpop.f32.mrb[6].mxu0  ;;  %590 = vmatmul.mubr.bf16.vlgmr.msra.gmra.mrb[0].mxu1 %v287_v10 }
 0x100   :  { %v526_v15 = vpop.f32.mrb[7].mxu0  ;;  %593 = vmatprep.mubr.msk.bf16.mxu1 %vm644_vm0, %v643_v1 }
 0x101   :  { %v527_v16 = vadd.f32 %v526_v15, %v525_v14  ;;  %v276_v17 = vmax.f32 %v524_v13, 0.0  ;;  %v314_v15 = vld [vmem:[%s923_s3 + $0x20] sm:$0xff] }
 0x103   :  { %v277_v18 = vmax.f32 %v527_v16, 0.0 }
 0x105   :  { %v288_v19 = vpack.c.bf16 %v277_v18, %v276_v17  ;;  %v528_v20 = vpop.f32.mrb[8].mxu0  ;;  %v315_v17 = vld [vmem:[%s923_s3 + $0x28] sm:$0xff] }
 0x106   :  { %v529_v21 = vpop.f32.mrb[9].mxu0 }
 0x107   :  { %v530_v22 = vadd.f32 %v529_v21, %v528_v20  ;;  %v531_v23 = vpop.f32.mrb[10].mxu0  ;;  %594 = vmatmul.mubr.bf16.gmra.mrb[4].mxu1 %v288_v19 }
 0x108   :  { %v532_v24 = vpop.f32.mrb[11].mxu0  ;;  %597 = vmatprep.mubr.msk.bf16.mxu1 %vm644_vm0, %v643_v1 }
 0x109   :  { %v533_v25 = vadd.f32 %v532_v24, %v531_v23  ;;  %v278_v26 = vmax.f32 %v530_v22, 0.0  ;;  %v316_v23 = vld [vmem:[%s923_s3 + $0x30] sm:$0xff] }
 0x10b   :  { %v279_v27 = vmax.f32 %v533_v25, 0.0  ;;  %v317_v25 = vld [vmem:[%s923_s3 + $0x38] sm:$0xff] }
 0x10d   :  { %v289_v28 = vpack.c.bf16 %v279_v27, %v278_v26  ;;  %v534_v29 = vpop.f32.mrb[12].mxu0 }
 0x10e   :  { %v535_v30 = vpop.f32.mrb[13].mxu0 }
 0x10f   :  { %v536_v31 = vadd.f32 %v535_v30, %v534_v29  ;;  %v537_v32 = vpop.f32.mrb[14].mxu0  ;;  %598 = vmatmul.mubr.bf16.gmra.mrb[8].mxu1 %v289_v28 }
 0x110   :  { %v538_v33 = vpop.f32.mrb[15].mxu0  ;;  %601 = vmatprep.mubr.msk.bf16.mxu1 %vm644_vm0, %v643_v1 }
 0x111   :  { %v539_v34 = vadd.f32 %v538_v33, %v537_v32  ;;  %v280_v35 = vmax.f32 %v536_v31, 0.0  ;;  %v318_v31 = vld [vmem:[%s923_s3 + $0x40] sm:$0xff]  ;;  %v319_v33 = vld [vmem:[%s923_s3 + $0x48] sm:$0xff] }
 0x113   :  { %v281_v36 = vmax.f32 %v539_v34, 0.0 }
 0x115   :  { %v290_v37 = vpack.c.bf16 %v281_v36, %v280_v35  ;;  %v540_v38 = vpop.f32.mrb[16].mxu0 }
 0x116   :  { %v541_v39 = vpop.f32.mrb[17].mxu0 }
 0x117   :  { %v542_v40 = vadd.f32 %v541_v39, %v540_v38  ;;  %v543_v41 = vpop.f32.mrb[18].mxu0  ;;  %602 = vmatmul.mubr.bf16.gmra.mrb[12].mxu1 %v290_v37  ;;  %v320_v39 = vld [vmem:[%s923_s3 + $0x50] sm:$0xff] }
 0x118   :  { %v544_v42 = vpop.f32.mrb[19].mxu0  ;;  %605 = vmatprep.mubr.msk.bf16.mxu1 %vm644_vm0, %v643_v1 }
 0x119   :  { %v545_v43 = vadd.f32 %v544_v42, %v543_v41  ;;  %v282_v44 = vmax.f32 %v542_v40, 0.0  ;;  %v321_v41 = vld [vmem:[%s923_s3 + $0x58] sm:$0xff] }
 0x11b   :  { %v283_v45 = vmax.f32 %v545_v43, 0.0 }
 0x11d   :  { %v291_v46 = vpack.c.bf16 %v283_v45, %v282_v44  ;;  %v546_v47 = vpop.f32.mrb[20].mxu0 }
 0x11e   :  { %v547_v48 = vpop.f32.mrb[21].mxu0 }
 0x11f   :  { %v548_v49 = vadd.f32 %v547_v48, %v546_v47  ;;  %v549_v50 = vpop.f32.mrb[22].mxu0  ;;  %606 = vmatmul.mubr.bf16.gmra.mrb[16].mxu1 %v291_v46  ;;  %v322_v47 = vld [vmem:[%s923_s3 + $0x60] sm:$0x3] }
 0x120   :  { %v550_v51 = vpop.f32.mrb[23].mxu0  ;;  %609 = vmatprep.mubr.msk.bf16.mxu1 %vm644_vm0, %v643_v1 }
 0x121   :  { %v551_v52 = vadd.f32 %v550_v51, %v549_v50  ;;  %v284_v53 = vmax.f32 %v548_v49, 0.0 }
 0x123   :  { %v285_v54 = vmax.f32 %v551_v52, 0.0 }
 0x125   :  { %v292_v55 = vpack.c.bf16 %v285_v54, %v284_v53  ;;  %v552_v56 = vpop.f32.mrb[24].mxu0 }
 0x126   :  { %v553_v57 = vpop.f32.mrb[25].mxu0 }
 0x127   :  { %v554_v58 = vadd.f32 %v553_v57, %v552_v56  ;;  %v555_v59 = vpop.f32.mrb[26].mxu0  ;;  %610 = vmatmul.mubr.bf16.gmra.mrb[20].mxu1 %v292_v55 }
 0x128   :  { %v556_v60 = vpop.f32.mrb[27].mxu0  ;;  %613 = vmatprep.mubr.msk.bf16.mxu1 %vm644_vm0, %v643_v1 }
 0x129   :  { %v286_v61 = vmax.f32 %v554_v58, 0.0 }
 0x12b   :  { %v293_v62 = vpack.c.bf16 %v286_v61, %v286_v61 }
 0x12f   :  { %614 = vmatmul.mubr.bf16.gmra.mrb[24].mxu1 %v293_v62 }
 0x1d2   :  { %v405_v0 = vpop.f32.mrb[0].mxu1 }
 0x1d3   :  { %v406_v3 = vadd.f32 %v405_v0, %v310_v63  ;;  %v591_v4 = vpop.f32.mrb[1].mxu1 }
 0x1d4   :  { %v408_v5 = vpop.f32.mrb[2].mxu1 }
 0x1d5   :  { %459 = vst [vmem:[%s924_s4] sm:$0xff] %v406_v3  ;;  %v409_v1 = vadd.f32 %v408_v5, %v311_v2  ;;  %v592_v6 = vpop.f32.mrb[3].mxu1 }
 0x1d7   :  { %460 = vst [vmem:[%s924_s4 + $0x8] sm:$0xff] %v409_v1 }
 0x1da   :  { %v413_v8 = vpop.f32.mrb[4].mxu1 }
 0x1db   :  { %v414_v10 = vadd.f32 %v413_v8, %v312_v7  ;;  %v595_v11 = vpop.f32.mrb[5].mxu1 }
 0x1dc   :  { %v416_v12 = vpop.f32.mrb[6].mxu1 }
 0x1dd   :  { %461 = vst [vmem:[%s924_s4 + $0x10] sm:$0xff] %v414_v10  ;;  %v417_v13 = vadd.f32 %v416_v12, %v313_v9  ;;  %v596_v14 = vpop.f32.mrb[7].mxu1 }
 0x1df   :  { %462 = vst [vmem:[%s924_s4 + $0x18] sm:$0xff] %v417_v13 }
 0x1e2   :  { %v421_v16 = vpop.f32.mrb[8].mxu1 }
 0x1e3   :  { %v422_v18 = vadd.f32 %v421_v16, %v314_v15  ;;  %v599_v19 = vpop.f32.mrb[9].mxu1 }
 0x1e4   :  { %v424_v20 = vpop.f32.mrb[10].mxu1 }
 0x1e5   :  { %463 = vst [vmem:[%s924_s4 + $0x20] sm:$0xff] %v422_v18  ;;  %v425_v21 = vadd.f32 %v424_v20, %v315_v17  ;;  %v600_v22 = vpop.f32.mrb[11].mxu1 }
 0x1e7   :  { %464 = vst [vmem:[%s924_s4 + $0x28] sm:$0xff] %v425_v21 }
 0x1ea   :  { %v429_v24 = vpop.f32.mrb[12].mxu1 }
 0x1eb   :  { %v430_v26 = vadd.f32 %v429_v24, %v316_v23  ;;  %v603_v27 = vpop.f32.mrb[13].mxu1 }
 0x1ec   :  { %v432_v28 = vpop.f32.mrb[14].mxu1 }
 0x1ed   :  { %465 = vst [vmem:[%s924_s4 + $0x30] sm:$0xff] %v430_v26  ;;  %v433_v29 = vadd.f32 %v432_v28, %v317_v25  ;;  %v604_v30 = vpop.f32.mrb[15].mxu1 }
 0x1ef   :  { %466 = vst [vmem:[%s924_s4 + $0x38] sm:$0xff] %v433_v29 }
 0x1f2   :  { %v437_v32 = vpop.f32.mrb[16].mxu1 }
 0x1f3   :  { %v438_v34 = vadd.f32 %v437_v32, %v318_v31  ;;  %v607_v35 = vpop.f32.mrb[17].mxu1 }
 0x1f4   :  { %v440_v36 = vpop.f32.mrb[18].mxu1 }
 0x1f5   :  { %467 = vst [vmem:[%s924_s4 + $0x40] sm:$0xff] %v438_v34  ;;  %v441_v37 = vadd.f32 %v440_v36, %v319_v33  ;;  %v608_v38 = vpop.f32.mrb[19].mxu1 }
 0x1f7   :  { %468 = vst [vmem:[%s924_s4 + $0x48] sm:$0xff] %v441_v37 }
 0x1fa   :  { %v445_v40 = vpop.f32.mrb[20].mxu1 }
 0x1fb   :  { %v446_v42 = vadd.f32 %v445_v40, %v320_v39  ;;  %v611_v43 = vpop.f32.mrb[21].mxu1 }
 0x1fc   :  { %v448_v44 = vpop.f32.mrb[22].mxu1 }
 0x1fd   :  { %469 = vst [vmem:[%s924_s4 + $0x50] sm:$0xff] %v446_v42  ;;  %v449_v45 = vadd.f32 %v448_v44, %v321_v41  ;;  %v612_v46 = vpop.f32.mrb[23].mxu1 }
 0x1ff   :  { %470 = vst [vmem:[%s924_s4 + $0x58] sm:$0xff] %v449_v45 }
 0x202   :  { %v453_v48 = vpop.f32.mrb[24].mxu1 }
 0x203   :  { %v454_v49 = vadd.f32 %v453_v48, %v322_v47  ;;  %v615_v50 = vpop.f32.mrb[25].mxu1 }
 0x204   :  { %v456_v51 = vpop.f32.mrb[26].mxu1 }
 0x205   :  { %471 = vst [vmem:[%s924_s4 + $0x60] sm:$0x3] %v454_v49  ;;  %v616_v52 = vpop.f32.mrb[27].mxu1 }

// kernel: amdim_forward.27
= control target key start
LH: loop header
LB: loop body
LE: loop exit
PB: predicated region body
PF: predicated region fallthrough
CT: control target
= control target key end

     0   :  { %v528_v0 = vmov 0.0   ;;  %vm529_vm0 = vmmov 0   ;;  %s773_s1 = inlined_call_operand.vmem [shape: bf16[128,128], index: 1, kind: input, shape index: {}]   ;;  %s774_s2 = inlined_call_operand.vmem [shape: bf16[128,128], index: 2, kind: input, shape index: {}]   ;;  %s775_s0 = inlined_call_operand.vmem [shape: f32[98,128], index: 0, kind: input, shape index: {}]   ;;  %s776_s3 = inlined_call_operand.vmem [shape: f32[98,128], index: 3, kind: output, shape index: {}]  }
   0x1   :  { %422 = vmatprep.subr.bf16.mxu0 %v528_v0  ;;  %v512_v1 = vld [vmem:[%s773_s1] sm:$0xff]   ;;  %438 = vmatprep.mubr.msk.bf16.mxu0 %vm529_vm0, %v528_v0  ;;  %v513_v2 = vld [vmem:[%s773_s1 + $0x8] sm:$0xff]   ;;  %v514_v3 = vld [vmem:[%s773_s1 + $0x10] sm:$0xff]  }
   0x2   :  { %466 = vmatprep.subr.bf16.mxu1 %v528_v0  ;;  %482 = vmatprep.mubr.msk.bf16.mxu1 %vm529_vm0, %v528_v0  ;;  %v515_v4 = vld [vmem:[%s773_s1 + $0x18] sm:$0xff]   ;;  %v520_v5 = vld [vmem:[%s774_s2] sm:$0xff]   ;;  %v521_v7 = vld [vmem:[%s774_s2 + $0x8] sm:$0xff]  }
   0x3   :  { %423 = vmatpush3.bf16.msra.mxu0 %v512_v1  ;;  %v516_v6 = vld [vmem:[%s773_s1 + $0x20] sm:$0xff]   ;;  %467 = vmatpush3.bf16.msra.mxu1 %v520_v5  ;;  %v517_v8 = vld [vmem:[%s773_s1 + $0x28] sm:$0xff]   ;;  %v522_v9 = vld [vmem:[%s774_s2 + $0x10] sm:$0xff]  }
   0x4   :  { %424 = vmatprep.subr.bf16.mxu0 %v528_v0  ;;  %468 = vmatprep.subr.bf16.mxu1 %v528_v0  ;;  %v518_v10 = vld [vmem:[%s773_s1 + $0x30] sm:$0xff]   ;;  %v523_v11 = vld [vmem:[%s774_s2 + $0x18] sm:$0xff]   ;;  %v604_v13 = vld [vmem:[%s775_s0] sm:$0xff] }
   0x5   :  { %v519_v12 = vld [vmem:[%s773_s1 + $0x38] sm:$0xff]   ;;  %v609_v14 = vld [vmem:[%s775_s0 + $0x8] sm:$0xff]  ;;  %v524_v15 = vld [vmem:[%s774_s2 + $0x20] sm:$0xff]  }
   0x6   :  { %v28_v16 = vpack.c.bf16 %v609_v14, %v604_v13  ;;  %v525_v17 = vld [vmem:[%s774_s2 + $0x28] sm:$0xff]   ;;  %v627_v18 = vld [vmem:[%s775_s0 + $0x10] sm:$0xff]  ;;  %v632_v19 = vld [vmem:[%s775_s0 + $0x18] sm:$0xff] }
   0x7   :  { %425 = vmatpush3.bf16.msra.mxu0 %v513_v2  ;;  %469 = vmatpush3.bf16.msra.mxu1 %v521_v7  ;;  %v29_v20 = vpack.c.bf16 %v632_v19, %v627_v18  ;;  %v642_v21 = vld [vmem:[%s775_s0 + $0x20] sm:$0xff]  ;;  %v647_v22 = vld [vmem:[%s775_s0 + $0x28] sm:$0xff]  ;;  %v656_v24 = vld [vmem:[%s775_s0 + $0x30] sm:$0xff] }
   0x8   :  { %426 = vmatprep.subr.bf16.mxu0 %v528_v0  ;;  %470 = vmatprep.subr.bf16.mxu1 %v528_v0  ;;  %v30_v23 = vpack.c.bf16 %v647_v22, %v642_v21  ;;  %v661_v25 = vld [vmem:[%s775_s0 + $0x38] sm:$0xff]  ;;  %v670_v27 = vld [vmem:[%s775_s0 + $0x40] sm:$0xff]  ;;  %v675_v28 = vld [vmem:[%s775_s0 + $0x48] sm:$0xff] }
   0x9   :  { %v31_v26 = vpack.c.bf16 %v661_v25, %v656_v24  ;;  %v32_v29 = vpack.c.bf16 %v675_v28, %v670_v27  ;;  %v684_v30 = vld [vmem:[%s775_s0 + $0x50] sm:$0xff]  ;;  %v689_v31 = vld [vmem:[%s775_s0 + $0x58] sm:$0xff]  ;;  %v698_v33 = vld [vmem:[%s775_s0 + $0x60] sm:$0x3] }
   0xa   :  { %v33_v32 = vpack.c.bf16 %v689_v31, %v684_v30  ;;  %v34_v34 = vpack.c.bf16 %v698_v33, %v698_v33  ;;  %v526_v35 = vld [vmem:[%s774_s2 + $0x30] sm:$0xff]   ;;  %v527_v36 = vld [vmem:[%s774_s2 + $0x38] sm:$0xff]  }
   0xb   :  { %427 = vmatpush3.bf16.msra.mxu0 %v514_v3  ;;  %471 = vmatpush3.bf16.msra.mxu1 %v522_v9 }
   0xc   :  { %428 = vmatprep.subr.bf16.mxu0 %v528_v0  ;;  %472 = vmatprep.subr.bf16.mxu1 %v528_v0 }
   0xf   :  { %429 = vmatpush3.bf16.msra.mxu0 %v515_v4  ;;  %473 = vmatpush3.bf16.msra.mxu1 %v523_v11 }
  0x10   :  { %430 = vmatprep.subr.bf16.mxu0 %v528_v0  ;;  %474 = vmatprep.subr.bf16.mxu1 %v528_v0 }
  0x13   :  { %431 = vmatpush3.bf16.msra.mxu0 %v516_v6  ;;  %475 = vmatpush3.bf16.msra.mxu1 %v524_v15 }
  0x14   :  { %432 = vmatprep.subr.bf16.mxu0 %v528_v0  ;;  %476 = vmatprep.subr.bf16.mxu1 %v528_v0 }
  0x17   :  { %433 = vmatpush3.bf16.msra.mxu0 %v517_v8  ;;  %477 = vmatpush3.bf16.msra.mxu1 %v525_v17 }
  0x18   :  { %434 = vmatprep.subr.bf16.mxu0 %v528_v0  ;;  %478 = vmatprep.subr.bf16.mxu1 %v528_v0 }
  0x1b   :  { %435 = vmatpush3.bf16.msra.mxu0 %v518_v10  ;;  %479 = vmatpush3.bf16.msra.mxu1 %v526_v35 }
  0x1c   :  { %436 = vmatprep.subr.bf16.mxu0 %v528_v0  ;;  %480 = vmatprep.subr.bf16.mxu1 %v528_v0 }
  0x1f   :  { %437 = vmatpush3.bf16.msra.mxu0 %v519_v12  ;;  %481 = vmatpush3.bf16.msra.mxu1 %v527_v36 }
  0x22   :  { %439 = vmatmul.mubr.bf16.vlgmr.msra.gmra.mrb[0].mxu0 %v28_v16 }
  0x23   :  { %442 = vmatprep.mubr.msk.bf16.mxu0 %vm529_vm0, %v528_v0 }
  0x2a   :  { %443 = vmatmul.mubr.bf16.gmra.mrb[4].mxu0 %v29_v20 }
  0x2b   :  { %446 = vmatprep.mubr.msk.bf16.mxu0 %vm529_vm0, %v528_v0 }
  0x32   :  { %447 = vmatmul.mubr.bf16.gmra.mrb[8].mxu0 %v30_v23 }
  0x33   :  { %450 = vmatprep.mubr.msk.bf16.mxu0 %vm529_vm0, %v528_v0 }
  0x3a   :  { %451 = vmatmul.mubr.bf16.gmra.mrb[12].mxu0 %v31_v26 }
  0x3b   :  { %454 = vmatprep.mubr.msk.bf16.mxu0 %vm529_vm0, %v528_v0 }
  0x42   :  { %455 = vmatmul.mubr.bf16.gmra.mrb[16].mxu0 %v32_v29 }
  0x43   :  { %458 = vmatprep.mubr.msk.bf16.mxu0 %vm529_vm0, %v528_v0 }
  0x4a   :  { %459 = vmatmul.mubr.bf16.gmra.mrb[20].mxu0 %v33_v32 }
  0x4b   :  { %462 = vmatprep.mubr.msk.bf16.mxu0 %vm529_vm0, %v528_v0 }
  0x52   :  { %463 = vmatmul.mubr.bf16.gmra.mrb[24].mxu0 %v34_v34 }
  0xf5   :  { %v133_v37 = vpop.f32.mrb[0].mxu0 }
  0xf6   :  { %v440_v38 = vpop.f32.mrb[1].mxu0  ;;  %v187_v40 = vmax.f32 %v133_v37, 0.0 }
  0xf7   :  { %v136_v39 = vpop.f32.mrb[2].mxu0 }
  0xf8   :  { %v188_v41 = vmax.f32 %v136_v39, 0.0  ;;  %v441_v42 = vpop.f32.mrb[3].mxu0 }
  0xfa   :  { %v200_v43 = vpack.c.bf16 %v188_v41, %v187_v40 }
  0xfc   :  { %483 = vmatmul.mubr.bf16.vlgmr.msra.gmra.mrb[0].mxu1 %v200_v43 }
  0xfd   :  { %v141_v44 = vpop.f32.mrb[4].mxu0  ;;  %486 = vmatprep.mubr.msk.bf16.mxu1 %vm529_vm0, %v528_v0 }
  0xfe   :  { %v444_v45 = vpop.f32.mrb[5].mxu0  ;;  %v189_v47 = vmax.f32 %v141_v44, 0.0 }
  0xff   :  { %v144_v46 = vpop.f32.mrb[6].mxu0 }
 0x100   :  { %v190_v48 = vmax.f32 %v144_v46, 0.0  ;;  %v445_v49 = vpop.f32.mrb[7].mxu0 }
 0x102   :  { %v201_v50 = vpack.c.bf16 %v190_v48, %v189_v47 }
 0x104   :  { %487 = vmatmul.mubr.bf16.gmra.mrb[4].mxu1 %v201_v50 }
 0x105   :  { %v149_v51 = vpop.f32.mrb[8].mxu0  ;;  %490 = vmatprep.mubr.msk.bf16.mxu1 %vm529_vm0, %v528_v0 }
 0x106   :  { %v448_v52 = vpop.f32.mrb[9].mxu0  ;;  %v191_v54 = vmax.f32 %v149_v51, 0.0 }
 0x107   :  { %v152_v53 = vpop.f32.mrb[10].mxu0 }
 0x108   :  { %v192_v55 = vmax.f32 %v152_v53, 0.0  ;;  %v449_v56 = vpop.f32.mrb[11].mxu0 }
 0x10a   :  { %v202_v57 = vpack.c.bf16 %v192_v55, %v191_v54 }
 0x10c   :  { %491 = vmatmul.mubr.bf16.gmra.mrb[8].mxu1 %v202_v57 }
 0x10d   :  { %v157_v58 = vpop.f32.mrb[12].mxu0  ;;  %494 = vmatprep.mubr.msk.bf16.mxu1 %vm529_vm0, %v528_v0 }
 0x10e   :  { %v452_v59 = vpop.f32.mrb[13].mxu0  ;;  %v193_v61 = vmax.f32 %v157_v58, 0.0 }
 0x10f   :  { %v160_v60 = vpop.f32.mrb[14].mxu0 }
 0x110   :  { %v194_v62 = vmax.f32 %v160_v60, 0.0  ;;  %v453_v63 = vpop.f32.mrb[15].mxu0 }
 0x112   :  { %v203_v1 = vpack.c.bf16 %v194_v62, %v193_v61 }
 0x114   :  { %495 = vmatmul.mubr.bf16.gmra.mrb[12].mxu1 %v203_v1 }
 0x115   :  { %v165_v2 = vpop.f32.mrb[16].mxu0  ;;  %498 = vmatprep.mubr.msk.bf16.mxu1 %vm529_vm0, %v528_v0 }
 0x116   :  { %v456_v3 = vpop.f32.mrb[17].mxu0  ;;  %v195_v5 = vmax.f32 %v165_v2, 0.0 }
 0x117   :  { %v168_v4 = vpop.f32.mrb[18].mxu0 }
 0x118   :  { %v196_v6 = vmax.f32 %v168_v4, 0.0  ;;  %v457_v7 = vpop.f32.mrb[19].mxu0 }
 0x11a   :  { %v204_v8 = vpack.c.bf16 %v196_v6, %v195_v5 }
 0x11c   :  { %499 = vmatmul.mubr.bf16.gmra.mrb[16].mxu1 %v204_v8 }
 0x11d   :  { %v173_v9 = vpop.f32.mrb[20].mxu0  ;;  %502 = vmatprep.mubr.msk.bf16.mxu1 %vm529_vm0, %v528_v0 }
 0x11e   :  { %v460_v10 = vpop.f32.mrb[21].mxu0  ;;  %v197_v12 = vmax.f32 %v173_v9, 0.0 }
 0x11f   :  { %v176_v11 = vpop.f32.mrb[22].mxu0 }
 0x120   :  { %v198_v15 = vmax.f32 %v176_v11, 0.0  ;;  %v461_v16 = vpop.f32.mrb[23].mxu0 }
 0x122   :  { %v205_v17 = vpack.c.bf16 %v198_v15, %v197_v12 }
 0x124   :  { %503 = vmatmul.mubr.bf16.gmra.mrb[20].mxu1 %v205_v17 }
 0x125   :  { %v181_v20 = vpop.f32.mrb[24].mxu0  ;;  %506 = vmatprep.mubr.msk.bf16.mxu1 %vm529_vm0, %v528_v0 }
 0x126   :  { %v199_v23 = vmax.f32 %v181_v20, 0.0  ;;  %v464_v26 = vpop.f32.mrb[25].mxu0 }
 0x127   :  { %v184_v29 = vpop.f32.mrb[26].mxu0 }
 0x128   :  { %v206_v32 = vpack.c.bf16 %v199_v23, %v199_v23  ;;  %v465_v34 = vpop.f32.mrb[27].mxu0 }
 0x12c   :  { %507 = vmatmul.mubr.bf16.gmra.mrb[24].mxu1 %v206_v32 }
 0x1cf   :  { %v305_v35 = vpop.f32.mrb[0].mxu1 }
 0x1d0   :  { %v306_v36 = vadd.f32 %v305_v35, %v604_v13  ;;  %v484_v37 = vpop.f32.mrb[1].mxu1 }
 0x1d1   :  { %v308_v38 = vpop.f32.mrb[2].mxu1 }
 0x1d2   :  { %359 = vst [vmem:[%s776_s3] sm:$0xff] %v306_v36  ;;  %v309_v39 = vadd.f32 %v308_v38, %v609_v14  ;;  %v485_v40 = vpop.f32.mrb[3].mxu1 }
 0x1d4   :  { %360 = vst [vmem:[%s776_s3 + $0x8] sm:$0xff] %v309_v39 }
 0x1d7   :  { %v313_v0 = vpop.f32.mrb[4].mxu1 }
 0x1d8   :  { %v314_v41 = vadd.f32 %v313_v0, %v627_v18  ;;  %v488_v42 = vpop.f32.mrb[5].mxu1 }
 0x1d9   :  { %v316_v43 = vpop.f32.mrb[6].mxu1 }
 0x1da   :  { %361 = vst [vmem:[%s776_s3 + $0x10] sm:$0xff] %v314_v41  ;;  %v317_v13 = vadd.f32 %v316_v43, %v632_v19  ;;  %v489_v44 = vpop.f32.mrb[7].mxu1 }
 0x1dc   :  { %362 = vst [vmem:[%s776_s3 + $0x18] sm:$0xff] %v317_v13 }
 0x1df   :  { %v321_v14 = vpop.f32.mrb[8].mxu1 }
 0x1e0   :  { %v322_v45 = vadd.f32 %v321_v14, %v642_v21  ;;  %v492_v46 = vpop.f32.mrb[9].mxu1 }
 0x1e1   :  { %v324_v47 = vpop.f32.mrb[10].mxu1 }
 0x1e2   :  { %363 = vst [vmem:[%s776_s3 + $0x20] sm:$0xff] %v322_v45  ;;  %v325_v18 = vadd.f32 %v324_v47, %v647_v22  ;;  %v493_v48 = vpop.f32.mrb[11].mxu1 }
 0x1e4   :  { %364 = vst [vmem:[%s776_s3 + $0x28] sm:$0xff] %v325_v18 }
 0x1e7   :  { %v329_v19 = vpop.f32.mrb[12].mxu1 }
 0x1e8   :  { %v330_v49 = vadd.f32 %v329_v19, %v656_v24  ;;  %v496_v50 = vpop.f32.mrb[13].mxu1 }
 0x1e9   :  { %v332_v51 = vpop.f32.mrb[14].mxu1 }
 0x1ea   :  { %365 = vst [vmem:[%s776_s3 + $0x30] sm:$0xff] %v330_v49  ;;  %v333_v21 = vadd.f32 %v332_v51, %v661_v25  ;;  %v497_v52 = vpop.f32.mrb[15].mxu1 }
 0x1ec   :  { %366 = vst [vmem:[%s776_s3 + $0x38] sm:$0xff] %v333_v21 }
 0x1ef   :  { %v337_v22 = vpop.f32.mrb[16].mxu1 }
 0x1f0   :  { %v338_v53 = vadd.f32 %v337_v22, %v670_v27  ;;  %v500_v54 = vpop.f32.mrb[17].mxu1 }
 0x1f1   :  { %v340_v55 = vpop.f32.mrb[18].mxu1 }
 0x1f2   :  { %367 = vst [vmem:[%s776_s3 + $0x40] sm:$0xff] %v338_v53  ;;  %v341_v24 = vadd.f32 %v340_v55, %v675_v28  ;;  %v501_v56 = vpop.f32.mrb[19].mxu1 }
 0x1f4   :  { %368 = vst [vmem:[%s776_s3 + $0x48] sm:$0xff] %v341_v24 }
 0x1f7   :  { %v345_v25 = vpop.f32.mrb[20].mxu1 }
 0x1f8   :  { %v346_v57 = vadd.f32 %v345_v25, %v684_v30  ;;  %v504_v58 = vpop.f32.mrb[21].mxu1 }
 0x1f9   :  { %v348_v59 = vpop.f32.mrb[22].mxu1 }
 0x1fa   :  { %369 = vst [vmem:[%s776_s3 + $0x50] sm:$0xff] %v346_v57  ;;  %v349_v27 = vadd.f32 %v348_v59, %v689_v31  ;;  %v505_v60 = vpop.f32.mrb[23].mxu1 }
 0x1fc   :  { %370 = vst [vmem:[%s776_s3 + $0x58] sm:$0xff] %v349_v27 }
 0x1ff   :  { %v353_v28 = vpop.f32.mrb[24].mxu1 }
 0x200   :  { %v354_v61 = vadd.f32 %v353_v28, %v698_v33  ;;  %v508_v62 = vpop.f32.mrb[25].mxu1 }
 0x201   :  { %v356_v63 = vpop.f32.mrb[26].mxu1 }
 0x202   :  { %371 = vst [vmem:[%s776_s3 + $0x60] sm:$0x3] %v354_v61  ;;  %v509_v30 = vpop.f32.mrb[27].mxu1 }

// kernel: amdim_forward.30
= control target key start
LH: loop header
LB: loop body
LE: loop exit
PB: predicated region body
PF: predicated region fallthrough
CT: control target
= control target key end

     0   :  { %s518_s1 = inlined_call_operand.vmem [shape: bf16[128,128], index: 1, kind: input, shape index: {}]   ;;  %s519_s2 = inlined_call_operand.vmem [shape: bf16[128,128], index: 2, kind: input, shape index: {}]   ;;  %s520_s0 = inlined_call_operand.vmem [shape: f32[50,128], index: 0, kind: input, shape index: {}]   ;;  %s521_s3 = inlined_call_operand.vmem [shape: f32[50,128], index: 3, kind: output, shape index: {}]  }
   0x1   :  { %v392_v0 = vld [vmem:[%s518_s1] sm:$0xff]   ;;  %v393_v1 = vld [vmem:[%s518_s1 + $0x8] sm:$0xff]   ;;  %v394_v2 = vld [vmem:[%s518_s1 + $0x10] sm:$0xff]  }
   0x2   :  { %344 = vmatprep.subr.bf16.mxu0 %v392_v0  ;;  %v395_v3 = vld [vmem:[%s518_s1 + $0x18] sm:$0xff]   ;;  %v400_v4 = vld [vmem:[%s519_s2] sm:$0xff]   ;;  %v401_v5 = vld [vmem:[%s519_s2 + $0x8] sm:$0xff]  }
   0x3   :  { %345 = vmatpush3.bf16.msra.mxu0 %v392_v0  ;;  %368 = vmatprep.subr.bf16.mxu1 %v400_v4  ;;  %v396_v6 = vld [vmem:[%s518_s1 + $0x20] sm:$0xff]   ;;  %v402_v7 = vld [vmem:[%s519_s2 + $0x10] sm:$0xff]   ;;  %v397_v8 = vld [vmem:[%s518_s1 + $0x28] sm:$0xff]  }
   0x4   :  { %346 = vmatprep.subr.bf16.mxu0 %v393_v1  ;;  %369 = vmatpush3.bf16.msra.mxu1 %v400_v4  ;;  %v403_v9 = vld [vmem:[%s519_s2 + $0x18] sm:$0xff]   ;;  %v398_v10 = vld [vmem:[%s518_s1 + $0x30] sm:$0xff]   ;;  %v404_v11 = vld [vmem:[%s519_s2 + $0x20] sm:$0xff]  }
   0x5   :  { %370 = vmatprep.subr.bf16.mxu1 %v401_v5  ;;  %v399_v12 = vld [vmem:[%s518_s1 + $0x38] sm:$0xff]   ;;  %v405_v13 = vld [vmem:[%s519_s2 + $0x28] sm:$0xff]   ;;  %v17_v14 = vld [vmem:[%s520_s0 + $0x10] sm:$0xff] }
   0x6   :  { %v18_v15 = vld [vmem:[%s520_s0 + $0x18] sm:$0xff]  ;;  %v21_v17 = vld [vmem:[%s520_s0 + $0x30] sm:$0x3]  ;;  %v15_v40 = vld [vmem:[%s520_s0] sm:$0xff] }
   0x7   :  { %347 = vmatpush3.bf16.msra.mxu0 %v393_v1  ;;  %v23_v16 = vpack.c.bf16 %v18_v15, %v17_v14  ;;  %v25_v18 = vpack.c.bf16 %v21_v17, %v21_v17  ;;  %v406_v19 = vld [vmem:[%s519_s2 + $0x30] sm:$0xff]   ;;  %v407_v20 = vld [vmem:[%s519_s2 + $0x38] sm:$0xff]   ;;  %v16_v41 = vld [vmem:[%s520_s0 + $0x8] sm:$0xff] }
   0x8   :  { %348 = vmatprep.subr.bf16.mxu0 %v394_v2  ;;  %371 = vmatpush3.bf16.msra.mxu1 %v401_v5  ;;  %v22_v42 = vpack.c.bf16 %v16_v41, %v15_v40  ;;  %v19_v43 = vld [vmem:[%s520_s0 + $0x20] sm:$0xff]  ;;  %v20_v44 = vld [vmem:[%s520_s0 + $0x28] sm:$0xff] }
   0x9   :  { %372 = vmatprep.subr.bf16.mxu1 %v402_v7  ;;  %v24_v45 = vpack.c.bf16 %v20_v44, %v19_v43 }
   0xb   :  { %349 = vmatpush3.bf16.msra.mxu0 %v394_v2 }
   0xc   :  { %350 = vmatprep.subr.bf16.mxu0 %v395_v3  ;;  %373 = vmatpush3.bf16.msra.mxu1 %v402_v7 }
   0xd   :  { %374 = vmatprep.subr.bf16.mxu1 %v403_v9 }
   0xf   :  { %351 = vmatpush3.bf16.msra.mxu0 %v395_v3 }
  0x10   :  { %352 = vmatprep.subr.bf16.mxu0 %v396_v6  ;;  %375 = vmatpush3.bf16.msra.mxu1 %v403_v9 }
  0x11   :  { %376 = vmatprep.subr.bf16.mxu1 %v404_v11 }
  0x13   :  { %353 = vmatpush3.bf16.msra.mxu0 %v396_v6 }
  0x14   :  { %354 = vmatprep.subr.bf16.mxu0 %v397_v8  ;;  %377 = vmatpush3.bf16.msra.mxu1 %v404_v11 }
  0x15   :  { %378 = vmatprep.subr.bf16.mxu1 %v405_v13 }
  0x17   :  { %355 = vmatpush3.bf16.msra.mxu0 %v397_v8 }
  0x18   :  { %356 = vmatprep.subr.bf16.mxu0 %v398_v10  ;;  %379 = vmatpush3.bf16.msra.mxu1 %v405_v13 }
  0x19   :  { %380 = vmatprep.subr.bf16.mxu1 %v406_v19 }
  0x1b   :  { %357 = vmatpush3.bf16.msra.mxu0 %v398_v10 }
  0x1c   :  { %358 = vmatprep.subr.bf16.mxu0 %v399_v12  ;;  %381 = vmatpush3.bf16.msra.mxu1 %v406_v19 }
  0x1d   :  { %382 = vmatprep.subr.bf16.mxu1 %v407_v20 }
  0x1f   :  { %359 = vmatpush3.bf16.msra.mxu0 %v399_v12 }
  0x20   :  { %383 = vmatpush3.bf16.msra.mxu1 %v407_v20 }
  0x22   :  { %361 = vmatmul.mubr.bf16.vlgmr.msra.gmra.mrb[0].mxu0 %v23_v16 }
  0x2a   :  { %365 = vmatmul.mubr.bf16.gmra.mrb[4].mxu0 %v25_v18 }
  0x2b   :  { %360 = vmatprep.mubr.bf16.mxu0 %v22_v42 }
  0x2c   :  { %364 = vmatprep.mubr.bf16.mxu0 %v24_v45 }
  0xf5   :  { %v362_v21 = vpop.f32.mrb[0].mxu0 }
  0xf6   :  { %v124_v22 = vpop.f32.mrb[1].mxu0  ;;  %v156_v24 = vmax.f32 %v362_v21, 0.0 }
  0xf7   :  { %v363_v23 = vpop.f32.mrb[2].mxu0  ;;  %v154_v27 = vmax.f32 %v124_v22, 0.0 }
  0xf8   :  { %v157_v25 = vmax.f32 %v363_v23, 0.0  ;;  %v127_v26 = vpop.f32.mrb[3].mxu0 }
  0xf9   :  { %v155_v28 = vmax.f32 %v127_v26, 0.0 }
  0xfa   :  { %v162_v29 = vpack.c.bf16 %v157_v25, %v156_v24 }
  0xfb   :  { %v161_v30 = vpack.c.bf16 %v155_v28, %v154_v27 }
  0xfd   :  { %v366_v31 = vpop.f32.mrb[4].mxu0  ;;  %384 = vmatprep.mubr.bf16.mxu1 %v161_v30 }
  0xfe   :  { %v140_v32 = vpop.f32.mrb[5].mxu0  ;;  %385 = vmatmul.mubr.bf16.vlgmr.msra.gmra.mrb[0].mxu1 %v162_v29  ;;  %v160_v34 = vmax.f32 %v366_v31, 0.0 }
  0xff   :  { %v367_v33 = vpop.f32.mrb[6].mxu0  ;;  %v158_v36 = vmax.f32 %v140_v32, 0.0 }
 0x100   :  { %v143_v35 = vpop.f32.mrb[7].mxu0  ;;  %v164_v39 = vpack.c.bf16 %v160_v34, %v160_v34 }
 0x101   :  { %v159_v37 = vmax.f32 %v143_v35, 0.0 }
 0x103   :  { %v163_v38 = vpack.c.bf16 %v159_v37, %v158_v36 }
 0x105   :  { %388 = vmatprep.mubr.bf16.mxu1 %v163_v38 }
 0x106   :  { %389 = vmatmul.mubr.bf16.gmra.mrb[4].mxu1 %v164_v39 }
 0x1d1   :  { %v386_v46 = vpop.f32.mrb[0].mxu1 }
 0x1d2   :  { %v272_v47 = vadd.f32 %v386_v46, %v17_v14  ;;  %v263_v48 = vpop.f32.mrb[1].mxu1 }
 0x1d3   :  { %v264_v49 = vadd.f32 %v263_v48, %v15_v40  ;;  %v387_v50 = vpop.f32.mrb[2].mxu1 }
 0x1d4   :  { %295 = vst [vmem:[%s521_s3 + $0x10] sm:$0xff] %v272_v47  ;;  %v275_v51 = vadd.f32 %v387_v50, %v18_v15  ;;  %v266_v52 = vpop.f32.mrb[3].mxu1 }
 0x1d5   :  { %293 = vst [vmem:[%s521_s3] sm:$0xff] %v264_v49  ;;  %v267_v53 = vadd.f32 %v266_v52, %v16_v41 }
 0x1d6   :  { %296 = vst [vmem:[%s521_s3 + $0x18] sm:$0xff] %v275_v51 }
 0x1d7   :  { %294 = vst [vmem:[%s521_s3 + $0x8] sm:$0xff] %v267_v53 }
 0x1d9   :  { %v390_v54 = vpop.f32.mrb[4].mxu1 }
 0x1da   :  { %v288_v55 = vadd.f32 %v390_v54, %v21_v17  ;;  %v279_v56 = vpop.f32.mrb[5].mxu1 }
 0x1db   :  { %v280_v57 = vadd.f32 %v279_v56, %v19_v43  ;;  %v391_v58 = vpop.f32.mrb[6].mxu1 }
 0x1dc   :  { %299 = vst [vmem:[%s521_s3 + $0x30] sm:$0x3] %v288_v55  ;;  %v282_v59 = vpop.f32.mrb[7].mxu1 }
 0x1dd   :  { %297 = vst [vmem:[%s521_s3 + $0x20] sm:$0xff] %v280_v57  ;;  %v283_v60 = vadd.f32 %v282_v59, %v20_v44 }
 0x1df   :  { %298 = vst [vmem:[%s521_s3 + $0x28] sm:$0xff] %v283_v60 }

// kernel: amdim_forward.29
= control target key start
LH: loop header
LB: loop body
LE: loop exit
PB: predicated region body
PF: predicated region fallthrough
CT: control target
= control target key end

     0   :  { %s2201_s1 = inlined_call_operand.vmem [shape: bf16[1152,128], index: 1, kind: input, shape index: {}]   ;;  %s2202_s0 = inlined_call_operand.vmem [shape: f32[50,1152], index: 0, kind: input, shape index: {}]   ;;  %s2203_s2 = inlined_call_operand.vmem [shape: bf16[128,128], index: 2, kind: input, shape index: {}]   ;;  %s2204_s3 = inlined_call_operand.vmem [shape: f32[50,128], index: 3, kind: output, shape index: {}]  }
   0x1   :  { %v1535_v0 = vld [vmem:[%s2201_s1 + $0x40] sm:$0xff]   ;;  %v1539_v4 = vld [vmem:[%s2201_s1 + $0x48] sm:$0xff]   ;;  %v1543_v8 = vld [vmem:[%s2201_s1 + $0x50] sm:$0xff]  }
   0x2   :  { %v1536_v1 = vld [vmem:[%s2201_s1 + $0xc0] sm:$0xff]   ;;  %1303 = vmatprep.subr.bf16.mxu0 %v1535_v0  ;;  %v1540_v5 = vld [vmem:[%s2201_s1 + $0xc8] sm:$0xff]   ;;  %v1544_v9 = vld [vmem:[%s2201_s1 + $0xd0] sm:$0xff]  }
   0x3   :  { %v1537_v2 = vld [vmem:[%s2201_s1] sm:$0xff]   ;;  %1343 = vmatprep.subr.bf16.mxu1 %v1536_v1  ;;  %v1541_v6 = vld [vmem:[%s2201_s1 + $0x8] sm:$0xff]   ;;  %v1545_v10 = vld [vmem:[%s2201_s1 + $0x10] sm:$0xff]  }
   0x4   :  { %v1538_v3 = vld [vmem:[%s2201_s1 + $0x80] sm:$0xff]   ;;  %1304 = vmatpush3.bf16.msra.mxu0 %v1537_v2  ;;  %v1542_v7 = vld [vmem:[%s2201_s1 + $0x88] sm:$0xff]   ;;  %v1546_v11 = vld [vmem:[%s2201_s1 + $0x90] sm:$0xff]  }
   0x5   :  { %1344 = vmatpush3.bf16.msra.mxu1 %v1538_v3  ;;  %1305 = vmatprep.subr.bf16.mxu0 %v1539_v4  ;;  %v1547_v12 = vld [vmem:[%s2201_s1 + $0x58] sm:$0xff]   ;;  %v1551_v16 = vld [vmem:[%s2201_s1 + $0x60] sm:$0xff]   ;;  %v1555_v20 = vld [vmem:[%s2201_s1 + $0x68] sm:$0xff]  }
   0x6   :  { %1345 = vmatprep.subr.bf16.mxu1 %v1540_v5  ;;  %v1548_v13 = vld [vmem:[%s2201_s1 + $0xd8] sm:$0xff]   ;;  %v1552_v17 = vld [vmem:[%s2201_s1 + $0xe0] sm:$0xff]   ;;  %v1556_v21 = vld [vmem:[%s2201_s1 + $0xe8] sm:$0xff]  }
   0x7   :  { %v1549_v14 = vld [vmem:[%s2201_s1 + $0x18] sm:$0xff]   ;;  %v1553_v18 = vld [vmem:[%s2201_s1 + $0x20] sm:$0xff]   ;;  %v1557_v22 = vld [vmem:[%s2201_s1 + $0x28] sm:$0xff]  }
   0x8   :  { %1306 = vmatpush3.bf16.msra.mxu0 %v1541_v6  ;;  %v1550_v15 = vld [vmem:[%s2201_s1 + $0x98] sm:$0xff]   ;;  %v1554_v19 = vld [vmem:[%s2201_s1 + $0xa0] sm:$0xff]   ;;  %v1558_v23 = vld [vmem:[%s2201_s1 + $0xa8] sm:$0xff]  }
   0x9   :  { %1346 = vmatpush3.bf16.msra.mxu1 %v1542_v7  ;;  %1307 = vmatprep.subr.bf16.mxu0 %v1543_v8  ;;  %v1559_v24 = vld [vmem:[%s2201_s1 + $0x70] sm:$0xff]   ;;  %v1563_v28 = vld [vmem:[%s2201_s1 + $0x78] sm:$0xff]   ;;  %v15_v32 = vld [vmem:[%s2202_s0] sm:$0xff] }
   0xa   :  { %1347 = vmatprep.subr.bf16.mxu1 %v1544_v9  ;;  %v1560_v25 = vld [vmem:[%s2201_s1 + $0xf0] sm:$0xff]   ;;  %v1564_v29 = vld [vmem:[%s2201_s1 + $0xf8] sm:$0xff]   ;;  %v16_v33 = vld [vmem:[%s2202_s0 + $0x8] sm:$0xff] }
   0xb   :  { %v1561_v26 = vld [vmem:[%s2201_s1 + $0x30] sm:$0xff]   ;;  %v1565_v30 = vld [vmem:[%s2201_s1 + $0x38] sm:$0xff]   ;;  %v24_v34 = vld [vmem:[%s2202_s0 + $0x48] sm:$0xff]  ;;  %v1037_v36 = vadd.f32 %v16_v33, %v15_v32 }
   0xc   :  { %1308 = vmatpush3.bf16.msra.mxu0 %v1545_v10  ;;  %v1562_v27 = vld [vmem:[%s2201_s1 + $0xb0] sm:$0xff]   ;;  %v1566_v31 = vld [vmem:[%s2201_s1 + $0xb8] sm:$0xff]   ;;  %v78_v39 = vpack.c.bf16 %v24_v34, %v15_v32  ;;  %v27_v43 = vld [vmem:[%s2202_s0 + $0x60] sm:$0xff] }
   0xd   :  { %1348 = vmatpush3.bf16.msra.mxu1 %v1546_v11  ;;  %1309 = vmatprep.subr.bf16.mxu0 %v1547_v12  ;;  %v25_v35 = vld [vmem:[%s2202_s0 + $0x50] sm:$0xff]  ;;  %v18_v38 = vld [vmem:[%s2202_s0 + $0x18] sm:$0xff]  ;;  %v1758_v47 = vld [vmem:[%s2202_s0 + $0x20] sm:$0xff] }
   0xe   :  { %1349 = vmatprep.subr.bf16.mxu1 %v1548_v13  ;;  %v17_v37 = vld [vmem:[%s2202_s0 + $0x10] sm:$0xff]  ;;  %v79_v40 = vpack.c.bf16 %v25_v35, %v16_v33  ;;  %v1038_v41 = vadd.f32 %v25_v35, %v24_v34  ;;  %v26_v42 = vld [vmem:[%s2202_s0 + $0x58] sm:$0xff]  ;;  %v81_v44 = vpack.c.bf16 %v27_v43, %v18_v38  ;;  %v1567_v49 = vld [vmem:[%s2201_s1 + $0x140] sm:$0xff]  }
   0xf   :  { %v1044_v45 = vadd.f32 %v1037_v36, %v17_v37  ;;  %v80_v46 = vpack.c.bf16 %v26_v42, %v17_v37  ;;  %v1766_v50 = vld [vmem:[%s2202_s0 + $0x68] sm:$0xff]  ;;  %v1568_v52 = vld [vmem:[%s2201_s1 + $0x100] sm:$0xff]   ;;  %v34_v61 = vld [vmem:[%s2202_s0 + $0x98] sm:$0xff] }
  0x10   :  { %1310 = vmatpush3.bf16.msra.mxu0 %v1549_v14  ;;  %722 = vmatprep.mubr.bf16.mxu0 %v79_v40  ;;  %v1045_v48 = vadd.f32 %v1038_v41, %v26_v42  ;;  %v1569_v54 = vld [vmem:[%s2201_s1 + $0x1c0] sm:$0xff]   ;;  %v1571_v58 = vld [vmem:[%s2201_s1 + $0x148] sm:$0xff]   ;;  %v45_v1 = vld [vmem:[%s2202_s0 + $0xf0] sm:$0xff] }
  0x11   :  { %1350 = vmatpush3.bf16.msra.mxu1 %v1550_v15  ;;  %1311 = vmatprep.subr.bf16.mxu0 %v1551_v16  ;;  %v1051_v51 = vadd.f32 %v1044_v45, %v18_v38  ;;  %v1570_v56 = vld [vmem:[%s2201_s1 + $0x180] sm:$0xff]   ;;  %v1572_v59 = vld [vmem:[%s2201_s1 + $0x108] sm:$0xff]   ;;  %v33_v4 = vld [vmem:[%s2202_s0 + $0x90] sm:$0xff] }
  0x12   :  { %1351 = vmatprep.subr.bf16.mxu1 %v1552_v17  ;;  %786 = vmatprep.mubr.bf16.mxu1 %v81_v44  ;;  %v1052_v53 = vadd.f32 %v1045_v48, %v27_v43  ;;  %v1573_v60 = vld [vmem:[%s2201_s1 + $0x1c8] sm:$0xff]   ;;  %v43_v62 = vld [vmem:[%s2202_s0 + $0xe0] sm:$0xff]  ;;  %v42_v5 = vld [vmem:[%s2202_s0 + $0xd8] sm:$0xff]  ;;  %v1039_v6 = vadd.f32 %v34_v61, %v33_v4 }
  0x13   :  { %v1775_v55 = vadd.f32 %v1051_v51, %v1758_v47  ;;  %v88_v63 = vpack.c.bf16 %v43_v62, %v34_v61  ;;  %v36_v0 = vld [vmem:[%s2202_s0 + $0xa8] sm:$0xff]  ;;  %v35_v7 = vld [vmem:[%s2202_s0 + $0xa0] sm:$0xff]  ;;  %v87_v9 = vpack.c.bf16 %v42_v5, %v33_v4  ;;  %v1040_v10 = vadd.f32 %v43_v62, %v42_v5  ;;  %v1575_v12 = vld [vmem:[%s2201_s1 + $0x150] sm:$0xff]  }
  0x14   :  { %1312 = vmatpush3.bf16.msra.mxu0 %v1553_v18  ;;  %v1781_v57 = vadd.f32 %v1052_v53, %v1766_v50  ;;  %v90_v2 = vpack.c.bf16 %v45_v1, %v36_v0  ;;  %v1574_v3 = vld [vmem:[%s2201_s1 + $0x188] sm:$0xff]   ;;  %v1046_v13 = vadd.f32 %v1039_v6, %v35_v7  ;;  %v1576_v14 = vld [vmem:[%s2201_s1 + $0x110] sm:$0xff]   ;;  %v62_v36 = vld [vmem:[%s2202_s0 + $0x178] sm:$0xff] }
  0x15   :  { %1352 = vmatpush3.bf16.msra.mxu1 %v1554_v19  ;;  %1313 = vmatprep.subr.bf16.mxu0 %v1555_v20  ;;  %v44_v8 = vld [vmem:[%s2202_s0 + $0xe8] sm:$0xff]  ;;  %v1577_v16 = vld [vmem:[%s2201_s1 + $0x1d0] sm:$0xff]   ;;  %v1579_v19 = vld [vmem:[%s2201_s1 + $0x158] sm:$0xff]  }
  0x16   :  { %1353 = vmatprep.subr.bf16.mxu1 %v1556_v21  ;;  %v89_v11 = vpack.c.bf16 %v44_v8, %v35_v7  ;;  %v1047_v15 = vadd.f32 %v1040_v10, %v44_v8  ;;  %v1578_v17 = vld [vmem:[%s2201_s1 + $0x190] sm:$0xff]   ;;  %v1831_v18 = vadd.f32 %v1046_v13, %v36_v0  ;;  %v1580_v21 = vld [vmem:[%s2201_s1 + $0x118] sm:$0xff]   ;;  %v1583_v38 = vld [vmem:[%s2201_s1 + $0x160] sm:$0xff]   ;;  %v82_v8 = vpack.c.bf16 %v1766_v50, %v1758_v47 }
  0x17   :  { %v53_v35 = vld [vmem:[%s2202_s0 + $0x130] sm:$0xff]  ;;  %v1584_v41 = vld [vmem:[%s2201_s1 + $0x120] sm:$0xff]   ;;  %v1588_v48 = vld [vmem:[%s2201_s1 + $0x128] sm:$0xff]  }
  0x18   :  { %1314 = vmatpush3.bf16.msra.mxu0 %v1557_v22  ;;  %v1836_v20 = vadd.f32 %v1047_v15, %v45_v1  ;;  %v1581_v22 = vld [vmem:[%s2201_s1 + $0x1d8] sm:$0xff]   ;;  %v98_v37 = vpack.c.bf16 %v62_v36, %v53_v35  ;;  %v1585_v42 = vld [vmem:[%s2201_s1 + $0x1e0] sm:$0xff]   ;;  %v72_v53 = vld [vmem:[%s2202_s0 + $0x1c8] sm:$0x3] }
  0x19   :  { %1354 = vmatpush3.bf16.msra.mxu1 %v1558_v23  ;;  %1315 = vmatprep.subr.bf16.mxu0 %v1559_v24  ;;  %v52_v23 = vld [vmem:[%s2202_s0 + $0x128] sm:$0xff]  ;;  %v61_v24 = vld [vmem:[%s2202_s0 + $0x170] sm:$0xff]  ;;  %v1586_v43 = vld [vmem:[%s2201_s1 + $0x1a0] sm:$0xff]  }
  0x1a   :  { %1355 = vmatprep.subr.bf16.mxu1 %v1560_v25  ;;  %v54_v25 = vld [vmem:[%s2202_s0 + $0x138] sm:$0xff]  ;;  %v1592_v0 = vld [vmem:[%s2201_s1 + $0x130] sm:$0xff]   ;;  %v1599_v50 = vld [vmem:[%s2201_s1 + $0x200] sm:$0xff]  }
  0x1b   :  { %v70_v51 = vld [vmem:[%s2202_s0 + $0x1b8] sm:$0x3]  ;;  %v29_v10 = vld [vmem:[%s2202_s0 + $0x70] sm:$0xff] }
  0x1c   :  { %1316 = vmatpush3.bf16.msra.mxu0 %v1561_v26  ;;  %v97_v26 = vpack.c.bf16 %v61_v24, %v52_v23  ;;  %v1595_v4 = vld [vmem:[%s2201_s1 + $0x178] sm:$0xff]   ;;  %v1946_v13 = vadd.f32 %v1781_v57, %v29_v10  ;;  %v1967_v57 = vld [vmem:[%s2202_s0 + $0x30] sm:$0xff] }
  0x1d   :  { %1356 = vmatpush3.bf16.msra.mxu1 %v1562_v27  ;;  %1317 = vmatprep.subr.bf16.mxu0 %v1563_v28  ;;  %v63_v27 = vld [vmem:[%s2202_s0 + $0x180] sm:$0xff]  ;;  %v1596_v6 = vld [vmem:[%s2201_s1 + $0x138] sm:$0xff]  }
  0x1e   :  { %1357 = vmatprep.subr.bf16.mxu1 %v1564_v29  ;;  %v99_v28 = vpack.c.bf16 %v63_v27, %v54_v25  ;;  %v1582_v29 = vld [vmem:[%s2201_s1 + $0x198] sm:$0xff]  }
  0x1f   :  { %v1597_v7 = vld [vmem:[%s2201_s1 + $0x1f8] sm:$0xff]  }
  0x20   :  { %1318 = vmatpush3.bf16.msra.mxu0 %v1565_v30  ;;  %v51_v30 = vld [vmem:[%s2202_s0 + $0x120] sm:$0xff]  ;;  %v1598_v47 = vld [vmem:[%s2201_s1 + $0x1b8] sm:$0xff]  }
  0x21   :  { %1358 = vmatpush3.bf16.msra.mxu1 %v1566_v31  ;;  %1383 = vmatprep.subr.bf16.mxu0 %v1567_v49  ;;  %v60_v31 = vld [vmem:[%s2202_s0 + $0x168] sm:$0xff]  ;;  %v1041_v33 = vadd.f32 %v52_v23, %v51_v30  ;;  %v1972_v15 = vld [vmem:[%s2202_s0 + $0x78] sm:$0xff]  ;;  %v37_v23 = vld [vmem:[%s2202_s0 + $0xb0] sm:$0xff] }
  0x22   :  { %1423 = vmatprep.subr.bf16.mxu1 %v1569_v54  ;;  %v96_v32 = vpack.c.bf16 %v60_v31, %v51_v30  ;;  %v1042_v34 = vadd.f32 %v61_v24, %v60_v31  ;;  %v1589_v49 = vld [vmem:[%s2201_s1 + $0x1e8] sm:$0xff]   ;;  %v108_v54 = vpack.c.bf16 %v72_v53, %v72_v53  ;;  %v2006_v30 = vld [vmem:[%s2202_s0 + $0x110] sm:$0xff] }
  0x23   :  { %723 = vmatmul.mubr.bf16.vlgmr.msra.gmra.mrb[0].mxu0 %v78_v39  ;;  %v1048_v39 = vadd.f32 %v1041_v33, %v53_v35  ;;  %v56_v35 = vld [vmem:[%s2202_s0 + $0x148] sm:$0xff] }
  0x24   :  { %787 = vmatmul.mubr.bf16.vlgmr.msra.gmra.mrb[0].mxu1 %v80_v46  ;;  %1384 = vmatpush3.bf16.msra.mxu0 %v1568_v52  ;;  %v1049_v40 = vadd.f32 %v1042_v34, %v62_v36  ;;  %v1587_v46 = vld [vmem:[%s2201_s1 + $0x168] sm:$0xff]   ;;  %v106_v52 = vpack.c.bf16 %v70_v51, %v70_v51 }
  0x25   :  { %1424 = vmatpush3.bf16.msra.mxu1 %v1570_v56  ;;  %1385 = vmatprep.subr.bf16.mxu0 %v1571_v58  ;;  %v1883_v44 = vadd.f32 %v1048_v39, %v54_v25  ;;  %v1590_v56 = vld [vmem:[%s2201_s1 + $0x1a8] sm:$0xff]   ;;  %v69_v58 = vld [vmem:[%s2202_s0 + $0x1b0] sm:$0x3]  ;;  %v46_v25 = vld [vmem:[%s2202_s0 + $0xf8] sm:$0xff] }
  0x26   :  { %1425 = vmatprep.subr.bf16.mxu1 %v1573_v60  ;;  %730 = vmatprep.mubr.bf16.mxu0 %v88_v63  ;;  %v1885_v45 = vadd.f32 %v1049_v40, %v63_v27  ;;  %v105_v60 = vpack.c.bf16 %v69_v58, %v69_v58  ;;  %v1043_v61 = vadd.f32 %v70_v51, %v69_v58  ;;  %v1591_v63 = vld [vmem:[%s2201_s1 + $0x170] sm:$0xff]   ;;  %v55_v39 = vld [vmem:[%s2202_s0 + $0x140] sm:$0xff] }
  0x27   :  { %794 = vmatprep.mubr.bf16.mxu1 %v90_v2  ;;  %v1593_v2 = vld [vmem:[%s2201_s1 + $0x1f0] sm:$0xff]   ;;  %v1061_v27 = vadd.f32 %v1836_v20, %v46_v25  ;;  %v91_v31 = vpack.c.bf16 %v46_v25, %v37_v23  ;;  %v39_v20 = vld [vmem:[%s2202_s0 + $0xc0] sm:$0xff] }
  0x28   :  { %1386 = vmatpush3.bf16.msra.mxu0 %v1572_v59  ;;  %v71_v59 = vld [vmem:[%s2202_s0 + $0x1c0] sm:$0x3]  ;;  %v73_v58 = vld [vmem:[%s2202_s0 + $0x1d0] sm:$0x3] }
  0x29   :  { %1426 = vmatpush3.bf16.msra.mxu1 %v1574_v3  ;;  %1387 = vmatprep.subr.bf16.mxu0 %v1575_v12  ;;  %v107_v62 = vpack.c.bf16 %v71_v59, %v71_v59  ;;  %v1050_v1 = vadd.f32 %v1043_v61, %v71_v59  ;;  %v1594_v3 = vld [vmem:[%s2201_s1 + $0x1b0] sm:$0xff]   ;;  %v2045_v51 = vld [vmem:[%s2202_s0 + $0x1a0] sm:$0xff]  ;;  %v66_v59 = vld [vmem:[%s2202_s0 + $0x198] sm:$0xff] }
  0x2a   :  { %1427 = vmatprep.subr.bf16.mxu1 %v1577_v16  ;;  %v2129_v25 = vld [vmem:[%s2202_s0 + $0x1f0] sm:$0x3] }
  0x2b   :  { %731 = vmatmul.mubr.bf16.gmra.mrb[4].mxu0 %v87_v9  ;;  %v1926_v5 = vadd.f32 %v1050_v1, %v72_v53  ;;  %v20_v9 = vld [vmem:[%s2202_s0 + $0x28] sm:$0xff]  ;;  %v57_v53 = vld [vmem:[%s2202_s0 + $0x150] sm:$0xff] }
  0x2c   :  { %795 = vmatmul.mubr.bf16.gmra.mrb[4].mxu1 %v89_v11  ;;  %1388 = vmatpush3.bf16.msra.mxu0 %v1576_v14  ;;  %v83_v11 = vpack.c.bf16 %v29_v10, %v20_v9  ;;  %v1943_v12 = vadd.f32 %v1775_v55, %v20_v9  ;;  %v1957_v14 = vld [vmem:[%s2202_s0 + $0x38] sm:$0xff]  ;;  %v1962_v55 = vld [vmem:[%s2202_s0 + $0x80] sm:$0xff]  ;;  %v2072_v1 = vld [vmem:[%s2202_s0 + $0x1e8] sm:$0x3] }
  0x2d   :  { %1428 = vmatpush3.bf16.msra.mxu1 %v1578_v17  ;;  %1389 = vmatprep.subr.bf16.mxu0 %v1579_v19  ;;  %v85_v16 = vpack.c.bf16 %v1962_v55, %v1957_v14  ;;  %v84_v17 = vpack.c.bf16 %v1972_v15, %v1967_v57  ;;  %v1600_v19 = vld [vmem:[%s2201_s1 + $0x208] sm:$0xff]   ;;  %v1064_v61 = vadd.f32 %v1926_v5, %v73_v58  ;;  %v2090_v9 = vld [vmem:[%s2202_s0 + $0x40] sm:$0xff] }
  0x2e   :  { %1429 = vmatprep.subr.bf16.mxu1 %v1581_v22  ;;  %738 = vmatprep.mubr.bf16.mxu0 %v97_v26  ;;  %v47_v22 = vld [vmem:[%s2202_s0 + $0x100] sm:$0xff]  ;;  %v1060_v26 = vadd.f32 %v1831_v18, %v37_v23  ;;  %v102_v5 = vpack.c.bf16 %v66_v59, %v57_v53  ;;  %v2095_v10 = vld [vmem:[%s2202_s0 + $0x88] sm:$0xff] }
  0x2f   :  { %802 = vmatprep.mubr.bf16.mxu1 %v99_v28  ;;  %v1601_v28 = vld [vmem:[%s2201_s1 + $0x210] sm:$0xff]   ;;  %v1068_v34 = vadd.f32 %v1061_v27, %v47_v22  ;;  %v1607_v27 = vld [vmem:[%s2203_s2] sm:$0xff]  }
  0x30   :  { %1390 = vmatpush3.bf16.msra.mxu0 %v1580_v21  ;;  %v38_v21 = vld [vmem:[%s2202_s0 + $0xb8] sm:$0xff] }
  0x31   :  { %1430 = vmatpush3.bf16.msra.mxu1 %v1582_v29  ;;  %1391 = vmatprep.subr.bf16.mxu0 %v1583_v38  ;;  %v92_v24 = vpack.c.bf16 %v47_v22, %v38_v21  ;;  %v2001_v29 = vld [vmem:[%s2202_s0 + $0xc8] sm:$0xff]  ;;  %v1067_v33 = vadd.f32 %v1060_v26, %v38_v21  ;;  %v65_v38 = vld [vmem:[%s2202_s0 + $0x190] sm:$0xff]  ;;  %v2115_v21 = vld [vmem:[%s2202_s0 + $0x160] sm:$0xff]  ;;  %v113_v26 = vpack.c.bf16 %v2129_v25, %v2129_v25 }
  0x32   :  { %1431 = vmatprep.subr.bf16.mxu1 %v1585_v42  ;;  %v94_v18 = vpack.c.bf16 %v2006_v30, %v2001_v29  ;;  %v101_v42 = vpack.c.bf16 %v65_v38, %v56_v35  ;;  %v2120_v22 = vld [vmem:[%s2202_s0 + $0x1a8] sm:$0xff] }
  0x33   :  { %739 = vmatmul.mubr.bf16.gmra.mrb[8].mxu0 %v96_v32  ;;  %v48_v32 = vld [vmem:[%s2202_s0 + $0x108] sm:$0xff]  ;;  %v2019_v36 = vadd.f32 %v1067_v33, %v39_v20  ;;  %v1613_v33 = vld [vmem:[%s2203_s2 + $0x30] sm:$0xff]  }
  0x34   :  { %803 = vmatmul.mubr.bf16.gmra.mrb[8].mxu1 %v98_v37  ;;  %1392 = vmatpush3.bf16.msra.mxu0 %v1584_v41  ;;  %v1602_v37 = vld [vmem:[%s2201_s1 + $0x218] sm:$0xff]   ;;  %v93_v40 = vpack.c.bf16 %v48_v32, %v39_v20  ;;  %v2030_v41 = vadd.f32 %v1068_v34, %v48_v32  ;;  %v1611_v20 = vld [vmem:[%s2203_s2 + $0x20] sm:$0xff]   ;;  %v1612_v32 = vld [vmem:[%s2203_s2 + $0x28] sm:$0xff]  }
  0x35   :  { %1432 = vmatpush3.bf16.msra.mxu1 %v1586_v43  ;;  %1393 = vmatprep.subr.bf16.mxu0 %v1587_v46  ;;  %v64_v43 = vld [vmem:[%s2202_s0 + $0x188] sm:$0xff]  ;;  %v1062_v46 = vadd.f32 %v1883_v44, %v55_v39  ;;  %v1614_v34 = vld [vmem:[%s2203_s2 + $0x38] sm:$0xff]  }
  0x36   :  { %1433 = vmatprep.subr.bf16.mxu1 %v1589_v49  ;;  %746 = vmatprep.mubr.bf16.mxu0 %v106_v52  ;;  %v2040_v49 = vld [vmem:[%s2202_s0 + $0x158] sm:$0xff]  ;;  %v1603_v52 = vld [vmem:[%s2201_s1 + $0x220] sm:$0xff]  }
  0x37   :  { %810 = vmatprep.mubr.bf16.mxu1 %v108_v54  ;;  %v103_v44 = vpack.c.bf16 %v2045_v51, %v2040_v49 }
  0x38   :  { %1394 = vmatpush3.bf16.msra.mxu0 %v1588_v48  ;;  %v1063_v48 = vadd.f32 %v1885_v45, %v64_v43  ;;  %v1069_v45 = vadd.f32 %v1062_v46, %v56_v35 }
  0x39   :  { %1434 = vmatpush3.bf16.msra.mxu1 %v1590_v56  ;;  %1395 = vmatprep.subr.bf16.mxu0 %v1591_v63  ;;  %v74_v56 = vld [vmem:[%s2202_s0 + $0x1d8] sm:$0x3] }
  0x3a   :  { %1435 = vmatprep.subr.bf16.mxu1 %v1593_v2  ;;  %v1070_v54 = vadd.f32 %v1063_v48, %v65_v38  ;;  %v1071_v2 = vadd.f32 %v1064_v61, %v74_v56 }
  0x3b   :  { %747 = vmatmul.mubr.bf16.gmra.mrb[12].mxu0 %v105_v60  ;;  %v2064_v60 = vadd.f32 %v1069_v45, %v57_v53 }
  0x3c   :  { %811 = vmatmul.mubr.bf16.gmra.mrb[12].mxu1 %v107_v62  ;;  %1396 = vmatpush3.bf16.msra.mxu0 %v1592_v0  ;;  %v100_v62 = vpack.c.bf16 %v64_v43, %v55_v39  ;;  %v2067_v63 = vadd.f32 %v1070_v54, %v66_v59  ;;  %v110_v0 = vpack.c.bf16 %v74_v56, %v74_v56 }
  0x3d   :  { %1436 = vmatpush3.bf16.msra.mxu1 %v1594_v3  ;;  %1397 = vmatprep.subr.bf16.mxu0 %v1595_v4  ;;  %v1604_v3 = vld [vmem:[%s2201_s1 + $0x228] sm:$0xff]   ;;  %v75_v4 = vld [vmem:[%s2202_s0 + $0x1e0] sm:$0x3] }
  0x3e   :  { %1437 = vmatprep.subr.bf16.mxu1 %v1597_v7  ;;  %850 = vmatprep.mubr.bf16.mxu0 %v83_v11  ;;  %v112_v7 = vpack.c.bf16 %v2072_v1, %v2072_v1  ;;  %v109_v11 = vpack.c.bf16 %v73_v58, %v73_v58 }
  0x3f   :  { %914 = vmatprep.mubr.bf16.mxu1 %v85_v16  ;;  %v111_v16 = vpack.c.bf16 %v75_v4, %v75_v4 }
  0x40   :  { %1398 = vmatpush3.bf16.msra.mxu0 %v1596_v6  ;;  %v2080_v6 = vadd.f32 %v1071_v2, %v75_v4 }
  0x41   :  { %1438 = vmatpush3.bf16.msra.mxu1 %v1598_v47  ;;  %1487 = vmatprep.subr.bf16.mxu0 %v1599_v50  ;;  %v86_v47 = vpack.c.bf16 %v2095_v10, %v2090_v9 }
  0x42   :  { %1511 = vmatprep.subr.bf16.mxu1 %v1607_v27 }
  0x43   :  { %851 = vmatmul.mubr.bf16.vlgmr.msra.gmra.mrb[16].mxu0 %v82_v8  ;;  %v1605_v8 = vld [vmem:[%s2201_s1 + $0x230] sm:$0xff]  }
  0x44   :  { %1488 = vmatpush3.bf16.msra.mxu0 %v1599_v50  ;;  %915 = vmatmul.mubr.bf16.vlgmr.msra.gmra.mrb[16].mxu1 %v84_v17  ;;  %v1606_v50 = vld [vmem:[%s2201_s1 + $0x238] sm:$0xff]   ;;  %v2105_v17 = vld [vmem:[%s2202_s0 + $0xd0] sm:$0xff] }
  0x45   :  { %1489 = vmatprep.subr.bf16.mxu0 %v1600_v19  ;;  %858 = vmatprep.mubr.bf16.mxu0 %v92_v24  ;;  %v104_v24 = vpack.c.bf16 %v2120_v22, %v2115_v21 }
  0x46   :  { %922 = vmatprep.mubr.bf16.mxu1 %v94_v18  ;;  %1512 = vmatpush3.bf16.msra.mxu1 %v1607_v27  ;;  %v1610_v18 = vld [vmem:[%s2203_s2 + $0x18] sm:$0xff]  }
  0x48   :  { %1490 = vmatpush3.bf16.msra.mxu0 %v1600_v19  ;;  %v2110_v19 = vld [vmem:[%s2202_s0 + $0x118] sm:$0xff] }
  0x49   :  { %1491 = vmatprep.subr.bf16.mxu0 %v1601_v28  ;;  %v95_v23 = vpack.c.bf16 %v2110_v19, %v2105_v17 }
  0x4b   :  { %859 = vmatmul.mubr.bf16.gmra.mrb[20].mxu0 %v91_v31  ;;  %v1609_v31 = vld [vmem:[%s2203_s2 + $0x10] sm:$0xff]  }
  0x4c   :  { %1492 = vmatpush3.bf16.msra.mxu0 %v1601_v28  ;;  %866 = vmatprep.mubr.bf16.mxu0 %v101_v42  ;;  %v1608_v28 = vld [vmem:[%s2203_s2 + $0x8] sm:$0xff]  }
  0x4d   :  { %1493 = vmatprep.subr.bf16.mxu0 %v1602_v37  ;;  %923 = vmatmul.mubr.bf16.gmra.mrb[20].mxu1 %v93_v40 }
  0x4e   :  { %930 = vmatprep.mubr.bf16.mxu1 %v103_v44  ;;  %1513 = vmatprep.subr.bf16.mxu1 %v1608_v28 }
  0x4f   :  { %1514 = vmatpush3.bf16.msra.mxu1 %v1608_v28 }
  0x50   :  { %1494 = vmatpush3.bf16.msra.mxu0 %v1602_v37  ;;  %1515 = vmatprep.subr.bf16.mxu1 %v1609_v31 }
  0x51   :  { %1495 = vmatprep.subr.bf16.mxu0 %v1603_v52 }
  0x53   :  { %867 = vmatmul.mubr.bf16.gmra.mrb[24].mxu0 %v100_v62  ;;  %1516 = vmatpush3.bf16.msra.mxu1 %v1609_v31 }
  0x54   :  { %1496 = vmatpush3.bf16.msra.mxu0 %v1603_v52  ;;  %874 = vmatprep.mubr.bf16.mxu0 %v110_v0 }
  0x55   :  { %1497 = vmatprep.subr.bf16.mxu0 %v1604_v3  ;;  %931 = vmatmul.mubr.bf16.gmra.mrb[24].mxu1 %v102_v5 }
  0x56   :  { %938 = vmatprep.mubr.bf16.mxu1 %v112_v7  ;;  %1517 = vmatprep.subr.bf16.mxu1 %v1610_v18 }
  0x57   :  { %1518 = vmatpush3.bf16.msra.mxu1 %v1610_v18 }
  0x58   :  { %1498 = vmatpush3.bf16.msra.mxu0 %v1604_v3  ;;  %1519 = vmatprep.subr.bf16.mxu1 %v1611_v20 }
  0x59   :  { %1499 = vmatprep.subr.bf16.mxu0 %v1605_v8 }
  0x5b   :  { %875 = vmatmul.mubr.bf16.gmra.mrb[28].mxu0 %v109_v11  ;;  %1520 = vmatpush3.bf16.msra.mxu1 %v1611_v20 }
  0x5c   :  { %1500 = vmatpush3.bf16.msra.mxu0 %v1605_v8  ;;  %1503 = vmatprep.mubr.bf16.mxu0 %v86_v47 }
  0x5d   :  { %1501 = vmatprep.subr.bf16.mxu0 %v1606_v50  ;;  %939 = vmatmul.mubr.bf16.gmra.mrb[28].mxu1 %v111_v16 }
  0x5e   :  { %1521 = vmatprep.subr.bf16.mxu1 %v1612_v32 }
  0x5f   :  { %1522 = vmatpush3.bf16.msra.mxu1 %v1612_v32 }
  0x60   :  { %1502 = vmatpush3.bf16.msra.mxu0 %v1606_v50  ;;  %1523 = vmatprep.subr.bf16.mxu1 %v1613_v33 }
  0x63   :  { %1504 = vmatmul.mubr.bf16.vlgmr.msra.gmra.mrb[32].mxu0 %v95_v23  ;;  %1524 = vmatpush3.bf16.msra.mxu1 %v1613_v33 }
  0x64   :  { %1507 = vmatprep.mubr.bf16.mxu0 %v104_v24  ;;  %1525 = vmatprep.subr.bf16.mxu1 %v1614_v34 }
  0x67   :  { %1526 = vmatpush3.bf16.msra.mxu1 %v1614_v34 }
  0x6b   :  { %1508 = vmatmul.mubr.bf16.gmra.mrb[36].mxu0 %v113_v26 }
  0xf6   :  { %v1319_v35 = vpop.f32.mrb[0].mxu0 }
  0xf7   :  { %v1359_v37 = vpop.f32.mrb[0].mxu1  ;;  %v1320_v38 = vpop.f32.mrb[1].mxu0 }
  0xf8   :  { %v1321_v39 = vadd.f32 %v1320_v38, %v1319_v35  ;;  %v1360_v40 = vpop.f32.mrb[1].mxu1  ;;  %v1322_v42 = vpop.f32.mrb[2].mxu0 }
  0xf9   :  { %v1361_v43 = vadd.f32 %v1360_v40, %v1359_v37  ;;  %v1362_v46 = vpop.f32.mrb[2].mxu1  ;;  %v1323_v48 = vpop.f32.mrb[3].mxu0 }
  0xfa   :  { %v1324_v52 = vadd.f32 %v1323_v48, %v1322_v42  ;;  %v1363_v44 = vpop.f32.mrb[3].mxu1 }
  0xfb   :  { %v789_v45 = vadd.f32 %v1361_v43, %v1321_v39  ;;  %v1364_v53 = vadd.f32 %v1363_v44, %v1362_v46 }
  0xfd   :  { %v792_v54 = vadd.f32 %v1364_v53, %v1324_v52 }
  0xfe   :  { %v1325_v56 = vpop.f32.mrb[4].mxu0 }
  0xff   :  { %v1365_v58 = vpop.f32.mrb[4].mxu1  ;;  %v1326_v59 = vpop.f32.mrb[5].mxu0 }
 0x100   :  { %v1366_v61 = vpop.f32.mrb[5].mxu1  ;;  %v1327_v62 = vadd.f32 %v1326_v59, %v1325_v56  ;;  %v1328_v2 = vpop.f32.mrb[6].mxu0 }
 0x101   :  { %v1367_v0 = vadd.f32 %v1366_v61, %v1365_v58  ;;  %v1368_v3 = vpop.f32.mrb[6].mxu1  ;;  %v1329_v4 = vpop.f32.mrb[7].mxu0 }
 0x102   :  { %v1369_v5 = vpop.f32.mrb[7].mxu1  ;;  %v1330_v8 = vadd.f32 %v1329_v4, %v1328_v2 }
 0x103   :  { %v797_v7 = vadd.f32 %v1367_v0, %v1327_v62  ;;  %v1370_v11 = vadd.f32 %v1369_v5, %v1368_v3 }
 0x105   :  { %v800_v47 = vadd.f32 %v1370_v11, %v1330_v8 }
 0x106   :  { %v1331_v50 = vpop.f32.mrb[8].mxu0 }
 0x107   :  { %v1371_v16 = vpop.f32.mrb[8].mxu1  ;;  %v1332_v23 = vpop.f32.mrb[9].mxu0 }
 0x108   :  { %v1333_v24 = vadd.f32 %v1332_v23, %v1331_v50  ;;  %v1372_v26 = vpop.f32.mrb[9].mxu1  ;;  %v1334_v27 = vpop.f32.mrb[10].mxu0 }
 0x109   :  { %v1373_v28 = vadd.f32 %v1372_v26, %v1371_v16  ;;  %v1374_v31 = vpop.f32.mrb[10].mxu1  ;;  %v1335_v18 = vpop.f32.mrb[11].mxu0 }
 0x10a   :  { %v1336_v20 = vadd.f32 %v1335_v18, %v1334_v27  ;;  %v1375_v32 = vpop.f32.mrb[11].mxu1 }
 0x10b   :  { %v805_v33 = vadd.f32 %v1373_v28, %v1333_v24  ;;  %v1376_v34 = vadd.f32 %v1375_v32, %v1374_v31 }
 0x10d   :  { %v808_v35 = vadd.f32 %v1376_v34, %v1336_v20 }
 0x10e   :  { %v1337_v37 = vpop.f32.mrb[12].mxu0 }
 0x10f   :  { %v1377_v38 = vpop.f32.mrb[12].mxu1  ;;  %v1338_v39 = vpop.f32.mrb[13].mxu0 }
 0x110   :  { %v1378_v40 = vpop.f32.mrb[13].mxu1  ;;  %v1339_v42 = vadd.f32 %v1338_v39, %v1337_v37  ;;  %v1340_v46 = vpop.f32.mrb[14].mxu0 }
 0x111   :  { %v1379_v43 = vadd.f32 %v1378_v40, %v1377_v38  ;;  %v1380_v48 = vpop.f32.mrb[14].mxu1  ;;  %v1341_v52 = vpop.f32.mrb[15].mxu0 }
 0x112   :  { %v1381_v44 = vpop.f32.mrb[15].mxu1 }
 0x113   :  { %v813_v53 = vadd.f32 %v1379_v43, %v1339_v42 }
 0x116   :  { %v1399_v56 = vpop.f32.mrb[16].mxu0 }
 0x117   :  { %v1400_v58 = vpop.f32.mrb[17].mxu0  ;;  %v1439_v62 = vpop.f32.mrb[16].mxu1 }
 0x118   :  { %v1401_v59 = vadd.f32 %v1400_v58, %v1399_v56  ;;  %v1402_v61 = vpop.f32.mrb[18].mxu0  ;;  %v1440_v4 = vpop.f32.mrb[17].mxu1 }
 0x119   :  { %v1403_v0 = vpop.f32.mrb[19].mxu0  ;;  %v1441_v5 = vadd.f32 %v1440_v4, %v1439_v62  ;;  %v1442_v8 = vpop.f32.mrb[18].mxu1 }
 0x11a   :  { %v853_v2 = vadd.f32 %v1401_v59, %v789_v45  ;;  %v1404_v3 = vadd.f32 %v1403_v0, %v1402_v61  ;;  %v1443_v50 = vpop.f32.mrb[19].mxu1 }
 0x11b   :  { %v1444_v16 = vadd.f32 %v1443_v50, %v1442_v8 }
 0x11c   :  { %v856_v11 = vadd.f32 %v1404_v3, %v792_v54  ;;  %v917_v23 = vadd.f32 %v1441_v5, %v853_v2 }
 0x11e   :  { %v1405_v24 = vpop.f32.mrb[20].mxu0  ;;  %v920_v27 = vadd.f32 %v1444_v16, %v856_v11 }
 0x11f   :  { %v1406_v26 = vpop.f32.mrb[21].mxu0 }
 0x120   :  { %v1407_v28 = vadd.f32 %v1406_v26, %v1405_v24  ;;  %v1408_v31 = vpop.f32.mrb[22].mxu0  ;;  %v1445_v18 = vpop.f32.mrb[20].mxu1 }
 0x121   :  { %v1409_v20 = vpop.f32.mrb[23].mxu0  ;;  %v1446_v37 = vpop.f32.mrb[21].mxu1 }
 0x122   :  { %v861_v32 = vadd.f32 %v1407_v28, %v797_v7  ;;  %v1410_v34 = vadd.f32 %v1409_v20, %v1408_v31  ;;  %v1447_v38 = vadd.f32 %v1446_v37, %v1445_v18  ;;  %v1448_v45 = vpop.f32.mrb[22].mxu1 }
 0x123   :  { %v1449_v40 = vpop.f32.mrb[23].mxu1 }
 0x124   :  { %v864_v39 = vadd.f32 %v1410_v34, %v800_v47  ;;  %v1450_v42 = vadd.f32 %v1449_v40, %v1448_v45  ;;  %v925_v43 = vadd.f32 %v1447_v38, %v861_v32 }
 0x126   :  { %v1411_v54 = vpop.f32.mrb[24].mxu0  ;;  %v928_v48 = vadd.f32 %v1450_v42, %v864_v39 }
 0x127   :  { %v1412_v46 = vpop.f32.mrb[25].mxu0 }
 0x128   :  { %v1413_v52 = vadd.f32 %v1412_v46, %v1411_v54  ;;  %v1414_v44 = vpop.f32.mrb[26].mxu0  ;;  %v1451_v56 = vpop.f32.mrb[24].mxu1 }
 0x129   :  { %v1415_v58 = vpop.f32.mrb[27].mxu0  ;;  %v1452_v62 = vpop.f32.mrb[25].mxu1 }
 0x12a   :  { %v869_v59 = vadd.f32 %v1413_v52, %v805_v33  ;;  %v1416_v61 = vadd.f32 %v1415_v58, %v1414_v44  ;;  %v1453_v0 = vadd.f32 %v1452_v62, %v1451_v56  ;;  %v1454_v7 = vpop.f32.mrb[26].mxu1 }
 0x12b   :  { %v1455_v3 = vpop.f32.mrb[27].mxu1 }
 0x12c   :  { %v872_v2 = vadd.f32 %v1416_v61, %v808_v35  ;;  %v1456_v4 = vadd.f32 %v1455_v3, %v1454_v7  ;;  %v933_v5 = vadd.f32 %v1453_v0, %v869_v59 }
 0x12e   :  { %v1417_v47 = vpop.f32.mrb[28].mxu0  ;;  %v936_v11 = vadd.f32 %v1456_v4, %v872_v2  ;;  %v1072_v4 = vadd.f32 %v1943_v12, %v1967_v57 }
 0x12f   :  { %v1418_v8 = vpop.f32.mrb[29].mxu0 }
 0x130   :  { %v1419_v50 = vadd.f32 %v1418_v8, %v1417_v47  ;;  %v1420_v16 = vpop.f32.mrb[30].mxu0  ;;  %v1457_v24 = vpop.f32.mrb[28].mxu1  ;;  %v1073_v47 = vadd.f32 %v1946_v13, %v1972_v15  ;;  %v1079_v8 = vadd.f32 %v1072_v4, %v1957_v14  ;;  %v1085_v13 = vadd.f32 %v2080_v6, %v2072_v1 }
 0x131   :  { %v1421_v26 = vpop.f32.mrb[31].mxu0  ;;  %v1458_v31 = vpop.f32.mrb[29].mxu1  ;;  %v1083_v14 = vadd.f32 %v2064_v60, %v2040_v49 }
 0x132   :  { %v877_v28 = vadd.f32 %v1419_v50, %v813_v53  ;;  %v1459_v18 = vadd.f32 %v1458_v31, %v1457_v24  ;;  %v1460_v20 = vpop.f32.mrb[30].mxu1  ;;  %v1080_v50 = vadd.f32 %v1073_v47, %v1962_v55  ;;  %v1086_v24 = vadd.f32 %v1079_v8, %v2090_v9 }
 0x133   :  { %v1461_v33 = vpop.f32.mrb[31].mxu1  ;;  %v1084_v55 = vadd.f32 %v2067_v63, %v2045_v51 }
 0x134   :  { %v941_v32 = vadd.f32 %v1459_v18, %v877_v28  ;;  %v1087_v12 = vadd.f32 %v1080_v50, %v2095_v10  ;;  %v1093_v15 = vmul.f32 0.11111111, %v1086_v24  ;;  %v1090_v28 = vadd.f32 %v1083_v14, %v2115_v21 }
 0x135   :  { %v1091_v51 = vadd.f32 %v1084_v55, %v2120_v22 }
 0x136   :  { %v1505_v34 = vpop.f32.mrb[32].mxu0  ;;  %v1097_v6 = vmul.f32 0.11111111, %v1090_v28 }
 0x137   :  { %v989_v37 = vadd.f32 %v1505_v34, %v925_v43  ;;  %v980_v38 = vpop.f32.mrb[33].mxu0 }
 0x138   :  { %v981_v35 = vadd.f32 %v980_v38, %v917_v23  ;;  %v1506_v45 = vpop.f32.mrb[34].mxu0 }
 0x139   :  { %v992_v39 = vadd.f32 %v1506_v45, %v928_v48  ;;  %v983_v40 = vpop.f32.mrb[35].mxu0  ;;  %v1012_v54 = vmax.f32 %v989_v37, 0.0 }
 0x13a   :  { %v984_v42 = vadd.f32 %v983_v40, %v920_v27  ;;  %v1010_v52 = vmax.f32 %v981_v35, 0.0 }
 0x13b   :  { %v1013_v46 = vmax.f32 %v992_v39, 0.0 }
 0x13c   :  { %v1011_v44 = vmax.f32 %v984_v42, 0.0 }
 0x13d   :  { %v1018_v56 = vpack.c.bf16 %v1013_v46, %v1012_v54 }
 0x13e   :  { %v1017_v58 = vpack.c.bf16 %v1011_v44, %v1010_v52  ;;  %v1509_v53 = vpop.f32.mrb[36].mxu0 }
 0x13f   :  { %v1005_v59 = vadd.f32 %v1509_v53, %v941_v32  ;;  %v996_v61 = vpop.f32.mrb[37].mxu0 }
 0x140   :  { %v997_v62 = vadd.f32 %v996_v61, %v933_v5  ;;  %v1510_v0 = vpop.f32.mrb[38].mxu0  ;;  %1527 = vmatprep.mubr.bf16.mxu1 %v1017_v58  ;;  %v1081_v5 = vadd.f32 %v2019_v36, %v2001_v29  ;;  %v1094_v36 = vmul.f32 0.11111111, %v1087_v12 }
 0x141   :  { %v999_v7 = vpop.f32.mrb[39].mxu0  ;;  %1528 = vmatmul.mubr.bf16.vlgmr.msra.gmra.mrb[32].mxu1 %v1018_v56  ;;  %v1016_v23 = vmax.f32 %v1005_v59, 0.0 }
 0x142   :  { %v1000_v43 = vadd.f32 %v999_v7, %v936_v11  ;;  %v1014_v2 = vmax.f32 %v997_v62, 0.0  ;;  %v1082_v11 = vadd.f32 %v2030_v41, %v2006_v30  ;;  %v1088_v16 = vadd.f32 %v1081_v5, %v2105_v17 }
 0x143   :  { %v1020_v27 = vpack.c.bf16 %v1016_v23, %v1016_v23  ;;  %v1092_v17 = vadd.f32 %v1085_v13, %v2129_v25  ;;  %v1098_v25 = vmul.f32 0.11111111, %v1091_v51 }
 0x144   :  { %v1015_v48 = vmax.f32 %v1000_v43, 0.0  ;;  %v1089_v26 = vadd.f32 %v1082_v11, %v2110_v19  ;;  %v1095_v57 = vmul.f32 0.11111111, %v1088_v16 }
 0x145   :  { %v1099_v63 = vmul.f32 0.11111111, %v1092_v17 }
 0x146   :  { %v1019_v3 = vpack.c.bf16 %v1015_v48, %v1014_v2  ;;  %v1096_v29 = vmul.f32 0.11111111, %v1089_v26 }
 0x148   :  { %1531 = vmatprep.mubr.bf16.mxu1 %v1019_v3 }
 0x149   :  { %1532 = vmatmul.mubr.bf16.gmra.mrb[36].mxu1 %v1020_v27 }
 0x214   :  { %v1529_v30 = vpop.f32.mrb[32].mxu1 }
 0x215   :  { %v1191_v41 = vadd.f32 %v1529_v30, %v1095_v57  ;;  %v1182_v9 = vpop.f32.mrb[33].mxu1 }
 0x216   :  { %v1183_v19 = vadd.f32 %v1182_v9, %v1093_v15  ;;  %v1530_v10 = vpop.f32.mrb[34].mxu1 }
 0x217   :  { %1214 = vst [vmem:[%s2204_s3 + $0x10] sm:$0xff] %v1191_v41  ;;  %v1194_v1 = vadd.f32 %v1530_v10, %v1096_v29  ;;  %v1185_v49 = vpop.f32.mrb[35].mxu1 }
 0x218   :  { %1212 = vst [vmem:[%s2204_s3] sm:$0xff] %v1183_v19  ;;  %v1186_v60 = vadd.f32 %v1185_v49, %v1094_v36 }
 0x219   :  { %1215 = vst [vmem:[%s2204_s3 + $0x18] sm:$0xff] %v1194_v1 }
 0x21a   :  { %1213 = vst [vmem:[%s2204_s3 + $0x8] sm:$0xff] %v1186_v60 }
 0x21c   :  { %v1533_v21 = vpop.f32.mrb[36].mxu1 }
 0x21d   :  { %v1207_v31 = vadd.f32 %v1533_v21, %v1099_v63  ;;  %v1198_v18 = vpop.f32.mrb[37].mxu1 }
 0x21e   :  { %v1199_v20 = vadd.f32 %v1198_v18, %v1097_v6  ;;  %v1534_v33 = vpop.f32.mrb[38].mxu1 }
 0x21f   :  { %1218 = vst [vmem:[%s2204_s3 + $0x30] sm:$0x3] %v1207_v31  ;;  %v1201_v22 = vpop.f32.mrb[39].mxu1 }
 0x220   :  { %1216 = vst [vmem:[%s2204_s3 + $0x20] sm:$0xff] %v1199_v20  ;;  %v1202_v32 = vadd.f32 %v1201_v22, %v1098_v25 }
 0x222   :  { %1217 = vst [vmem:[%s2204_s3 + $0x28] sm:$0xff] %v1202_v32 }

// kernel: amdim_forward.33
= control target key start
LH: loop header
LB: loop body
LE: loop exit
PB: predicated region body
PF: predicated region fallthrough
CT: control target
= control target key end

     0   :  { %s434_s1 = inlined_call_operand.vmem [shape: bf16[128,128], index: 1, kind: input, shape index: {}]   ;;  %s435_s2 = inlined_call_operand.vmem [shape: bf16[128,128], index: 2, kind: input, shape index: {}]   ;;  %s436_s0 = inlined_call_operand.vmem [shape: f32[18,128], index: 0, kind: input, shape index: {}]   ;;  %s437_s3 = inlined_call_operand.vmem [shape: f32[18,128], index: 3, kind: output, shape index: {}]  }
   0x1   :  { %v332_v0 = vld [vmem:[%s434_s1] sm:$0xff]   ;;  %v333_v1 = vld [vmem:[%s434_s1 + $0x8] sm:$0xff]   ;;  %v334_v2 = vld [vmem:[%s434_s1 + $0x10] sm:$0xff]  }
   0x2   :  { %292 = vmatprep.subr.bf16.mxu0 %v332_v0  ;;  %v335_v3 = vld [vmem:[%s434_s1 + $0x18] sm:$0xff]   ;;  %v340_v4 = vld [vmem:[%s435_s2] sm:$0xff]   ;;  %v341_v5 = vld [vmem:[%s435_s2 + $0x8] sm:$0xff]  }
   0x3   :  { %293 = vmatpush3.bf16.msra.mxu0 %v332_v0  ;;  %312 = vmatprep.subr.bf16.mxu1 %v340_v4  ;;  %v336_v6 = vld [vmem:[%s434_s1 + $0x20] sm:$0xff]   ;;  %v342_v7 = vld [vmem:[%s435_s2 + $0x10] sm:$0xff]   ;;  %v337_v8 = vld [vmem:[%s434_s1 + $0x28] sm:$0xff]  }
   0x4   :  { %294 = vmatprep.subr.bf16.mxu0 %v333_v1  ;;  %313 = vmatpush3.bf16.msra.mxu1 %v340_v4  ;;  %v343_v9 = vld [vmem:[%s435_s2 + $0x18] sm:$0xff]   ;;  %v338_v10 = vld [vmem:[%s434_s1 + $0x30] sm:$0xff]   ;;  %v344_v11 = vld [vmem:[%s435_s2 + $0x20] sm:$0xff]  }
   0x5   :  { %314 = vmatprep.subr.bf16.mxu1 %v341_v5  ;;  %v339_v12 = vld [vmem:[%s434_s1 + $0x38] sm:$0xff]   ;;  %v345_v13 = vld [vmem:[%s435_s2 + $0x28] sm:$0xff]   ;;  %v17_v14 = vld [vmem:[%s436_s0 + $0x10] sm:$0x3] }
   0x6   :  { %v19_v15 = vpack.c.bf16 %v17_v14, %v17_v14  ;;  %v346_v16 = vld [vmem:[%s435_s2 + $0x30] sm:$0xff]   ;;  %v347_v17 = vld [vmem:[%s435_s2 + $0x38] sm:$0xff]   ;;  %v15_v27 = vld [vmem:[%s436_s0] sm:$0xff] }
   0x7   :  { %295 = vmatpush3.bf16.msra.mxu0 %v333_v1  ;;  %v16_v28 = vld [vmem:[%s436_s0 + $0x8] sm:$0xff] }
   0x8   :  { %296 = vmatprep.subr.bf16.mxu0 %v334_v2  ;;  %315 = vmatpush3.bf16.msra.mxu1 %v341_v5  ;;  %v18_v29 = vpack.c.bf16 %v16_v28, %v15_v27 }
   0x9   :  { %316 = vmatprep.subr.bf16.mxu1 %v342_v7 }
   0xb   :  { %297 = vmatpush3.bf16.msra.mxu0 %v334_v2 }
   0xc   :  { %298 = vmatprep.subr.bf16.mxu0 %v335_v3  ;;  %317 = vmatpush3.bf16.msra.mxu1 %v342_v7 }
   0xd   :  { %318 = vmatprep.subr.bf16.mxu1 %v343_v9 }
   0xf   :  { %299 = vmatpush3.bf16.msra.mxu0 %v335_v3 }
  0x10   :  { %300 = vmatprep.subr.bf16.mxu0 %v336_v6  ;;  %319 = vmatpush3.bf16.msra.mxu1 %v343_v9 }
  0x11   :  { %320 = vmatprep.subr.bf16.mxu1 %v344_v11 }
  0x13   :  { %301 = vmatpush3.bf16.msra.mxu0 %v336_v6 }
  0x14   :  { %302 = vmatprep.subr.bf16.mxu0 %v337_v8  ;;  %321 = vmatpush3.bf16.msra.mxu1 %v344_v11 }
  0x15   :  { %322 = vmatprep.subr.bf16.mxu1 %v345_v13 }
  0x17   :  { %303 = vmatpush3.bf16.msra.mxu0 %v337_v8 }
  0x18   :  { %304 = vmatprep.subr.bf16.mxu0 %v338_v10  ;;  %323 = vmatpush3.bf16.msra.mxu1 %v345_v13 }
  0x19   :  { %324 = vmatprep.subr.bf16.mxu1 %v346_v16 }
  0x1b   :  { %305 = vmatpush3.bf16.msra.mxu0 %v338_v10 }
  0x1c   :  { %306 = vmatprep.subr.bf16.mxu0 %v339_v12  ;;  %325 = vmatpush3.bf16.msra.mxu1 %v346_v16 }
  0x1d   :  { %326 = vmatprep.subr.bf16.mxu1 %v347_v17 }
  0x1f   :  { %307 = vmatpush3.bf16.msra.mxu0 %v339_v12 }
  0x20   :  { %327 = vmatpush3.bf16.msra.mxu1 %v347_v17 }
  0x22   :  { %309 = vmatmul.mubr.bf16.vlgmr.msra.gmra.mrb[0].mxu0 %v19_v15 }
  0x23   :  { %308 = vmatprep.mubr.bf16.mxu0 %v18_v29 }
  0xf5   :  { %v310_v18 = vpop.f32.mrb[0].mxu0 }
  0xf6   :  { %v118_v19 = vpop.f32.mrb[1].mxu0  ;;  %v134_v21 = vmax.f32 %v310_v18, 0.0 }
  0xf7   :  { %v311_v20 = vpop.f32.mrb[2].mxu0  ;;  %v132_v23 = vmax.f32 %v118_v19, 0.0 }
  0xf8   :  { %v121_v22 = vpop.f32.mrb[3].mxu0  ;;  %v136_v26 = vpack.c.bf16 %v134_v21, %v134_v21 }
  0xf9   :  { %v133_v24 = vmax.f32 %v121_v22, 0.0 }
  0xfb   :  { %v135_v25 = vpack.c.bf16 %v133_v24, %v132_v23 }
  0xfd   :  { %328 = vmatprep.mubr.bf16.mxu1 %v135_v25 }
  0xfe   :  { %329 = vmatmul.mubr.bf16.vlgmr.msra.gmra.mrb[0].mxu1 %v136_v26 }
 0x1d1   :  { %v330_v30 = vpop.f32.mrb[0].mxu1 }
 0x1d2   :  { %v244_v31 = vadd.f32 %v330_v30, %v17_v14  ;;  %v235_v32 = vpop.f32.mrb[1].mxu1 }
 0x1d3   :  { %v236_v33 = vadd.f32 %v235_v32, %v15_v27  ;;  %v331_v34 = vpop.f32.mrb[2].mxu1 }
 0x1d4   :  { %251 = vst [vmem:[%s437_s3 + $0x10] sm:$0x3] %v244_v31  ;;  %v238_v35 = vpop.f32.mrb[3].mxu1 }
 0x1d5   :  { %249 = vst [vmem:[%s437_s3] sm:$0xff] %v236_v33  ;;  %v239_v36 = vadd.f32 %v238_v35, %v16_v28 }
 0x1d7   :  { %250 = vst [vmem:[%s437_s3 + $0x8] sm:$0xff] %v239_v36 }

// kernel: amdim_forward.32
= control target key start
LH: loop header
LB: loop body
LE: loop exit
PB: predicated region body
PF: predicated region fallthrough
CT: control target
= control target key end

     0   :  { %s1766_s1 = inlined_call_operand.vmem [shape: bf16[1152,128], index: 1, kind: input, shape index: {}]   ;;  %s1767_s0 = inlined_call_operand.vmem [shape: f32[18,1152], index: 0, kind: input, shape index: {}]   ;;  %s1768_s2 = inlined_call_operand.vmem [shape: bf16[128,128], index: 2, kind: input, shape index: {}]   ;;  %s1769_s3 = inlined_call_operand.vmem [shape: f32[18,128], index: 3, kind: output, shape index: {}]  }
   0x1   :  { %v1279_v0 = vld [vmem:[%s1766_s1 + $0x40] sm:$0xff]   ;;  %v1283_v4 = vld [vmem:[%s1766_s1 + $0x48] sm:$0xff]   ;;  %v1287_v8 = vld [vmem:[%s1766_s1 + $0x50] sm:$0xff]  }
   0x2   :  { %v1280_v1 = vld [vmem:[%s1766_s1 + $0xc0] sm:$0xff]   ;;  %1107 = vmatprep.subr.bf16.mxu0 %v1279_v0  ;;  %v1284_v5 = vld [vmem:[%s1766_s1 + $0xc8] sm:$0xff]   ;;  %v1288_v9 = vld [vmem:[%s1766_s1 + $0xd0] sm:$0xff]  }
   0x3   :  { %v1281_v2 = vld [vmem:[%s1766_s1] sm:$0xff]   ;;  %1135 = vmatprep.subr.bf16.mxu1 %v1280_v1  ;;  %v1285_v6 = vld [vmem:[%s1766_s1 + $0x8] sm:$0xff]   ;;  %v1289_v10 = vld [vmem:[%s1766_s1 + $0x10] sm:$0xff]  }
   0x4   :  { %v1282_v3 = vld [vmem:[%s1766_s1 + $0x80] sm:$0xff]   ;;  %1108 = vmatpush3.bf16.msra.mxu0 %v1281_v2  ;;  %v1286_v7 = vld [vmem:[%s1766_s1 + $0x88] sm:$0xff]   ;;  %v1290_v11 = vld [vmem:[%s1766_s1 + $0x90] sm:$0xff]  }
   0x5   :  { %1136 = vmatpush3.bf16.msra.mxu1 %v1282_v3  ;;  %1109 = vmatprep.subr.bf16.mxu0 %v1283_v4  ;;  %v1291_v12 = vld [vmem:[%s1766_s1 + $0x58] sm:$0xff]   ;;  %v1295_v16 = vld [vmem:[%s1766_s1 + $0x60] sm:$0xff]   ;;  %v1299_v20 = vld [vmem:[%s1766_s1 + $0x68] sm:$0xff]  }
   0x6   :  { %1137 = vmatprep.subr.bf16.mxu1 %v1284_v5  ;;  %v1292_v13 = vld [vmem:[%s1766_s1 + $0xd8] sm:$0xff]   ;;  %v1296_v17 = vld [vmem:[%s1766_s1 + $0xe0] sm:$0xff]   ;;  %v1300_v21 = vld [vmem:[%s1766_s1 + $0xe8] sm:$0xff]  }
   0x7   :  { %v1293_v14 = vld [vmem:[%s1766_s1 + $0x18] sm:$0xff]   ;;  %v1297_v18 = vld [vmem:[%s1766_s1 + $0x20] sm:$0xff]   ;;  %v1301_v22 = vld [vmem:[%s1766_s1 + $0x28] sm:$0xff]  }
   0x8   :  { %1110 = vmatpush3.bf16.msra.mxu0 %v1285_v6  ;;  %v1294_v15 = vld [vmem:[%s1766_s1 + $0x98] sm:$0xff]   ;;  %v1298_v19 = vld [vmem:[%s1766_s1 + $0xa0] sm:$0xff]   ;;  %v1302_v23 = vld [vmem:[%s1766_s1 + $0xa8] sm:$0xff]  }
   0x9   :  { %1138 = vmatpush3.bf16.msra.mxu1 %v1286_v7  ;;  %1111 = vmatprep.subr.bf16.mxu0 %v1287_v8  ;;  %v1303_v24 = vld [vmem:[%s1766_s1 + $0x70] sm:$0xff]   ;;  %v1307_v28 = vld [vmem:[%s1766_s1 + $0x78] sm:$0xff]   ;;  %v15_v32 = vld [vmem:[%s1767_s0] sm:$0xff] }
   0xa   :  { %1139 = vmatprep.subr.bf16.mxu1 %v1288_v9  ;;  %v1304_v25 = vld [vmem:[%s1766_s1 + $0xf0] sm:$0xff]   ;;  %v1308_v29 = vld [vmem:[%s1766_s1 + $0xf8] sm:$0xff]   ;;  %v16_v33 = vld [vmem:[%s1767_s0 + $0x8] sm:$0xff] }
   0xb   :  { %v1305_v26 = vld [vmem:[%s1766_s1 + $0x30] sm:$0xff]   ;;  %v1309_v30 = vld [vmem:[%s1766_s1 + $0x38] sm:$0xff]   ;;  %v24_v34 = vld [vmem:[%s1767_s0 + $0x48] sm:$0xff]  ;;  %v897_v36 = vadd.f32 %v16_v33, %v15_v32 }
   0xc   :  { %1112 = vmatpush3.bf16.msra.mxu0 %v1289_v10  ;;  %v1306_v27 = vld [vmem:[%s1766_s1 + $0xb0] sm:$0xff]   ;;  %v1310_v31 = vld [vmem:[%s1766_s1 + $0xb8] sm:$0xff]   ;;  %v42_v39 = vpack.c.bf16 %v24_v34, %v15_v32  ;;  %v27_v43 = vld [vmem:[%s1767_s0 + $0x60] sm:$0xff] }
   0xd   :  { %1140 = vmatpush3.bf16.msra.mxu1 %v1290_v11  ;;  %1113 = vmatprep.subr.bf16.mxu0 %v1291_v12  ;;  %v25_v35 = vld [vmem:[%s1767_s0 + $0x50] sm:$0xff]  ;;  %v18_v38 = vld [vmem:[%s1767_s0 + $0x18] sm:$0xff]  ;;  %v1502_v47 = vld [vmem:[%s1767_s0 + $0x20] sm:$0xff] }
   0xe   :  { %1141 = vmatprep.subr.bf16.mxu1 %v1292_v13  ;;  %v17_v37 = vld [vmem:[%s1767_s0 + $0x10] sm:$0xff]  ;;  %v43_v40 = vpack.c.bf16 %v25_v35, %v16_v33  ;;  %v898_v41 = vadd.f32 %v25_v35, %v24_v34  ;;  %v26_v42 = vld [vmem:[%s1767_s0 + $0x58] sm:$0xff]  ;;  %v45_v44 = vpack.c.bf16 %v27_v43, %v18_v38  ;;  %v1311_v49 = vld [vmem:[%s1766_s1 + $0x140] sm:$0xff]  }
   0xf   :  { %v900_v45 = vadd.f32 %v897_v36, %v17_v37  ;;  %v44_v46 = vpack.c.bf16 %v26_v42, %v17_v37  ;;  %v1510_v50 = vld [vmem:[%s1767_s0 + $0x68] sm:$0xff]  ;;  %v1312_v52 = vld [vmem:[%s1766_s1 + $0x100] sm:$0xff]   ;;  %v1319_v62 = vld [vmem:[%s1766_s1 + $0x150] sm:$0xff]  }
  0x10   :  { %1114 = vmatpush3.bf16.msra.mxu0 %v1293_v14  ;;  %668 = vmatprep.mubr.bf16.mxu0 %v43_v40  ;;  %v901_v48 = vadd.f32 %v898_v41, %v26_v42  ;;  %v1313_v54 = vld [vmem:[%s1766_s1 + $0x1c0] sm:$0xff]   ;;  %v1315_v58 = vld [vmem:[%s1766_s1 + $0x148] sm:$0xff]   ;;  %v1320_v63 = vld [vmem:[%s1766_s1 + $0x110] sm:$0xff]   ;;  %v46_v33 = vpack.c.bf16 %v1510_v50, %v1502_v47 }
  0x11   :  { %1142 = vmatpush3.bf16.msra.mxu1 %v1294_v15  ;;  %1115 = vmatprep.subr.bf16.mxu0 %v1295_v16  ;;  %v903_v51 = vadd.f32 %v900_v45, %v18_v38  ;;  %v1314_v56 = vld [vmem:[%s1766_s1 + $0x180] sm:$0xff]   ;;  %v1316_v59 = vld [vmem:[%s1766_s1 + $0x108] sm:$0xff]   ;;  %v1321_v0 = vld [vmem:[%s1766_s1 + $0x1d0] sm:$0xff]  }
  0x12   :  { %1143 = vmatprep.subr.bf16.mxu1 %v1296_v17  ;;  %716 = vmatprep.mubr.bf16.mxu1 %v45_v44  ;;  %v904_v53 = vadd.f32 %v901_v48, %v27_v43  ;;  %v1317_v60 = vld [vmem:[%s1766_s1 + $0x1c8] sm:$0xff]   ;;  %v1322_v1 = vld [vmem:[%s1766_s1 + $0x190] sm:$0xff]   ;;  %v1323_v2 = vld [vmem:[%s1766_s1 + $0x158] sm:$0xff]  }
  0x13   :  { %v1519_v55 = vadd.f32 %v903_v51, %v1502_v47  ;;  %v1318_v61 = vld [vmem:[%s1766_s1 + $0x188] sm:$0xff]   ;;  %v1324_v3 = vld [vmem:[%s1766_s1 + $0x118] sm:$0xff]   ;;  %v1327_v6 = vld [vmem:[%s1766_s1 + $0x160] sm:$0xff]  }
  0x14   :  { %1116 = vmatpush3.bf16.msra.mxu0 %v1297_v18  ;;  %v1525_v57 = vadd.f32 %v904_v53, %v1510_v50  ;;  %v1325_v4 = vld [vmem:[%s1766_s1 + $0x1d8] sm:$0xff]   ;;  %v1328_v7 = vld [vmem:[%s1766_s1 + $0x120] sm:$0xff]   ;;  %v1331_v10 = vld [vmem:[%s1766_s1 + $0x168] sm:$0xff]  }
  0x15   :  { %1144 = vmatpush3.bf16.msra.mxu1 %v1298_v19  ;;  %1117 = vmatprep.subr.bf16.mxu0 %v1299_v20  ;;  %v1326_v5 = vld [vmem:[%s1766_s1 + $0x198] sm:$0xff]   ;;  %v1329_v8 = vld [vmem:[%s1766_s1 + $0x1e0] sm:$0xff]   ;;  %v1332_v13 = vld [vmem:[%s1766_s1 + $0x128] sm:$0xff]  }
  0x16   :  { %1145 = vmatprep.subr.bf16.mxu1 %v1300_v21  ;;  %v1330_v9 = vld [vmem:[%s1766_s1 + $0x1a0] sm:$0xff]   ;;  %v34_v11 = vld [vmem:[%s1767_s0 + $0x98] sm:$0x3]  ;;  %v33_v14 = vld [vmem:[%s1767_s0 + $0x90] sm:$0x3] }
  0x17   :  { %v52_v12 = vpack.c.bf16 %v34_v11, %v34_v11  ;;  %v51_v15 = vpack.c.bf16 %v33_v14, %v33_v14  ;;  %v899_v16 = vadd.f32 %v34_v11, %v33_v14  ;;  %v1333_v17 = vld [vmem:[%s1766_s1 + $0x1e8] sm:$0xff]   ;;  %v35_v21 = vld [vmem:[%s1767_s0 + $0xa0] sm:$0x3]  ;;  %v29_v34 = vld [vmem:[%s1767_s0 + $0x70] sm:$0xff] }
  0x18   :  { %1118 = vmatpush3.bf16.msra.mxu0 %v1301_v22  ;;  %v36_v18 = vld [vmem:[%s1767_s0 + $0xa8] sm:$0x3]  ;;  %v53_v22 = vpack.c.bf16 %v35_v21, %v35_v21  ;;  %v1632_v37 = vadd.f32 %v1525_v57, %v29_v34  ;;  %v1342_v38 = vld [vmem:[%s1766_s1 + $0x1b8] sm:$0xff]   ;;  %v1648_v41 = vld [vmem:[%s1767_s0 + $0x80] sm:$0xff] }
  0x19   :  { %1146 = vmatpush3.bf16.msra.mxu1 %v1302_v23  ;;  %1119 = vmatprep.subr.bf16.mxu0 %v1303_v24  ;;  %v54_v19 = vpack.c.bf16 %v36_v18, %v36_v18  ;;  %v1334_v20 = vld [vmem:[%s1766_s1 + $0x1a8] sm:$0xff]   ;;  %v902_v23 = vadd.f32 %v899_v16, %v35_v21  ;;  %v1335_v24 = vld [vmem:[%s1766_s1 + $0x170] sm:$0xff]   ;;  %v1643_v40 = vld [vmem:[%s1767_s0 + $0x38] sm:$0xff] }
  0x1a   :  { %1147 = vmatprep.subr.bf16.mxu1 %v1304_v25  ;;  %v1336_v25 = vld [vmem:[%s1766_s1 + $0x130] sm:$0xff]   ;;  %v20_v32 = vld [vmem:[%s1767_s0 + $0x28] sm:$0xff]  ;;  %v49_v42 = vpack.c.bf16 %v1648_v41, %v1643_v40  ;;  %v1660_v44 = vld [vmem:[%s1767_s0 + $0x78] sm:$0xff] }
  0x1b   :  { %v1629_v35 = vadd.f32 %v1519_v55, %v20_v32  ;;  %v47_v36 = vpack.c.bf16 %v29_v34, %v20_v32  ;;  %v1655_v43 = vld [vmem:[%s1767_s0 + $0x30] sm:$0xff]  ;;  %v38_v47 = vld [vmem:[%s1767_s0 + $0xb8] sm:$0x3] }
  0x1c   :  { %1120 = vmatpush3.bf16.msra.mxu0 %v1305_v26  ;;  %v1337_v26 = vld [vmem:[%s1766_s1 + $0x1f0] sm:$0xff]   ;;  %v48_v45 = vpack.c.bf16 %v1660_v44, %v1655_v43  ;;  %v56_v48 = vpack.c.bf16 %v38_v47, %v38_v47 }
  0x1d   :  { %1148 = vmatpush3.bf16.msra.mxu1 %v1306_v27  ;;  %1121 = vmatprep.subr.bf16.mxu0 %v1307_v28  ;;  %v905_v27 = vadd.f32 %v902_v23, %v36_v18  ;;  %v1338_v28 = vld [vmem:[%s1766_s1 + $0x1b0] sm:$0xff]  }
  0x1e   :  { %1149 = vmatprep.subr.bf16.mxu1 %v1308_v29  ;;  %v1339_v29 = vld [vmem:[%s1766_s1 + $0x178] sm:$0xff]   ;;  %v1345_v51 = vld [vmem:[%s1766_s1 + $0x210] sm:$0xff]  }
  0x1f   :  { %v1357_v11 = vld [vmem:[%s1768_s2 + $0x30] sm:$0xff]  }
  0x20   :  { %1122 = vmatpush3.bf16.msra.mxu0 %v1309_v30  ;;  %v1340_v30 = vld [vmem:[%s1766_s1 + $0x138] sm:$0xff]  }
  0x21   :  { %1150 = vmatpush3.bf16.msra.mxu1 %v1310_v31  ;;  %1163 = vmatprep.subr.bf16.mxu0 %v1311_v49  ;;  %v1341_v31 = vld [vmem:[%s1766_s1 + $0x1f8] sm:$0xff]   ;;  %v37_v49 = vld [vmem:[%s1767_s0 + $0xb0] sm:$0x3] }
  0x22   :  { %1191 = vmatprep.subr.bf16.mxu1 %v1313_v54  ;;  %v908_v50 = vadd.f32 %v905_v27, %v37_v49  ;;  %v39_v54 = vld [vmem:[%s1767_s0 + $0xc0] sm:$0x3]  ;;  %v55_v55 = vpack.c.bf16 %v37_v49, %v37_v49 }
  0x23   :  { %669 = vmatmul.mubr.bf16.vlgmr.msra.gmra.mrb[0].mxu0 %v42_v39  ;;  %v1343_v39 = vld [vmem:[%s1766_s1 + $0x200] sm:$0xff]   ;;  %v57_v57 = vpack.c.bf16 %v39_v54, %v39_v54 }
  0x24   :  { %717 = vmatmul.mubr.bf16.vlgmr.msra.gmra.mrb[0].mxu1 %v44_v46  ;;  %1164 = vmatpush3.bf16.msra.mxu0 %v1312_v52  ;;  %v1344_v46 = vld [vmem:[%s1766_s1 + $0x208] sm:$0xff]  }
  0x25   :  { %1192 = vmatpush3.bf16.msra.mxu1 %v1314_v56  ;;  %1165 = vmatprep.subr.bf16.mxu0 %v1315_v58  ;;  %v1679_v52 = vld [vmem:[%s1767_s0 + $0xc8] sm:$0x3]  ;;  %v911_v56 = vadd.f32 %v908_v50, %v38_v47 }
  0x26   :  { %1193 = vmatprep.subr.bf16.mxu1 %v1317_v60  ;;  %676 = vmatprep.mubr.bf16.mxu0 %v52_v12  ;;  %v58_v53 = vpack.c.bf16 %v1679_v52, %v1679_v52  ;;  %v1694_v60 = vld [vmem:[%s1767_s0 + $0x40] sm:$0xff]  ;;  %v1358_v12 = vld [vmem:[%s1768_s2 + $0x38] sm:$0xff]  }
  0x27   :  { %724 = vmatprep.mubr.bf16.mxu1 %v54_v19  ;;  %v1686_v58 = vadd.f32 %v911_v56, %v39_v54 }
  0x28   :  { %1166 = vmatpush3.bf16.msra.mxu0 %v1316_v59  ;;  %v1346_v59 = vld [vmem:[%s1766_s1 + $0x218] sm:$0xff]  }
  0x29   :  { %1194 = vmatpush3.bf16.msra.mxu1 %v1318_v61  ;;  %1167 = vmatprep.subr.bf16.mxu0 %v1319_v62  ;;  %v1699_v61 = vld [vmem:[%s1767_s0 + $0x88] sm:$0xff] }
  0x2a   :  { %1195 = vmatprep.subr.bf16.mxu1 %v1321_v0  ;;  %v50_v62 = vpack.c.bf16 %v1699_v61, %v1694_v60  ;;  %v1348_v0 = vld [vmem:[%s1766_s1 + $0x228] sm:$0xff]  }
  0x2b   :  { %677 = vmatmul.mubr.bf16.gmra.mrb[4].mxu0 %v51_v15 }
  0x2c   :  { %1168 = vmatpush3.bf16.msra.mxu0 %v1320_v63  ;;  %725 = vmatmul.mubr.bf16.gmra.mrb[4].mxu1 %v53_v22  ;;  %v1347_v63 = vld [vmem:[%s1766_s1 + $0x220] sm:$0xff]  }
  0x2d   :  { %1196 = vmatpush3.bf16.msra.mxu1 %v1322_v1  ;;  %1169 = vmatprep.subr.bf16.mxu0 %v1323_v2  ;;  %v1349_v1 = vld [vmem:[%s1766_s1 + $0x230] sm:$0xff]   ;;  %v1350_v2 = vld [vmem:[%s1766_s1 + $0x238] sm:$0xff]  }
  0x2e   :  { %1197 = vmatprep.subr.bf16.mxu1 %v1325_v4  ;;  %764 = vmatprep.mubr.bf16.mxu0 %v47_v36 }
  0x2f   :  { %812 = vmatprep.mubr.bf16.mxu1 %v49_v42 }
  0x30   :  { %1170 = vmatpush3.bf16.msra.mxu0 %v1324_v3  ;;  %v1718_v3 = vld [vmem:[%s1767_s0 + $0xd0] sm:$0x3] }
  0x31   :  { %1198 = vmatpush3.bf16.msra.mxu1 %v1326_v5  ;;  %1171 = vmatprep.subr.bf16.mxu0 %v1327_v6  ;;  %v59_v4 = vpack.c.bf16 %v1718_v3, %v1718_v3  ;;  %v1351_v5 = vld [vmem:[%s1768_s2] sm:$0xff]   ;;  %v1352_v6 = vld [vmem:[%s1768_s2 + $0x8] sm:$0xff]  }
  0x32   :  { %1199 = vmatprep.subr.bf16.mxu1 %v1329_v8  ;;  %v1354_v8 = vld [vmem:[%s1768_s2 + $0x18] sm:$0xff]  }
  0x34   :  { %1172 = vmatpush3.bf16.msra.mxu0 %v1328_v7  ;;  %v1353_v7 = vld [vmem:[%s1768_s2 + $0x10] sm:$0xff]  }
  0x35   :  { %1200 = vmatpush3.bf16.msra.mxu1 %v1330_v9  ;;  %1173 = vmatprep.subr.bf16.mxu0 %v1331_v10  ;;  %v1355_v9 = vld [vmem:[%s1768_s2 + $0x20] sm:$0xff]   ;;  %v1356_v10 = vld [vmem:[%s1768_s2 + $0x28] sm:$0xff]  }
  0x36   :  { %1201 = vmatprep.subr.bf16.mxu1 %v1333_v17 }
  0x38   :  { %1174 = vmatpush3.bf16.msra.mxu0 %v1332_v13 }
  0x39   :  { %1202 = vmatpush3.bf16.msra.mxu1 %v1334_v20  ;;  %1175 = vmatprep.subr.bf16.mxu0 %v1335_v24 }
  0x3a   :  { %1203 = vmatprep.subr.bf16.mxu1 %v1337_v26 }
  0x3c   :  { %1176 = vmatpush3.bf16.msra.mxu0 %v1336_v25 }
  0x3d   :  { %1204 = vmatpush3.bf16.msra.mxu1 %v1338_v28  ;;  %1177 = vmatprep.subr.bf16.mxu0 %v1339_v29 }
  0x3e   :  { %1205 = vmatprep.subr.bf16.mxu1 %v1341_v31 }
  0x40   :  { %1178 = vmatpush3.bf16.msra.mxu0 %v1340_v30 }
  0x41   :  { %1206 = vmatpush3.bf16.msra.mxu1 %v1342_v38  ;;  %1239 = vmatprep.subr.bf16.mxu0 %v1343_v39 }
  0x42   :  { %1259 = vmatprep.subr.bf16.mxu1 %v1351_v5 }
  0x43   :  { %765 = vmatmul.mubr.bf16.vlgmr.msra.gmra.mrb[8].mxu0 %v46_v33 }
  0x44   :  { %1240 = vmatpush3.bf16.msra.mxu0 %v1343_v39  ;;  %813 = vmatmul.mubr.bf16.vlgmr.msra.gmra.mrb[8].mxu1 %v48_v45 }
  0x45   :  { %1241 = vmatprep.subr.bf16.mxu0 %v1344_v46  ;;  %772 = vmatprep.mubr.bf16.mxu0 %v56_v48 }
  0x46   :  { %820 = vmatprep.mubr.bf16.mxu1 %v58_v53  ;;  %1260 = vmatpush3.bf16.msra.mxu1 %v1351_v5 }
  0x47   :  { %1261 = vmatprep.subr.bf16.mxu1 %v1352_v6 }
  0x48   :  { %1242 = vmatpush3.bf16.msra.mxu0 %v1344_v46 }
  0x49   :  { %1243 = vmatprep.subr.bf16.mxu0 %v1345_v51 }
  0x4a   :  { %1262 = vmatpush3.bf16.msra.mxu1 %v1352_v6 }
  0x4b   :  { %773 = vmatmul.mubr.bf16.gmra.mrb[12].mxu0 %v55_v55  ;;  %1263 = vmatprep.subr.bf16.mxu1 %v1353_v7 }
  0x4c   :  { %1244 = vmatpush3.bf16.msra.mxu0 %v1345_v51  ;;  %821 = vmatmul.mubr.bf16.gmra.mrb[12].mxu1 %v57_v57 }
  0x4d   :  { %1245 = vmatprep.subr.bf16.mxu0 %v1346_v59  ;;  %1255 = vmatprep.mubr.bf16.mxu0 %v50_v62 }
  0x4e   :  { %1264 = vmatpush3.bf16.msra.mxu1 %v1353_v7 }
  0x4f   :  { %1265 = vmatprep.subr.bf16.mxu1 %v1354_v8 }
  0x50   :  { %1246 = vmatpush3.bf16.msra.mxu0 %v1346_v59 }
  0x51   :  { %1247 = vmatprep.subr.bf16.mxu0 %v1347_v63 }
  0x52   :  { %1266 = vmatpush3.bf16.msra.mxu1 %v1354_v8 }
  0x53   :  { %1267 = vmatprep.subr.bf16.mxu1 %v1355_v9 }
  0x54   :  { %1248 = vmatpush3.bf16.msra.mxu0 %v1347_v63 }
  0x55   :  { %1249 = vmatprep.subr.bf16.mxu0 %v1348_v0 }
  0x56   :  { %1268 = vmatpush3.bf16.msra.mxu1 %v1355_v9 }
  0x57   :  { %1269 = vmatprep.subr.bf16.mxu1 %v1356_v10 }
  0x58   :  { %1250 = vmatpush3.bf16.msra.mxu0 %v1348_v0 }
  0x59   :  { %1251 = vmatprep.subr.bf16.mxu0 %v1349_v1 }
  0x5a   :  { %1270 = vmatpush3.bf16.msra.mxu1 %v1356_v10 }
  0x5b   :  { %1271 = vmatprep.subr.bf16.mxu1 %v1357_v11 }
  0x5c   :  { %1252 = vmatpush3.bf16.msra.mxu0 %v1349_v1 }
  0x5d   :  { %1253 = vmatprep.subr.bf16.mxu0 %v1350_v2 }
  0x5e   :  { %1272 = vmatpush3.bf16.msra.mxu1 %v1357_v11 }
  0x5f   :  { %1273 = vmatprep.subr.bf16.mxu1 %v1358_v12 }
  0x60   :  { %1254 = vmatpush3.bf16.msra.mxu0 %v1350_v2 }
  0x62   :  { %1274 = vmatpush3.bf16.msra.mxu1 %v1358_v12 }
  0x63   :  { %1256 = vmatmul.mubr.bf16.vlgmr.msra.gmra.mrb[16].mxu0 %v59_v4 }
  0xf6   :  { %v1123_v13 = vpop.f32.mrb[0].mxu0 }
  0xf7   :  { %v1151_v14 = vpop.f32.mrb[0].mxu1  ;;  %v1124_v15 = vpop.f32.mrb[1].mxu0 }
  0xf8   :  { %v1125_v16 = vadd.f32 %v1124_v15, %v1123_v13  ;;  %v1152_v17 = vpop.f32.mrb[1].mxu1  ;;  %v1126_v18 = vpop.f32.mrb[2].mxu0 }
  0xf9   :  { %v1153_v19 = vadd.f32 %v1152_v17, %v1151_v14  ;;  %v1154_v20 = vpop.f32.mrb[2].mxu1  ;;  %v1127_v21 = vpop.f32.mrb[3].mxu0 }
  0xfa   :  { %v1128_v22 = vadd.f32 %v1127_v21, %v1126_v18  ;;  %v1155_v23 = vpop.f32.mrb[3].mxu1 }
  0xfb   :  { %v719_v24 = vadd.f32 %v1153_v19, %v1125_v16  ;;  %v1156_v25 = vadd.f32 %v1155_v23, %v1154_v20 }
  0xfd   :  { %v722_v26 = vadd.f32 %v1156_v25, %v1128_v22  ;;  %v912_v25 = vadd.f32 %v1629_v35, %v1655_v43 }
  0xfe   :  { %v1129_v27 = vpop.f32.mrb[4].mxu0 }
  0xff   :  { %v1130_v28 = vpop.f32.mrb[5].mxu0  ;;  %v1157_v31 = vpop.f32.mrb[4].mxu1 }
 0x100   :  { %v1131_v29 = vadd.f32 %v1130_v28, %v1129_v27  ;;  %v1132_v30 = vpop.f32.mrb[6].mxu0  ;;  %v1158_v33 = vpop.f32.mrb[5].mxu1  ;;  %v917_v27 = vadd.f32 %v1686_v58, %v1679_v52  ;;  %v915_v28 = vadd.f32 %v912_v25, %v1643_v40 }
 0x101   :  { %v1133_v32 = vpop.f32.mrb[7].mxu0  ;;  %v1159_v34 = vadd.f32 %v1158_v33, %v1157_v31  ;;  %v1160_v36 = vpop.f32.mrb[6].mxu1 }
 0x102   :  { %v1161_v38 = vpop.f32.mrb[7].mxu1  ;;  %v920_v30 = vadd.f32 %v917_v27, %v1718_v3  ;;  %v918_v31 = vadd.f32 %v915_v28, %v1694_v60 }
 0x103   :  { %v727_v39 = vadd.f32 %v1159_v34, %v1131_v29 }
 0x104   :  { %v923_v33 = vmul.f32 0.11111111, %v920_v30  ;;  %v921_v34 = vmul.f32 0.11111111, %v918_v31 }
 0x116   :  { %v1179_v42 = vpop.f32.mrb[8].mxu0 }
 0x117   :  { %v1180_v45 = vpop.f32.mrb[9].mxu0  ;;  %v1207_v48 = vpop.f32.mrb[8].mxu1 }
 0x118   :  { %v1181_v46 = vadd.f32 %v1180_v45, %v1179_v42  ;;  %v1182_v47 = vpop.f32.mrb[10].mxu0  ;;  %v1208_v50 = vpop.f32.mrb[9].mxu1 }
 0x119   :  { %v1183_v49 = vpop.f32.mrb[11].mxu0  ;;  %v1209_v54 = vadd.f32 %v1208_v50, %v1207_v48  ;;  %v1210_v55 = vpop.f32.mrb[10].mxu1 }
 0x11a   :  { %v767_v51 = vadd.f32 %v1181_v46, %v719_v24  ;;  %v1184_v53 = vadd.f32 %v1183_v49, %v1182_v47  ;;  %v1211_v56 = vpop.f32.mrb[11].mxu1 }
 0x11b   :  { %v1212_v59 = vadd.f32 %v1211_v56, %v1210_v55 }
 0x11c   :  { %v770_v57 = vadd.f32 %v1184_v53, %v722_v26  ;;  %v815_v62 = vadd.f32 %v1209_v54, %v767_v51  ;;  %v913_v26 = vadd.f32 %v1632_v37, %v1660_v44 }
 0x11e   :  { %v1185_v63 = vpop.f32.mrb[12].mxu0  ;;  %v818_v0 = vadd.f32 %v1212_v59, %v770_v57  ;;  %v916_v29 = vadd.f32 %v913_v26, %v1648_v41 }
 0x11f   :  { %v1186_v1 = vpop.f32.mrb[13].mxu0  ;;  %v1213_v4 = vpop.f32.mrb[12].mxu1 }
 0x120   :  { %v1187_v2 = vadd.f32 %v1186_v1, %v1185_v63  ;;  %v1188_v5 = vpop.f32.mrb[14].mxu0  ;;  %v1214_v6 = vpop.f32.mrb[13].mxu1  ;;  %v919_v32 = vadd.f32 %v916_v29, %v1699_v61 }
 0x121   :  { %v1189_v7 = vpop.f32.mrb[15].mxu0  ;;  %v1215_v9 = vadd.f32 %v1214_v6, %v1213_v4  ;;  %v1216_v10 = vpop.f32.mrb[14].mxu1 }
 0x122   :  { %v775_v8 = vadd.f32 %v1187_v2, %v727_v39  ;;  %v1217_v11 = vpop.f32.mrb[15].mxu1  ;;  %v922_v35 = vmul.f32 0.11111111, %v919_v32 }
 0x124   :  { %v823_v12 = vadd.f32 %v1215_v9, %v775_v8 }
 0x136   :  { %v1257_v13 = vpop.f32.mrb[16].mxu0 }
 0x137   :  { %v871_v14 = vadd.f32 %v1257_v13, %v823_v12  ;;  %v862_v15 = vpop.f32.mrb[17].mxu0 }
 0x138   :  { %v863_v16 = vadd.f32 %v862_v15, %v815_v62  ;;  %v1258_v17 = vpop.f32.mrb[18].mxu0 }
 0x139   :  { %v865_v18 = vpop.f32.mrb[19].mxu0  ;;  %v878_v20 = vmax.f32 %v871_v14, 0.0 }
 0x13a   :  { %v866_v19 = vadd.f32 %v865_v18, %v818_v0  ;;  %v876_v21 = vmax.f32 %v863_v16, 0.0 }
 0x13b   :  { %v880_v24 = vpack.c.bf16 %v878_v20, %v878_v20 }
 0x13c   :  { %v877_v22 = vmax.f32 %v866_v19, 0.0 }
 0x13e   :  { %v879_v23 = vpack.c.bf16 %v877_v22, %v876_v21 }
 0x140   :  { %1275 = vmatprep.mubr.bf16.mxu1 %v879_v23 }
 0x141   :  { %1276 = vmatmul.mubr.bf16.vlgmr.msra.gmra.mrb[16].mxu1 %v880_v24 }
 0x214   :  { %v1277_v36 = vpop.f32.mrb[16].mxu1 }
 0x215   :  { %v1015_v43 = vadd.f32 %v1277_v36, %v923_v33  ;;  %v1006_v38 = vpop.f32.mrb[17].mxu1 }
 0x216   :  { %v1007_v37 = vadd.f32 %v1006_v38, %v921_v34  ;;  %v1278_v44 = vpop.f32.mrb[18].mxu1 }
 0x217   :  { %1022 = vst [vmem:[%s1769_s3 + $0x10] sm:$0x3] %v1015_v43  ;;  %v1009_v40 = vpop.f32.mrb[19].mxu1 }
 0x218   :  { %1020 = vst [vmem:[%s1769_s3] sm:$0xff] %v1007_v37  ;;  %v1010_v41 = vadd.f32 %v1009_v40, %v922_v35 }
 0x21a   :  { %1021 = vst [vmem:[%s1769_s3 + $0x8] sm:$0xff] %v1010_v41 }

// kernel: amdim_forward.35
= control target key start
LH: loop header
LB: loop body
LE: loop exit
PB: predicated region body
PF: predicated region fallthrough
CT: control target
= control target key end

     0   :  { %v32_v28 = vlaneseq  ;;  %v1359_v36 = vmov 1983009808   ;;  %s1689_s0 = inlined_call_operand.vmem [shape: f32[2,1152], index: 0, kind: input, shape index: {}]   ;;  %s1690_s1 = inlined_call_operand.vmem [shape: bf16[1152,128], index: 1, kind: input, shape index: {}]   ;;  %s1691_s2 = inlined_call_operand.vmem [shape: bf16[128,128], index: 2, kind: input, shape index: {}]   ;;  %s1692_s3 = inlined_call_operand.vmem [shape: f32[1,128], index: 3, kind: input, shape index: {}]   ;;  %s1693_s4 = inlined_call_operand.vmem [shape: f32[1,128], index: 4, kind: input, shape index: {}]   ;;  %s1694_s5 = inlined_call_operand.hbm [shape: f32[2,128], index: 5, kind: output, shape index: {}]  }
   0x1   :  { %v1253_v0 = vld [vmem:[%s1690_s1 + $0x40] sm:$0xff]   ;;  %v1257_v4 = vld [vmem:[%s1690_s1 + $0x48] sm:$0xff]   ;;  %v1261_v8 = vld [vmem:[%s1690_s1 + $0x50] sm:$0xff]   ;;  %v30_v37 = vunpack.c.l.s4 %v1359_v36 }
   0x2   :  { %v1254_v1 = vld [vmem:[%s1690_s1 + $0xc0] sm:$0xff]   ;;  %1103 = vmatprep.subr.bf16.mxu0 %v1253_v0  ;;  %v1258_v5 = vld [vmem:[%s1690_s1 + $0xc8] sm:$0xff]   ;;  %v1262_v9 = vld [vmem:[%s1690_s1 + $0xd0] sm:$0xff]   ;;  %v33_v33 = vshrl.u32 %v32_v28, 7 }
   0x3   :  { %v1255_v2 = vld [vmem:[%s1690_s1] sm:$0xff]   ;;  %1125 = vmatprep.subr.bf16.mxu1 %v1254_v1  ;;  %v1259_v6 = vld [vmem:[%s1690_s1 + $0x8] sm:$0xff]   ;;  %v1263_v10 = vld [vmem:[%s1690_s1 + $0x10] sm:$0xff]   ;;  %v31_v38 = vunpack.c.0.s8 %v30_v37 }
   0x4   :  { %v1256_v3 = vld [vmem:[%s1690_s1 + $0x80] sm:$0xff]   ;;  %1104 = vmatpush3.bf16.msra.mxu0 %v1255_v2  ;;  %v1260_v7 = vld [vmem:[%s1690_s1 + $0x88] sm:$0xff]   ;;  %v1264_v11 = vld [vmem:[%s1690_s1 + $0x90] sm:$0xff]  }
   0x5   :  { %1126 = vmatpush3.bf16.msra.mxu1 %v1256_v3  ;;  %1105 = vmatprep.subr.bf16.mxu0 %v1257_v4  ;;  %v1265_v12 = vld [vmem:[%s1690_s1 + $0x58] sm:$0xff]   ;;  %v1269_v16 = vld [vmem:[%s1690_s1 + $0x60] sm:$0xff]   ;;  %v1273_v20 = vld [vmem:[%s1690_s1 + $0x68] sm:$0xff]   ;;  %v1502_v41 = vsub.s32 %v31_v38, %v33_v33 }
   0x6   :  { %1127 = vmatprep.subr.bf16.mxu1 %v1258_v5  ;;  %v1266_v13 = vld [vmem:[%s1690_s1 + $0xd8] sm:$0xff]   ;;  %v1270_v17 = vld [vmem:[%s1690_s1 + $0xe0] sm:$0xff]   ;;  %v1274_v21 = vld [vmem:[%s1690_s1 + $0xe8] sm:$0xff]  }
   0x7   :  { %v1267_v14 = vld [vmem:[%s1690_s1 + $0x18] sm:$0xff]   ;;  %v1271_v18 = vld [vmem:[%s1690_s1 + $0x20] sm:$0xff]   ;;  %v1275_v22 = vld [vmem:[%s1690_s1 + $0x28] sm:$0xff]  }
   0x8   :  { %1106 = vmatpush3.bf16.msra.mxu0 %v1259_v6  ;;  %v1268_v15 = vld [vmem:[%s1690_s1 + $0x98] sm:$0xff]   ;;  %v1272_v19 = vld [vmem:[%s1690_s1 + $0xa0] sm:$0xff]   ;;  %v1276_v23 = vld [vmem:[%s1690_s1 + $0xa8] sm:$0xff]  }
   0x9   :  { %1128 = vmatpush3.bf16.msra.mxu1 %v1260_v7  ;;  %1107 = vmatprep.subr.bf16.mxu0 %v1261_v8  ;;  %v1277_v24 = vld [vmem:[%s1690_s1 + $0x70] sm:$0xff]   ;;  %v1281_v29 = vld [vmem:[%s1690_s1 + $0x78] sm:$0xff]   ;;  %v1492_v34 = vld [vmem:[%s1689_s0] sm:$0xff] }
   0xa   :  { %1129 = vmatprep.subr.bf16.mxu1 %v1262_v9  ;;  %v1278_v25 = vld [vmem:[%s1690_s1 + $0xf0] sm:$0xff]   ;;  %v1282_v30 = vld [vmem:[%s1690_s1 + $0xf8] sm:$0xff]   ;;  %v1286_v35 = vld [vmem:[%s1690_s1 + $0x140] sm:$0xff]   ;;  %v28_v39 = vcombine.high %v1492_v34, %v1492_v34  ;;  %v35_v42 = vrot.slane %v1492_v34, %v1502_v41 }
   0xb   :  { %v1279_v26 = vld [vmem:[%s1690_s1 + $0x30] sm:$0xff]   ;;  %v1283_v31 = vld [vmem:[%s1690_s1 + $0x38] sm:$0xff]   ;;  %v1288_v40 = vld [vmem:[%s1690_s1 + $0x1c0] sm:$0xff]  }
   0xc   :  { %1108 = vmatpush3.bf16.msra.mxu0 %v1263_v10  ;;  %v1280_v27 = vld [vmem:[%s1690_s1 + $0xb0] sm:$0xff]   ;;  %v1284_v32 = vld [vmem:[%s1690_s1 + $0xb8] sm:$0xff]   ;;  %v42_v43 = vrot.slane %v28_v39, %v1502_v41  ;;  %v43_v44 = vcombine.high %v35_v42, %v35_v42  ;;  %v1287_v46 = vld [vmem:[%s1690_s1 + $0x100] sm:$0xff]   ;;  %v78_v47 = vpack.c.bf16 %v35_v42, %v35_v42 }
   0xd   :  { %1130 = vmatpush3.bf16.msra.mxu1 %v1264_v11  ;;  %1109 = vmatprep.subr.bf16.mxu0 %v1265_v12  ;;  %v1289_v49 = vld [vmem:[%s1690_s1 + $0x180] sm:$0xff]   ;;  %v1290_v52 = vld [vmem:[%s1690_s1 + $0x148] sm:$0xff]   ;;  %v1294_v56 = vld [vmem:[%s1690_s1 + $0x150] sm:$0xff]  }
   0xe   :  { %1131 = vmatprep.subr.bf16.mxu1 %v1266_v13  ;;  %v44_v45 = vcombine.high %v42_v43, %v42_v43  ;;  %v80_v48 = vpack.c.bf16 %v42_v43, %v42_v43  ;;  %v79_v50 = vpack.c.bf16 %v43_v44, %v43_v44  ;;  %v1292_v53 = vld [vmem:[%s1690_s1 + $0x1c8] sm:$0xff]   ;;  %v1296_v57 = vld [vmem:[%s1690_s1 + $0x1d0] sm:$0xff]   ;;  %v1298_v60 = vld [vmem:[%s1690_s1 + $0x158] sm:$0xff]  }
   0xf   :  { %v1291_v54 = vld [vmem:[%s1690_s1 + $0x108] sm:$0xff]   ;;  %v1295_v58 = vld [vmem:[%s1690_s1 + $0x110] sm:$0xff]   ;;  %v1300_v61 = vld [vmem:[%s1690_s1 + $0x1d8] sm:$0xff]  }
  0x10   :  { %1110 = vmatpush3.bf16.msra.mxu0 %v1267_v14  ;;  %v81_v51 = vpack.c.bf16 %v44_v45, %v44_v45  ;;  %695 = vmatprep.mubr.bf16.mxu0 %v79_v50  ;;  %v1293_v55 = vld [vmem:[%s1690_s1 + $0x188] sm:$0xff]   ;;  %v1297_v59 = vld [vmem:[%s1690_s1 + $0x190] sm:$0xff]   ;;  %v1299_v62 = vld [vmem:[%s1690_s1 + $0x118] sm:$0xff]  }
  0x11   :  { %1132 = vmatpush3.bf16.msra.mxu1 %v1268_v15  ;;  %1111 = vmatprep.subr.bf16.mxu0 %v1269_v16  ;;  %v1301_v63 = vld [vmem:[%s1690_s1 + $0x198] sm:$0xff]   ;;  %v1302_v0 = vld [vmem:[%s1690_s1 + $0x160] sm:$0xff]   ;;  %v1306_v4 = vld [vmem:[%s1690_s1 + $0x168] sm:$0xff]  }
  0x12   :  { %1133 = vmatprep.subr.bf16.mxu1 %v1270_v17  ;;  %735 = vmatprep.mubr.bf16.mxu1 %v81_v51  ;;  %v1304_v1 = vld [vmem:[%s1690_s1 + $0x1e0] sm:$0xff]   ;;  %v1308_v5 = vld [vmem:[%s1690_s1 + $0x1e8] sm:$0xff]   ;;  %v1310_v8 = vld [vmem:[%s1690_s1 + $0x170] sm:$0xff]  }
  0x13   :  { %v1303_v2 = vld [vmem:[%s1690_s1 + $0x120] sm:$0xff]   ;;  %v1307_v6 = vld [vmem:[%s1690_s1 + $0x128] sm:$0xff]   ;;  %v1312_v10 = vld [vmem:[%s1690_s1 + $0x1f0] sm:$0xff]  }
  0x14   :  { %1112 = vmatpush3.bf16.msra.mxu0 %v1271_v18  ;;  %v1305_v3 = vld [vmem:[%s1690_s1 + $0x1a0] sm:$0xff]   ;;  %v1309_v7 = vld [vmem:[%s1690_s1 + $0x1a8] sm:$0xff]   ;;  %v1311_v13 = vld [vmem:[%s1690_s1 + $0x130] sm:$0xff]  }
  0x15   :  { %1134 = vmatpush3.bf16.msra.mxu1 %v1272_v19  ;;  %1113 = vmatprep.subr.bf16.mxu0 %v1273_v20  ;;  %v1579_v9 = vld [vmem:[%s1689_s0 + $0x8] sm:$0xff]  ;;  %v1313_v14 = vld [vmem:[%s1690_s1 + $0x1b0] sm:$0xff]   ;;  %v1314_v17 = vld [vmem:[%s1690_s1 + $0x178] sm:$0xff]  }
  0x16   :  { %1135 = vmatprep.subr.bf16.mxu1 %v1274_v21  ;;  %v52_v11 = vrot.slane %v1579_v9, %v1502_v41  ;;  %v45_v12 = vcombine.high %v1579_v9, %v1579_v9  ;;  %v1316_v18 = vld [vmem:[%s1690_s1 + $0x1f8] sm:$0xff]  }
  0x17   :  { %v1315_v21 = vld [vmem:[%s1690_s1 + $0x138] sm:$0xff]  }
  0x18   :  { %1114 = vmatpush3.bf16.msra.mxu0 %v1275_v22  ;;  %v60_v15 = vcombine.high %v52_v11, %v52_v11  ;;  %v59_v16 = vrot.slane %v45_v12, %v1502_v41 }
  0x19   :  { %1136 = vmatpush3.bf16.msra.mxu1 %v1276_v23  ;;  %1115 = vmatprep.subr.bf16.mxu0 %v1277_v24  ;;  %v1317_v23 = vld [vmem:[%s1690_s1 + $0x1b8] sm:$0xff]   ;;  %v1319_v24 = vld [vmem:[%s1690_s1 + $0x200] sm:$0xff]  }
  0x1a   :  { %1137 = vmatprep.subr.bf16.mxu1 %v1278_v25  ;;  %v83_v19 = vpack.c.bf16 %v60_v15, %v60_v15  ;;  %v61_v20 = vcombine.high %v59_v16, %v59_v16  ;;  %v82_v25 = vpack.c.bf16 %v52_v11, %v52_v11 }
  0x1c   :  { %1116 = vmatpush3.bf16.msra.mxu0 %v1279_v26  ;;  %v85_v22 = vpack.c.bf16 %v61_v20, %v61_v20  ;;  %v84_v26 = vpack.c.bf16 %v59_v16, %v59_v16 }
  0x1d   :  { %1138 = vmatpush3.bf16.msra.mxu1 %v1280_v27  ;;  %1117 = vmatprep.subr.bf16.mxu0 %v1281_v29  ;;  %v1360_v27 = vmov 0.0  }
  0x1e   :  { %1139 = vmatprep.subr.bf16.mxu1 %v1282_v30 }
  0x20   :  { %1118 = vmatpush3.bf16.msra.mxu0 %v1283_v31 }
  0x21   :  { %1140 = vmatpush3.bf16.msra.mxu1 %v1284_v32  ;;  %1147 = vmatprep.subr.bf16.mxu0 %v1286_v35 }
  0x22   :  { %1169 = vmatprep.subr.bf16.mxu1 %v1288_v40 }
  0x23   :  { %696 = vmatmul.mubr.bf16.vlgmr.msra.gmra.mrb[0].mxu0 %v78_v47 }
  0x24   :  { %736 = vmatmul.mubr.bf16.vlgmr.msra.gmra.mrb[0].mxu1 %v80_v48  ;;  %1148 = vmatpush3.bf16.msra.mxu0 %v1287_v46 }
  0x25   :  { %1170 = vmatpush3.bf16.msra.mxu1 %v1289_v49  ;;  %1149 = vmatprep.subr.bf16.mxu0 %v1290_v52 }
  0x26   :  { %1171 = vmatprep.subr.bf16.mxu1 %v1292_v53  ;;  %775 = vmatprep.mubr.bf16.mxu0 %v83_v19 }
  0x27   :  { %815 = vmatprep.mubr.bf16.mxu1 %v85_v22 }
  0x28   :  { %1150 = vmatpush3.bf16.msra.mxu0 %v1291_v54 }
  0x29   :  { %1172 = vmatpush3.bf16.msra.mxu1 %v1293_v55  ;;  %1151 = vmatprep.subr.bf16.mxu0 %v1294_v56 }
  0x2a   :  { %1173 = vmatprep.subr.bf16.mxu1 %v1296_v57 }
  0x2c   :  { %1152 = vmatpush3.bf16.msra.mxu0 %v1295_v58 }
  0x2d   :  { %1174 = vmatpush3.bf16.msra.mxu1 %v1297_v59  ;;  %1153 = vmatprep.subr.bf16.mxu0 %v1298_v60 }
  0x2e   :  { %1175 = vmatprep.subr.bf16.mxu1 %v1300_v61 }
  0x30   :  { %1154 = vmatpush3.bf16.msra.mxu0 %v1299_v62 }
  0x31   :  { %1176 = vmatpush3.bf16.msra.mxu1 %v1301_v63  ;;  %1155 = vmatprep.subr.bf16.mxu0 %v1302_v0 }
  0x32   :  { %1177 = vmatprep.subr.bf16.mxu1 %v1304_v1 }
  0x34   :  { %1156 = vmatpush3.bf16.msra.mxu0 %v1303_v2 }
  0x35   :  { %1178 = vmatpush3.bf16.msra.mxu1 %v1305_v3  ;;  %1157 = vmatprep.subr.bf16.mxu0 %v1306_v4 }
  0x36   :  { %1179 = vmatprep.subr.bf16.mxu1 %v1308_v5 }
  0x38   :  { %1158 = vmatpush3.bf16.msra.mxu0 %v1307_v6 }
  0x39   :  { %1180 = vmatpush3.bf16.msra.mxu1 %v1309_v7  ;;  %1159 = vmatprep.subr.bf16.mxu0 %v1310_v8 }
  0x3a   :  { %1181 = vmatprep.subr.bf16.mxu1 %v1312_v10 }
  0x3c   :  { %1160 = vmatpush3.bf16.msra.mxu0 %v1311_v13 }
  0x3d   :  { %1182 = vmatpush3.bf16.msra.mxu1 %v1313_v14  ;;  %1161 = vmatprep.subr.bf16.mxu0 %v1314_v17 }
  0x3e   :  { %1183 = vmatprep.subr.bf16.mxu1 %v1316_v18 }
  0x40   :  { %1162 = vmatpush3.bf16.msra.mxu0 %v1315_v21 }
  0x41   :  { %1184 = vmatpush3.bf16.msra.mxu1 %v1317_v23  ;;  %1209 = vmatprep.subr.bf16.mxu0 %v1360_v27 }
  0x42   :  { %1229 = vmatprep.subr.bf16.mxu1 %v1360_v27 }
  0x43   :  { %776 = vmatmul.mubr.bf16.vlgmr.msra.gmra.mrb[4].mxu0 %v82_v25 }
  0x44   :  { %816 = vmatmul.mubr.bf16.vlgmr.msra.gmra.mrb[4].mxu1 %v84_v26 }
  0x45   :  { %10 = vsyncpa [#allocation3], 0  ;;  %1210 = vmatpush3.bf16.msra.mxu0 %v1319_v24  ;;  %v1320_v28 = vld [vmem:[%s1690_s1 + $0x208] sm:$0xff]   ;;  %vm1361_vm0 = vmmov 0   ;;  %v1321_v29 = vld [vmem:[%s1690_s1 + $0x210] sm:$0xff]   ;;  %v881_v14 = vrot.slane %v1492_v34, 2 }
  0x46   :  { %1225 = vmatprep.mubr.msk.bf16.mxu0 %vm1361_vm0, %v1360_v27  ;;  %1211 = vmatprep.subr.bf16.mxu0 %v1360_v27  ;;  %v1322_v30 = vld [vmem:[%s1690_s1 + $0x218] sm:$0xff]   ;;  %v1323_v31 = vld [vmem:[%s1690_s1 + $0x220] sm:$0xff]   ;;  %v1324_v32 = vld [vmem:[%s1690_s1 + $0x228] sm:$0xff]   ;;  %v884_v16 = vrot.slane %v1492_v34, 4  ;;  %v887_v18 = vrot.slane %v1492_v34, 6  ;;  %v891_v21 = vrot.slane %v1579_v9, 2 }
  0x47   :  { %1245 = vmatprep.mubr.msk.bf16.mxu1 %vm1361_vm0, %v1360_v27  ;;  %v1325_v33 = vld [vmem:[%s1690_s1 + $0x230] sm:$0xff]   ;;  %v1326_v37 = vld [vmem:[%s1690_s1 + $0x238] sm:$0xff]   ;;  %v1327_v39 = vld [vmem:[%s1691_s2] sm:$0xff]   ;;  %v883_v15 = vadd.f32 %v881_v14, %v1492_v34  ;;  %v894_v23 = vrot.slane %v1579_v9, 4  ;;  %v897_v25 = vrot.slane %v1579_v9, 6  ;;  %s1362_s10 = smov [#allocation2]  }
  0x48   :  { %v1631_v35 = vld [vmem:[%s1689_s0 + $0x10] sm:$0x3]  ;;  %1230 = vmatpush3.bf16.msra.mxu1 %v1327_v39  ;;  %v1328_v40 = vld [vmem:[%s1691_s2 + $0x8] sm:$0xff]   ;;  %v1330_v42 = vld [vmem:[%s1691_s2 + $0x18] sm:$0xff]   ;;  %s1013_s11 = sshll.u32 %s1362_s10, 4  ;;  %s1014_s11 = int_to_ptr.vmem [resolvable:$true] %s1013_s11 }
  0x49   :  { %1212 = vmatpush3.bf16.msra.mxu0 %v1320_v28  ;;  %v68_v36 = vrot.slane %v1631_v35, %v1502_v41  ;;  %1231 = vmatprep.subr.bf16.mxu1 %v1360_v27  ;;  %v1329_v41 = vld [vmem:[%s1691_s2 + $0x10] sm:$0xff]   ;;  %v1331_v43 = vld [vmem:[%s1691_s2 + $0x20] sm:$0xff]   ;;  %v1332_v44 = vld [vmem:[%s1691_s2 + $0x28] sm:$0xff]   ;;  %v886_v17 = vadd.f32 %v884_v16, %v883_v15  ;;  %s1335_s12 = scalar_lea.vmem %s1014_s11, 32  ;;  %p1340_p1 = scmp.lt.s32.totalorder %s1014_s11, %s1014_s11 }
  0x4a   :  { %1213 = vmatprep.subr.bf16.mxu0 %v1360_v27  ;;  %v1333_v45 = vld [vmem:[%s1691_s2 + $0x30] sm:$0xff]   ;;  %v1334_v46 = vld [vmem:[%s1691_s2 + $0x38] sm:$0xff]   ;;  %v1101_v34 = vld [vmem:[%s1692_s3] ss:$0 sm:$0xff]  ;;  %p1336_p0 = scmp.ne.s32.totalorder %s1014_s11, %s1335_s12  ;;  %p1341_p2 = scmp.lt.s32.totalorder %s1335_s12, %s1335_s12 }
  0x4b   :  { %v86_v38 = vpack.c.bf16 %v68_v36, %v68_v36  ;;  %v889_v19 = vadd.f32 %v887_v18, %v886_v17 }
  0x4c   :  { %1232 = vmatpush3.bf16.msra.mxu1 %v1328_v40  ;;  %p1342_p3 = por %p1341_p2, %p1340_p1 }
  0x4d   :  { %1214 = vmatpush3.bf16.msra.mxu0 %v1321_v29  ;;  %1233 = vmatprep.subr.bf16.mxu1 %v1360_v27  ;;  %v890_v20 = vadd.f32 %v889_v19, %v1579_v9 }
  0x4e   :  { %1215 = vmatprep.subr.bf16.mxu0 %v1360_v27  ;;  %p1343_p4 = pnand %p1342_p3, %p1336_p0 }
  0x4f   :  { %v893_v22 = vadd.f32 %v891_v21, %v890_v20 }
  0x50   :  { %1234 = vmatpush3.bf16.msra.mxu1 %v1329_v41 }
  0x51   :  { %1216 = vmatpush3.bf16.msra.mxu0 %v1322_v30  ;;  %1235 = vmatprep.subr.bf16.mxu1 %v1360_v27  ;;  %v896_v24 = vadd.f32 %v894_v23, %v893_v22 }
  0x52   :  { %1217 = vmatprep.subr.bf16.mxu0 %v1360_v27 }
  0x53   :  { %v899_v26 = vadd.f32 %v897_v25, %v896_v24 }
  0x54   :  { %1236 = vmatpush3.bf16.msra.mxu1 %v1330_v42 }
  0x55   :  { %1218 = vmatpush3.bf16.msra.mxu0 %v1323_v31  ;;  %1237 = vmatprep.subr.bf16.mxu1 %v1360_v27 }
  0x56   :  { %1219 = vmatprep.subr.bf16.mxu0 %v1360_v27 }
  0x58   :  { %1238 = vmatpush3.bf16.msra.mxu1 %v1331_v43 }
  0x59   :  { %1220 = vmatpush3.bf16.msra.mxu0 %v1324_v32  ;;  %1239 = vmatprep.subr.bf16.mxu1 %v1360_v27 }
  0x5a   :  { %1221 = vmatprep.subr.bf16.mxu0 %v1360_v27 }
  0x5c   :  { %1240 = vmatpush3.bf16.msra.mxu1 %v1332_v44 }
  0x5d   :  { %1222 = vmatpush3.bf16.msra.mxu0 %v1325_v33  ;;  %1241 = vmatprep.subr.bf16.mxu1 %v1360_v27  ;;  %v1102_v33 = vld [vmem:[%s1693_s4] ss:$0 sm:$0xff] }
  0x5e   :  { %1223 = vmatprep.subr.bf16.mxu0 %v1360_v27 }
  0x60   :  { %1242 = vmatpush3.bf16.msra.mxu1 %v1333_v45 }
  0x61   :  { %1224 = vmatpush3.bf16.msra.mxu0 %v1326_v37  ;;  %1243 = vmatprep.subr.bf16.mxu1 %v1360_v27  ;;  %v900_v27 = vadd.f32 %v899_v26, %v1631_v35 }
  0x63   :  { %v901_v28 = vmul.f32 0.11111111, %v900_v27 }
  0x64   :  { %1226 = vmatmul.mubr.bf16.vlgmr.msra.gmra.mrb[8].mxu0 %v86_v38  ;;  %1244 = vmatpush3.bf16.msra.mxu1 %v1334_v46 }
  0xf6   :  { %v1119_v47 = vpop.f32.mrb[0].mxu0 }
  0xf7   :  { %v1141_v48 = vpop.f32.mrb[0].mxu1  ;;  %v1120_v49 = vpop.f32.mrb[1].mxu0 }
  0xf8   :  { %v1142_v50 = vpop.f32.mrb[1].mxu1  ;;  %v1121_v51 = vadd.f32 %v1120_v49, %v1119_v47  ;;  %v1122_v53 = vpop.f32.mrb[2].mxu0 }
  0xf9   :  { %v1143_v52 = vadd.f32 %v1142_v50, %v1141_v48  ;;  %v1144_v54 = vpop.f32.mrb[2].mxu1  ;;  %v1123_v55 = vpop.f32.mrb[3].mxu0 }
  0xfa   :  { %v1145_v56 = vpop.f32.mrb[3].mxu1 }
  0xfb   :  { %v738_v57 = vadd.f32 %v1143_v52, %v1121_v51 }
 0x116   :  { %v1163_v58 = vpop.f32.mrb[4].mxu0 }
 0x117   :  { %v1185_v59 = vpop.f32.mrb[4].mxu1  ;;  %v1164_v60 = vpop.f32.mrb[5].mxu0 }
 0x118   :  { %v1186_v61 = vpop.f32.mrb[5].mxu1  ;;  %v1165_v62 = vadd.f32 %v1164_v60, %v1163_v58  ;;  %v1166_v63 = vpop.f32.mrb[6].mxu0 }
 0x119   :  { %v1187_v0 = vadd.f32 %v1186_v61, %v1185_v59  ;;  %v1188_v1 = vpop.f32.mrb[6].mxu1  ;;  %v1167_v2 = vpop.f32.mrb[7].mxu0 }
 0x11a   :  { %v1189_v3 = vpop.f32.mrb[7].mxu1  ;;  %v778_v4 = vadd.f32 %v1165_v62, %v738_v57 }
 0x11c   :  { %v818_v5 = vadd.f32 %v1187_v0, %v778_v4 }
 0x137   :  { %v857_v6 = vpop.f32.mrb[8].mxu0 }
 0x138   :  { %v858_v7 = vadd.f32 %v857_v6, %v818_v5  ;;  %v1227_v8 = vpop.f32.mrb[9].mxu0 }
 0x139   :  { %v860_v10 = vpop.f32.mrb[10].mxu0 }
 0x13a   :  { %v863_v11 = vmax.f32 %v858_v7, 0.0  ;;  %v1228_v12 = vpop.f32.mrb[11].mxu0 }
 0x13c   :  { %v864_v13 = vpack.c.bf16 %v863_v11, %v863_v11 }
 0x13e   :  { %1246 = vmatmul.mubr.bf16.vlgmr.msra.gmra.mrb[8].mxu1 %v864_v13 }
 0x211   :  { %v984_v29 = vpop.f32.mrb[8].mxu1 }
 0x212   :  { %v985_v30 = vadd.f32 %v984_v29, %v901_v28  ;;  %v1247_v31 = vpop.f32.mrb[9].mxu1 }
 0x213   :  { %v987_v32 = vpop.f32.mrb[10].mxu1 }
 0x214   :  { %v997_v36 = vmul.f32 %v1101_v34, %v985_v30  ;;  %v1248_v9 = vpop.f32.mrb[11].mxu1 }
 0x216   :  { %v1005_v37 = vadd.f32 %v1102_v33, %v997_v36 }
 0x218   :  { %1006 = vst [vmem:[#allocation2] sm:$0x3] %v1005_v37 }
 0x219   :  { %1346 = shalt.err (!%p1343_p4)
}
 0x21a   :  { %s1347_s14 = scalar_lea.hbm %s1694_s5, 32 }
 0x21b   :  { %p1348_p5 = scmp.ne.s32.totalorder %s1694_s5, %s1347_s14  ;;  %p1351_p6 = scmp.lt.u32.totalorder %s1347_s14, %s1694_s5 }
 0x21d   :  { %p1353_p7 = pnand %p1351_p6, %p1348_p5 }
 0x21f   :  { %1356 = shalt.err (!%p1353_p7)
}
 0x220   :  { %1016 = dma.vmem_to_hbm [thread:$0]  %s1014_s11, 32, %s1694_s5, [#allocation3]  }
 0x221   :  { %1357 = dma.done.wait [#allocation3], 32  }
 0x222   :  { %1358 = vsyncadd [#allocation3], 4294967264 }
 0x223   :  { %1020 = vsyncpa [#allocation3], 1 }

</bundles_post_ra>
